<compile_context>
chip_gen: v7x
topology: tpu7x:2x2x1
jax: 0.10.0
libtpu: 0.0.40
codegen_flags: <defaults>
</compile_context>

<pallas_src>
import functools

import jax
import jax.numpy as jnp
from jax import lax
from jax.experimental import pallas as pl
from jax.experimental.pallas import tpu as pltpu

EPS = 1e-5


# ---------------------------------------------------------------------------
# Kernel 1 / 3: pointwise (1x1) conv over flat lane-dense pixel slabs.
# Optionally fuses the previous layer's BN-apply + ReLU on the input load and
# always emits per-image partial sums / sums-of-squares of the (bias-free)
# conv output for training-mode BatchNorm.
# ---------------------------------------------------------------------------
def _pointwise_kernel(*refs, n_planes, fuse_bn_relu):
    idx = n_planes
    x_refs = refs[:n_planes]
    if fuse_bn_relu:
        scale_ref, shift_ref = refs[idx], refs[idx + 1]
        idx += 2
    w_ref = refs[idx]
    y_refs = refs[idx + 1:idx + 1 + n_planes]
    s1_ref = refs[idx + 1 + n_planes]
    s2_ref = refs[idx + 2 + n_planes]

    cin = x_refs[0].shape[1]
    cout = w_ref.shape[0]
    w = w_ref[...]                                        # (Cout, Cin)

    s1 = jnp.zeros((cout, 1), jnp.float32)
    s2 = jnp.zeros((cout, 1), jnp.float32)
    for x_ref, y_ref in zip(x_refs, y_refs):
        x = x_ref[0]                                      # (Cin, P) lane-dense
        if fuse_bn_relu:
            x = jnp.maximum(x * scale_ref[...] + shift_ref[...], 0.0)
        # Cin unrolled VPU FMAs on lane-dense pixel vregs (review item 11).
        t = w[:, 0:1] * x[0:1, :]                         # (Cout, P)
        for ci in range(1, cin):
            t = t + w[:, ci:ci + 1] * x[ci:ci + 1, :]
        y_ref[0] = t                                      # single lane-dense store
        s1 = s1 + jnp.sum(t, axis=1, keepdims=True)
        s2 = s2 + jnp.sum(t * t, axis=1, keepdims=True)
    s1_ref[0] = s1
    s2_ref[0] = s2


def pointwise_conv_stats(xs, w, scale=None, shift=None):
    """xs: list of (N, Cin, P_i) f32 slabs.  Returns ([y_i], s1, s2)."""
    n_planes = len(xs)
    N, cin, _ = xs[0].shape
    cout = w.shape[0]
    fuse = scale is not None
    kern = functools.partial(_pointwise_kernel, n_planes=n_planes,
                             fuse_bn_relu=fuse)

    in_specs = [pl.BlockSpec((1, cin, x.shape[2]), lambda n: (n, 0, 0))
                for x in xs]
    args = list(xs)
    if fuse:
        in_specs += [pl.BlockSpec((cin, 1), lambda n: (0, 0)),
                     pl.BlockSpec((cin, 1), lambda n: (0, 0))]
        args += [scale.reshape(cin, 1).astype(jnp.float32),
                 shift.reshape(cin, 1).astype(jnp.float32)]
    in_specs.append(pl.BlockSpec((cout, cin), lambda n: (0, 0)))
    args.append(w)

    out_shape = tuple(jax.ShapeDtypeStruct((N, cout, x.shape[2]), jnp.float32)
                      for x in xs) + (
        jax.ShapeDtypeStruct((N, cout, 1), jnp.float32),
        jax.ShapeDtypeStruct((N, cout, 1), jnp.float32))
    out_specs = [pl.BlockSpec((1, cout, x.shape[2]), lambda n: (n, 0, 0))
                 for x in xs] + [
        pl.BlockSpec((1, cout, 1), lambda n: (n, 0, 0)),
        pl.BlockSpec((1, cout, 1), lambda n: (n, 0, 0))]

    outs = pl.pallas_call(
        kern,
        out_shape=out_shape,
        grid=(N,),
        in_specs=in_specs,
        out_specs=out_specs,
        compiler_params=pltpu.CompilerParams(
            dimension_semantics=("parallel",)),
    )(*args)
    return list(outs[:n_planes]), outs[n_planes], outs[n_planes + 1]


# ---------------------------------------------------------------------------
# Kernel 2: ConvTranspose2d(k=3, stride=2, padding=0) with the previous
# layer's BN+ReLU fused on the input load.  Emits the output as four parity
# planes (single dense store each) plus per-image BN partial stats computed
# from the in-register values.
# ---------------------------------------------------------------------------
def _deconv3x3_s2_kernel(x_ref, scale_ref, shift_ref, w_ref,
                         ee_ref, eo_ref, oe_ref, oo_ref, s1_ref, s2_ref,
                         xe_ref):
    _, cin, H, W = x_ref.shape
    cout = w_ref.shape[1]
    H1, W1 = H + 2, W + 2          # deconv input dims (incl. layer-1 pad ring)

    # BN1 + ReLU fused on load; conv bias is folded into shift downstream.
    ring = jnp.maximum(shift_ref[...], 0.0)                           # (Cin,1,1)
    a = jnp.maximum(x_ref[0] * scale_ref[...] + shift_ref[...], 0.0)  # (Cin,H,W)

    # Stage the padded input once in VMEM scratch, with one extra all-zero
    # frame so every overlap-add term below is a pure static slice.
    xe_ref[...] = jnp.zeros(xe_ref.shape, jnp.float32)
    xe_ref[:, 1:H1 + 1, 1:W1 + 1] = jnp.broadcast_to(ring, (cin, H1, W1))
    xe_ref[:, 2:H + 2, 2:W + 2] = a

    xeb = [xe_ref[ci][None, :, :] for ci in range(cin)]   # (1, H1+2, W1+2) each

    # All 9 taps: per tap, Cin fused multiply-adds over the extended plane
    # (replaces the previous 9 tiny per-tap matmuls).
    ys = []
    for t in range(9):
        yt = w_ref[0 * 9 + t] * xeb[0]                    # (Cout, H1+2, W1+2)
        for ci in range(1, cin):
            yt = yt + w_ref[ci * 9 + t] * xeb[ci]
        ys.append(yt)

    # Parity planes as in-register values; each output element written once.
    # tap index t = kh*3 + kw; out[2i+kh, 2j+kw] += tap(kh,kw)[i, j].
    ee = (ys[0][:, 1:H1 + 2, 1:W1 + 2] + ys[2][:, 1:H1 + 2, 0:W1 + 1] +
          ys[6][:, 0:H1 + 1, 1:W1 + 2] + ys[8][:, 0:H1 + 1, 0:W1 + 1])
    eo = ys[1][:, 1:H1 + 2, 1:W1 + 1] + ys[7][:, 0:H1 + 1, 1:W1 + 1]
    oe = ys[3][:, 1:H1 + 1, 1:W1 + 2] + ys[5][:, 1:H1 + 1, 0:W1 + 1]
    oo = ys[4][:, 1:H1 + 1, 1:W1 + 1]

    ee_ref[0] = ee
    eo_ref[0] = eo
    oe_ref[0] = oe
    oo_ref[0] = oo

    # Per-image BN partials of the bias-free output, from the values above.
    def _sums(v):
        s = jnp.sum(jnp.sum(v, axis=2, keepdims=True), axis=1, keepdims=True)
        q = jnp.sum(jnp.sum(v * v, axis=2, keepdims=True), axis=1,
                    keepdims=True)
        return s, q

    s_tot = None
    q_tot = None
    for v in (ee, eo, oe, oo):
        s, q = _sums(v)
        s_tot = s if s_tot is None else s_tot + s
        q_tot = q if q_tot is None else q_tot + q
    s1_ref[0] = s_tot
    s2_ref[0] = q_tot
    del cout  # (derived only for clarity)


def deconv3x3_s2_stats(t1_sp, scale1, shift1, w2p):
    """t1_sp: (N, Cmid, H, W) bias-free layer-1 output.  w2p: (Cmid*9, Cmid, 1, 1)."""
    N, cmid, H, W = t1_sp.shape
    H1, W1 = H + 2, W + 2
    cout = w2p.shape[1]
    out_shape = (
        jax.ShapeDtypeStruct((N, cout, H1 + 1, W1 + 1), jnp.float32),
        jax.ShapeDtypeStruct((N, cout, H1 + 1, W1), jnp.float32),
        jax.ShapeDtypeStruct((N, cout, H1, W1 + 1), jnp.float32),
        jax.ShapeDtypeStruct((N, cout, H1, W1), jnp.float32),
        jax.ShapeDtypeStruct((N, cout, 1, 1), jnp.float32),
        jax.ShapeDtypeStruct((N, cout, 1, 1), jnp.float32),
    )
    return pl.pallas_call(
        _deconv3x3_s2_kernel,
        out_shape=out_shape,
        grid=(N,),
        in_specs=[
            pl.BlockSpec((1, cmid, H, W), lambda n: (n, 0, 0, 0)),
            pl.BlockSpec((cmid, 1, 1), lambda n: (0, 0, 0)),
            pl.BlockSpec((cmid, 1, 1), lambda n: (0, 0, 0)),
            pl.BlockSpec((cmid * 9, cout, 1, 1), lambda n: (0, 0, 0, 0)),
        ],
        out_specs=[
            pl.BlockSpec((1, cout, H1 + 1, W1 + 1), lambda n: (n, 0, 0, 0)),
            pl.BlockSpec((1, cout, H1 + 1, W1), lambda n: (n, 0, 0, 0)),
            pl.BlockSpec((1, cout, H1, W1 + 1), lambda n: (n, 0, 0, 0)),
            pl.BlockSpec((1, cout, H1, W1), lambda n: (n, 0, 0, 0)),
            pl.BlockSpec((1, cout, 1, 1), lambda n: (n, 0, 0, 0)),
            pl.BlockSpec((1, cout, 1, 1), lambda n: (n, 0, 0, 0)),
        ],
        scratch_shapes=[pltpu.VMEM((cmid, H1 + 2, W1 + 2), jnp.float32)],
        compiler_params=pltpu.CompilerParams(
            dimension_semantics=("parallel",)),
    )(t1_sp, scale1, shift1, w2p)


# ---------------------------------------------------------------------------
# JAX glue
# ---------------------------------------------------------------------------
def _bn_affine(s1p, s2p, count, gamma, beta):
    """Training-mode BN affine from bias-free (shifted) partial sums.

    Kernels accumulate sum / sum-of-squares of the conv output WITHOUT its
    bias; padding-ring pixels (value == bias) contribute exactly zero and only
    enter through `count`.  The returned (scale, shift) are meant to be
    applied to the bias-free conv output (the conv bias cancels under BN).
    """
    red = tuple(i for i in range(s1p.ndim) if i != 1)
    m = jnp.sum(s1p, axis=red) / count                    # E[y] - bias
    var = jnp.maximum(jnp.sum(s2p, axis=red) / count - m * m, 0.0)
    scale = gamma / jnp.sqrt(var + EPS)
    shift = beta - scale * m
    return scale, shift


def _interleave_cols(a, b):
    # a: (N,C,R,Wa), b: (N,C,R,Wa-1) -> (N,C,R,2*Wa-1); a on even columns.
    n, c, r, wa = a.shape
    bp = jnp.concatenate([b, jnp.zeros((n, c, r, 1), a.dtype)], axis=3)
    st = jnp.stack([a, bp], axis=4)                       # (N,C,R,Wa,2)
    return st.reshape(n, c, r, 2 * wa)[..., :2 * wa - 1]


def _interleave_rows(a, b):
    # a: (N,C,Ra,W), b: (N,C,Ra-1,W) -> (N,C,2*Ra-1,W); a on even rows.
    n, c, ra, w = a.shape
    bp = jnp.concatenate([b, jnp.zeros((n, c, 1, w), a.dtype)], axis=2)
    st = jnp.stack([a, bp], axis=3)                       # (N,C,Ra,2,W)
    return st.reshape(n, c, 2 * ra, w)[:, :, :2 * ra - 1, :]


def linknet_up_forward(params, x_nchw):
    N, Cin, H, W = x_nchw.shape
    Cmid = params["w1"].shape[0]
    Cout = params["w3"].shape[0]
    H1, W1 = H + 2, W + 2                  # after the 1x1 conv with padding=1
    Ho, Wo = 2 * H1 + 1, 2 * W1 + 1        # after ConvTranspose2d(3, stride 2)

    x = x_nchw.astype(jnp.float32)

    # ---- layer 1: 1x1 conv (lane-dense, whole image per parallel grid step) --
    w1 = params["w1"][:, :, 0, 0].astype(jnp.float32)          # (Cmid, Cin)
    (t1,), s1p, q1p = pointwise_conv_stats([x.reshape(N, Cin, H * W)], w1)
    scale1, shift1 = _bn_affine(s1p, q1p, count=N * H1 * W1,
                                gamma=params["g1"], beta=params["be1"])

    # ---- layer 2: ConvTranspose2d(3x3, s=2); BN1+ReLU fused on load ----------
    w2p = jnp.transpose(params["w2"], (0, 2, 3, 1)).astype(jnp.float32)
    w2p = w2p.reshape(Cmid * 9, Cmid, 1, 1)                    # (ci*9+t, co, 1, 1)
    pee, peo, poe, poo, s2p, q2p = deconv3x3_s2_stats(
        t1.reshape(N, Cmid, H, W),
        scale1.reshape(Cmid, 1, 1), shift1.reshape(Cmid, 1, 1), w2p)
    scale2, shift2 = _bn_affine(s2p, q2p, count=N * Ho * Wo,
                                gamma=params["g2"], beta=params["be2"])

    # ---- layer 3: 1x1 conv on the four parity planes; BN2+ReLU fused ---------
    # (pointwise conv does not care about plane boundaries, so no HBM concat.)
    w3 = params["w3"][:, :, 0, 0].astype(jnp.float32)          # (Cout, Cmid)
    y3_planes, s3p, q3p = pointwise_conv_stats(
        [pee.reshape(N, Cmid, -1), peo.reshape(N, Cmid, -1),
         poe.reshape(N, Cmid, -1), poo.reshape(N, Cmid, -1)],
        w3, scale=scale2, shift=shift2)
    scale3, shift3 = _bn_affine(s3p, q3p, count=N * (Ho + 2) * (Wo + 2),
                                gamma=params["g3"], beta=params["be3"])

    # ---- XLA epilogue: BN3+ReLU fused with the parity interleave + pad ring --
    sc3 = scale3.reshape(1, Cout, 1, 1)
    sh3 = shift3.reshape(1, Cout, 1, 1)

    def act(y, rows, cols):
        return jnp.maximum(y.reshape(N, Cout, rows, cols) * sc3 + sh3, 0.0)

    f_ee = act(y3_planes[0], H1 + 1, W1 + 1)
    f_eo = act(y3_planes[1], H1 + 1, W1)
    f_oe = act(y3_planes[2], H1, W1 + 1)
    f_oo = act(y3_planes[3], H1, W1)
    even_rows = _interleave_cols(f_ee, f_eo)               # (N, Cout, H1+1, Wo)
    odd_rows = _interleave_cols(f_oe, f_oo)                # (N, Cout, H1,   Wo)
    inter = _interleave_rows(even_rows, odd_rows)          # (N, Cout, Ho,   Wo)
    ring = jnp.maximum(sh3, 0.0)                           # BN3+ReLU of pad ring
    out = jnp.broadcast_to(ring, (N, Cout, Ho + 2, Wo + 2))
    out = out.at[:, :, 1:-1, 1:-1].set(inter)
    return out


# ---------------------------------------------------------------------------
# Pure-JAX reference (correctness check)
# ---------------------------------------------------------------------------
def _bn_relu_ref(y, gamma, beta):
    mean = jnp.mean(y, axis=(0, 1, 2))
    var = jnp.mean((y - mean) ** 2, axis=(0, 1, 2))
    return jnp.maximum((y - mean) / jnp.sqrt(var + EPS) * gamma + beta, 0.0)


def ref_forward(params, x_nchw):
    x = jnp.transpose(x_nchw, (0, 2, 3, 1)).astype(jnp.float32)
    # layer 1: 1x1 conv, padding 1
    w1 = jnp.transpose(params["w1"], (2, 3, 1, 0))
    y = lax.conv_general_dilated(x, w1, (1, 1), [(1, 1), (1, 1)],
                                 dimension_numbers=("NHWC", "HWIO", "NHWC"))
    x = _bn_relu_ref(y + params["b1"], params["g1"], params["be1"])
    # layer 2: ConvTranspose2d(3x3, stride 2, pad 0) == dilated conv w/ flipped kernel
    w2 = jnp.transpose(params["w2"][:, :, ::-1, ::-1], (2, 3, 0, 1))
    y = lax.conv_general_dilated(x, w2, (1, 1), [(2, 2), (2, 2)],
                                 lhs_dilation=(2, 2),
                                 dimension_numbers=("NHWC", "HWIO", "NHWC"))
    x = _bn_relu_ref(y + params["b2"], params["g2"], params["be2"])
    # layer 3: 1x1 conv, padding 1
    w3 = jnp.transpose(params["w3"], (2, 3, 1, 0))
    y = lax.conv_general_dilated(x, w3, (1, 1), [(1, 1), (1, 1)],
                                 dimension_numbers=("NHWC", "HWIO", "NHWC"))
    x = _bn_relu_ref(y + params["b3"], params["g3"], params["be3"])
    return jnp.transpose(x, (0, 3, 1, 2))


# ---------------------------------------------------------------------------
if __name__ == "__main__":
    key = jax.random.PRNGKey(0)
    keys = jax.random.split(key, 7)

    # linknetUp(in_channels=4, n_filters=8): Cmid = 4, Cout = 8
    N, Cin, n_filters, H, W = 2, 4, 8, 16, 16
    Cmid, Cout = n_filters // 2, n_filters

    x = jax.random.normal(keys[0], (N, Cin, H, W), jnp.float32)

    # PyTorch-native parameter shapes; BN affine at module init (gamma=1, beta=0).
    params = {
        "w1": 0.2 * jax.random.normal(keys[1], (Cmid, Cin, 1, 1), jnp.float32),
        "b1": 0.1 * jax.random.normal(keys[2], (Cmid,), jnp.float32),
        "g1": jnp.ones((Cmid,), jnp.float32),
        "be1": jnp.zeros((Cmid,), jnp.float32),
        "w2": 0.2 * jax.random.normal(keys[3], (Cmid, Cmid, 3, 3), jnp.float32),
        "b2": 0.1 * jax.random.normal(keys[4], (Cmid,), jnp.float32),
        "g2": jnp.ones((Cmid,), jnp.float32),
        "be2": jnp.zeros((Cmid,), jnp.float32),
        "w3": 0.2 * jax.random.normal(keys[5], (Cout, Cmid, 1, 1), jnp.float32),
        "b3": 0.1 * jax.random.normal(keys[6], (Cout,), jnp.float32),
        "g3": jnp.ones((Cout,), jnp.float32),
        "be3": jnp.zeros((Cout,), jnp.float32),
    }

    fwd = jax.jit(linknet_up_forward)
    out = jax.block_until_ready(fwd(params, x))
    ref = jax.block_until_ready(ref_forward(params, x))

    expected_shape = (N, Cout, 2 * (H + 2) + 3, 2 * (W + 2) + 3)
    assert out.shape == expected_shape, out.shape
    err = float(jnp.max(jnp.abs(out - ref)))
    assert jnp.allclose(out, ref, rtol=2e-3, atol=2e-3), err

    print("KERNEL_OK")
</pallas_src>

<mosaic_0001>
module attributes {stable_mosaic.version = 11 : i64} {
  func.func @_pointwise_kernel(%arg0: i32, %arg1: memref<1x4x256xf32, #tpu.memory_space<vmem>>, %arg2: memref<4x4xf32, #tpu.memory_space<vmem>>, %arg3: memref<1x4x256xf32, #tpu.memory_space<vmem>>, %arg4: memref<1x4x1xf32, #tpu.memory_space<vmem>>, %arg5: memref<1x4x1xf32, #tpu.memory_space<vmem>>) attributes {dimension_semantics = [#tpu.dimension_semantics<parallel>], iteration_bounds = array<i64: 2>, scalar_prefetch = 0 : i64, scratch_operands = 0 : i64, tpu.core_type = #tpu.core_type<tc>, window_params = [{transform_indices = @transform_0, window_bounds = array<i64: 1, 4, 256>}, {pipeline_mode = #tpu.pipeline_mode<synchronous>, transform_indices = @transform_1, window_bounds = array<i64: 4, 4>}, {transform_indices = @transform_2, window_bounds = array<i64: 1, 4, 256>}, {transform_indices = @transform_3, window_bounds = array<i64: 1, 4, 1>}, {transform_indices = @transform_4, window_bounds = array<i64: 1, 4, 1>}]} {
    %c0 = arith.constant 0 : index
    %c0_0 = arith.constant 0 : index
    %0 = vector.load %arg2[%c0, %c0_0] : memref<4x4xf32, #tpu.memory_space<vmem>>, vector<4x4xf32>
    %cst = arith.constant 0.000000e+00 : f32
    %1 = vector.broadcast %cst : f32 to vector<4x1xf32>
    %cst_1 = arith.constant 0.000000e+00 : f32
    %2 = vector.broadcast %cst_1 : f32 to vector<4x1xf32>
    %c0_2 = arith.constant 0 : index
    %c0_3 = arith.constant 0 : index
    %c0_4 = arith.constant 0 : index
    %3 = vector.load %arg1[%c0_2, %c0_3, %c0_4] : memref<1x4x256xf32, #tpu.memory_space<vmem>>, vector<1x4x256xf32>
    %4 = vector.shape_cast %3 : vector<1x4x256xf32> to vector<4x256xf32>
    %5 = vector.extract_strided_slice %0 {offsets = [0, 0], sizes = [4, 1], strides = [1, 1]} : vector<4x4xf32> to vector<4x1xf32>
    %6 = vector.extract_strided_slice %4 {offsets = [0, 0], sizes = [1, 256], strides = [1, 1]} : vector<4x256xf32> to vector<1x256xf32>
    %7 = vector.broadcast %5 : vector<4x1xf32> to vector<4x256xf32>
    %8 = vector.broadcast %6 : vector<1x256xf32> to vector<4x256xf32>
    %9 = arith.mulf %7, %8 : vector<4x256xf32>
    %10 = vector.extract_strided_slice %0 {offsets = [0, 1], sizes = [4, 1], strides = [1, 1]} : vector<4x4xf32> to vector<4x1xf32>
    %11 = vector.extract_strided_slice %4 {offsets = [1, 0], sizes = [1, 256], strides = [1, 1]} : vector<4x256xf32> to vector<1x256xf32>
    %12 = vector.broadcast %10 : vector<4x1xf32> to vector<4x256xf32>
    %13 = vector.broadcast %11 : vector<1x256xf32> to vector<4x256xf32>
    %14 = arith.mulf %12, %13 : vector<4x256xf32>
    %15 = arith.addf %9, %14 : vector<4x256xf32>
    %16 = vector.extract_strided_slice %0 {offsets = [0, 2], sizes = [4, 1], strides = [1, 1]} : vector<4x4xf32> to vector<4x1xf32>
    %17 = vector.extract_strided_slice %4 {offsets = [2, 0], sizes = [1, 256], strides = [1, 1]} : vector<4x256xf32> to vector<1x256xf32>
    %18 = vector.broadcast %16 : vector<4x1xf32> to vector<4x256xf32>
    %19 = vector.broadcast %17 : vector<1x256xf32> to vector<4x256xf32>
    %20 = arith.mulf %18, %19 : vector<4x256xf32>
    %21 = arith.addf %15, %20 : vector<4x256xf32>
    %22 = vector.extract_strided_slice %0 {offsets = [0, 3], sizes = [4, 1], strides = [1, 1]} : vector<4x4xf32> to vector<4x1xf32>
    %23 = vector.extract_strided_slice %4 {offsets = [3, 0], sizes = [1, 256], strides = [1, 1]} : vector<4x256xf32> to vector<1x256xf32>
    %24 = vector.broadcast %22 : vector<4x1xf32> to vector<4x256xf32>
    %25 = vector.broadcast %23 : vector<1x256xf32> to vector<4x256xf32>
    %26 = arith.mulf %24, %25 : vector<4x256xf32>
    %27 = arith.addf %21, %26 : vector<4x256xf32>
    %c0_5 = arith.constant 0 : index
    %c0_6 = arith.constant 0 : index
    %c0_7 = arith.constant 0 : index
    %28 = vector.load %arg3[%c0_5, %c0_6, %c0_7] : memref<1x4x256xf32, #tpu.memory_space<vmem>>, vector<1x4x256xf32>
    %29 = vector.shape_cast %28 : vector<1x4x256xf32> to vector<4x256xf32>
    %30 = vector.shape_cast %27 : vector<4x256xf32> to vector<1x4x256xf32>
    tpu.vector_store %arg3[%c0_5, %c0_6, %c0_7], %30 {strides = array<i32>} : memref<1x4x256xf32, #tpu.memory_space<vmem>>, vector<1x4x256xf32>,
    %cst_8 = arith.constant dense<0.000000e+00> : vector<4xf32>
    %31 = vector.multi_reduction <add>, %27, %cst_8 [1] : vector<4x256xf32> to vector<4xf32>
    %32 = vector.shape_cast %31 : vector<4xf32> to vector<4x1xf32>
    %33 = arith.addf %1, %32 : vector<4x1xf32>
    %34 = arith.mulf %27, %27 : vector<4x256xf32>
    %cst_9 = arith.constant dense<0.000000e+00> : vector<4xf32>
    %35 = vector.multi_reduction <add>, %34, %cst_9 [1] : vector<4x256xf32> to vector<4xf32>
    %36 = vector.shape_cast %35 : vector<4xf32> to vector<4x1xf32>
    %37 = arith.addf %2, %36 : vector<4x1xf32>
    %c0_10 = arith.constant 0 : index
    %c0_11 = arith.constant 0 : index
    %c0_12 = arith.constant 0 : index
    %38 = vector.load %arg4[%c0_10, %c0_11, %c0_12] : memref<1x4x1xf32, #tpu.memory_space<vmem>>, vector<1x4x1xf32>
    %39 = vector.shape_cast %38 : vector<1x4x1xf32> to vector<4x1xf32>
    %40 = vector.shape_cast %33 : vector<4x1xf32> to vector<1x4x1xf32>
    tpu.vector_store %arg4[%c0_10, %c0_11, %c0_12], %40 {strides = array<i32>} : memref<1x4x1xf32, #tpu.memory_space<vmem>>, vector<1x4x1xf32>,
    %c0_13 = arith.constant 0 : index
    %c0_14 = arith.constant 0 : index
    %c0_15 = arith.constant 0 : index
    %41 = vector.load %arg5[%c0_13, %c0_14, %c0_15] : memref<1x4x1xf32, #tpu.memory_space<vmem>>, vector<1x4x1xf32>
    %42 = vector.shape_cast %41 : vector<1x4x1xf32> to vector<4x1xf32>
    %43 = vector.shape_cast %37 : vector<4x1xf32> to vector<1x4x1xf32>
    tpu.vector_store %arg5[%c0_13, %c0_14, %c0_15], %43 {strides = array<i32>} : memref<1x4x1xf32, #tpu.memory_space<vmem>>, vector<1x4x1xf32>,
    return
  }
  func.func @transform_0(%arg0: i32) -> (i32, i32, i32) {
    %c0_i32 = arith.constant 0 : i32
    %c0_i32_0 = arith.constant 0 : i32
    %c0_i32_1 = arith.constant 0 : i32
    return %arg0, %c0_i32, %c0_i32_0 : i32, i32, i32
  }
  func.func @transform_1(%arg0: i32) -> (i32, i32) {
    %c0_i32 = arith.constant 0 : i32
    %c0_i32_0 = arith.constant 0 : i32
    %c0_i32_1 = arith.constant 0 : i32
    return %c0_i32, %c0_i32_0 : i32, i32
  }
  func.func @transform_2(%arg0: i32) -> (i32, i32, i32) {
    %c0_i32 = arith.constant 0 : i32
    %c0_i32_0 = arith.constant 0 : i32
    %c0_i32_1 = arith.constant 0 : i32
    return %arg0, %c0_i32, %c0_i32_0 : i32, i32, i32
  }
  func.func @transform_3(%arg0: i32) -> (i32, i32, i32) {
    %c0_i32 = arith.constant 0 : i32
    %c0_i32_0 = arith.constant 0 : i32
    %c0_i32_1 = arith.constant 0 : i32
    return %arg0, %c0_i32, %c0_i32_0 : i32, i32, i32
  }
  func.func @transform_4(%arg0: i32) -> (i32, i32, i32) {
    %c0_i32 = arith.constant 0 : i32
    %c0_i32_0 = arith.constant 0 : i32
    %c0_i32_1 = arith.constant 0 : i32
    return %arg0, %c0_i32, %c0_i32_0 : i32, i32, i32
  }
}

module attributes {stable_mosaic.version = 11 : i64} {
  func.func @_deconv3x3_s2_kernel(%arg0: i32, %arg1: memref<1x4x16x16xf32, #tpu.memory_space<vmem>>, %arg2: memref<4x1x1xf32, #tpu.memory_space<vmem>>, %arg3: memref<4x1x1xf32, #tpu.memory_space<vmem>>, %arg4: memref<36x4x1x1xf32, #tpu.memory_space<vmem>>, %arg5: memref<1x4x19x19xf32, #tpu.memory_space<vmem>>, %arg6: memref<1x4x19x18xf32, #tpu.memory_space<vmem>>, %arg7: memref<1x4x18x19xf32, #tpu.memory_space<vmem>>, %arg8: memref<1x4x18x18xf32, #tpu.memory_space<vmem>>, %arg9: memref<1x4x1x1xf32, #tpu.memory_space<vmem>>, %arg10: memref<1x4x1x1xf32, #tpu.memory_space<vmem>>, %arg11: memref<4x20x20xf32, #tpu.memory_space<vmem>>) attributes {dimension_semantics = [#tpu.dimension_semantics<parallel>], iteration_bounds = array<i64: 2>, scalar_prefetch = 0 : i64, scratch_operands = 1 : i64, tpu.core_type = #tpu.core_type<tc>, window_params = [{transform_indices = @transform_0, window_bounds = array<i64: 1, 4, 16, 16>}, {pipeline_mode = #tpu.pipeline_mode<synchronous>, transform_indices = @transform_1, window_bounds = array<i64: 4, 1, 1>}, {pipeline_mode = #tpu.pipeline_mode<synchronous>, transform_indices = @transform_2, window_bounds = array<i64: 4, 1, 1>}, {pipeline_mode = #tpu.pipeline_mode<synchronous>, transform_indices = @transform_3, window_bounds = array<i64: 36, 4, 1, 1>}, {transform_indices = @transform_4, window_bounds = array<i64: 1, 4, 19, 19>}, {transform_indices = @transform_5, window_bounds = array<i64: 1, 4, 19, 18>}, {transform_indices = @transform_6, window_bounds = array<i64: 1, 4, 18, 19>}, {transform_indices = @transform_7, window_bounds = array<i64: 1, 4, 18, 18>}, {transform_indices = @transform_8, window_bounds = array<i64: 1, 4, 1, 1>}, {transform_indices = @transform_9, window_bounds = array<i64: 1, 4, 1, 1>}]} {
    %c0 = arith.constant 0 : index
    %c0_0 = arith.constant 0 : index
    %c0_1 = arith.constant 0 : index
    %0 = vector.load %arg3[%c0, %c0_0, %c0_1] : memref<4x1x1xf32, #tpu.memory_space<vmem>>, vector<4x1x1xf32>
    %cst = arith.constant 0.000000e+00 : f32
    %1 = vector.broadcast %cst : f32 to vector<4x1x1xf32>
    %2 = arith.maximumf %0, %1 : vector<4x1x1xf32>
    %c0_2 = arith.constant 0 : index
    %c0_3 = arith.constant 0 : index
    %c0_4 = arith.constant 0 : index
    %c0_5 = arith.constant 0 : index
    %3 = vector.load %arg1[%c0_2, %c0_3, %c0_4, %c0_5] : memref<1x4x16x16xf32, #tpu.memory_space<vmem>>, vector<1x4x16x16xf32>
    %4 = vector.shape_cast %3 : vector<1x4x16x16xf32> to vector<4x16x16xf32>
    %c0_6 = arith.constant 0 : index
    %c0_7 = arith.constant 0 : index
    %c0_8 = arith.constant 0 : index
    %5 = vector.load %arg2[%c0_6, %c0_7, %c0_8] : memref<4x1x1xf32, #tpu.memory_space<vmem>>, vector<4x1x1xf32>
    %6 = vector.broadcast %5 : vector<4x1x1xf32> to vector<4x16x16xf32>
    %7 = arith.mulf %4, %6 : vector<4x16x16xf32>
    %c0_9 = arith.constant 0 : index
    %c0_10 = arith.constant 0 : index
    %c0_11 = arith.constant 0 : index
    %8 = vector.load %arg3[%c0_9, %c0_10, %c0_11] : memref<4x1x1xf32, #tpu.memory_space<vmem>>, vector<4x1x1xf32>
    %9 = vector.broadcast %8 : vector<4x1x1xf32> to vector<4x16x16xf32>
    %10 = arith.addf %7, %9 : vector<4x16x16xf32>
    %cst_12 = arith.constant 0.000000e+00 : f32
    %11 = vector.broadcast %cst_12 : f32 to vector<4x16x16xf32>
    %12 = arith.maximumf %10, %11 : vector<4x16x16xf32>
    %cst_13 = arith.constant 0.000000e+00 : f32
    %13 = vector.broadcast %cst_13 : f32 to vector<4x20x20xf32>
    %c0_14 = arith.constant 0 : index
    %c0_15 = arith.constant 0 : index
    %c0_16 = arith.constant 0 : index
    %14 = vector.load %arg11[%c0_14, %c0_15, %c0_16] : memref<4x20x20xf32, #tpu.memory_space<vmem>>, vector<4x20x20xf32>
    tpu.vector_store %arg11[%c0_14, %c0_15, %c0_16], %13 {strides = array<i32>} : memref<4x20x20xf32, #tpu.memory_space<vmem>>, vector<4x20x20xf32>,
    %15 = vector.shape_cast %2 : vector<4x1x1xf32> to vector<4x1x1xf32>
    %16 = vector.broadcast %15 : vector<4x1x1xf32> to vector<4x18x18xf32>
    %c0_17 = arith.constant 0 : index
    %c1 = arith.constant 1 : index
    %c1_18 = arith.constant 1 : index
    %17 = vector.load %arg11[%c0_17, %c1, %c1_18] : memref<4x20x20xf32, #tpu.memory_space<vmem>>, vector<4x18x18xf32>
    tpu.vector_store %arg11[%c0_17, %c1, %c1_18], %16 {strides = array<i32>} : memref<4x20x20xf32, #tpu.memory_space<vmem>>, vector<4x18x18xf32>,
    %c0_19 = arith.constant 0 : index
    %c2 = arith.constant 2 : index
    %c2_20 = arith.constant 2 : index
    %18 = vector.load %arg11[%c0_19, %c2, %c2_20] : memref<4x20x20xf32, #tpu.memory_space<vmem>>, vector<4x16x16xf32>
    tpu.vector_store %arg11[%c0_19, %c2, %c2_20], %12 {strides = array<i32>} : memref<4x20x20xf32, #tpu.memory_space<vmem>>, vector<4x16x16xf32>,
    %c0_21 = arith.constant 0 : index
    %c0_22 = arith.constant 0 : index
    %c0_23 = arith.constant 0 : index
    %19 = vector.load %arg11[%c0_21, %c0_22, %c0_23] : memref<4x20x20xf32, #tpu.memory_space<vmem>>, vector<1x20x20xf32>
    %20 = vector.shape_cast %19 : vector<1x20x20xf32> to vector<20x20xf32>
    %21 = vector.shape_cast %20 : vector<20x20xf32> to vector<1x20x20xf32>
    %c1_24 = arith.constant 1 : index
    %c0_25 = arith.constant 0 : index
    %c0_26 = arith.constant 0 : index
    %22 = vector.load %arg11[%c1_24, %c0_25, %c0_26] : memref<4x20x20xf32, #tpu.memory_space<vmem>>, vector<1x20x20xf32>
    %23 = vector.shape_cast %22 : vector<1x20x20xf32> to vector<20x20xf32>
    %24 = vector.shape_cast %23 : vector<20x20xf32> to vector<1x20x20xf32>
    %c2_27 = arith.constant 2 : index
    %c0_28 = arith.constant 0 : index
    %c0_29 = arith.constant 0 : index
    %25 = vector.load %arg11[%c2_27, %c0_28, %c0_29] : memref<4x20x20xf32, #tpu.memory_space<vmem>>, vector<1x20x20xf32>
    %26 = vector.shape_cast %25 : vector<1x20x20xf32> to vector<20x20xf32>
    %27 = vector.shape_cast %26 : vector<20x20xf32> to vector<1x20x20xf32>
    %c3 = arith.constant 3 : index
    %c0_30 = arith.constant 0 : index
    %c0_31 = arith.constant 0 : index
    %28 = vector.load %arg11[%c3, %c0_30, %c0_31] : memref<4x20x20xf32, #tpu.memory_space<vmem>>, vector<1x20x20xf32>
    %29 = vector.shape_cast %28 : vector<1x20x20xf32> to vector<20x20xf32>
    %30 = vector.shape_cast %29 : vector<20x20xf32> to vector<1x20x20xf32>
    %c0_32 = arith.constant 0 : index
    %c0_33 = arith.constant 0 : index
    %c0_34 = arith.constant 0 : index
    %c0_35 = arith.constant 0 : index
    %31 = vector.load %arg4[%c0_32, %c0_33, %c0_34, %c0_35] : memref<36x4x1x1xf32, #tpu.memory_space<vmem>>, vector<1x4x1x1xf32>
    %32 = vector.shape_cast %31 : vector<1x4x1x1xf32> to vector<4x1x1xf32>
    %33 = vector.broadcast %32 : vector<4x1x1xf32> to vector<4x20x20xf32>
    %34 = vector.broadcast %21 : vector<1x20x20xf32> to vector<4x20x20xf32>
    %35 = arith.mulf %33, %34 : vector<4x20x20xf32>
    %c9 = arith.constant 9 : index
    %c0_36 = arith.constant 0 : index
    %c0_37 = arith.constant 0 : index
    %c0_38 = arith.constant 0 : index
    %36 = vector.load %arg4[%c9, %c0_36, %c0_37, %c0_38] : memref<36x4x1x1xf32, #tpu.memory_space<vmem>>, vector<1x4x1x1xf32>
    %37 = vector.shape_cast %36 : vector<1x4x1x1xf32> to vector<4x1x1xf32>
    %38 = vector.broadcast %37 : vector<4x1x1xf32> to vector<4x20x20xf32>
    %39 = vector.broadcast %24 : vector<1x20x20xf32> to vector<4x20x20xf32>
    %40 = arith.mulf %38, %39 : vector<4x20x20xf32>
    %41 = arith.addf %35, %40 : vector<4x20x20xf32>
    %c18 = arith.constant 18 : index
    %c0_39 = arith.constant 0 : index
    %c0_40 = arith.constant 0 : index
    %c0_41 = arith.constant 0 : index
    %42 = vector.load %arg4[%c18, %c0_39, %c0_40, %c0_41] : memref<36x4x1x1xf32, #tpu.memory_space<vmem>>, vector<1x4x1x1xf32>
    %43 = vector.shape_cast %42 : vector<1x4x1x1xf32> to vector<4x1x1xf32>
    %44 = vector.broadcast %43 : vector<4x1x1xf32> to vector<4x20x20xf32>
    %45 = vector.broadcast %27 : vector<1x20x20xf32> to vector<4x20x20xf32>
    %46 = arith.mulf %44, %45 : vector<4x20x20xf32>
    %47 = arith.addf %41, %46 : vector<4x20x20xf32>
    %c27 = arith.constant 27 : index
    %c0_42 = arith.constant 0 : index
    %c0_43 = arith.constant 0 : index
    %c0_44 = arith.constant 0 : index
    %48 = vector.load %arg4[%c27, %c0_42, %c0_43, %c0_44] : memref<36x4x1x1xf32, #tpu.memory_space<vmem>>, vector<1x4x1x1xf32>
    %49 = vector.shape_cast %48 : vector<1x4x1x1xf32> to vector<4x1x1xf32>
    %50 = vector.broadcast %49 : vector<4x1x1xf32> to vector<4x20x20xf32>
    %51 = vector.broadcast %30 : vector<1x20x20xf32> to vector<4x20x20xf32>
    %52 = arith.mulf %50, %51 : vector<4x20x20xf32>
    %53 = arith.addf %47, %52 : vector<4x20x20xf32>
    %c1_45 = arith.constant 1 : index
    %c0_46 = arith.constant 0 : index
    %c0_47 = arith.constant 0 : index
    %c0_48 = arith.constant 0 : index
    %54 = vector.load %arg4[%c1_45, %c0_46, %c0_47, %c0_48] : memref<36x4x1x1xf32, #tpu.memory_space<vmem>>, vector<1x4x1x1xf32>
    %55 = vector.shape_cast %54 : vector<1x4x1x1xf32> to vector<4x1x1xf32>
    %56 = vector.broadcast %55 : vector<4x1x1xf32> to vector<4x20x20xf32>
    %57 = vector.broadcast %21 : vector<1x20x20xf32> to vector<4x20x20xf32>
    %58 = arith.mulf %56, %57 : vector<4x20x20xf32>
    %c10 = arith.constant 10 : index
    %c0_49 = arith.constant 0 : index
    %c0_50 = arith.constant 0 : index
    %c0_51 = arith.constant 0 : index
    %59 = vector.load %arg4[%c10, %c0_49, %c0_50, %c0_51] : memref<36x4x1x1xf32, #tpu.memory_space<vmem>>, vector<1x4x1x1xf32>
    %60 = vector.shape_cast %59 : vector<1x4x1x1xf32> to vector<4x1x1xf32>
    %61 = vector.broadcast %60 : vector<4x1x1xf32> to vector<4x20x20xf32>
    %62 = vector.broadcast %24 : vector<1x20x20xf32> to vector<4x20x20xf32>
    %63 = arith.mulf %61, %62 : vector<4x20x20xf32>
    %64 = arith.addf %58, %63 : vector<4x20x20xf32>
    %c19 = arith.constant 19 : index
    %c0_52 = arith.constant 0 : index
    %c0_53 = arith.constant 0 : index
    %c0_54 = arith.constant 0 : index
    %65 = vector.load %arg4[%c19, %c0_52, %c0_53, %c0_54] : memref<36x4x1x1xf32, #tpu.memory_space<vmem>>, vector<1x4x1x1xf32>
    %66 = vector.shape_cast %65 : vector<1x4x1x1xf32> to vector<4x1x1xf32>
    %67 = vector.broadcast %66 : vector<4x1x1xf32> to vector<4x20x20xf32>
    %68 = vector.broadcast %27 : vector<1x20x20xf32> to vector<4x20x20xf32>
    %69 = arith.mulf %67, %68 : vector<4x20x20xf32>
    %70 = arith.addf %64, %69 : vector<4x20x20xf32>
    %c28 = arith.constant 28 : index
    %c0_55 = arith.constant 0 : index
    %c0_56 = arith.constant 0 : index
    %c0_57 = arith.constant 0 : index
    %71 = vector.load %arg4[%c28, %c0_55, %c0_56, %c0_57] : memref<36x4x1x1xf32, #tpu.memory_space<vmem>>, vector<1x4x1x1xf32>
    %72 = vector.shape_cast %71 : vector<1x4x1x1xf32> to vector<4x1x1xf32>
    %73 = vector.broadcast %72 : vector<4x1x1xf32> to vector<4x20x20xf32>
    %74 = vector.broadcast %30 : vector<1x20x20xf32> to vector<4x20x20xf32>
    %75 = arith.mulf %73, %74 : vector<4x20x20xf32>
    %76 = arith.addf %70, %75 : vector<4x20x20xf32>
    %c2_58 = arith.constant 2 : index
    %c0_59 = arith.constant 0 : index
    %c0_60 = arith.constant 0 : index
    %c0_61 = arith.constant 0 : index
    %77 = vector.load %arg4[%c2_58, %c0_59, %c0_60, %c0_61] : memref<36x4x1x1xf32, #tpu.memory_space<vmem>>, vector<1x4x1x1xf32>
    %78 = vector.shape_cast %77 : vector<1x4x1x1xf32> to vector<4x1x1xf32>
    %79 = vector.broadcast %78 : vector<4x1x1xf32> to vector<4x20x20xf32>
    %80 = vector.broadcast %21 : vector<1x20x20xf32> to vector<4x20x20xf32>
    %81 = arith.mulf %79, %80 : vector<4x20x20xf32>
    %c11 = arith.constant 11 : index
    %c0_62 = arith.constant 0 : index
    %c0_63 = arith.constant 0 : index
    %c0_64 = arith.constant 0 : index
    %82 = vector.load %arg4[%c11, %c0_62, %c0_63, %c0_64] : memref<36x4x1x1xf32, #tpu.memory_space<vmem>>, vector<1x4x1x1xf32>
    %83 = vector.shape_cast %82 : vector<1x4x1x1xf32> to vector<4x1x1xf32>
    %84 = vector.broadcast %83 : vector<4x1x1xf32> to vector<4x20x20xf32>
    %85 = vector.broadcast %24 : vector<1x20x20xf32> to vector<4x20x20xf32>
    %86 = arith.mulf %84, %85 : vector<4x20x20xf32>
    %87 = arith.addf %81, %86 : vector<4x20x20xf32>
    %c20 = arith.constant 20 : index
    %c0_65 = arith.constant 0 : index
    %c0_66 = arith.constant 0 : index
    %c0_67 = arith.constant 0 : index
    %88 = vector.load %arg4[%c20, %c0_65, %c0_66, %c0_67] : memref<36x4x1x1xf32, #tpu.memory_space<vmem>>, vector<1x4x1x1xf32>
    %89 = vector.shape_cast %88 : vector<1x4x1x1xf32> to vector<4x1x1xf32>
    %90 = vector.broadcast %89 : vector<4x1x1xf32> to vector<4x20x20xf32>
    %91 = vector.broadcast %27 : vector<1x20x20xf32> to vector<4x20x20xf32>
    %92 = arith.mulf %90, %91 : vector<4x20x20xf32>
    %93 = arith.addf %87, %92 : vector<4x20x20xf32>
    %c29 = arith.constant 29 : index
    %c0_68 = arith.constant 0 : index
    %c0_69 = arith.constant 0 : index
    %c0_70 = arith.constant 0 : index
    %94 = vector.load %arg4[%c29, %c0_68, %c0_69, %c0_70] : memref<36x4x1x1xf32, #tpu.memory_space<vmem>>, vector<1x4x1x1xf32>
    %95 = vector.shape_cast %94 : vector<1x4x1x1xf32> to vector<4x1x1xf32>
    %96 = vector.broadcast %95 : vector<4x1x1xf32> to vector<4x20x20xf32>
    %97 = vector.broadcast %30 : vector<1x20x20xf32> to vector<4x20x20xf32>
    %98 = arith.mulf %96, %97 : vector<4x20x20xf32>
    %99 = arith.addf %93, %98 : vector<4x20x20xf32>
    %c3_71 = arith.constant 3 : index
    %c0_72 = arith.constant 0 : index
    %c0_73 = arith.constant 0 : index
    %c0_74 = arith.constant 0 : index
    %100 = vector.load %arg4[%c3_71, %c0_72, %c0_73, %c0_74] : memref<36x4x1x1xf32, #tpu.memory_space<vmem>>, vector<1x4x1x1xf32>
    %101 = vector.shape_cast %100 : vector<1x4x1x1xf32> to vector<4x1x1xf32>
    %102 = vector.broadcast %101 : vector<4x1x1xf32> to vector<4x20x20xf32>
    %103 = vector.broadcast %21 : vector<1x20x20xf32> to vector<4x20x20xf32>
    %104 = arith.mulf %102, %103 : vector<4x20x20xf32>
    %c12 = arith.constant 12 : index
    %c0_75 = arith.constant 0 : index
    %c0_76 = arith.constant 0 : index
    %c0_77 = arith.constant 0 : index
    %105 = vector.load %arg4[%c12, %c0_75, %c0_76, %c0_77] : memref<36x4x1x1xf32, #tpu.memory_space<vmem>>, vector<1x4x1x1xf32>
    %106 = vector.shape_cast %105 : vector<1x4x1x1xf32> to vector<4x1x1xf32>
    %107 = vector.broadcast %106 : vector<4x1x1xf32> to vector<4x20x20xf32>
    %108 = vector.broadcast %24 : vector<1x20x20xf32> to vector<4x20x20xf32>
    %109 = arith.mulf %107, %108 : vector<4x20x20xf32>
    %110 = arith.addf %104, %109 : vector<4x20x20xf32>
    %c21 = arith.constant 21 : index
    %c0_78 = arith.constant 0 : index
    %c0_79 = arith.constant 0 : index
    %c0_80 = arith.constant 0 : index
    %111 = vector.load %arg4[%c21, %c0_78, %c0_79, %c0_80] : memref<36x4x1x1xf32, #tpu.memory_space<vmem>>, vector<1x4x1x1xf32>
    %112 = vector.shape_cast %111 : vector<1x4x1x1xf32> to vector<4x1x1xf32>
    %113 = vector.broadcast %112 : vector<4x1x1xf32> to vector<4x20x20xf32>
    %114 = vector.broadcast %27 : vector<1x20x20xf32> to vector<4x20x20xf32>
    %115 = arith.mulf %113, %114 : vector<4x20x20xf32>
    %116 = arith.addf %110, %115 : vector<4x20x20xf32>
    %c30 = arith.constant 30 : index
    %c0_81 = arith.constant 0 : index
    %c0_82 = arith.constant 0 : index
    %c0_83 = arith.constant 0 : index
    %117 = vector.load %arg4[%c30, %c0_81, %c0_82, %c0_83] : memref<36x4x1x1xf32, #tpu.memory_space<vmem>>, vector<1x4x1x1xf32>
    %118 = vector.shape_cast %117 : vector<1x4x1x1xf32> to vector<4x1x1xf32>
    %119 = vector.broadcast %118 : vector<4x1x1xf32> to vector<4x20x20xf32>
    %120 = vector.broadcast %30 : vector<1x20x20xf32> to vector<4x20x20xf32>
    %121 = arith.mulf %119, %120 : vector<4x20x20xf32>
    %122 = arith.addf %116, %121 : vector<4x20x20xf32>
    %c4 = arith.constant 4 : index
    %c0_84 = arith.constant 0 : index
    %c0_85 = arith.constant 0 : index
    %c0_86 = arith.constant 0 : index
    %123 = vector.load %arg4[%c4, %c0_84, %c0_85, %c0_86] : memref<36x4x1x1xf32, #tpu.memory_space<vmem>>, vector<1x4x1x1xf32>
    %124 = vector.shape_cast %123 : vector<1x4x1x1xf32> to vector<4x1x1xf32>
    %125 = vector.broadcast %124 : vector<4x1x1xf32> to vector<4x20x20xf32>
    %126 = vector.broadcast %21 : vector<1x20x20xf32> to vector<4x20x20xf32>
    %127 = arith.mulf %125, %126 : vector<4x20x20xf32>
    %c13 = arith.constant 13 : index
    %c0_87 = arith.constant 0 : index
    %c0_88 = arith.constant 0 : index
    %c0_89 = arith.constant 0 : index
    %128 = vector.load %arg4[%c13, %c0_87, %c0_88, %c0_89] : memref<36x4x1x1xf32, #tpu.memory_space<vmem>>, vector<1x4x1x1xf32>
    %129 = vector.shape_cast %128 : vector<1x4x1x1xf32> to vector<4x1x1xf32>
    %130 = vector.broadcast %129 : vector<4x1x1xf32> to vector<4x20x20xf32>
    %131 = vector.broadcast %24 : vector<1x20x20xf32> to vector<4x20x20xf32>
    %132 = arith.mulf %130, %131 : vector<4x20x20xf32>
    %133 = arith.addf %127, %132 : vector<4x20x20xf32>
    %c22 = arith.constant 22 : index
    %c0_90 = arith.constant 0 : index
    %c0_91 = arith.constant 0 : index
    %c0_92 = arith.constant 0 : index
    %134 = vector.load %arg4[%c22, %c0_90, %c0_91, %c0_92] : memref<36x4x1x1xf32, #tpu.memory_space<vmem>>, vector<1x4x1x1xf32>
    %135 = vector.shape_cast %134 : vector<1x4x1x1xf32> to vector<4x1x1xf32>
    %136 = vector.broadcast %135 : vector<4x1x1xf32> to vector<4x20x20xf32>
    %137 = vector.broadcast %27 : vector<1x20x20xf32> to vector<4x20x20xf32>
    %138 = arith.mulf %136, %137 : vector<4x20x20xf32>
    %139 = arith.addf %133, %138 : vector<4x20x20xf32>
    %c31 = arith.constant 31 : index
    %c0_93 = arith.constant 0 : index
    %c0_94 = arith.constant 0 : index
    %c0_95 = arith.constant 0 : index
    %140 = vector.load %arg4[%c31, %c0_93, %c0_94, %c0_95] : memref<36x4x1x1xf32, #tpu.memory_space<vmem>>, vector<1x4x1x1xf32>
    %141 = vector.shape_cast %140 : vector<1x4x1x1xf32> to vector<4x1x1xf32>
    %142 = vector.broadcast %141 : vector<4x1x1xf32> to vector<4x20x20xf32>
    %143 = vector.broadcast %30 : vector<1x20x20xf32> to vector<4x20x20xf32>
    %144 = arith.mulf %142, %143 : vector<4x20x20xf32>
    %145 = arith.addf %139, %144 : vector<4x20x20xf32>
    %c5 = arith.constant 5 : index
    %c0_96 = arith.constant 0 : index
    %c0_97 = arith.constant 0 : index
    %c0_98 = arith.constant 0 : index
    %146 = vector.load %arg4[%c5, %c0_96, %c0_97, %c0_98] : memref<36x4x1x1xf32, #tpu.memory_space<vmem>>, vector<1x4x1x1xf32>
    %147 = vector.shape_cast %146 : vector<1x4x1x1xf32> to vector<4x1x1xf32>
    %148 = vector.broadcast %147 : vector<4x1x1xf32> to vector<4x20x20xf32>
    %149 = vector.broadcast %21 : vector<1x20x20xf32> to vector<4x20x20xf32>
    %150 = arith.mulf %148, %149 : vector<4x20x20xf32>
    %c14 = arith.constant 14 : index
    %c0_99 = arith.constant 0 : index
    %c0_100 = arith.constant 0 : index
    %c0_101 = arith.constant 0 : index
    %151 = vector.load %arg4[%c14, %c0_99, %c0_100, %c0_101] : memref<36x4x1x1xf32, #tpu.memory_space<vmem>>, vector<1x4x1x1xf32>
    %152 = vector.shape_cast %151 : vector<1x4x1x1xf32> to vector<4x1x1xf32>
    %153 = vector.broadcast %152 : vector<4x1x1xf32> to vector<4x20x20xf32>
    %154 = vector.broadcast %24 : vector<1x20x20xf32> to vector<4x20x20xf32>
    %155 = arith.mulf %153, %154 : vector<4x20x20xf32>
    %156 = arith.addf %150, %155 : vector<4x20x20xf32>
    %c23 = arith.constant 23 : index
    %c0_102 = arith.constant 0 : index
    %c0_103 = arith.constant 0 : index
    %c0_104 = arith.constant 0 : index
    %157 = vector.load %arg4[%c23, %c0_102, %c0_103, %c0_104] : memref<36x4x1x1xf32, #tpu.memory_space<vmem>>, vector<1x4x1x1xf32>
    %158 = vector.shape_cast %157 : vector<1x4x1x1xf32> to vector<4x1x1xf32>
    %159 = vector.broadcast %158 : vector<4x1x1xf32> to vector<4x20x20xf32>
    %160 = vector.broadcast %27 : vector<1x20x20xf32> to vector<4x20x20xf32>
    %161 = arith.mulf %159, %160 : vector<4x20x20xf32>
    %162 = arith.addf %156, %161 : vector<4x20x20xf32>
    %c32 = arith.constant 32 : index
    %c0_105 = arith.constant 0 : index
    %c0_106 = arith.constant 0 : index
    %c0_107 = arith.constant 0 : index
    %163 = vector.load %arg4[%c32, %c0_105, %c0_106, %c0_107] : memref<36x4x1x1xf32, #tpu.memory_space<vmem>>, vector<1x4x1x1xf32>
    %164 = vector.shape_cast %163 : vector<1x4x1x1xf32> to vector<4x1x1xf32>
    %165 = vector.broadcast %164 : vector<4x1x1xf32> to vector<4x20x20xf32>
    %166 = vector.broadcast %30 : vector<1x20x20xf32> to vector<4x20x20xf32>
    %167 = arith.mulf %165, %166 : vector<4x20x20xf32>
    %168 = arith.addf %162, %167 : vector<4x20x20xf32>
    %c6 = arith.constant 6 : index
    %c0_108 = arith.constant 0 : index
    %c0_109 = arith.constant 0 : index
    %c0_110 = arith.constant 0 : index
    %169 = vector.load %arg4[%c6, %c0_108, %c0_109, %c0_110] : memref<36x4x1x1xf32, #tpu.memory_space<vmem>>, vector<1x4x1x1xf32>
    %170 = vector.shape_cast %169 : vector<1x4x1x1xf32> to vector<4x1x1xf32>
    %171 = vector.broadcast %170 : vector<4x1x1xf32> to vector<4x20x20xf32>
    %172 = vector.broadcast %21 : vector<1x20x20xf32> to vector<4x20x20xf32>
    %173 = arith.mulf %171, %172 : vector<4x20x20xf32>
    %c15 = arith.constant 15 : index
    %c0_111 = arith.constant 0 : index
    %c0_112 = arith.constant 0 : index
    %c0_113 = arith.constant 0 : index
    %174 = vector.load %arg4[%c15, %c0_111, %c0_112, %c0_113] : memref<36x4x1x1xf32, #tpu.memory_space<vmem>>, vector<1x4x1x1xf32>
    %175 = vector.shape_cast %174 : vector<1x4x1x1xf32> to vector<4x1x1xf32>
    %176 = vector.broadcast %175 : vector<4x1x1xf32> to vector<4x20x20xf32>
    %177 = vector.broadcast %24 : vector<1x20x20xf32> to vector<4x20x20xf32>
    %178 = arith.mulf %176, %177 : vector<4x20x20xf32>
    %179 = arith.addf %173, %178 : vector<4x20x20xf32>
    %c24 = arith.constant 24 : index
    %c0_114 = arith.constant 0 : index
    %c0_115 = arith.constant 0 : index
    %c0_116 = arith.constant 0 : index
    %180 = vector.load %arg4[%c24, %c0_114, %c0_115, %c0_116] : memref<36x4x1x1xf32, #tpu.memory_space<vmem>>, vector<1x4x1x1xf32>
    %181 = vector.shape_cast %180 : vector<1x4x1x1xf32> to vector<4x1x1xf32>
    %182 = vector.broadcast %181 : vector<4x1x1xf32> to vector<4x20x20xf32>
    %183 = vector.broadcast %27 : vector<1x20x20xf32> to vector<4x20x20xf32>
    %184 = arith.mulf %182, %183 : vector<4x20x20xf32>
    %185 = arith.addf %179, %184 : vector<4x20x20xf32>
    %c33 = arith.constant 33 : index
    %c0_117 = arith.constant 0 : index
    %c0_118 = arith.constant 0 : index
    %c0_119 = arith.constant 0 : index
    %186 = vector.load %arg4[%c33, %c0_117, %c0_118, %c0_119] : memref<36x4x1x1xf32, #tpu.memory_space<vmem>>, vector<1x4x1x1xf32>
    %187 = vector.shape_cast %186 : vector<1x4x1x1xf32> to vector<4x1x1xf32>
    %188 = vector.broadcast %187 : vector<4x1x1xf32> to vector<4x20x20xf32>
    %189 = vector.broadcast %30 : vector<1x20x20xf32> to vector<4x20x20xf32>
    %190 = arith.mulf %188, %189 : vector<4x20x20xf32>
    %191 = arith.addf %185, %190 : vector<4x20x20xf32>
    %c7 = arith.constant 7 : index
    %c0_120 = arith.constant 0 : index
    %c0_121 = arith.constant 0 : index
    %c0_122 = arith.constant 0 : index
    %192 = vector.load %arg4[%c7, %c0_120, %c0_121, %c0_122] : memref<36x4x1x1xf32, #tpu.memory_space<vmem>>, vector<1x4x1x1xf32>
    %193 = vector.shape_cast %192 : vector<1x4x1x1xf32> to vector<4x1x1xf32>
    %194 = vector.broadcast %193 : vector<4x1x1xf32> to vector<4x20x20xf32>
    %195 = vector.broadcast %21 : vector<1x20x20xf32> to vector<4x20x20xf32>
    %196 = arith.mulf %194, %195 : vector<4x20x20xf32>
    %c16 = arith.constant 16 : index
    %c0_123 = arith.constant 0 : index
    %c0_124 = arith.constant 0 : index
    %c0_125 = arith.constant 0 : index
    %197 = vector.load %arg4[%c16, %c0_123, %c0_124, %c0_125] : memref<36x4x1x1xf32, #tpu.memory_space<vmem>>, vector<1x4x1x1xf32>
    %198 = vector.shape_cast %197 : vector<1x4x1x1xf32> to vector<4x1x1xf32>
    %199 = vector.broadcast %198 : vector<4x1x1xf32> to vector<4x20x20xf32>
    %200 = vector.broadcast %24 : vector<1x20x20xf32> to vector<4x20x20xf32>
    %201 = arith.mulf %199, %200 : vector<4x20x20xf32>
    %202 = arith.addf %196, %201 : vector<4x20x20xf32>
    %c25 = arith.constant 25 : index
    %c0_126 = arith.constant 0 : index
    %c0_127 = arith.constant 0 : index
    %c0_128 = arith.constant 0 : index
    %203 = vector.load %arg4[%c25, %c0_126, %c0_127, %c0_128] : memref<36x4x1x1xf32, #tpu.memory_space<vmem>>, vector<1x4x1x1xf32>
    %204 = vector.shape_cast %203 : vector<1x4x1x1xf32> to vector<4x1x1xf32>
    %205 = vector.broadcast %204 : vector<4x1x1xf32> to vector<4x20x20xf32>
    %206 = vector.broadcast %27 : vector<1x20x20xf32> to vector<4x20x20xf32>
    %207 = arith.mulf %205, %206 : vector<4x20x20xf32>
    %208 = arith.addf %202, %207 : vector<4x20x20xf32>
    %c34 = arith.constant 34 : index
    %c0_129 = arith.constant 0 : index
    %c0_130 = arith.constant 0 : index
    %c0_131 = arith.constant 0 : index
    %209 = vector.load %arg4[%c34, %c0_129, %c0_130, %c0_131] : memref<36x4x1x1xf32, #tpu.memory_space<vmem>>, vector<1x4x1x1xf32>
    %210 = vector.shape_cast %209 : vector<1x4x1x1xf32> to vector<4x1x1xf32>
    %211 = vector.broadcast %210 : vector<4x1x1xf32> to vector<4x20x20xf32>
    %212 = vector.broadcast %30 : vector<1x20x20xf32> to vector<4x20x20xf32>
    %213 = arith.mulf %211, %212 : vector<4x20x20xf32>
    %214 = arith.addf %208, %213 : vector<4x20x20xf32>
    %c8 = arith.constant 8 : index
    %c0_132 = arith.constant 0 : index
    %c0_133 = arith.constant 0 : index
    %c0_134 = arith.constant 0 : index
    %215 = vector.load %arg4[%c8, %c0_132, %c0_133, %c0_134] : memref<36x4x1x1xf32, #tpu.memory_space<vmem>>, vector<1x4x1x1xf32>
    %216 = vector.shape_cast %215 : vector<1x4x1x1xf32> to vector<4x1x1xf32>
    %217 = vector.broadcast %216 : vector<4x1x1xf32> to vector<4x20x20xf32>
    %218 = vector.broadcast %21 : vector<1x20x20xf32> to vector<4x20x20xf32>
    %219 = arith.mulf %217, %218 : vector<4x20x20xf32>
    %c17 = arith.constant 17 : index
    %c0_135 = arith.constant 0 : index
    %c0_136 = arith.constant 0 : index
    %c0_137 = arith.constant 0 : index
    %220 = vector.load %arg4[%c17, %c0_135, %c0_136, %c0_137] : memref<36x4x1x1xf32, #tpu.memory_space<vmem>>, vector<1x4x1x1xf32>
    %221 = vector.shape_cast %220 : vector<1x4x1x1xf32> to vector<4x1x1xf32>
    %222 = vector.broadcast %221 : vector<4x1x1xf32> to vector<4x20x20xf32>
    %223 = vector.broadcast %24 : vector<1x20x20xf32> to vector<4x20x20xf32>
    %224 = arith.mulf %222, %223 : vector<4x20x20xf32>
    %225 = arith.addf %219, %224 : vector<4x20x20xf32>
    %c26 = arith.constant 26 : index
    %c0_138 = arith.constant 0 : index
    %c0_139 = arith.constant 0 : index
    %c0_140 = arith.constant 0 : index
    %226 = vector.load %arg4[%c26, %c0_138, %c0_139, %c0_140] : memref<36x4x1x1xf32, #tpu.memory_space<vmem>>, vector<1x4x1x1xf32>
    %227 = vector.shape_cast %226 : vector<1x4x1x1xf32> to vector<4x1x1xf32>
    %228 = vector.broadcast %227 : vector<4x1x1xf32> to vector<4x20x20xf32>
    %229 = vector.broadcast %27 : vector<1x20x20xf32> to vector<4x20x20xf32>
    %230 = arith.mulf %228, %229 : vector<4x20x20xf32>
    %231 = arith.addf %225, %230 : vector<4x20x20xf32>
    %c35 = arith.constant 35 : index
    %c0_141 = arith.constant 0 : index
    %c0_142 = arith.constant 0 : index
    %c0_143 = arith.constant 0 : index
    %232 = vector.load %arg4[%c35, %c0_141, %c0_142, %c0_143] : memref<36x4x1x1xf32, #tpu.memory_space<vmem>>, vector<1x4x1x1xf32>
    %233 = vector.shape_cast %232 : vector<1x4x1x1xf32> to vector<4x1x1xf32>
    %234 = vector.broadcast %233 : vector<4x1x1xf32> to vector<4x20x20xf32>
    %235 = vector.broadcast %30 : vector<1x20x20xf32> to vector<4x20x20xf32>
    %236 = arith.mulf %234, %235 : vector<4x20x20xf32>
    %237 = arith.addf %231, %236 : vector<4x20x20xf32>
    %238 = vector.extract_strided_slice %53 {offsets = [0, 1, 1], sizes = [4, 19, 19], strides = [1, 1, 1]} : vector<4x20x20xf32> to vector<4x19x19xf32>
    %239 = vector.extract_strided_slice %99 {offsets = [0, 1, 0], sizes = [4, 19, 19], strides = [1, 1, 1]} : vector<4x20x20xf32> to vector<4x19x19xf32>
    %240 = arith.addf %238, %239 : vector<4x19x19xf32>
    %241 = vector.extract_strided_slice %191 {offsets = [0, 0, 1], sizes = [4, 19, 19], strides = [1, 1, 1]} : vector<4x20x20xf32> to vector<4x19x19xf32>
    %242 = arith.addf %240, %241 : vector<4x19x19xf32>
    %243 = vector.extract_strided_slice %237 {offsets = [0, 0, 0], sizes = [4, 19, 19], strides = [1, 1, 1]} : vector<4x20x20xf32> to vector<4x19x19xf32>
    %244 = arith.addf %242, %243 : vector<4x19x19xf32>
    %245 = vector.extract_strided_slice %76 {offsets = [0, 1, 1], sizes = [4, 19, 18], strides = [1, 1, 1]} : vector<4x20x20xf32> to vector<4x19x18xf32>
    %246 = vector.extract_strided_slice %214 {offsets = [0, 0, 1], sizes = [4, 19, 18], strides = [1, 1, 1]} : vector<4x20x20xf32> to vector<4x19x18xf32>
    %247 = arith.addf %245, %246 : vector<4x19x18xf32>
    %248 = vector.extract_strided_slice %122 {offsets = [0, 1, 1], sizes = [4, 18, 19], strides = [1, 1, 1]} : vector<4x20x20xf32> to vector<4x18x19xf32>
    %249 = vector.extract_strided_slice %168 {offsets = [0, 1, 0], sizes = [4, 18, 19], strides = [1, 1, 1]} : vector<4x20x20xf32> to vector<4x18x19xf32>
    %250 = arith.addf %248, %249 : vector<4x18x19xf32>
    %251 = vector.extract_strided_slice %145 {offsets = [0, 1, 1], sizes = [4, 18, 18], strides = [1, 1, 1]} : vector<4x20x20xf32> to vector<4x18x18xf32>
    %c0_144 = arith.constant 0 : index
    %c0_145 = arith.constant 0 : index
    %c0_146 = arith.constant 0 : index
    %c0_147 = arith.constant 0 : index
    %252 = vector.load %arg5[%c0_144, %c0_145, %c0_146, %c0_147] : memref<1x4x19x19xf32, #tpu.memory_space<vmem>>, vector<1x4x19x19xf32>
    %253 = vector.shape_cast %252 : vector<1x4x19x19xf32> to vector<4x19x19xf32>
    %254 = vector.shape_cast %244 : vector<4x19x19xf32> to vector<1x4x19x19xf32>
    tpu.vector_store %arg5[%c0_144, %c0_145, %c0_146, %c0_147], %254 {strides = array<i32>} : memref<1x4x19x19xf32, #tpu.memory_space<vmem>>, vector<1x4x19x19xf32>,
    %c0_148 = arith.constant 0 : index
    %c0_149 = arith.constant 0 : index
    %c0_150 = arith.constant 0 : index
    %c0_151 = arith.constant 0 : index
    %255 = vector.load %arg6[%c0_148, %c0_149, %c0_150, %c0_151] : memref<1x4x19x18xf32, #tpu.memory_space<vmem>>, vector<1x4x19x18xf32>
    %256 = vector.shape_cast %255 : vector<1x4x19x18xf32> to vector<4x19x18xf32>
    %257 = vector.shape_cast %247 : vector<4x19x18xf32> to vector<1x4x19x18xf32>
    tpu.vector_store %arg6[%c0_148, %c0_149, %c0_150, %c0_151], %257 {strides = array<i32>} : memref<1x4x19x18xf32, #tpu.memory_space<vmem>>, vector<1x4x19x18xf32>,
    %c0_152 = arith.constant 0 : index
    %c0_153 = arith.constant 0 : index
    %c0_154 = arith.constant 0 : index
    %c0_155 = arith.constant 0 : index
    %258 = vector.load %arg7[%c0_152, %c0_153, %c0_154, %c0_155] : memref<1x4x18x19xf32, #tpu.memory_space<vmem>>, vector<1x4x18x19xf32>
    %259 = vector.shape_cast %258 : vector<1x4x18x19xf32> to vector<4x18x19xf32>
    %260 = vector.shape_cast %250 : vector<4x18x19xf32> to vector<1x4x18x19xf32>
    tpu.vector_store %arg7[%c0_152, %c0_153, %c0_154, %c0_155], %260 {strides = array<i32>} : memref<1x4x18x19xf32, #tpu.memory_space<vmem>>, vector<1x4x18x19xf32>,
    %c0_156 = arith.constant 0 : index
    %c0_157 = arith.constant 0 : index
    %c0_158 = arith.constant 0 : index
    %c0_159 = arith.constant 0 : index
    %261 = vector.load %arg8[%c0_156, %c0_157, %c0_158, %c0_159] : memref<1x4x18x18xf32, #tpu.memory_space<vmem>>, vector<1x4x18x18xf32>
    %262 = vector.shape_cast %261 : vector<1x4x18x18xf32> to vector<4x18x18xf32>
    %263 = vector.shape_cast %251 : vector<4x18x18xf32> to vector<1x4x18x18xf32>
    tpu.vector_store %arg8[%c0_156, %c0_157, %c0_158, %c0_159], %263 {strides = array<i32>} : memref<1x4x18x18xf32, #tpu.memory_space<vmem>>, vector<1x4x18x18xf32>,
    %cst_160 = arith.constant dense<0.000000e+00> : vector<4x19xf32>
    %264 = vector.multi_reduction <add>, %244, %cst_160 [2] : vector<4x19x19xf32> to vector<4x19xf32>
    %265 = vector.shape_cast %264 : vector<4x19xf32> to vector<4x19x1xf32>
    %cst_161 = arith.constant dense<0.000000e+00> : vector<4x1xf32>
    %266 = vector.multi_reduction <add>, %265, %cst_161 [1] : vector<4x19x1xf32> to vector<4x1xf32>
    %267 = vector.shape_cast %266 : vector<4x1xf32> to vector<4x1x1xf32>
    %268 = arith.mulf %244, %244 : vector<4x19x19xf32>
    %cst_162 = arith.constant dense<0.000000e+00> : vector<4x19xf32>
    %269 = vector.multi_reduction <add>, %268, %cst_162 [2] : vector<4x19x19xf32> to vector<4x19xf32>
    %270 = vector.shape_cast %269 : vector<4x19xf32> to vector<4x19x1xf32>
    %cst_163 = arith.constant dense<0.000000e+00> : vector<4x1xf32>
    %271 = vector.multi_reduction <add>, %270, %cst_163 [1] : vector<4x19x1xf32> to vector<4x1xf32>
    %272 = vector.shape_cast %271 : vector<4x1xf32> to vector<4x1x1xf32>
    %cst_164 = arith.constant dense<0.000000e+00> : vector<4x19xf32>
    %273 = vector.multi_reduction <add>, %247, %cst_164 [2] : vector<4x19x18xf32> to vector<4x19xf32>
    %274 = vector.shape_cast %273 : vector<4x19xf32> to vector<4x19x1xf32>
    %cst_165 = arith.constant dense<0.000000e+00> : vector<4x1xf32>
    %275 = vector.multi_reduction <add>, %274, %cst_165 [1] : vector<4x19x1xf32> to vector<4x1xf32>
    %276 = vector.shape_cast %275 : vector<4x1xf32> to vector<4x1x1xf32>
    %277 = arith.mulf %247, %247 : vector<4x19x18xf32>
    %cst_166 = arith.constant dense<0.000000e+00> : vector<4x19xf32>
    %278 = vector.multi_reduction <add>, %277, %cst_166 [2] : vector<4x19x18xf32> to vector<4x19xf32>
    %279 = vector.shape_cast %278 : vector<4x19xf32> to vector<4x19x1xf32>
    %cst_167 = arith.constant dense<0.000000e+00> : vector<4x1xf32>
    %280 = vector.multi_reduction <add>, %279, %cst_167 [1] : vector<4x19x1xf32> to vector<4x1xf32>
    %281 = vector.shape_cast %280 : vector<4x1xf32> to vector<4x1x1xf32>
    %282 = arith.addf %267, %276 : vector<4x1x1xf32>
    %283 = arith.addf %272, %281 : vector<4x1x1xf32>
    %cst_168 = arith.constant dense<0.000000e+00> : vector<4x18xf32>
    %284 = vector.multi_reduction <add>, %250, %cst_168 [2] : vector<4x18x19xf32> to vector<4x18xf32>
    %285 = vector.shape_cast %284 : vector<4x18xf32> to vector<4x18x1xf32>
    %cst_169 = arith.constant dense<0.000000e+00> : vector<4x1xf32>
    %286 = vector.multi_reduction <add>, %285, %cst_169 [1] : vector<4x18x1xf32> to vector<4x1xf32>
    %287 = vector.shape_cast %286 : vector<4x1xf32> to vector<4x1x1xf32>
    %288 = arith.mulf %250, %250 : vector<4x18x19xf32>
    %cst_170 = arith.constant dense<0.000000e+00> : vector<4x18xf32>
    %289 = vector.multi_reduction <add>, %288, %cst_170 [2] : vector<4x18x19xf32> to vector<4x18xf32>
    %290 = vector.shape_cast %289 : vector<4x18xf32> to vector<4x18x1xf32>
    %cst_171 = arith.constant dense<0.000000e+00> : vector<4x1xf32>
    %291 = vector.multi_reduction <add>, %290, %cst_171 [1] : vector<4x18x1xf32> to vector<4x1xf32>
    %292 = vector.shape_cast %291 : vector<4x1xf32> to vector<4x1x1xf32>
    %293 = arith.addf %282, %287 : vector<4x1x1xf32>
    %294 = arith.addf %283, %292 : vector<4x1x1xf32>
    %cst_172 = arith.constant dense<0.000000e+00> : vector<4x18xf32>
    %295 = vector.multi_reduction <add>, %251, %cst_172 [2] : vector<4x18x18xf32> to vector<4x18xf32>
    %296 = vector.shape_cast %295 : vector<4x18xf32> to vector<4x18x1xf32>
    %cst_173 = arith.constant dense<0.000000e+00> : vector<4x1xf32>
    %297 = vector.multi_reduction <add>, %296, %cst_173 [1] : vector<4x18x1xf32> to vector<4x1xf32>
    %298 = vector.shape_cast %297 : vector<4x1xf32> to vector<4x1x1xf32>
    %299 = arith.mulf %251, %251 : vector<4x18x18xf32>
    %cst_174 = arith.constant dense<0.000000e+00> : vector<4x18xf32>
    %300 = vector.multi_reduction <add>, %299, %cst_174 [2] : vector<4x18x18xf32> to vector<4x18xf32>
    %301 = vector.shape_cast %300 : vector<4x18xf32> to vector<4x18x1xf32>
    %cst_175 = arith.constant dense<0.000000e+00> : vector<4x1xf32>
    %302 = vector.multi_reduction <add>, %301, %cst_175 [1] : vector<4x18x1xf32> to vector<4x1xf32>
    %303 = vector.shape_cast %302 : vector<4x1xf32> to vector<4x1x1xf32>
    %304 = arith.addf %293, %298 : vector<4x1x1xf32>
    %305 = arith.addf %294, %303 : vector<4x1x1xf32>
    %c0_176 = arith.constant 0 : index
    %c0_177 = arith.constant 0 : index
    %c0_178 = arith.constant 0 : index
    %c0_179 = arith.constant 0 : index
    %306 = vector.load %arg9[%c0_176, %c0_177, %c0_178, %c0_179] : memref<1x4x1x1xf32, #tpu.memory_space<vmem>>, vector<1x4x1x1xf32>
    %307 = vector.shape_cast %306 : vector<1x4x1x1xf32> to vector<4x1x1xf32>
    %308 = vector.shape_cast %304 : vector<4x1x1xf32> to vector<1x4x1x1xf32>
    tpu.vector_store %arg9[%c0_176, %c0_177, %c0_178, %c0_179], %308 {strides = array<i32>} : memref<1x4x1x1xf32, #tpu.memory_space<vmem>>, vector<1x4x1x1xf32>,
    %c0_180 = arith.constant 0 : index
    %c0_181 = arith.constant 0 : index
    %c0_182 = arith.constant 0 : index
    %c0_183 = arith.constant 0 : index
    %309 = vector.load %arg10[%c0_180, %c0_181, %c0_182, %c0_183] : memref<1x4x1x1xf32, #tpu.memory_space<vmem>>, vector<1x4x1x1xf32>
    %310 = vector.shape_cast %309 : vector<1x4x1x1xf32> to vector<4x1x1xf32>
    %311 = vector.shape_cast %305 : vector<4x1x1xf32> to vector<1x4x1x1xf32>
    tpu.vector_store %arg10[%c0_180, %c0_181, %c0_182, %c0_183], %311 {strides = array<i32>} : memref<1x4x1x1xf32, #tpu.memory_space<vmem>>, vector<1x4x1x1xf32>,
    return
  }
  func.func @transform_0(%arg0: i32) -> (i32, i32, i32, i32) {
    %c0_i32 = arith.constant 0 : i32
    %c0_i32_0 = arith.constant 0 : i32
    %c0_i32_1 = arith.constant 0 : i32
    %c0_i32_2 = arith.constant 0 : i32
    return %arg0, %c0_i32, %c0_i32_0, %c0_i32_1 : i32, i32, i32, i32
  }
  func.func @transform_1(%arg0: i32) -> (i32, i32, i32) {
    %c0_i32 = arith.constant 0 : i32
    %c0_i32_0 = arith.constant 0 : i32
    %c0_i32_1 = arith.constant 0 : i32
    %c0_i32_2 = arith.constant 0 : i32
    return %c0_i32, %c0_i32_0, %c0_i32_1 : i32, i32, i32
  }
  func.func @transform_2(%arg0: i32) -> (i32, i32, i32) {
    %c0_i32 = arith.constant 0 : i32
    %c0_i32_0 = arith.constant 0 : i32
    %c0_i32_1 = arith.constant 0 : i32
    %c0_i32_2 = arith.constant 0 : i32
    return %c0_i32, %c0_i32_0, %c0_i32_1 : i32, i32, i32
  }
  func.func @transform_3(%arg0: i32) -> (i32, i32, i32, i32) {
    %c0_i32 = arith.constant 0 : i32
    %c0_i32_0 = arith.constant 0 : i32
    %c0_i32_1 = arith.constant 0 : i32
    %c0_i32_2 = arith.constant 0 : i32
    %c0_i32_3 = arith.constant 0 : i32
    return %c0_i32, %c0_i32_0, %c0_i32_1, %c0_i32_2 : i32, i32, i32, i32
  }
  func.func @transform_4(%arg0: i32) -> (i32, i32, i32, i32) {
    %c0_i32 = arith.constant 0 : i32
    %c0_i32_0 = arith.constant 0 : i32
    %c0_i32_1 = arith.constant 0 : i32
    %c0_i32_2 = arith.constant 0 : i32
    return %arg0, %c0_i32, %c0_i32_0, %c0_i32_1 : i32, i32, i32, i32
  }
  func.func @transform_5(%arg0: i32) -> (i32, i32, i32, i32) {
    %c0_i32 = arith.constant 0 : i32
    %c0_i32_0 = arith.constant 0 : i32
    %c0_i32_1 = arith.constant 0 : i32
    %c0_i32_2 = arith.constant 0 : i32
    return %arg0, %c0_i32, %c0_i32_0, %c0_i32_1 : i32, i32, i32, i32
  }
  func.func @transform_6(%arg0: i32) -> (i32, i32, i32, i32) {
    %c0_i32 = arith.constant 0 : i32
    %c0_i32_0 = arith.constant 0 : i32
    %c0_i32_1 = arith.constant 0 : i32
    %c0_i32_2 = arith.constant 0 : i32
    return %arg0, %c0_i32, %c0_i32_0, %c0_i32_1 : i32, i32, i32, i32
  }
  func.func @transform_7(%arg0: i32) -> (i32, i32, i32, i32) {
    %c0_i32 = arith.constant 0 : i32
    %c0_i32_0 = arith.constant 0 : i32
    %c0_i32_1 = arith.constant 0 : i32
    %c0_i32_2 = arith.constant 0 : i32
    return %arg0, %c0_i32, %c0_i32_0, %c0_i32_1 : i32, i32, i32, i32
  }
  func.func @transform_8(%arg0: i32) -> (i32, i32, i32, i32) {
    %c0_i32 = arith.constant 0 : i32
    %c0_i32_0 = arith.constant 0 : i32
    %c0_i32_1 = arith.constant 0 : i32
    %c0_i32_2 = arith.constant 0 : i32
    return %arg0, %c0_i32, %c0_i32_0, %c0_i32_1 : i32, i32, i32, i32
  }
  func.func @transform_9(%arg0: i32) -> (i32, i32, i32, i32) {
    %c0_i32 = arith.constant 0 : i32
    %c0_i32_0 = arith.constant 0 : i32
    %c0_i32_1 = arith.constant 0 : i32
    %c0_i32_2 = arith.constant 0 : i32
    return %arg0, %c0_i32, %c0_i32_0, %c0_i32_1 : i32, i32, i32, i32
  }
}

module attributes {stable_mosaic.version = 11 : i64} {
  func.func @_pointwise_kernel(%arg0: i32, %arg1: memref<1x4x361xf32, #tpu.memory_space<vmem>>, %arg2: memref<1x4x342xf32, #tpu.memory_space<vmem>>, %arg3: memref<1x4x342xf32, #tpu.memory_space<vmem>>, %arg4: memref<1x4x324xf32, #tpu.memory_space<vmem>>, %arg5: memref<4x1xf32, #tpu.memory_space<vmem>>, %arg6: memref<4x1xf32, #tpu.memory_space<vmem>>, %arg7: memref<8x4xf32, #tpu.memory_space<vmem>>, %arg8: memref<1x8x361xf32, #tpu.memory_space<vmem>>, %arg9: memref<1x8x342xf32, #tpu.memory_space<vmem>>, %arg10: memref<1x8x342xf32, #tpu.memory_space<vmem>>, %arg11: memref<1x8x324xf32, #tpu.memory_space<vmem>>, %arg12: memref<1x8x1xf32, #tpu.memory_space<vmem>>, %arg13: memref<1x8x1xf32, #tpu.memory_space<vmem>>) attributes {dimension_semantics = [#tpu.dimension_semantics<parallel>], iteration_bounds = array<i64: 2>, scalar_prefetch = 0 : i64, scratch_operands = 0 : i64, tpu.core_type = #tpu.core_type<tc>, window_params = [{transform_indices = @transform_0, window_bounds = array<i64: 1, 4, 361>}, {transform_indices = @transform_1, window_bounds = array<i64: 1, 4, 342>}, {transform_indices = @transform_2, window_bounds = array<i64: 1, 4, 342>}, {transform_indices = @transform_3, window_bounds = array<i64: 1, 4, 324>}, {pipeline_mode = #tpu.pipeline_mode<synchronous>, transform_indices = @transform_4, window_bounds = array<i64: 4, 1>}, {pipeline_mode = #tpu.pipeline_mode<synchronous>, transform_indices = @transform_5, window_bounds = array<i64: 4, 1>}, {pipeline_mode = #tpu.pipeline_mode<synchronous>, transform_indices = @transform_6, window_bounds = array<i64: 8, 4>}, {transform_indices = @transform_7, window_bounds = array<i64: 1, 8, 361>}, {transform_indices = @transform_8, window_bounds = array<i64: 1, 8, 342>}, {transform_indices = @transform_9, window_bounds = array<i64: 1, 8, 342>}, {transform_indices = @transform_10, window_bounds = array<i64: 1, 8, 324>}, {transform_indices = @transform_11, window_bounds = array<i64: 1, 8, 1>}, {transform_indices = @transform_12, window_bounds = array<i64: 1, 8, 1>}]} {
    %c0 = arith.constant 0 : index
    %c0_0 = arith.constant 0 : index
    %0 = vector.load %arg7[%c0, %c0_0] : memref<8x4xf32, #tpu.memory_space<vmem>>, vector<8x4xf32>
    %cst = arith.constant 0.000000e+00 : f32
    %1 = vector.broadcast %cst : f32 to vector<8x1xf32>
    %cst_1 = arith.constant 0.000000e+00 : f32
    %2 = vector.broadcast %cst_1 : f32 to vector<8x1xf32>
    %c0_2 = arith.constant 0 : index
    %c0_3 = arith.constant 0 : index
    %c0_4 = arith.constant 0 : index
    %3 = vector.load %arg1[%c0_2, %c0_3, %c0_4] : memref<1x4x361xf32, #tpu.memory_space<vmem>>, vector<1x4x361xf32>
    %4 = vector.shape_cast %3 : vector<1x4x361xf32> to vector<4x361xf32>
    %c0_5 = arith.constant 0 : index
    %c0_6 = arith.constant 0 : index
    %5 = vector.load %arg5[%c0_5, %c0_6] : memref<4x1xf32, #tpu.memory_space<vmem>>, vector<4x1xf32>
    %6 = vector.broadcast %5 : vector<4x1xf32> to vector<4x361xf32>
    %7 = arith.mulf %4, %6 : vector<4x361xf32>
    %c0_7 = arith.constant 0 : index
    %c0_8 = arith.constant 0 : index
    %8 = vector.load %arg6[%c0_7, %c0_8] : memref<4x1xf32, #tpu.memory_space<vmem>>, vector<4x1xf32>
    %9 = vector.broadcast %8 : vector<4x1xf32> to vector<4x361xf32>
    %10 = arith.addf %7, %9 : vector<4x361xf32>
    %cst_9 = arith.constant 0.000000e+00 : f32
    %11 = vector.broadcast %cst_9 : f32 to vector<4x361xf32>
    %12 = arith.maximumf %10, %11 : vector<4x361xf32>
    %13 = vector.extract_strided_slice %0 {offsets = [0, 0], sizes = [8, 1], strides = [1, 1]} : vector<8x4xf32> to vector<8x1xf32>
    %14 = vector.extract_strided_slice %12 {offsets = [0, 0], sizes = [1, 361], strides = [1, 1]} : vector<4x361xf32> to vector<1x361xf32>
    %15 = vector.broadcast %13 : vector<8x1xf32> to vector<8x361xf32>
    %16 = vector.broadcast %14 : vector<1x361xf32> to vector<8x361xf32>
    %17 = arith.mulf %15, %16 : vector<8x361xf32>
    %18 = vector.extract_strided_slice %0 {offsets = [0, 1], sizes = [8, 1], strides = [1, 1]} : vector<8x4xf32> to vector<8x1xf32>
    %19 = vector.extract_strided_slice %12 {offsets = [1, 0], sizes = [1, 361], strides = [1, 1]} : vector<4x361xf32> to vector<1x361xf32>
    %20 = vector.broadcast %18 : vector<8x1xf32> to vector<8x361xf32>
    %21 = vector.broadcast %19 : vector<1x361xf32> to vector<8x361xf32>
    %22 = arith.mulf %20, %21 : vector<8x361xf32>
    %23 = arith.addf %17, %22 : vector<8x361xf32>
    %24 = vector.extract_strided_slice %0 {offsets = [0, 2], sizes = [8, 1], strides = [1, 1]} : vector<8x4xf32> to vector<8x1xf32>
    %25 = vector.extract_strided_slice %12 {offsets = [2, 0], sizes = [1, 361], strides = [1, 1]} : vector<4x361xf32> to vector<1x361xf32>
    %26 = vector.broadcast %24 : vector<8x1xf32> to vector<8x361xf32>
    %27 = vector.broadcast %25 : vector<1x361xf32> to vector<8x361xf32>
    %28 = arith.mulf %26, %27 : vector<8x361xf32>
    %29 = arith.addf %23, %28 : vector<8x361xf32>
    %30 = vector.extract_strided_slice %0 {offsets = [0, 3], sizes = [8, 1], strides = [1, 1]} : vector<8x4xf32> to vector<8x1xf32>
    %31 = vector.extract_strided_slice %12 {offsets = [3, 0], sizes = [1, 361], strides = [1, 1]} : vector<4x361xf32> to vector<1x361xf32>
    %32 = vector.broadcast %30 : vector<8x1xf32> to vector<8x361xf32>
    %33 = vector.broadcast %31 : vector<1x361xf32> to vector<8x361xf32>
    %34 = arith.mulf %32, %33 : vector<8x361xf32>
    %35 = arith.addf %29, %34 : vector<8x361xf32>
    %c0_10 = arith.constant 0 : index
    %c0_11 = arith.constant 0 : index
    %c0_12 = arith.constant 0 : index
    %36 = vector.load %arg8[%c0_10, %c0_11, %c0_12] : memref<1x8x361xf32, #tpu.memory_space<vmem>>, vector<1x8x361xf32>
    %37 = vector.shape_cast %36 : vector<1x8x361xf32> to vector<8x361xf32>
    %38 = vector.shape_cast %35 : vector<8x361xf32> to vector<1x8x361xf32>
    tpu.vector_store %arg8[%c0_10, %c0_11, %c0_12], %38 {strides = array<i32>} : memref<1x8x361xf32, #tpu.memory_space<vmem>>, vector<1x8x361xf32>,
    %cst_13 = arith.constant dense<0.000000e+00> : vector<8xf32>
    %39 = vector.multi_reduction <add>, %35, %cst_13 [1] : vector<8x361xf32> to vector<8xf32>
    %40 = vector.shape_cast %39 : vector<8xf32> to vector<8x1xf32>
    %41 = arith.addf %1, %40 : vector<8x1xf32>
    %42 = arith.mulf %35, %35 : vector<8x361xf32>
    %cst_14 = arith.constant dense<0.000000e+00> : vector<8xf32>
    %43 = vector.multi_reduction <add>, %42, %cst_14 [1] : vector<8x361xf32> to vector<8xf32>
    %44 = vector.shape_cast %43 : vector<8xf32> to vector<8x1xf32>
    %45 = arith.addf %2, %44 : vector<8x1xf32>
    %c0_15 = arith.constant 0 : index
    %c0_16 = arith.constant 0 : index
    %c0_17 = arith.constant 0 : index
    %46 = vector.load %arg2[%c0_15, %c0_16, %c0_17] : memref<1x4x342xf32, #tpu.memory_space<vmem>>, vector<1x4x342xf32>
    %47 = vector.shape_cast %46 : vector<1x4x342xf32> to vector<4x342xf32>
    %c0_18 = arith.constant 0 : index
    %c0_19 = arith.constant 0 : index
    %48 = vector.load %arg5[%c0_18, %c0_19] : memref<4x1xf32, #tpu.memory_space<vmem>>, vector<4x1xf32>
    %49 = vector.broadcast %48 : vector<4x1xf32> to vector<4x342xf32>
    %50 = arith.mulf %47, %49 : vector<4x342xf32>
    %c0_20 = arith.constant 0 : index
    %c0_21 = arith.constant 0 : index
    %51 = vector.load %arg6[%c0_20, %c0_21] : memref<4x1xf32, #tpu.memory_space<vmem>>, vector<4x1xf32>
    %52 = vector.broadcast %51 : vector<4x1xf32> to vector<4x342xf32>
    %53 = arith.addf %50, %52 : vector<4x342xf32>
    %cst_22 = arith.constant 0.000000e+00 : f32
    %54 = vector.broadcast %cst_22 : f32 to vector<4x342xf32>
    %55 = arith.maximumf %53, %54 : vector<4x342xf32>
    %56 = vector.extract_strided_slice %0 {offsets = [0, 0], sizes = [8, 1], strides = [1, 1]} : vector<8x4xf32> to vector<8x1xf32>
    %57 = vector.extract_strided_slice %55 {offsets = [0, 0], sizes = [1, 342], strides = [1, 1]} : vector<4x342xf32> to vector<1x342xf32>
    %58 = vector.broadcast %56 : vector<8x1xf32> to vector<8x342xf32>
    %59 = vector.broadcast %57 : vector<1x342xf32> to vector<8x342xf32>
    %60 = arith.mulf %58, %59 : vector<8x342xf32>
    %61 = vector.extract_strided_slice %0 {offsets = [0, 1], sizes = [8, 1], strides = [1, 1]} : vector<8x4xf32> to vector<8x1xf32>
    %62 = vector.extract_strided_slice %55 {offsets = [1, 0], sizes = [1, 342], strides = [1, 1]} : vector<4x342xf32> to vector<1x342xf32>
    %63 = vector.broadcast %61 : vector<8x1xf32> to vector<8x342xf32>
    %64 = vector.broadcast %62 : vector<1x342xf32> to vector<8x342xf32>
    %65 = arith.mulf %63, %64 : vector<8x342xf32>
    %66 = arith.addf %60, %65 : vector<8x342xf32>
    %67 = vector.extract_strided_slice %0 {offsets = [0, 2], sizes = [8, 1], strides = [1, 1]} : vector<8x4xf32> to vector<8x1xf32>
    %68 = vector.extract_strided_slice %55 {offsets = [2, 0], sizes = [1, 342], strides = [1, 1]} : vector<4x342xf32> to vector<1x342xf32>
    %69 = vector.broadcast %67 : vector<8x1xf32> to vector<8x342xf32>
    %70 = vector.broadcast %68 : vector<1x342xf32> to vector<8x342xf32>
    %71 = arith.mulf %69, %70 : vector<8x342xf32>
    %72 = arith.addf %66, %71 : vector<8x342xf32>
    %73 = vector.extract_strided_slice %0 {offsets = [0, 3], sizes = [8, 1], strides = [1, 1]} : vector<8x4xf32> to vector<8x1xf32>
    %74 = vector.extract_strided_slice %55 {offsets = [3, 0], sizes = [1, 342], strides = [1, 1]} : vector<4x342xf32> to vector<1x342xf32>
    %75 = vector.broadcast %73 : vector<8x1xf32> to vector<8x342xf32>
    %76 = vector.broadcast %74 : vector<1x342xf32> to vector<8x342xf32>
    %77 = arith.mulf %75, %76 : vector<8x342xf32>
    %78 = arith.addf %72, %77 : vector<8x342xf32>
    %c0_23 = arith.constant 0 : index
    %c0_24 = arith.constant 0 : index
    %c0_25 = arith.constant 0 : index
    %79 = vector.load %arg9[%c0_23, %c0_24, %c0_25] : memref<1x8x342xf32, #tpu.memory_space<vmem>>, vector<1x8x342xf32>
    %80 = vector.shape_cast %79 : vector<1x8x342xf32> to vector<8x342xf32>
    %81 = vector.shape_cast %78 : vector<8x342xf32> to vector<1x8x342xf32>
    tpu.vector_store %arg9[%c0_23, %c0_24, %c0_25], %81 {strides = array<i32>} : memref<1x8x342xf32, #tpu.memory_space<vmem>>, vector<1x8x342xf32>,
    %cst_26 = arith.constant dense<0.000000e+00> : vector<8xf32>
    %82 = vector.multi_reduction <add>, %78, %cst_26 [1] : vector<8x342xf32> to vector<8xf32>
    %83 = vector.shape_cast %82 : vector<8xf32> to vector<8x1xf32>
    %84 = arith.addf %41, %83 : vector<8x1xf32>
    %85 = arith.mulf %78, %78 : vector<8x342xf32>
    %cst_27 = arith.constant dense<0.000000e+00> : vector<8xf32>
    %86 = vector.multi_reduction <add>, %85, %cst_27 [1] : vector<8x342xf32> to vector<8xf32>
    %87 = vector.shape_cast %86 : vector<8xf32> to vector<8x1xf32>
    %88 = arith.addf %45, %87 : vector<8x1xf32>
    %c0_28 = arith.constant 0 : index
    %c0_29 = arith.constant 0 : index
    %c0_30 = arith.constant 0 : index
    %89 = vector.load %arg3[%c0_28, %c0_29, %c0_30] : memref<1x4x342xf32, #tpu.memory_space<vmem>>, vector<1x4x342xf32>
    %90 = vector.shape_cast %89 : vector<1x4x342xf32> to vector<4x342xf32>
    %c0_31 = arith.constant 0 : index
    %c0_32 = arith.constant 0 : index
    %91 = vector.load %arg5[%c0_31, %c0_32] : memref<4x1xf32, #tpu.memory_space<vmem>>, vector<4x1xf32>
    %92 = vector.broadcast %91 : vector<4x1xf32> to vector<4x342xf32>
    %93 = arith.mulf %90, %92 : vector<4x342xf32>
    %c0_33 = arith.constant 0 : index
    %c0_34 = arith.constant 0 : index
    %94 = vector.load %arg6[%c0_33, %c0_34] : memref<4x1xf32, #tpu.memory_space<vmem>>, vector<4x1xf32>
    %95 = vector.broadcast %94 : vector<4x1xf32> to vector<4x342xf32>
    %96 = arith.addf %93, %95 : vector<4x342xf32>
    %cst_35 = arith.constant 0.000000e+00 : f32
    %97 = vector.broadcast %cst_35 : f32 to vector<4x342xf32>
    %98 = arith.maximumf %96, %97 : vector<4x342xf32>
    %99 = vector.extract_strided_slice %0 {offsets = [0, 0], sizes = [8, 1], strides = [1, 1]} : vector<8x4xf32> to vector<8x1xf32>
    %100 = vector.extract_strided_slice %98 {offsets = [0, 0], sizes = [1, 342], strides = [1, 1]} : vector<4x342xf32> to vector<1x342xf32>
    %101 = vector.broadcast %99 : vector<8x1xf32> to vector<8x342xf32>
    %102 = vector.broadcast %100 : vector<1x342xf32> to vector<8x342xf32>
    %103 = arith.mulf %101, %102 : vector<8x342xf32>
    %104 = vector.extract_strided_slice %0 {offsets = [0, 1], sizes = [8, 1], strides = [1, 1]} : vector<8x4xf32> to vector<8x1xf32>
    %105 = vector.extract_strided_slice %98 {offsets = [1, 0], sizes = [1, 342], strides = [1, 1]} : vector<4x342xf32> to vector<1x342xf32>
    %106 = vector.broadcast %104 : vector<8x1xf32> to vector<8x342xf32>
    %107 = vector.broadcast %105 : vector<1x342xf32> to vector<8x342xf32>
    %108 = arith.mulf %106, %107 : vector<8x342xf32>
    %109 = arith.addf %103, %108 : vector<8x342xf32>
    %110 = vector.extract_strided_slice %0 {offsets = [0, 2], sizes = [8, 1], strides = [1, 1]} : vector<8x4xf32> to vector<8x1xf32>
    %111 = vector.extract_strided_slice %98 {offsets = [2, 0], sizes = [1, 342], strides = [1, 1]} : vector<4x342xf32> to vector<1x342xf32>
    %112 = vector.broadcast %110 : vector<8x1xf32> to vector<8x342xf32>
    %113 = vector.broadcast %111 : vector<1x342xf32> to vector<8x342xf32>
    %114 = arith.mulf %112, %113 : vector<8x342xf32>
    %115 = arith.addf %109, %114 : vector<8x342xf32>
    %116 = vector.extract_strided_slice %0 {offsets = [0, 3], sizes = [8, 1], strides = [1, 1]} : vector<8x4xf32> to vector<8x1xf32>
    %117 = vector.extract_strided_slice %98 {offsets = [3, 0], sizes = [1, 342], strides = [1, 1]} : vector<4x342xf32> to vector<1x342xf32>
    %118 = vector.broadcast %116 : vector<8x1xf32> to vector<8x342xf32>
    %119 = vector.broadcast %117 : vector<1x342xf32> to vector<8x342xf32>
    %120 = arith.mulf %118, %119 : vector<8x342xf32>
    %121 = arith.addf %115, %120 : vector<8x342xf32>
    %c0_36 = arith.constant 0 : index
    %c0_37 = arith.constant 0 : index
    %c0_38 = arith.constant 0 : index
    %122 = vector.load %arg10[%c0_36, %c0_37, %c0_38] : memref<1x8x342xf32, #tpu.memory_space<vmem>>, vector<1x8x342xf32>
    %123 = vector.shape_cast %122 : vector<1x8x342xf32> to vector<8x342xf32>
    %124 = vector.shape_cast %121 : vector<8x342xf32> to vector<1x8x342xf32>
    tpu.vector_store %arg10[%c0_36, %c0_37, %c0_38], %124 {strides = array<i32>} : memref<1x8x342xf32, #tpu.memory_space<vmem>>, vector<1x8x342xf32>,
    %cst_39 = arith.constant dense<0.000000e+00> : vector<8xf32>
    %125 = vector.multi_reduction <add>, %121, %cst_39 [1] : vector<8x342xf32> to vector<8xf32>
    %126 = vector.shape_cast %125 : vector<8xf32> to vector<8x1xf32>
    %127 = arith.addf %84, %126 : vector<8x1xf32>
    %128 = arith.mulf %121, %121 : vector<8x342xf32>
    %cst_40 = arith.constant dense<0.000000e+00> : vector<8xf32>
    %129 = vector.multi_reduction <add>, %128, %cst_40 [1] : vector<8x342xf32> to vector<8xf32>
    %130 = vector.shape_cast %129 : vector<8xf32> to vector<8x1xf32>
    %131 = arith.addf %88, %130 : vector<8x1xf32>
    %c0_41 = arith.constant 0 : index
    %c0_42 = arith.constant 0 : index
    %c0_43 = arith.constant 0 : index
    %132 = vector.load %arg4[%c0_41, %c0_42, %c0_43] : memref<1x4x324xf32, #tpu.memory_space<vmem>>, vector<1x4x324xf32>
    %133 = vector.shape_cast %132 : vector<1x4x324xf32> to vector<4x324xf32>
    %c0_44 = arith.constant 0 : index
    %c0_45 = arith.constant 0 : index
    %134 = vector.load %arg5[%c0_44, %c0_45] : memref<4x1xf32, #tpu.memory_space<vmem>>, vector<4x1xf32>
    %135 = vector.broadcast %134 : vector<4x1xf32> to vector<4x324xf32>
    %136 = arith.mulf %133, %135 : vector<4x324xf32>
    %c0_46 = arith.constant 0 : index
    %c0_47 = arith.constant 0 : index
    %137 = vector.load %arg6[%c0_46, %c0_47] : memref<4x1xf32, #tpu.memory_space<vmem>>, vector<4x1xf32>
    %138 = vector.broadcast %137 : vector<4x1xf32> to vector<4x324xf32>
    %139 = arith.addf %136, %138 : vector<4x324xf32>
    %cst_48 = arith.constant 0.000000e+00 : f32
    %140 = vector.broadcast %cst_48 : f32 to vector<4x324xf32>
    %141 = arith.maximumf %139, %140 : vector<4x324xf32>
    %142 = vector.extract_strided_slice %0 {offsets = [0, 0], sizes = [8, 1], strides = [1, 1]} : vector<8x4xf32> to vector<8x1xf32>
    %143 = vector.extract_strided_slice %141 {offsets = [0, 0], sizes = [1, 324], strides = [1, 1]} : vector<4x324xf32> to vector<1x324xf32>
    %144 = vector.broadcast %142 : vector<8x1xf32> to vector<8x324xf32>
    %145 = vector.broadcast %143 : vector<1x324xf32> to vector<8x324xf32>
    %146 = arith.mulf %144, %145 : vector<8x324xf32>
    %147 = vector.extract_strided_slice %0 {offsets = [0, 1], sizes = [8, 1], strides = [1, 1]} : vector<8x4xf32> to vector<8x1xf32>
    %148 = vector.extract_strided_slice %141 {offsets = [1, 0], sizes = [1, 324], strides = [1, 1]} : vector<4x324xf32> to vector<1x324xf32>
    %149 = vector.broadcast %147 : vector<8x1xf32> to vector<8x324xf32>
    %150 = vector.broadcast %148 : vector<1x324xf32> to vector<8x324xf32>
    %151 = arith.mulf %149, %150 : vector<8x324xf32>
    %152 = arith.addf %146, %151 : vector<8x324xf32>
    %153 = vector.extract_strided_slice %0 {offsets = [0, 2], sizes = [8, 1], strides = [1, 1]} : vector<8x4xf32> to vector<8x1xf32>
    %154 = vector.extract_strided_slice %141 {offsets = [2, 0], sizes = [1, 324], strides = [1, 1]} : vector<4x324xf32> to vector<1x324xf32>
    %155 = vector.broadcast %153 : vector<8x1xf32> to vector<8x324xf32>
    %156 = vector.broadcast %154 : vector<1x324xf32> to vector<8x324xf32>
    %157 = arith.mulf %155, %156 : vector<8x324xf32>
    %158 = arith.addf %152, %157 : vector<8x324xf32>
    %159 = vector.extract_strided_slice %0 {offsets = [0, 3], sizes = [8, 1], strides = [1, 1]} : vector<8x4xf32> to vector<8x1xf32>
    %160 = vector.extract_strided_slice %141 {offsets = [3, 0], sizes = [1, 324], strides = [1, 1]} : vector<4x324xf32> to vector<1x324xf32>
    %161 = vector.broadcast %159 : vector<8x1xf32> to vector<8x324xf32>
    %162 = vector.broadcast %160 : vector<1x324xf32> to vector<8x324xf32>
    %163 = arith.mulf %161, %162 : vector<8x324xf32>
    %164 = arith.addf %158, %163 : vector<8x324xf32>
    %c0_49 = arith.constant 0 : index
    %c0_50 = arith.constant 0 : index
    %c0_51 = arith.constant 0 : index
    %165 = vector.load %arg11[%c0_49, %c0_50, %c0_51] : memref<1x8x324xf32, #tpu.memory_space<vmem>>, vector<1x8x324xf32>
    %166 = vector.shape_cast %165 : vector<1x8x324xf32> to vector<8x324xf32>
    %167 = vector.shape_cast %164 : vector<8x324xf32> to vector<1x8x324xf32>
    tpu.vector_store %arg11[%c0_49, %c0_50, %c0_51], %167 {strides = array<i32>} : memref<1x8x324xf32, #tpu.memory_space<vmem>>, vector<1x8x324xf32>,
    %cst_52 = arith.constant dense<0.000000e+00> : vector<8xf32>
    %168 = vector.multi_reduction <add>, %164, %cst_52 [1] : vector<8x324xf32> to vector<8xf32>
    %169 = vector.shape_cast %168 : vector<8xf32> to vector<8x1xf32>
    %170 = arith.addf %127, %169 : vector<8x1xf32>
    %171 = arith.mulf %164, %164 : vector<8x324xf32>
    %cst_53 = arith.constant dense<0.000000e+00> : vector<8xf32>
    %172 = vector.multi_reduction <add>, %171, %cst_53 [1] : vector<8x324xf32> to vector<8xf32>
    %173 = vector.shape_cast %172 : vector<8xf32> to vector<8x1xf32>
    %174 = arith.addf %131, %173 : vector<8x1xf32>
    %c0_54 = arith.constant 0 : index
    %c0_55 = arith.constant 0 : index
    %c0_56 = arith.constant 0 : index
    %175 = vector.load %arg12[%c0_54, %c0_55, %c0_56] : memref<1x8x1xf32, #tpu.memory_space<vmem>>, vector<1x8x1xf32>
    %176 = vector.shape_cast %175 : vector<1x8x1xf32> to vector<8x1xf32>
    %177 = vector.shape_cast %170 : vector<8x1xf32> to vector<1x8x1xf32>
    tpu.vector_store %arg12[%c0_54, %c0_55, %c0_56], %177 {strides = array<i32>} : memref<1x8x1xf32, #tpu.memory_space<vmem>>, vector<1x8x1xf32>,
    %c0_57 = arith.constant 0 : index
    %c0_58 = arith.constant 0 : index
    %c0_59 = arith.constant 0 : index
    %178 = vector.load %arg13[%c0_57, %c0_58, %c0_59] : memref<1x8x1xf32, #tpu.memory_space<vmem>>, vector<1x8x1xf32>
    %179 = vector.shape_cast %178 : vector<1x8x1xf32> to vector<8x1xf32>
    %180 = vector.shape_cast %174 : vector<8x1xf32> to vector<1x8x1xf32>
    tpu.vector_store %arg13[%c0_57, %c0_58, %c0_59], %180 {strides = array<i32>} : memref<1x8x1xf32, #tpu.memory_space<vmem>>, vector<1x8x1xf32>,
    return
  }
  func.func @transform_0(%arg0: i32) -> (i32, i32, i32) {
    %c0_i32 = arith.constant 0 : i32
    %c0_i32_0 = arith.constant 0 : i32
    %c0_i32_1 = arith.constant 0 : i32
    return %arg0, %c0_i32, %c0_i32_0 : i32, i32, i32
  }
  func.func @transform_1(%arg0: i32) -> (i32, i32, i32) {
    %c0_i32 = arith.constant 0 : i32
    %c0_i32_0 = arith.constant 0 : i32
    %c0_i32_1 = arith.constant 0 : i32
    return %arg0, %c0_i32, %c0_i32_0 : i32, i32, i32
  }
  func.func @transform_2(%arg0: i32) -> (i32, i32, i32) {
    %c0_i32 = arith.constant 0 : i32
    %c0_i32_0 = arith.constant 0 : i32
    %c0_i32_1 = arith.constant 0 : i32
    return %arg0, %c0_i32, %c0_i32_0 : i32, i32, i32
  }
  func.func @transform_3(%arg0: i32) -> (i32, i32, i32) {
    %c0_i32 = arith.constant 0 : i32
    %c0_i32_0 = arith.constant 0 : i32
    %c0_i32_1 = arith.constant 0 : i32
    return %arg0, %c0_i32, %c0_i32_0 : i32, i32, i32
  }
  func.func @transform_4(%arg0: i32) -> (i32, i32) {
    %c0_i32 = arith.constant 0 : i32
    %c0_i32_0 = arith.constant 0 : i32
    %c0_i32_1 = arith.constant 0 : i32
    return %c0_i32, %c0_i32_0 : i32, i32
  }
  func.func @transform_5(%arg0: i32) -> (i32, i32) {
    %c0_i32 = arith.constant 0 : i32
    %c0_i32_0 = arith.constant 0 : i32
    %c0_i32_1 = arith.constant 0 : i32
    return %c0_i32, %c0_i32_0 : i32, i32
  }
  func.func @transform_6(%arg0: i32) -> (i32, i32) {
    %c0_i32 = arith.constant 0 : i32
    %c0_i32_0 = arith.constant 0 : i32
    %c0_i32_1 = arith.constant 0 : i32
    return %c0_i32, %c0_i32_0 : i32, i32
  }
  func.func @transform_7(%arg0: i32) -> (i32, i32, i32) {
    %c0_i32 = arith.constant 0 : i32
    %c0_i32_0 = arith.constant 0 : i32
    %c0_i32_1 = arith.constant 0 : i32
    return %arg0, %c0_i32, %c0_i32_0 : i32, i32, i32
  }
  func.func @transform_8(%arg0: i32) -> (i32, i32, i32) {
    %c0_i32 = arith.constant 0 : i32
    %c0_i32_0 = arith.constant 0 : i32
    %c0_i32_1 = arith.constant 0 : i32
    return %arg0, %c0_i32, %c0_i32_0 : i32, i32, i32
  }
  func.func @transform_9(%arg0: i32) -> (i32, i32, i32) {
    %c0_i32 = arith.constant 0 : i32
    %c0_i32_0 = arith.constant 0 : i32
    %c0_i32_1 = arith.constant 0 : i32
    return %arg0, %c0_i32, %c0_i32_0 : i32, i32, i32
  }
  func.func @transform_10(%arg0: i32) -> (i32, i32, i32) {
    %c0_i32 = arith.constant 0 : i32
    %c0_i32_0 = arith.constant 0 : i32
    %c0_i32_1 = arith.constant 0 : i32
    return %arg0, %c0_i32, %c0_i32_0 : i32, i32, i32
  }
  func.func @transform_11(%arg0: i32) -> (i32, i32, i32) {
    %c0_i32 = arith.constant 0 : i32
    %c0_i32_0 = arith.constant 0 : i32
    %c0_i32_1 = arith.constant 0 : i32
    return %arg0, %c0_i32, %c0_i32_0 : i32, i32, i32
  }
  func.func @transform_12(%arg0: i32) -> (i32, i32, i32) {
    %c0_i32 = arith.constant 0 : i32
    %c0_i32_0 = arith.constant 0 : i32
    %c0_i32_1 = arith.constant 0 : i32
    return %arg0, %c0_i32, %c0_i32_0 : i32, i32, i32
  }
}

</mosaic_0001>

<bundles_post_ra>
// kernel: linknet_up_forward.3
= control target key start
LH: loop header
LB: loop body
LE: loop exit
PB: predicated region body
PF: predicated region fallthrough
CT: control target
= control target key end

     0   :  { %s534_s15 = smov 0   ;;  %s568_s0 = inlined_call_operand.vmem [shape: f32[2,4,256], index: 0, kind: input, shape index: {}]   ;;  %s569_s1 = inlined_call_operand.vmem [shape: f32[4,4], index: 1, kind: input, shape index: {}]   ;;  %s570_s2 = inlined_call_operand.vmem [shape: f32[2,4,256], index: 2, kind: output, shape index: {0}]   ;;  %s571_s3 = inlined_call_operand.vmem [shape: f32[2,4,1], index: 3, kind: output, shape index: {1}]   ;;  %s572_s4 = inlined_call_operand.vmem [shape: f32[2,4,1], index: 4, kind: output, shape index: {2}]  }
   0x1 LB: > { %s465_s16 = sadd.s32 4294967295, %s503_s15   ;;  %p469_p0 = scmp.ge.s32.totalorder %s503_s15, 1  ;;  %s503_s15 = sphi %s534_s15, %s15_s15  }
   0x2   : > { %p167_p1 = scmp.lt.s32.totalorder %s503_s15, 3 }
   0x4   : > { %p168_p2 = pnand %p469_p0, %p167_p1 }
   0x5   : > { %v219_v0 = vld [vmem:[%s569_s1] sm:$0xf] (!%p168_p2)  ;;  %v505_v1 = vmov (!%p168_p2), 0   ;;  %v506_v2 = vmov (!%p168_p2), 2   ;;  %v507_v3 = vmov (!%p168_p2), 1   ;;  %v508_v4 = vmov (!%p168_p2), 3  }
   0x6   : > { %171 = sbr.rel (%p168_p2) target bundleno = 297 (0x129), region = 28  ;;  %492 = vset.pattern.permute.xlu0 (!%p168_p2), %v505_v1  ;;  %494 = vset.pattern.permute.xlu1 (!%p168_p2), %v506_v2  ;;  %p201_p3 = scmp.lt.s32.totalorder (!%p168_p2), %s465_s16, 1  ;;  %v227_v5 = vlaneseq (!%p168_p2)  ;;  %vm330_vm0 = vcmask (!%p168_p2), 1043456   ;;  %vm345_vm1 = vcmask (!%p168_p2), 3072  }
   0x7   : > { %223 = vperm.xlu0 (!%p168_p2), %492, %v219_v0   ;;  %274 = vperm.xlu1 (!%p168_p2), %494, %v219_v0  }
   0x8   : > { %v228_v6 = vshrl.u32 (!%p168_p2), %v227_v5, 7 }
   0xa   : > { %v229_v7 = vsub.s32 (!%p168_p2), 0, %v228_v6  ;;  %v233_v8 = vsub.s32 (!%p168_p2), 4, %v228_v6  ;;  %v253_v9 = vsub.s32 (!%p168_p2), 1, %v228_v6  ;;  %v257_v10 = vsub.s32 (!%p168_p2), 5, %v228_v6 }
   0xb   : > { %493 = vset.pattern.permute.xlu0 (!%p168_p2), %v507_v3  ;;  %495 = vset.pattern.permute.xlu1 (!%p168_p2), %v508_v4  ;;  %v279_v12 = vsub.s32 (!%p168_p2), 2, %v228_v6  ;;  %v283_v13 = vsub.s32 (!%p168_p2), 6, %v228_v6  ;;  %v305_v14 = vsub.s32 (!%p168_p2), 3, %v228_v6  ;;  %v309_v15 = vsub.s32 (!%p168_p2), 7, %v228_v6 }
   0xc   : > { %248 = vperm.xlu0 (!%p168_p2), %493, %v219_v0   ;;  %300 = vperm.xlu1 (!%p168_p2), %495, %v219_v0  }
   0xd   : > { %s574_s16 = smov (!%p201_p3, %s465_s16), 1 }
   0xe   : > { %s478_s19 = sshll.u32 %s574_s16, 3  ;;  %s474_s26 = sshll.u32 %s574_s16, 2 }
   0xf   : > { %s205_s22 = scalar_lea.vmem %s568_s0, %s478_s19  ;;  %s210_s25 = scalar_lea.vmem %s570_s2, %s478_s19 }
  0x10   : > { %496 = vset.pattern.permute.xlu0 %v508_v4  ;;  %v220_v11 = vld [vmem:[%s205_s22] sm:$0xff]  ;;  %s214_s29 = scalar_lea.vmem %s571_s3, %s474_s26  ;;  %s218_s6 = scalar_lea.vmem %s572_s4, %s474_s26 }
  0x11   : > { %v230_v16 = vrot.slane %v220_v11, %v229_v7  ;;  %v234_v17 = vrot.slane %v220_v11, %v233_v8  ;;  %v254_v18 = vrot.slane %v220_v11, %v253_v9  ;;  %v258_v19 = vrot.slane %v220_v11, %v257_v10 }
  0x12   : > { %v280_v20 = vrot.slane %v220_v11, %v279_v12  ;;  %v284_v21 = vrot.slane %v220_v11, %v283_v13  ;;  %v306_v24 = vrot.slane %v220_v11, %v305_v14  ;;  %v310_v25 = vrot.slane %v220_v11, %v309_v15 }
  0x13   : > { %v240_v26 = vrot.slane %v230_v16, %v229_v7  ;;  %v244_v27 = vrot.slane %v234_v17, %v229_v7  ;;  %v264_v28 = vrot.slane %v254_v18, %v253_v9  ;;  %v268_v29 = vrot.slane %v258_v19, %v253_v9 }
  0x14   : > { %v290_v30 = vrot.slane %v280_v20, %v279_v12  ;;  %v294_v31 = vrot.slane %v284_v21, %v279_v12  ;;  %v316_v32 = vrot.slane %v306_v24, %v305_v14  ;;  %v320_v33 = vrot.slane %v310_v25, %v305_v14 }
  0x86   : > { %v224_v22 = vpop.permute.xlu0 %223  ;;  %v275_v23 = vpop.permute.xlu1 %274 }
  0x87   : > { %v245_v36 = vmul.f32 %v240_v26, %v224_v22  ;;  %v246_v37 = vmul.f32 %v244_v27, %v224_v22  ;;  %v295_v40 = vmul.f32 %v290_v30, %v275_v23  ;;  %v296_v41 = vmul.f32 %v294_v31, %v275_v23 }
  0x8b   : > { %v249_v34 = vpop.permute.xlu0 %248  ;;  %v301_v35 = vpop.permute.xlu1 %300 }
  0x8c   : > { %v269_v38 = vmul.f32 %v264_v28, %v249_v34  ;;  %v270_v39 = vmul.f32 %v268_v29, %v249_v34  ;;  %v321_v44 = vmul.f32 %v316_v32, %v301_v35  ;;  %v322_v45 = vmul.f32 %v320_v33, %v301_v35 }
  0x8e   : > { %v271_v42 = vadd.f32 %v269_v38, %v245_v36  ;;  %v272_v43 = vadd.f32 %v270_v39, %v246_v37 }
  0x90   : > { %v297_v46 = vadd.f32 %v295_v40, %v271_v42  ;;  %v298_v47 = vadd.f32 %v296_v41, %v272_v43 }
  0x92   : > { %v323_v48 = vadd.f32 %v321_v44, %v297_v46  ;;  %v324_v49 = vadd.f32 %v322_v45, %v298_v47 }
  0x94   : > { %v327_v50 = vcombine.low %v323_v48, %v324_v49  ;;  %v331_v51 = vsel %vm330_vm0, %v323_v48, 0.0  ;;  %v332_v52 = vsel %vm330_vm0, %v324_v49, 0.0  ;;  %v337_v53 = vmul.f32 %v323_v48, %v323_v48 }
  0x95   : > { %v333_v54 = vadd.f32 %v332_v52, %v331_v51  ;;  %v338_v55 = vmul.f32 %v324_v49, %v324_v49 }
  0x96   : > { %329 = vst [vmem:[%s210_s25] sm:$0xff] %v327_v50  ;;  %v339_v56 = vsel %vm330_vm0, %v337_v53, 0.0 }
  0x97   : > { %334 = vadd.xlane.f32.xlu1 %v333_v54  ;;  %v340_v57 = vsel %vm330_vm0, %v338_v55, 0.0 }
  0x98   : > { %v341_v58 = vadd.f32 %v340_v57, %v339_v56 }
  0x9a   : > { %342 = vadd.xlane.f32.xlu0 %v341_v58 }
 0x124   : > { %v335_v59 = vpop.xlane.xlu1 %334 }
 0x125   : > { %346 = vst.msk [vmem:[%s214_s29] sm:$0xf] %vm345_vm1, %v335_v59 }
 0x127   : > { %v343_v60 = vpop.xlane.xlu0 %342 }
 0x128   : > { %347 = vst.msk [vmem:[%s218_s6] sm:$0xf] %vm345_vm1, %v343_v60 }
 0x129 PF: > { %s15_s15 = sadd.s32 1, %s503_s15  }
 0x12a   : > { %p12_p4 = scmp.ge.s32.totalorder %s15_s15, 4  }
 0x12c   :  { %14 = sbr.rel (!%p12_p4) target bundleno = 1 (0x1), region = 82 }

// kernel: linknet_up_forward.5
= control target key start
LH: loop header
LB: loop body
LE: loop exit
PB: predicated region body
PF: predicated region fallthrough
CT: control target
= control target key end

     0   :  { %s1655_s21 = smov 0   ;;  %s2036_s0 = inlined_call_operand.vmem [shape: f32[2,4,361], index: 0, kind: input, shape index: {}]   ;;  %s2037_s1 = inlined_call_operand.vmem [shape: f32[2,4,342], index: 1, kind: input, shape index: {}]   ;;  %s2038_s2 = inlined_call_operand.vmem [shape: f32[2,4,342], index: 2, kind: input, shape index: {}]   ;;  %s2039_s3 = inlined_call_operand.vmem [shape: f32[2,4,324], index: 3, kind: input, shape index: {}]   ;;  %s2040_s4 = inlined_call_operand.vmem [shape: f32[4,1], index: 4, kind: input, shape index: {}]   ;;  %s2041_s5 = inlined_call_operand.vmem [shape: f32[4,1], index: 5, kind: input, shape index: {}]   ;;  %s2042_s6 = inlined_call_operand.vmem [shape: f32[8,4], index: 6, kind: input, shape index: {}]   ;;  %s2043_s7 = inlined_call_operand.vmem [shape: f32[2,8,361], index: 7, kind: output, shape index: {0}]   ;;  %s2044_s8 = inlined_call_operand.vmem [shape: f32[2,8,342], index: 8, kind: output, shape index: {1}]   ;;  %s2045_s9 = inlined_call_operand.vmem [shape: f32[2,8,342], index: 9, kind: output, shape index: {2}]   ;;  %s2046_s10 = inlined_call_operand.vmem [shape: f32[2,8,324], index: 10, kind: output, shape index: {3}]   ;;  %s2047_s11 = inlined_call_operand.vmem [shape: f32[2,8,1], index: 11, kind: output, shape index: {4}]   ;;  %s2048_s12 = inlined_call_operand.vmem [shape: f32[2,8,1], index: 12, kind: output, shape index: {5}]  }
   0x1 LB: > { %s1539_s22 = sadd.s32 4294967295, %s1583_s21   ;;  %p1543_p0 = scmp.ge.s32.totalorder %s1583_s21, 1  ;;  %s1583_s21 = sphi %s1655_s21, %s23_s21  }
   0x2   : > { %p403_p1 = scmp.lt.s32.totalorder %s1583_s21, 3 }
   0x4   : > { %p404_p2 = pnand %p1543_p0, %p403_p1 }
   0x5   : > { %v735_v0 = vld [vmem:[%s2040_s4] sm:$0xf] (!%p404_p2)  ;;  %v1585_v2 = vmov (!%p404_p2), 0   ;;  %v1586_v10 = vmov (!%p404_p2), 1   ;;  %v1587_v11 = vmov (!%p404_p2), 2   ;;  %v1588_v12 = vmov (!%p404_p2), 3  }
   0x6   : > { %407 = sbr.rel (%p404_p2) target bundleno = 354 (0x162), region = 48  ;;  %v534_v1 = vld [vmem:[%s2040_s4] sm:$0xf] (!%p404_p2)  ;;  %1572 = vset.pattern.permute.xlu1 (!%p404_p2), %v1585_v2  ;;  %1571 = vset.pattern.permute.xlu0 (!%p404_p2), %v1585_v2  ;;  %p483_p3 = scmp.lt.s32.totalorder (!%p404_p2), %s1539_s22, 1  ;;  %v1589_v13 = vmov (!%p404_p2), 839922192   ;;  %v542_v15 = vlaneseq (!%p404_p2) }
   0x7   : > { %738 = vperm.xlu1 (!%p404_p2), %1572, %v735_v0   ;;  %537 = vperm.xlu0 (!%p404_p2), %1571, %v534_v1   ;;  %v750_v3 = vld [vmem:[%s2041_s5] sm:$0xf] (!%p404_p2)  ;;  %v540_v14 = vunpack.c.l.s4 (!%p404_p2), %v1589_v13  ;;  %vm900_vm0 = vcmask (!%p404_p2), 703488   ;;  %vm716_vm1 = vcmask (!%p404_p2), 859136   ;;  %vm1267_vm2 = vcmask (!%p404_p2), 556032  }
   0x8   : > { %v549_v4 = vld [vmem:[%s2041_s5] sm:$0xf] (!%p404_p2)  ;;  %v543_v17 = vshrl.u32 (!%p404_p2), %v542_v15, 7  ;;  %vm1284_vm3 = vcmask (!%p404_p2), 7168  }
   0x9   : > { %v934_v5 = vld [vmem:[%s2041_s5] sm:$0xf] (!%p404_p2)  ;;  %v541_v16 = vunpack.c.0.s8 (!%p404_p2), %v540_v14 }
   0xa   : > { %v919_v6 = vld [vmem:[%s2040_s4] sm:$0xf] (!%p404_p2)  ;;  %v1707_v35 = vsub.s32 (!%p404_p2), 0, %v543_v17  ;;  %v1709_v36 = vsub.s32 (!%p404_p2), 1, %v543_v17  ;;  %v1711_v37 = vsub.s32 (!%p404_p2), 2, %v543_v17  ;;  %v1713_v38 = vsub.s32 (!%p404_p2), 3, %v543_v17 }
   0xb   : > { %753 = vperm.xlu1 (!%p404_p2), %1572, %v750_v3   ;;  %552 = vperm.xlu0 (!%p404_p2), %1571, %v549_v4   ;;  %v1117_v7 = vld [vmem:[%s2041_s5] sm:$0xf] (!%p404_p2)  ;;  %v544_v18 = vsub.s32 (!%p404_p2), %v541_v16, %v543_v17  ;;  %v1719_v45 = vsub.s32 (!%p404_p2), 4, %v543_v17  ;;  %v1721_v46 = vsub.s32 (!%p404_p2), 5, %v543_v17  ;;  %v1727_v49 = vsub.s32 (!%p404_p2), 6, %v543_v17 }
   0xc   : > { %v1102_v8 = vld [vmem:[%s2040_s4] sm:$0xf] (!%p404_p2)  ;;  %v1729_v50 = vsub.s32 (!%p404_p2), 7, %v543_v17 }
   0xd   : > { %v531_v9 = vld [vmem:[%s2042_s6] sm:$0xff]  ;;  %s2050_s22 = smov (!%p483_p3, %s1539_s22), 1 }
   0xe   : > { %s1697_s25 = smul.u32 12, %s2050_s22  ;;  %s1552_s17 = sshll.u32 %s2050_s22, 3 }
   0xf   : > { %937 = vperm.xlu1 %1572, %v934_v5   ;;  %922 = vperm.xlu0 %1571, %v919_v6   ;;  %s1821_s20 = smul.u32 24, %s2050_s22 }
  0x10   : > { %s492_s28 = scalar_lea.vmem %s2037_s1, %s1697_s25  ;;  %s487_s13 = scalar_lea.vmem %s2036_s0, %s1697_s25 }
  0x11   : > { %v733_v20 = vld [vmem:[%s492_s28] sm:$0xff]  ;;  %v734_v21 = vld [vmem:[%s492_s28 + $0x8] sm:$0xf]  ;;  %s497_s16 = scalar_lea.vmem %s2038_s2, %s1697_s25  ;;  %s502_s19 = scalar_lea.vmem %s2039_s3, %s1697_s25 }
  0x12   : > { %v532_v25 = vld [vmem:[%s487_s13] sm:$0xff]  ;;  %v533_v26 = vld [vmem:[%s487_s13 + $0x8] sm:$0xf]  ;;  %s512_s25 = scalar_lea.vmem %s2044_s8, %s1821_s20  ;;  %s507_s28 = scalar_lea.vmem %s2043_s7, %s1821_s20 }
  0x13   : > { %1120 = vperm.xlu1 %1572, %v1117_v7   ;;  %1105 = vperm.xlu0 %1571, %v1102_v8   ;;  %v917_v54 = vld [vmem:[%s497_s16] sm:$0xff]  ;;  %v918_v55 = vld [vmem:[%s497_s16 + $0x8] sm:$0xf]  ;;  %s517_s13 = scalar_lea.vmem %s2045_s9, %s1821_s20  ;;  %s522_s16 = scalar_lea.vmem %s2046_s10, %s1821_s20 }
  0x14   : > { %v1100_v7 = vld [vmem:[%s502_s19] sm:$0xff]  ;;  %v1101_v8 = vld [vmem:[%s502_s19 + $0x8] sm:$0xf]  ;;  %s526_s20 = scalar_lea.vmem %s2047_s11, %s1552_s17 }
  0x17   : > { %1573 = vset.pattern.permute.xlu1 %v1586_v10  ;;  %568 = vperm.xlu0 %1571, %v531_v9  }
  0x18   : > { %604 = vperm.xlu1 %1573, %v531_v9  }
  0x1b   : > { %1574 = vset.pattern.permute.xlu0 %v1587_v11 }
  0x1c   : > { %1575 = vset.pattern.permute.xlu1 %v1588_v12  ;;  %641 = vperm.xlu0 %1574, %v531_v9  }
  0x1d   : > { %678 = vperm.xlu1 %1575, %v531_v9  }
  0x20   : > { %1576 = vset.pattern.permute.xlu0 %v1585_v2 }
  0x86   : > { %v739_v19 = vpop.permute.xlu1 %738  ;;  %v538_v22 = vpop.permute.xlu0 %537 }
  0x87   : > { %v746_v23 = vrot.slane %v739_v19, %v544_v18  ;;  %v545_v24 = vrot.slane %v538_v22, %v544_v18 }
  0x89   : > { %v748_v27 = vmul.f32 %v746_v23, %v733_v20  ;;  %v749_v28 = vmul.f32 %v746_v23, %v734_v21  ;;  %v547_v31 = vmul.f32 %v545_v24, %v532_v25  ;;  %v548_v32 = vmul.f32 %v545_v24, %v533_v26 }
  0x8a   : > { %v754_v29 = vpop.permute.xlu1 %753  ;;  %v553_v30 = vpop.permute.xlu0 %552 }
  0x8b   : > { %v761_v33 = vrot.slane %v754_v29, %v544_v18  ;;  %v560_v34 = vrot.slane %v553_v30, %v544_v18 }
  0x8d   : > { %v763_v39 = vadd.f32 %v761_v33, %v748_v27  ;;  %v764_v40 = vadd.f32 %v761_v33, %v749_v28  ;;  %v562_v41 = vadd.f32 %v560_v34, %v547_v31  ;;  %v563_v42 = vadd.f32 %v560_v34, %v548_v32 }
  0x8e   : > { %v938_v43 = vpop.permute.xlu1 %937  ;;  %v923_v44 = vpop.permute.xlu0 %922 }
  0x8f   : > { %v1723_v47 = vmax.f32 %v764_v40, 0.0  ;;  %v1725_v48 = vmax.f32 %v563_v42, 0.0  ;;  %v1731_v51 = vmax.f32 %v763_v39, 0.0  ;;  %v1733_v52 = vmax.f32 %v562_v41, 0.0 }
  0x90   : > { %v945_v53 = vrot.slane %v938_v43, %v544_v18  ;;  %v930_v56 = vrot.slane %v923_v44, %v544_v18 }
  0x91   : > { %v780_v57 = vrot.slane %v1723_v47, %v1707_v35  ;;  %v810_v58 = vrot.slane %v1723_v47, %v1709_v36  ;;  %v843_v59 = vrot.slane %v1723_v47, %v1711_v37  ;;  %v876_v60 = vrot.slane %v1723_v47, %v1713_v38 }
  0x92   : > { %v584_v61 = vrot.slane %v1725_v48, %v1707_v35  ;;  %v618_v62 = vrot.slane %v1725_v48, %v1709_v36  ;;  %v655_v63 = vrot.slane %v1725_v48, %v1711_v37  ;;  %v692_v0 = vrot.slane %v1725_v48, %v1713_v38  ;;  %v1121_v1 = vpop.permute.xlu1 %1120  ;;  %v1106_v2 = vpop.permute.xlu0 %1105 }
  0x93   : > { %v795_v3 = vrot.slane %v780_v57, %v1707_v35  ;;  %v825_v4 = vrot.slane %v810_v58, %v1709_v36  ;;  %v932_v5 = vmul.f32 %v930_v56, %v917_v54  ;;  %v933_v6 = vmul.f32 %v930_v56, %v918_v55 }
  0x94   : > { %v1758_v9 = vrot.slane %v584_v61, %v1707_v35  ;;  %v1761_v10 = vrot.slane %v618_v62, %v1709_v36  ;;  %v1128_v11 = vrot.slane %v1121_v1, %v544_v18  ;;  %v1113_v12 = vrot.slane %v1106_v2, %v544_v18 }
  0x95   : > { %v947_v13 = vadd.f32 %v945_v53, %v932_v5  ;;  %v948_v14 = vadd.f32 %v945_v53, %v933_v6  ;;  %v772_v15 = vrot.slane %v1731_v51, %v1707_v35  ;;  %v776_v16 = vrot.slane %v1731_v51, %v1719_v45 }
  0x96   : > { %v1115_v17 = vmul.f32 %v1113_v12, %v1100_v7  ;;  %v1116_v19 = vmul.f32 %v1113_v12, %v1101_v8  ;;  %v1767_v20 = vpop.permute.xlu0 %568  ;;  %v802_v21 = vrot.slane %v1731_v51, %v1709_v36  ;;  %v806_v22 = vrot.slane %v1731_v51, %v1721_v46 }
  0x97   : > { %v1773_v23 = vmax.f32 %v947_v13, 0.0  ;;  %v1775_v18 = vmax.f32 %v948_v14, 0.0  ;;  %v787_v24 = vrot.slane %v772_v15, %v1707_v35  ;;  %v791_v25 = vrot.slane %v776_v16, %v1707_v35  ;;  %v1779_v28 = vpop.permute.xlu1 %604 }
  0x98   : > { %v1130_v26 = vadd.f32 %v1128_v11, %v1115_v17  ;;  %v1131_v27 = vadd.f32 %v1128_v11, %v1116_v19  ;;  %v798_v29 = vmul.f32 %v795_v3, %v1767_v20  ;;  %v817_v30 = vrot.slane %v802_v21, %v1709_v36 }
  0x99   : > { %v964_v31 = vrot.slane %v1775_v18, %v1707_v35  ;;  %v994_v32 = vrot.slane %v1775_v18, %v1709_v36  ;;  %v1027_v33 = vrot.slane %v1775_v18, %v1711_v37  ;;  %v796_v34 = vmul.f32 %v787_v24, %v1767_v20 }
  0x9a   : > { %v1790_v39 = vmax.f32 %v1130_v26, 0.0  ;;  %v1792_v40 = vmax.f32 %v1131_v27, 0.0  ;;  %v797_v41 = vmul.f32 %v791_v25, %v1767_v20  ;;  %v821_v42 = vrot.slane %v806_v22, %v1709_v36 }
  0x9b   : > { %v826_v43 = vmul.f32 %v817_v30, %v1779_v28  ;;  %v828_v44 = vmul.f32 %v825_v4, %v1779_v28  ;;  %v835_v53 = vrot.slane %v1731_v51, %v1711_v37  ;;  %v839_v54 = vrot.slane %v1731_v51, %v1727_v49  ;;  %v1808_v58 = vpop.permute.xlu0 %641 }
  0x9c   : > { %v1147_v55 = vrot.slane %v1792_v40, %v1707_v35  ;;  %v1177_v56 = vrot.slane %v1792_v40, %v1709_v36  ;;  %v1210_v57 = vrot.slane %v1792_v40, %v1711_v37  ;;  %v827_v61 = vmul.f32 %v821_v42, %v1779_v28  ;;  %v1813_v4 = vpop.permute.xlu1 %678 }
  0x9d   : > { %v829_v62 = vadd.f32 %v826_v43, %v796_v34  ;;  %v831_v1 = vadd.f32 %v828_v44, %v798_v29  ;;  %v850_v2 = vrot.slane %v835_v53, %v1711_v37  ;;  %v854_v3 = vrot.slane %v839_v54, %v1711_v37 }
  0x9e   : > { %v830_v5 = vadd.f32 %v827_v61, %v797_v41  ;;  %v858_v6 = vrot.slane %v843_v59, %v1711_v37  ;;  %v868_v7 = vrot.slane %v1731_v51, %v1713_v38  ;;  %v872_v8 = vrot.slane %v1731_v51, %v1729_v50 }
  0x9f   : > { %v859_v11 = vmul.f32 %v850_v2, %v1808_v58  ;;  %v860_v12 = vmul.f32 %v854_v3, %v1808_v58  ;;  %v891_v13 = vrot.slane %v876_v60, %v1713_v38  ;;  %v576_v59 = vrot.slane %v1733_v52, %v1707_v35 }
  0xa0   : > { %v861_v14 = vmul.f32 %v858_v6, %v1808_v58  ;;  %v883_v15 = vrot.slane %v868_v7, %v1713_v38  ;;  %v887_v51 = vrot.slane %v872_v8, %v1713_v38  ;;  %v580_v16 = vrot.slane %v1733_v52, %v1719_v45 }
  0xa1   : > { %v862_v17 = vadd.f32 %v859_v11, %v829_v62  ;;  %v863_v19 = vadd.f32 %v860_v12, %v830_v5  ;;  %v894_v21 = vmul.f32 %v891_v13, %v1813_v4  ;;  %v591_v22 = vrot.slane %v576_v59, %v1707_v35 }
  0xa2   : > { %v864_v47 = vadd.f32 %v861_v14, %v831_v1  ;;  %v892_v60 = vmul.f32 %v883_v15, %v1813_v4  ;;  %v893_v24 = vmul.f32 %v887_v51, %v1813_v4  ;;  %v595_v25 = vrot.slane %v580_v16, %v1707_v35 }
  0xa3   : > { %v600_v26 = vmul.f32 %v591_v22, %v1767_v20  ;;  %v602_v27 = vmul.f32 %v1758_v9, %v1767_v20  ;;  %v610_v29 = vrot.slane %v1733_v52, %v1709_v36  ;;  %v614_v30 = vrot.slane %v1733_v52, %v1721_v46 }
  0xa4   : > { %v1852_v34 = vadd.f32 %v892_v60, %v862_v17  ;;  %v1854_v41 = vadd.f32 %v893_v24, %v863_v19  ;;  %v1856_v42 = vadd.f32 %v894_v21, %v864_v47  ;;  %v601_v43 = vmul.f32 %v595_v25, %v1767_v20 }
  0xa5   : > { %v625_v44 = vrot.slane %v610_v29, %v1709_v36  ;;  %v629_v53 = vrot.slane %v614_v30, %v1709_v36  ;;  %v636_v9 = vmul.f32 %v1761_v10, %v1779_v28  ;;  %v647_v54 = vrot.slane %v1733_v52, %v1711_v37 }
  0xa6   : > { %899 = vst [vmem:[%s512_s25 + $0x8] sm:$0xff] %v1854_v41  ;;  %901 = vst.msk [vmem:[%s512_s25 + $0x10] sm:$0xff] %vm900_vm0, %v1856_v42  ;;  %v902_v61 = vadd.f32 %v1854_v41, %v1852_v34  ;;  %v903_v62 = vsel %vm900_vm0, %v1856_v42, 0.0  ;;  %v651_v10 = vrot.slane %v1733_v52, %v1727_v49  ;;  %v670_v1 = vrot.slane %v655_v63, %v1711_v37 }
  0xa7   : > { %898 = vst [vmem:[%s512_s25] sm:$0xff] %v1852_v34  ;;  %v634_v2 = vmul.f32 %v625_v44, %v1779_v28  ;;  %v635_v3 = vmul.f32 %v629_v53, %v1779_v28  ;;  %v639_v5 = vadd.f32 %v636_v9, %v602_v27  ;;  %v662_v6 = vrot.slane %v647_v54, %v1711_v37  ;;  %s530_s25 = scalar_lea.vmem %s2048_s12, %s1552_s17 }
  0xa8   : > { %v904_v7 = vadd.f32 %v903_v62, %v902_v61  ;;  %v666_v8 = vrot.slane %v651_v10, %v1711_v37  ;;  %v673_v11 = vmul.f32 %v670_v1, %v1808_v58  ;;  %v684_v12 = vrot.slane %v1733_v52, %v1713_v38 }
  0xa9   : > { %v637_v13 = vadd.f32 %v634_v2, %v600_v26  ;;  %v638_v59 = vadd.f32 %v635_v3, %v601_v43  ;;  %v671_v63 = vmul.f32 %v662_v6, %v1808_v58  ;;  %v688_v14 = vrot.slane %v1733_v52, %v1729_v50 }
  0xaa   : > { %905 = vadd.xlane.f32.xlu0 %v904_v7  ;;  %v672_v15 = vmul.f32 %v666_v8, %v1808_v58  ;;  %v676_v51 = vadd.f32 %v673_v11, %v639_v5  ;;  %v699_v16 = vrot.slane %v684_v12, %v1713_v38  ;;  %v707_v17 = vrot.slane %v692_v0, %v1713_v38 }
  0xab   : > { %v674_v19 = vadd.f32 %v671_v63, %v637_v13  ;;  %v703_v21 = vrot.slane %v688_v14, %v1713_v38  ;;  %v956_v22 = vrot.slane %v1773_v23, %v1707_v35  ;;  %v960_v52 = vrot.slane %v1773_v23, %v1719_v45 }
  0xac   : > { %v675_v47 = vadd.f32 %v672_v15, %v638_v59  ;;  %v708_v60 = vmul.f32 %v699_v16, %v1813_v4  ;;  %v710_v24 = vmul.f32 %v707_v17, %v1813_v4  ;;  %v979_v48 = vrot.slane %v964_v31, %v1707_v35 }
  0xad   : > { %v709_v0 = vmul.f32 %v703_v21, %v1813_v4  ;;  %v971_v25 = vrot.slane %v956_v22, %v1707_v35  ;;  %v975_v26 = vrot.slane %v960_v52, %v1707_v35  ;;  %v986_v27 = vrot.slane %v1773_v23, %v1709_v36 }
  0xae   : > { %v711_v29 = vadd.f32 %v708_v60, %v674_v19  ;;  %v713_v30 = vadd.f32 %v710_v24, %v676_v51  ;;  %v982_v43 = vmul.f32 %v979_v48, %v1767_v20  ;;  %v990_v31 = vrot.slane %v1773_v23, %v1721_v46 }
  0xaf   : > { %v712_v44 = vadd.f32 %v709_v0, %v675_v47  ;;  %v980_v53 = vmul.f32 %v971_v25, %v1767_v20  ;;  %v981_v9 = vmul.f32 %v975_v26, %v1767_v20  ;;  %v1001_v54 = vrot.slane %v986_v27, %v1709_v36 }
  0xb0   : > { %717 = vst.msk [vmem:[%s507_s28 + $0x10] sm:$0xff] %vm716_vm1, %v713_v30  ;;  %v719_v61 = vsel %vm716_vm1, %v713_v30, 0.0  ;;  %714 = vst [vmem:[%s507_s28] sm:$0xff] %v711_v29  ;;  %v1005_v62 = vrot.slane %v990_v31, %v1709_v36  ;;  %v1009_v10 = vrot.slane %v994_v32, %v1709_v36  ;;  %v1019_v1 = vrot.slane %v1773_v23, %v1711_v37 }
  0xb1   : > { %715 = vst [vmem:[%s507_s28 + $0x8] sm:$0xff] %v712_v44  ;;  %v718_v2 = vadd.f32 %v712_v44, %v711_v29  ;;  %v1010_v3 = vmul.f32 %v1001_v54, %v1779_v28  ;;  %v1023_v5 = vrot.slane %v1773_v23, %v1727_v49  ;;  %v1042_v6 = vrot.slane %v1027_v33, %v1711_v37 }
  0xb2   : > { %v1011_v7 = vmul.f32 %v1005_v62, %v1779_v28  ;;  %v1012_v8 = vmul.f32 %v1009_v10, %v1779_v28  ;;  %v1034_v32 = vrot.slane %v1019_v1, %v1711_v37  ;;  %v1052_v11 = vrot.slane %v1773_v23, %v1713_v38 }
  0xb3   : > { %v720_v12 = vadd.f32 %v719_v61, %v718_v2  ;;  %v1013_v13 = vadd.f32 %v1010_v3, %v980_v53  ;;  %v1038_v59 = vrot.slane %v1023_v5, %v1711_v37  ;;  %v1045_v63 = vmul.f32 %v1042_v6, %v1808_v58 }
  0xb4   : > { %v1014_v14 = vadd.f32 %v1011_v7, %v981_v9  ;;  %v1015_v15 = vadd.f32 %v1012_v8, %v982_v43  ;;  %v1043_v33 = vmul.f32 %v1034_v32, %v1808_v58  ;;  %v1056_v51 = vrot.slane %v1773_v23, %v1729_v50 }
  0xb5   : > { %721 = vadd.xlane.f32.xlu1 %v720_v12  ;;  %v1044_v16 = vmul.f32 %v1038_v59, %v1808_v58  ;;  %v1060_v17 = vrot.slane %v1775_v18, %v1713_v38  ;;  %v1067_v19 = vrot.slane %v1052_v11, %v1713_v38  ;;  %v908_v21 = vmul.f32 %v1852_v34, %v1852_v34 }
  0xb6   : > { %v1046_v22 = vadd.f32 %v1043_v33, %v1013_v13  ;;  %v1048_v52 = vadd.f32 %v1045_v63, %v1015_v15  ;;  %v1071_v47 = vrot.slane %v1056_v51, %v1713_v38  ;;  %v909_v60 = vmul.f32 %v1854_v41, %v1854_v41 }
  0xb7   : > { %v1047_v24 = vadd.f32 %v1044_v16, %v1014_v14  ;;  %v1075_v23 = vrot.slane %v1060_v17, %v1713_v38  ;;  %v1076_v48 = vmul.f32 %v1067_v19, %v1813_v4  ;;  %v910_v18 = vmul.f32 %v1856_v42, %v1856_v42 }
  0xb8   : > { %v1077_v34 = vmul.f32 %v1071_v47, %v1813_v4  ;;  %v911_v0 = vadd.f32 %v909_v60, %v908_v21  ;;  %v724_v25 = vmul.f32 %v711_v29, %v711_v29  ;;  %v725_v26 = vmul.f32 %v712_v44, %v712_v44 }
  0xb9   : > { %v1078_v27 = vmul.f32 %v1075_v23, %v1813_v4  ;;  %v1079_v41 = vadd.f32 %v1076_v48, %v1046_v22  ;;  %v912_v43 = vsel %vm900_vm0, %v910_v18, 0.0  ;;  %v726_v31 = vmul.f32 %v713_v30, %v713_v30 }
  0xba   : > { %v1080_v53 = vadd.f32 %v1077_v34, %v1047_v24  ;;  %v913_v9 = vadd.f32 %v912_v43, %v911_v0  ;;  %v727_v54 = vadd.f32 %v725_v26, %v724_v25  ;;  %v1139_v42 = vrot.slane %v1790_v39, %v1707_v35 }
  0xbb   : > { %v1081_v61 = vadd.f32 %v1078_v27, %v1048_v52  ;;  %1082 = vst [vmem:[%s517_s13] sm:$0xff] %v1079_v41  ;;  %v728_v62 = vsel %vm716_vm1, %v726_v31, 0.0  ;;  %v1091_v10 = vmul.f32 %v1079_v41, %v1079_v41  ;;  %v1143_v29 = vrot.slane %v1790_v39, %v1719_v45 }
  0xbc   : > { %1083 = vst [vmem:[%s517_s13 + $0x8] sm:$0xff] %v1080_v53  ;;  %v1085_v44 = vadd.f32 %v1080_v53, %v1079_v41  ;;  %914 = vadd.xlane.f32.xlu1 %v913_v9  ;;  %v729_v1 = vadd.f32 %v728_v62, %v727_v54  ;;  %v1092_v2 = vmul.f32 %v1080_v53, %v1080_v53 }
  0xbd   : > { %v1154_v30 = vrot.slane %v1139_v42, %v1707_v35  ;;  %1084 = vst.msk [vmem:[%s517_s13 + $0x10] sm:$0xff] %vm900_vm0, %v1081_v61  ;;  %v1086_v3 = vsel %vm900_vm0, %v1081_v61, 0.0  ;;  %v1093_v5 = vmul.f32 %v1081_v61, %v1081_v61  ;;  %v1158_v6 = vrot.slane %v1143_v29, %v1707_v35 }
  0xbe   : > { %v1162_v7 = vrot.slane %v1147_v55, %v1707_v35  ;;  %v1087_v45 = vadd.f32 %v1086_v3, %v1085_v44  ;;  %v1094_v8 = vadd.f32 %v1092_v2, %v1091_v10  ;;  %v1169_v11 = vrot.slane %v1790_v39, %v1709_v36 }
  0xbf   : > { %v1163_v32 = vmul.f32 %v1154_v30, %v1767_v20  ;;  %v1095_v12 = vsel %vm900_vm0, %v1093_v5, 0.0  ;;  %v1164_v13 = vmul.f32 %v1158_v6, %v1767_v20  ;;  %v1173_v63 = vrot.slane %v1790_v39, %v1721_v46 }
  0xc0   : > { %v1165_v59 = vmul.f32 %v1162_v7, %v1767_v20  ;;  %1088 = vadd.xlane.f32.xlu0 %v1087_v45  ;;  %v1096_v14 = vadd.f32 %v1095_v12, %v1094_v8  ;;  %v1184_v35 = vrot.slane %v1169_v11, %v1709_v36  ;;  %v1192_v55 = vrot.slane %v1177_v56, %v1709_v36 }
  0xc1   : > { %v1202_v15 = vrot.slane %v1790_v39, %v1711_v37  ;;  %v1188_v33 = vrot.slane %v1173_v63, %v1709_v36  ;;  %v1206_v20 = vrot.slane %v1790_v39, %v1727_v49  ;;  %v1225_v46 = vrot.slane %v1210_v57, %v1711_v37 }
  0xc2   : > { %v1235_v51 = vrot.slane %v1790_v39, %v1713_v38  ;;  %1097 = vadd.xlane.f32.xlu1 %v1096_v14  ;;  %v1193_v16 = vmul.f32 %v1184_v35, %v1779_v28  ;;  %v1195_v56 = vmul.f32 %v1192_v55, %v1779_v28  ;;  %v1239_v36 = vrot.slane %v1790_v39, %v1729_v50 }
  0xc3   : > { %v1217_v17 = vrot.slane %v1202_v15, %v1711_v37  ;;  %v1194_v49 = vmul.f32 %v1188_v33, %v1779_v28  ;;  %v1221_v19 = vrot.slane %v1206_v20, %v1711_v37  ;;  %v1228_v57 = vmul.f32 %v1225_v46, %v1808_v58 }
  0xc4   : > { %v1243_v21 = vrot.slane %v1792_v40, %v1713_v38  ;;  %730 = vadd.xlane.f32.xlu0 %v729_v1  ;;  %v1196_v22 = vadd.f32 %v1193_v16, %v1163_v32  ;;  %v1198_v52 = vadd.f32 %v1195_v56, %v1165_v59  ;;  %v1250_v60 = vrot.slane %v1235_v51, %v1713_v38 }
  0xc5   : > { %v1226_v47 = vmul.f32 %v1217_v17, %v1808_v58  ;;  %v1197_v24 = vadd.f32 %v1194_v49, %v1164_v13  ;;  %v1227_v50 = vmul.f32 %v1221_v19, %v1808_v58  ;;  %v1254_v28 = vrot.slane %v1239_v36, %v1713_v38 }
  0xc6   : > { %v1258_v39 = vrot.slane %v1243_v21, %v1713_v38  ;;  %v1231_v23 = vadd.f32 %v1228_v57, %v1198_v52  ;;  %v1259_v48 = vmul.f32 %v1250_v60, %v1813_v4 }
  0xc7   : > { %v1229_v37 = vadd.f32 %v1226_v47, %v1196_v22  ;;  %v1230_v40 = vadd.f32 %v1227_v50, %v1197_v24  ;;  %v1260_v18 = vmul.f32 %v1254_v28, %v1813_v4 }
  0xc8   : > { %v1261_v34 = vmul.f32 %v1258_v39, %v1813_v4 }
  0xc9   : > { %v1262_v0 = vadd.f32 %v1259_v48, %v1229_v37  ;;  %v1263_v58 = vadd.f32 %v1260_v18, %v1230_v40 }
  0xca   : > { %v1264_v25 = vadd.f32 %v1261_v34, %v1231_v23 }
  0xcb   : > { %1265 = vst [vmem:[%s522_s16] sm:$0xff] %v1262_v0  ;;  %v1275_v26 = vmul.f32 %v1262_v0, %v1262_v0  ;;  %1266 = vst [vmem:[%s522_s16 + $0x8] sm:$0xff] %v1263_v58  ;;  %v1269_v38 = vadd.f32 %v1263_v58, %v1262_v0  ;;  %v1276_v41 = vmul.f32 %v1263_v58, %v1263_v58 }
  0xcc   : > { %1268 = vst.msk [vmem:[%s522_s16 + $0x10] sm:$0xff] %vm1267_vm2, %v1264_v25  ;;  %v1270_v27 = vsel %vm1267_vm2, %v1264_v25, 0.0  ;;  %v1277_v43 = vmul.f32 %v1264_v25, %v1264_v25 }
  0xcd   : > { %v1271_v31 = vadd.f32 %v1270_v27, %v1269_v38  ;;  %v1278_v53 = vadd.f32 %v1276_v41, %v1275_v26 }
  0xce   : > { %v1279_v9 = vsel %vm1267_vm2, %v1277_v43, 0.0 }
  0xcf   : > { %1272 = vadd.xlane.f32.xlu0 %v1271_v31  ;;  %v1280_v54 = vadd.f32 %v1279_v9, %v1278_v53 }
  0xd1   : > { %1281 = vadd.xlane.f32.xlu1 %v1280_v54 }
 0x137   : > { %v906_v4 = vpop.xlane.xlu0 %905 }
 0x142   : > { %v722_v42 = vpop.xlane.xlu1 %721 }
 0x143   : > { %v907_v1 = vadd.f32 %v906_v4, %v722_v42 }
 0x149   : > { %v915_v62 = vpop.xlane.xlu1 %914 }
 0x14d   : > { %v1089_v61 = vpop.xlane.xlu0 %1088 }
 0x14e   : > { %v1090_v2 = vadd.f32 %v1089_v61, %v907_v1 }
 0x14f   : > { %v1098_v44 = vpop.xlane.xlu1 %1097 }
 0x151   : > { %v731_v10 = vpop.xlane.xlu0 %730 }
 0x152   : > { %v916_v29 = vadd.f32 %v915_v62, %v731_v10 }
 0x154   : > { %v1099_v30 = vadd.f32 %v1098_v44, %v916_v29 }
 0x15c   : > { %v1273_v3 = vpop.xlane.xlu0 %1272 }
 0x15d   : > { %v1274_v5 = vadd.f32 %v1273_v3, %v1090_v2 }
 0x15e   : > { %v1282_v6 = vpop.xlane.xlu1 %1281 }
 0x15f   : > { %1285 = vst.msk [vmem:[%s526_s20] sm:$0xff] %vm1284_vm3, %v1274_v5  ;;  %v1283_v7 = vadd.f32 %v1282_v6, %v1099_v30 }
 0x161   : > { %1286 = vst.msk [vmem:[%s530_s25] sm:$0xff] %vm1284_vm3, %v1283_v7 }
 0x162 PF: > { %s23_s21 = sadd.s32 1, %s1583_s21  }
 0x163   : > { %p20_p4 = scmp.ge.s32.totalorder %s23_s21, 4  }
 0x165   :  { %22 = sbr.rel (!%p20_p4) target bundleno = 1 (0x1), region = 147 }

// kernel: linknet_up_forward.4
= control target key start
LH: loop header
LB: loop body
LE: loop exit
PB: predicated region body
PF: predicated region fallthrough
CT: control target
= control target key end

     0   :  { %s5237_s30 = smov 0   ;;  %s8258_s0 = inlined_call_operand.vmem [shape: f32[2,4,16,16], index: 0, kind: input, shape index: {}]   ;;  %s8259_s1 = inlined_call_operand.vmem [shape: f32[4,1,1], index: 1, kind: input, shape index: {}]   ;;  %s8260_s2 = inlined_call_operand.vmem [shape: f32[4,1,1], index: 2, kind: input, shape index: {}]   ;;  %s8261_s3 = inlined_call_operand.vmem [shape: f32[36,4,1,1], index: 3, kind: input, shape index: {}]   ;;  %s8262_s4 = inlined_call_operand.vmem [shape: f32[2,4,19,19], index: 4, kind: output, shape index: {0}]   ;;  %s8263_s5 = inlined_call_operand.vmem [shape: f32[2,4,19,18], index: 5, kind: output, shape index: {1}]   ;;  %s8264_s6 = inlined_call_operand.vmem [shape: f32[2,4,18,19], index: 6, kind: output, shape index: {2}]   ;;  %s8265_s7 = inlined_call_operand.vmem [shape: f32[2,4,18,18], index: 7, kind: output, shape index: {3}]   ;;  %s8266_s8 = inlined_call_operand.vmem [shape: f32[2,4,1,1], index: 8, kind: output, shape index: {4}]   ;;  %s8267_s9 = inlined_call_operand.vmem [shape: f32[2,4,1,1], index: 9, kind: output, shape index: {5}]  }
   0x1 LB: > { %s4838_s10 = sadd.s32 4294967295, %s5180_s30   ;;  %p4842_p0 = scmp.ge.s32.totalorder %s5180_s30, 1  ;;  %s5180_s30 = sphi %s5237_s30, %s20_s30  }
   0x2   : > { %p298_p1 = scmp.lt.s32.totalorder %s5180_s30, 3 }
   0x4   : > { %p299_p2 = pnand %p4842_p0, %p298_p1 }
   0x6   : > { %302 = sbr.rel (%p299_p2) target bundleno = 1508 (0x5e4), region = 36 }
   0xd   : > { %v4853_v0 = vld [vmem:[%s8259_s1 + $0x2] ss:$0 sm:$0xff]  ;;  %v4851_v1 = vld [vmem:[%s8259_s1] ss:$0 sm:$0xff]  ;;  %v458_v2 = vlaneseq  ;;  %v5182_v3 = vmov 0   ;;  %vm506_vm0 = vcmask 162816  }
   0xe   : > { %5157 = vset.pattern.permute.xlu1 %v5182_v3  ;;  %5156 = vset.pattern.permute.xlu0 %v5182_v3  ;;  %v4854_v4 = vld [vmem:[%s8259_s1 + $0x3] ss:$0 sm:$0xff]  ;;  %v4852_v6 = vld [vmem:[%s8259_s1 + $0x1] ss:$0 sm:$0xff]  ;;  %v390_v8 = vld [vmem:[%s8260_s2] sm:$0x1] }
   0xf   : > { %439 = vperm.xlu1 %5157, %v4853_v0   ;;  %431 = vperm.xlu0 %5156, %v4851_v1   ;;  %v459_v5 = vshrl.u32 %v458_v2, 7  ;;  %v391_v7 = vld [vmem:[%s8260_s2 + $0x1] sm:$0x1]  ;;  %v393_v12 = vld [vmem:[%s8260_s2 + $0x3] sm:$0x1]  ;;  %v394_v17 = vmax.f32 %v390_v8, 0.0 }
  0x10   : > { %v392_v13 = vld [vmem:[%s8260_s2 + $0x2] sm:$0x1]  ;;  %v395_v16 = vmax.f32 %v391_v7, 0.0  ;;  %v397_v20 = vmax.f32 %v393_v12, 0.0  ;;  %vm509_vm1 = vcmask 158720   ;;  %v5183_v24 = vmov 0.0  }
  0x11   : > { %v460_v9 = vsub.s32 0, %v459_v5  ;;  %v396_v21 = vmax.f32 %v392_v13, 0.0  ;;  %511 = vst.msk [vmem:[#allocation2 + $0x18] sm:$0xff] %vm506_vm0, %v5183_v24  ;;  %512 = vst.msk [vmem:[#allocation2 + $0x20] sm:$0xff] %vm506_vm0, %v5183_v24  ;;  %v4856_v25 = vld [vmem:[%s8261_s3 + $0x1] ss:$0 sm:$0xff] }
  0x12   : > { %513 = vst.msk [vmem:[#allocation2 + $0x28] sm:$0xf] %vm509_vm1, %v5183_v24  ;;  %510 = vst.msk [vmem:[#allocation2 + $0x10] sm:$0xf] %vm509_vm1, %v5183_v24  ;;  %v4855_v26 = vld [vmem:[%s8261_s3] ss:$0 sm:$0xff] }
  0x13   : > { %443 = vperm.xlu1 %5157, %v4854_v4   ;;  %435 = vperm.xlu0 %5156, %v4852_v6   ;;  %v465_v10 = vrot.slane %v391_v7, %v460_v9  ;;  %v461_v11 = vrot.slane %v390_v8, %v460_v9  ;;  %v473_v14 = vrot.slane %v393_v12, %v460_v9  ;;  %v4858_v27 = vld [vmem:[%s8261_s3 + $0x3] ss:$0 sm:$0xff]  ;;  %v4857_v28 = vld [vmem:[%s8261_s3 + $0x2] ss:$0 sm:$0xff]  ;;  %v4864_v29 = vld [vmem:[%s8261_s3 + $0x25] ss:$0 sm:$0xff] }
  0x14   : > { %v469_v15 = vrot.slane %v392_v13, %v460_v9  ;;  %v531_v18 = vrot.slane %v395_v16, %v460_v9  ;;  %v527_v19 = vrot.slane %v394_v17, %v460_v9  ;;  %v539_v22 = vrot.slane %v397_v20, %v460_v9  ;;  %507 = vst.msk [vmem:[#allocation2] sm:$0xff] %vm506_vm0, %v5183_v24  ;;  %v4863_v30 = vld [vmem:[%s8261_s3 + $0x24] ss:$0 sm:$0xff]  ;;  %v4866_v31 = vld [vmem:[%s8261_s3 + $0x27] ss:$0 sm:$0xff]  ;;  %p357_p3 = scmp.lt.s32.totalorder %s4838_s10, 1 }
  0x15   : > { %v535_v23 = vrot.slane %v396_v21, %v460_v9  ;;  %508 = vst.msk [vmem:[#allocation2 + $0x8] sm:$0xff] %vm506_vm0, %v5183_v24  ;;  %514 = vst.msk [vmem:[#allocation2 + $0x30] sm:$0xff] %vm506_vm0, %v5183_v24  ;;  %v4865_v32 = vld [vmem:[%s8261_s3 + $0x26] ss:$0 sm:$0xff]  ;;  %v4872_v33 = vld [vmem:[%s8261_s3 + $0x49] ss:$0 sm:$0xff] }
  0x16   : > { %515 = vst.msk [vmem:[#allocation2 + $0x38] sm:$0xff] %vm506_vm0, %v5183_v24  ;;  %517 = vst.msk [vmem:[#allocation2 + $0x48] sm:$0xff] %vm506_vm0, %v5183_v24  ;;  %v4871_v34 = vld [vmem:[%s8261_s3 + $0x48] ss:$0 sm:$0xff]  ;;  %v4874_v35 = vld [vmem:[%s8261_s3 + $0x4b] ss:$0 sm:$0xff] }
  0x17   : > { %479 = vperm.xlu1 %5157, %v465_v10   ;;  %475 = vperm.xlu0 %5156, %v461_v11   ;;  %516 = vst.msk [vmem:[#allocation2 + $0x40] sm:$0xf] %vm509_vm1, %v5183_v24  ;;  %519 = vst.msk [vmem:[#allocation2 + $0x58] sm:$0xf] %vm509_vm1, %v5183_v24  ;;  %v4873_v36 = vld [vmem:[%s8261_s3 + $0x4a] ss:$0 sm:$0xff] }
  0x18   : > { %518 = vst.msk [vmem:[#allocation2 + $0x50] sm:$0xff] %vm506_vm0, %v5183_v24  ;;  %v4880_v37 = vld [vmem:[%s8261_s3 + $0x6d] ss:$0 sm:$0xff]  ;;  %v4879_v38 = vld [vmem:[%s8261_s3 + $0x6c] ss:$0 sm:$0xff]  ;;  %s8735_s10 = smov (!%p357_p3, %s4838_s10), 1 }
  0x19   : > { %v4882_v39 = vld [vmem:[%s8261_s3 + $0x6f] ss:$0 sm:$0xff]  ;;  %v4881_v40 = vld [vmem:[%s8261_s3 + $0x6e] ss:$0 sm:$0xff]  ;;  %v4888_v41 = vld [vmem:[%s8261_s3 + $0x5] ss:$0 sm:$0xff] }
  0x1a   : > { %v4887_v42 = vld [vmem:[%s8261_s3 + $0x4] ss:$0 sm:$0xff]  ;;  %v4890_v43 = vld [vmem:[%s8261_s3 + $0x7] ss:$0 sm:$0xff]  ;;  %v4889_v44 = vld [vmem:[%s8261_s3 + $0x6] ss:$0 sm:$0xff] }
  0x1b   : > { %487 = vperm.xlu1 %5157, %v473_v14   ;;  %483 = vperm.xlu0 %5156, %v469_v15   ;;  %v4896_v45 = vld [vmem:[%s8261_s3 + $0x29] ss:$0 sm:$0xff]  ;;  %v4895_v46 = vld [vmem:[%s8261_s3 + $0x28] ss:$0 sm:$0xff]  ;;  %v4898_v47 = vld [vmem:[%s8261_s3 + $0x2b] ss:$0 sm:$0xff] }
  0x1c   : > { %v4897_v48 = vld [vmem:[%s8261_s3 + $0x2a] ss:$0 sm:$0xff]  ;;  %v4904_v49 = vld [vmem:[%s8261_s3 + $0x4d] ss:$0 sm:$0xff]  ;;  %v4903_v50 = vld [vmem:[%s8261_s3 + $0x4c] ss:$0 sm:$0xff] }
  0x1d   : > { %v4906_v51 = vld [vmem:[%s8261_s3 + $0x4f] ss:$0 sm:$0xff]  ;;  %v4905_v52 = vld [vmem:[%s8261_s3 + $0x4e] ss:$0 sm:$0xff]  ;;  %v4912_v53 = vld [vmem:[%s8261_s3 + $0x71] ss:$0 sm:$0xff] }
  0x1e   : > { %v4911_v54 = vld [vmem:[%s8261_s3 + $0x70] ss:$0 sm:$0xff]  ;;  %v4914_v55 = vld [vmem:[%s8261_s3 + $0x73] ss:$0 sm:$0xff]  ;;  %v4913_v56 = vld [vmem:[%s8261_s3 + $0x72] ss:$0 sm:$0xff] }
  0x1f   : > { %545 = vperm.xlu1 %5157, %v531_v18   ;;  %541 = vperm.xlu0 %5156, %v527_v19   ;;  %v4920_v57 = vld [vmem:[%s8261_s3 + $0x9] ss:$0 sm:$0xff]  ;;  %v4919_v58 = vld [vmem:[%s8261_s3 + $0x8] ss:$0 sm:$0xff]  ;;  %v4922_v59 = vld [vmem:[%s8261_s3 + $0xb] ss:$0 sm:$0xff] }
  0x20   : > { %v4921_v60 = vld [vmem:[%s8261_s3 + $0xa] ss:$0 sm:$0xff]  ;;  %v4928_v61 = vld [vmem:[%s8261_s3 + $0x2d] ss:$0 sm:$0xff]  ;;  %v4927_v62 = vld [vmem:[%s8261_s3 + $0x2c] ss:$0 sm:$0xff] }
  0x21   : > { %v4930_v63 = vld [vmem:[%s8261_s3 + $0x2f] ss:$0 sm:$0xff]  ;;  %v4929_v0 = vld [vmem:[%s8261_s3 + $0x2e] ss:$0 sm:$0xff]  ;;  %v4936_v1 = vld [vmem:[%s8261_s3 + $0x51] ss:$0 sm:$0xff] }
  0x22   : > { %v4935_v2 = vld [vmem:[%s8261_s3 + $0x50] ss:$0 sm:$0xff]  ;;  %v4938_v3 = vld [vmem:[%s8261_s3 + $0x53] ss:$0 sm:$0xff]  ;;  %v4937_v4 = vld [vmem:[%s8261_s3 + $0x52] ss:$0 sm:$0xff] }
  0x23   : > { %553 = vperm.xlu1 %5157, %v539_v22   ;;  %549 = vperm.xlu0 %5156, %v535_v23   ;;  %v4944_v5 = vld [vmem:[%s8261_s3 + $0x75] ss:$0 sm:$0xff]  ;;  %v4943_v6 = vld [vmem:[%s8261_s3 + $0x74] ss:$0 sm:$0xff]  ;;  %v4946_v7 = vld [vmem:[%s8261_s3 + $0x77] ss:$0 sm:$0xff] }
  0x24   : > { %v4945_v8 = vld [vmem:[%s8261_s3 + $0x76] ss:$0 sm:$0xff]  ;;  %v4952_v9 = vld [vmem:[%s8261_s3 + $0xd] ss:$0 sm:$0xff]  ;;  %v4951_v10 = vld [vmem:[%s8261_s3 + $0xc] ss:$0 sm:$0xff] }
  0x25   : > { %v4954_v11 = vld [vmem:[%s8261_s3 + $0xf] ss:$0 sm:$0xff]  ;;  %v4953_v12 = vld [vmem:[%s8261_s3 + $0xe] ss:$0 sm:$0xff]  ;;  %s5141_s17 = sshll.u32 %s8735_s10, 6  ;;  %s5184_s21 = smov 2  }
  0x26   : > { %s5435_s20 = scalar_lea.vmem %s8258_s0, %s5141_s17  ;;  %vm556_vm2 = vcmask 154632   ;;  %vm559_vm3 = vcmask 148488   ;;  %vm602_vm4 = vcmask 146448   ;;  %s5185_s16 = smov 1   ;;  %vm2929_vm5 = vcmask 1040384  }
  0x27   : > { %655 = vperm.xlu1 %5157, %v4856_v25   ;;  %651 = vperm.xlu0 %5156, %v4855_v26   ;;  %v398_v15 = vld [vmem:[%s5435_s20] sm:$0xff]  ;;  %v399_v16 = vld [vmem:[%s5435_s20 + $0x8] sm:$0xff]  ;;  %v401_v19 = vld [vmem:[%s5435_s20 + $0x18] sm:$0xff]  ;;  %s5186_s17 = smov 127   ;;  %s7429_s18 = smul.u32 96, %s8735_s10  ;;  %vm3218_vm6 = vcmask 154625  }
  0x28   : > { %v400_v22 = vld [vmem:[%s5435_s20 + $0x10] sm:$0xff]  ;;  %vm3220_vm7 = vcmask 154624   ;;  %vm3222_vm8 = vcmask 150528   ;;  %vm3281_vm9 = vcmask 146433   ;;  %vm3283_vm10 = vcmask 146432   ;;  %s4849_s12 = sshll.u32 %s8735_s10, 2 }
  0x29   : > { %s7469_s24 = scalar_lea.vmem %s8263_s5, %s7429_s18  ;;  %vm3285_vm11 = vcmask 142336   ;;  %s7540_s27 = scalar_lea.vmem %s8264_s6, %s7429_s18  ;;  %vm3346_vm12 = vcmask 149504   ;;  %vm3407_vm13 = vcmask 141312   ;;  %vm3466_vm14 = vcmask 1046528  }
  0x2a   : > { %s381_s11 = scalar_lea.vmem %s8265_s7, %s7429_s18  ;;  %vm3500_vm15 = vcmask 1042432   ;;  %vm4093_vm0 = vcmask 1041408   ;;  %s8188_s15 = scalar_lea.vmem %s8266_s8, %s4849_s12  ;;  %vm4613_vm1 = vcmask 0  }
  0x2b   : > { %663 = vperm.xlu1 %5157, %v4858_v27   ;;  %659 = vperm.xlu0 %5156, %v4857_v28   ;;  %v403_v28 = vld [vmem:[%s5435_s20 + $0x28] sm:$0xff] }
  0x2f   : > { %708 = vperm.xlu1 %5157, %v4864_v29   ;;  %704 = vperm.xlu0 %5156, %v4863_v30   ;;  %v402_v30 = vld [vmem:[%s5435_s20 + $0x20] sm:$0xff] }
  0x33   : > { %716 = vperm.xlu1 %5157, %v4866_v31   ;;  %712 = vperm.xlu0 %5156, %v4865_v32  }
  0x37   : > { %773 = vperm.xlu1 %5157, %v4872_v33   ;;  %769 = vperm.xlu0 %5156, %v4871_v34  }
  0x3b   : > { %781 = vperm.xlu1 %5157, %v4874_v35   ;;  %777 = vperm.xlu0 %5156, %v4873_v36  }
  0x3f   : > { %838 = vperm.xlu1 %5157, %v4880_v37   ;;  %834 = vperm.xlu0 %5156, %v4879_v38  }
  0x43   : > { %846 = vperm.xlu1 %5157, %v4882_v39   ;;  %842 = vperm.xlu0 %5156, %v4881_v40   ;;  %v405_v39 = vld [vmem:[%s5435_s20 + $0x38] sm:$0xff]  ;;  %v404_v40 = vld [vmem:[%s5435_s20 + $0x30] sm:$0xff] }
  0x47   : > { %903 = vperm.xlu1 %5157, %v4888_v41   ;;  %899 = vperm.xlu0 %5156, %v4887_v42  }
  0x4b   : > { %911 = vperm.xlu1 %5157, %v4890_v43   ;;  %907 = vperm.xlu0 %5156, %v4889_v44  }
  0x4f   : > { %956 = vperm.xlu1 %5157, %v4896_v45   ;;  %952 = vperm.xlu0 %5156, %v4895_v46  }
  0x53   : > { %964 = vperm.xlu1 %5157, %v4898_v47   ;;  %960 = vperm.xlu0 %5156, %v4897_v48  }
  0x57   : > { %1021 = vperm.xlu1 %5157, %v4904_v49   ;;  %1017 = vperm.xlu0 %5156, %v4903_v50  }
  0x5b   : > { %1029 = vperm.xlu1 %5157, %v4906_v51   ;;  %1025 = vperm.xlu0 %5156, %v4905_v52  }
  0x5f   : > { %1086 = vperm.xlu1 %5157, %v4912_v53   ;;  %1082 = vperm.xlu0 %5156, %v4911_v54  }
  0x63   : > { %1094 = vperm.xlu1 %5157, %v4914_v55   ;;  %1090 = vperm.xlu0 %5156, %v4913_v56  }
  0x67   : > { %1151 = vperm.xlu1 %5157, %v4920_v57   ;;  %1147 = vperm.xlu0 %5156, %v4919_v58  }
  0x6b   : > { %1159 = vperm.xlu1 %5157, %v4922_v59   ;;  %1155 = vperm.xlu0 %5156, %v4921_v60   ;;  %v4960_v59 = vld [vmem:[%s8261_s3 + $0x31] ss:$0 sm:$0xff]  ;;  %v4959_v60 = vld [vmem:[%s8261_s3 + $0x30] ss:$0 sm:$0xff] }
  0x6f   : > { %1204 = vperm.xlu1 %5157, %v4928_v61   ;;  %1200 = vperm.xlu0 %5156, %v4927_v62  }
  0x73   : > { %1212 = vperm.xlu1 %5157, %v4930_v63   ;;  %1208 = vperm.xlu0 %5156, %v4929_v0   ;;  %v4962_v63 = vld [vmem:[%s8261_s3 + $0x33] ss:$0 sm:$0xff]  ;;  %v4961_v0 = vld [vmem:[%s8261_s3 + $0x32] ss:$0 sm:$0xff] }
  0x77   : > { %1269 = vperm.xlu1 %5157, %v4936_v1   ;;  %1265 = vperm.xlu0 %5156, %v4935_v2  }
  0x7b   : > { %1277 = vperm.xlu1 %5157, %v4938_v3   ;;  %1273 = vperm.xlu0 %5156, %v4937_v4   ;;  %v4968_v3 = vld [vmem:[%s8261_s3 + $0x55] ss:$0 sm:$0xff]  ;;  %v4967_v4 = vld [vmem:[%s8261_s3 + $0x54] ss:$0 sm:$0xff] }
  0x7f   : > { %1334 = vperm.xlu1 %5157, %v4944_v5   ;;  %1330 = vperm.xlu0 %5156, %v4943_v6  }
  0x83   : > { %1342 = vperm.xlu1 %5157, %v4946_v7   ;;  %1338 = vperm.xlu0 %5156, %v4945_v8   ;;  %v4970_v7 = vld [vmem:[%s8261_s3 + $0x57] ss:$0 sm:$0xff]  ;;  %v4969_v8 = vld [vmem:[%s8261_s3 + $0x56] ss:$0 sm:$0xff] }
  0x87   : > { %1399 = vperm.xlu1 %5157, %v4952_v9   ;;  %1395 = vperm.xlu0 %5156, %v4951_v10  }
  0x8b   : > { %1407 = vperm.xlu1 %5157, %v4954_v11   ;;  %1403 = vperm.xlu0 %5156, %v4953_v12   ;;  %v4976_v11 = vld [vmem:[%s8261_s3 + $0x79] ss:$0 sm:$0xff]  ;;  %v4975_v12 = vld [vmem:[%s8261_s3 + $0x78] ss:$0 sm:$0xff] }
  0x8e   : > { %v440_v13 = vpop.permute.xlu1 %439  ;;  %v432_v14 = vpop.permute.xlu0 %431 }
  0x8f   : > { %v446_v20 = vmul.f32 %v432_v14, %v398_v15  ;;  %v447_v21 = vmul.f32 %v432_v14, %v399_v16  ;;  %v451_v37 = vmul.f32 %v440_v13, %v403_v28  ;;  %v450_v38 = vmul.f32 %v440_v13, %v402_v30  ;;  %v4978_v15 = vld [vmem:[%s8261_s3 + $0x7b] ss:$0 sm:$0xff]  ;;  %v4977_v16 = vld [vmem:[%s8261_s3 + $0x7a] ss:$0 sm:$0xff]  ;;  %v4991_v28 = vld [vmem:[%s8261_s3 + $0x34] ss:$0 sm:$0xff] }
  0x92   : > { %v444_v17 = vpop.permute.xlu1 %443  ;;  %v436_v18 = vpop.permute.xlu0 %435 }
  0x93   : > { %v449_v25 = vmul.f32 %v436_v18, %v401_v19  ;;  %v448_v29 = vmul.f32 %v436_v18, %v400_v22  ;;  %v453_v47 = vmul.f32 %v444_v17, %v405_v39  ;;  %v452_v48 = vmul.f32 %v444_v17, %v404_v40  ;;  %v4984_v19 = vld [vmem:[%s8261_s3 + $0x11] ss:$0 sm:$0xff]  ;;  %v5002_v39 = vld [vmem:[%s8261_s3 + $0x5b] ss:$0 sm:$0xff]  ;;  %v5001_v40 = vld [vmem:[%s8261_s3 + $0x5a] ss:$0 sm:$0xff] }
  0x96   : > { %v480_v23 = vpop.permute.xlu1 %479  ;;  %v476_v24 = vpop.permute.xlu0 %475 }
  0x97   : > { %v490_v26 = vadd.f32 %v476_v24, %v446_v20  ;;  %v491_v27 = vadd.f32 %v476_v24, %v447_v21  ;;  %v493_v31 = vadd.f32 %v480_v23, %v449_v25  ;;  %v492_v34 = vadd.f32 %v480_v23, %v448_v29  ;;  %v4983_v20 = vld [vmem:[%s8261_s3 + $0x10] ss:$0 sm:$0xff]  ;;  %v4986_v23 = vld [vmem:[%s8261_s3 + $0x13] ss:$0 sm:$0xff]  ;;  %v4985_v24 = vld [vmem:[%s8261_s3 + $0x12] ss:$0 sm:$0xff] }
  0x99   : > { %v499_v32 = vmax.f32 %v491_v27, 0.0  ;;  %v498_v33 = vmax.f32 %v490_v26, 0.0  ;;  %v501_v42 = vmax.f32 %v493_v31, 0.0  ;;  %v500_v46 = vmax.f32 %v492_v34, 0.0  ;;  %v4992_v27 = vld [vmem:[%s8261_s3 + $0x35] ss:$0 sm:$0xff] }
  0x9a   : > { %v488_v35 = vpop.permute.xlu1 %487  ;;  %v484_v36 = vpop.permute.xlu0 %483  ;;  %v4994_v31 = vld [vmem:[%s8261_s3 + $0x37] ss:$0 sm:$0xff] }
  0x9b   : > { %580 = vrot.lane.b32.xlu1 %v499_v32, %s5184_s21  ;;  %578 = vrot.lane.b32.xlu0 %v498_v33, %s5184_s21  ;;  %v495_v41 = vadd.f32 %v484_v36, %v451_v37  ;;  %v494_v43 = vadd.f32 %v484_v36, %v450_v38  ;;  %v497_v49 = vadd.f32 %v488_v35, %v453_v47  ;;  %v4993_v32 = vld [vmem:[%s8261_s3 + $0x36] ss:$0 sm:$0xff]  ;;  %v4999_v36 = vld [vmem:[%s8261_s3 + $0x58] ss:$0 sm:$0xff] }
  0x9c   : > { %v496_v51 = vadd.f32 %v488_v35, %v452_v48  ;;  %v5000_v35 = vld [vmem:[%s8261_s3 + $0x59] ss:$0 sm:$0xff]  ;;  %v5010_v47 = vld [vmem:[%s8261_s3 + $0x7f] ss:$0 sm:$0xff]  ;;  %v5009_v48 = vld [vmem:[%s8261_s3 + $0x7e] ss:$0 sm:$0xff] }
  0x9d   : > { %v503_v50 = vmax.f32 %v495_v41, 0.0  ;;  %v502_v54 = vmax.f32 %v494_v43, 0.0  ;;  %v505_v55 = vmax.f32 %v497_v49, 0.0  ;;  %v5008_v43 = vld [vmem:[%s8261_s3 + $0x7d] ss:$0 sm:$0xff] }
  0x9e   : > { %v546_v44 = vpop.permute.xlu1 %545  ;;  %v542_v45 = vpop.permute.xlu0 %541  ;;  %v504_v58 = vmax.f32 %v496_v51, 0.0  ;;  %v5016_v51 = vld [vmem:[%s8261_s3 + $0x15] ss:$0 sm:$0xff] }
  0x9f   : > { %561 = vst.msk [vmem:[#allocation2 + $0x19] sm:$0xff] %vm556_vm2, %v546_v44  ;;  %562 = vst.msk [vmem:[#allocation2 + $0x21] sm:$0xff] %vm556_vm2, %v546_v44  ;;  %584 = vrot.lane.b32.xlu1 %v501_v42, %s5184_s21  ;;  %582 = vrot.lane.b32.xlu0 %v500_v46, %s5184_s21 }
  0xa0   : > { %563 = vst.msk [vmem:[#allocation2 + $0x29] sm:$0x3] %vm559_vm3, %v546_v44  ;;  %560 = vst.msk [vmem:[#allocation2 + $0x11] sm:$0x3] %vm559_vm3, %v542_v45  ;;  %v5007_v44 = vld [vmem:[%s8261_s3 + $0x7c] ss:$0 sm:$0xff] }
  0xa1   : > { %557 = vst.msk [vmem:[#allocation2 + $0x1] sm:$0xff] %vm556_vm2, %v542_v45  ;;  %558 = vst.msk [vmem:[#allocation2 + $0x9] sm:$0xff] %vm556_vm2, %v542_v45 }
  0xa2   : > { %v554_v52 = vpop.permute.xlu1 %553  ;;  %v550_v53 = vpop.permute.xlu0 %549 }
  0xa3   : > { %567 = vst.msk [vmem:[#allocation2 + $0x49] sm:$0xff] %vm556_vm2, %v554_v52  ;;  %568 = vst.msk [vmem:[#allocation2 + $0x51] sm:$0xff] %vm556_vm2, %v554_v52  ;;  %588 = vrot.lane.b32.xlu1 %v503_v50, %s5184_s21  ;;  %586 = vrot.lane.b32.xlu0 %v502_v54, %s5184_s21 }
  0xa4   : > { %569 = vst.msk [vmem:[#allocation2 + $0x59] sm:$0x3] %vm559_vm3, %v554_v52  ;;  %566 = vst.msk [vmem:[#allocation2 + $0x41] sm:$0x3] %vm559_vm3, %v550_v53  ;;  %v5015_v52 = vld [vmem:[%s8261_s3 + $0x14] ss:$0 sm:$0xff] }
  0xa5   : > { %564 = vst.msk [vmem:[#allocation2 + $0x31] sm:$0xff] %vm556_vm2, %v550_v53  ;;  %565 = vst.msk [vmem:[#allocation2 + $0x39] sm:$0xff] %vm556_vm2, %v550_v53 }
  0xa6   : > { %v5463_v56 = vpop.permute.xlu1 %655  ;;  %v5465_v57 = vpop.permute.xlu0 %651 }
  0xa7   : > { %8396 = vst [vmem:[#allocation3_spill] sm:$0xff] %v5463_v56  ;;  %8397 = vst [vmem:[#allocation4_spill] sm:$0xff] %v5465_v57  ;;  %592 = vrot.lane.b32.xlu1 %v505_v55, %s5184_s21  ;;  %590 = vrot.lane.b32.xlu0 %v504_v58, %s5184_s21  ;;  %v5018_v55 = vld [vmem:[%s8261_s3 + $0x17] ss:$0 sm:$0xff]  ;;  %v5017_v58 = vld [vmem:[%s8261_s3 + $0x16] ss:$0 sm:$0xff]  ;;  %s7435_s21 = scalar_lea.vmem %s8262_s4, %s7429_s18  ;;  %s8237_s18 = scalar_lea.vmem %s8267_s9, %s4849_s12 }
  0xaa   : > { %v5475_v61 = vpop.permute.xlu1 %663  ;;  %v5477_v62 = vpop.permute.xlu0 %659 }
  0xab   : > { %8398 = vst [vmem:[#allocation5_spill] sm:$0xff] %v5475_v61  ;;  %8399 = vst [vmem:[#allocation6_spill] sm:$0xff] %v5477_v62  ;;  %1452 = vperm.xlu1 %5157, %v4960_v59   ;;  %1448 = vperm.xlu0 %5156, %v4959_v60  }
  0xae   : > { %v5485_v1 = vpop.permute.xlu1 %708  ;;  %v5487_v2 = vpop.permute.xlu0 %704 }
  0xaf   : > { %8400 = vst [vmem:[#allocation7_spill] sm:$0xff] %v5485_v1  ;;  %8401 = vst [vmem:[#allocation8_spill] sm:$0xff] %v5487_v2  ;;  %1460 = vperm.xlu1 %5157, %v4962_v63   ;;  %1456 = vperm.xlu0 %5156, %v4961_v0   ;;  %v5024_v63 = vld [vmem:[%s8261_s3 + $0x39] ss:$0 sm:$0xff]  ;;  %v5023_v0 = vld [vmem:[%s8261_s3 + $0x38] ss:$0 sm:$0xff] }
  0xb2   : > { %v5495_v5 = vpop.permute.xlu1 %716  ;;  %v5497_v6 = vpop.permute.xlu0 %712 }
  0xb3   : > { %8402 = vst [vmem:[#allocation9_spill] sm:$0xff] %v5495_v5  ;;  %8403 = vst [vmem:[#allocation10_spill] sm:$0xff] %v5497_v6  ;;  %1517 = vperm.xlu1 %5157, %v4968_v3   ;;  %1513 = vperm.xlu0 %5156, %v4967_v4  }
  0xb6   : > { %v5505_v9 = vpop.permute.xlu1 %773  ;;  %v5507_v10 = vpop.permute.xlu0 %769 }
  0xb7   : > { %8404 = vst [vmem:[#allocation11_spill] sm:$0xff] %v5505_v9  ;;  %8405 = vst [vmem:[#allocation12_spill] sm:$0xff] %v5507_v10  ;;  %1525 = vperm.xlu1 %5157, %v4970_v7   ;;  %1521 = vperm.xlu0 %5156, %v4969_v8   ;;  %v5026_v7 = vld [vmem:[%s8261_s3 + $0x3b] ss:$0 sm:$0xff]  ;;  %v5025_v8 = vld [vmem:[%s8261_s3 + $0x3a] ss:$0 sm:$0xff] }
  0xba   : > { %v5515_v13 = vpop.permute.xlu1 %781  ;;  %v5517_v14 = vpop.permute.xlu0 %777 }
  0xbb   : > { %8406 = vst [vmem:[#allocation13_spill] sm:$0xff] %v5515_v13  ;;  %8407 = vst [vmem:[#allocation14_spill] sm:$0xff] %v5517_v14  ;;  %1582 = vperm.xlu1 %5157, %v4976_v11   ;;  %1578 = vperm.xlu0 %5156, %v4975_v12  }
  0xbe   : > { %v5525_v17 = vpop.permute.xlu1 %838  ;;  %v5527_v18 = vpop.permute.xlu0 %834 }
  0xbf   : > { %8408 = vst [vmem:[#allocation15_spill] sm:$0xff] %v5525_v17  ;;  %8409 = vst [vmem:[#allocation16_spill] sm:$0xff] %v5527_v18  ;;  %1590 = vperm.xlu1 %5157, %v4978_v15   ;;  %1586 = vperm.xlu0 %5156, %v4977_v16   ;;  %v5032_v15 = vld [vmem:[%s8261_s3 + $0x5d] ss:$0 sm:$0xff]  ;;  %v5031_v16 = vld [vmem:[%s8261_s3 + $0x5c] ss:$0 sm:$0xff] }
  0xc2   : > { %v5535_v21 = vpop.permute.xlu1 %846  ;;  %v5537_v22 = vpop.permute.xlu0 %842 }
  0xc3   : > { %8410 = vst [vmem:[#allocation17_spill] sm:$0xff] %v5535_v21  ;;  %8411 = vst [vmem:[#allocation18_spill] sm:$0xff] %v5537_v22  ;;  %1647 = vperm.xlu1 %5157, %v4984_v19   ;;  %1643 = vperm.xlu0 %5156, %v4983_v20  }
  0xc6   : > { %v5545_v25 = vpop.permute.xlu1 %903  ;;  %v5547_v26 = vpop.permute.xlu0 %899 }
  0xc7   : > { %8412 = vst [vmem:[#allocation19_spill] sm:$0xff] %v5545_v25  ;;  %8413 = vst [vmem:[#allocation20_spill] sm:$0xff] %v5547_v26  ;;  %1655 = vperm.xlu1 %5157, %v4986_v23   ;;  %1651 = vperm.xlu0 %5156, %v4985_v24   ;;  %v5034_v23 = vld [vmem:[%s8261_s3 + $0x5f] ss:$0 sm:$0xff]  ;;  %v5033_v24 = vld [vmem:[%s8261_s3 + $0x5e] ss:$0 sm:$0xff] }
  0xca   : > { %v5555_v29 = vpop.permute.xlu1 %911  ;;  %v5557_v30 = vpop.permute.xlu0 %907 }
  0xcb   : > { %8414 = vst [vmem:[#allocation21_spill] sm:$0xff] %v5555_v29  ;;  %8415 = vst [vmem:[#allocation22_spill] sm:$0xff] %v5557_v30  ;;  %1700 = vperm.xlu1 %5157, %v4992_v27   ;;  %1696 = vperm.xlu0 %5156, %v4991_v28  }
  0xce   : > { %v5565_v33 = vpop.permute.xlu1 %956  ;;  %v5567_v34 = vpop.permute.xlu0 %952 }
  0xcf   : > { %8416 = vst [vmem:[#allocation23_spill] sm:$0xff] %v5565_v33  ;;  %8417 = vst [vmem:[#allocation24_spill] sm:$0xff] %v5567_v34  ;;  %1708 = vperm.xlu1 %5157, %v4994_v31   ;;  %1704 = vperm.xlu0 %5156, %v4993_v32   ;;  %v5040_v31 = vld [vmem:[%s8261_s3 + $0x81] ss:$0 sm:$0xff]  ;;  %v5039_v32 = vld [vmem:[%s8261_s3 + $0x80] ss:$0 sm:$0xff] }
  0xd2   : > { %v5575_v37 = vpop.permute.xlu1 %964  ;;  %v5577_v38 = vpop.permute.xlu0 %960 }
  0xd3   : > { %8418 = vst [vmem:[#allocation25_spill] sm:$0xff] %v5575_v37  ;;  %8419 = vst [vmem:[#allocation26_spill] sm:$0xff] %v5577_v38  ;;  %1765 = vperm.xlu1 %5157, %v5000_v35   ;;  %1761 = vperm.xlu0 %5156, %v4999_v36  }
  0xd6   : > { %v5585_v41 = vpop.permute.xlu1 %1021  ;;  %v5587_v42 = vpop.permute.xlu0 %1017 }
  0xd7   : > { %8420 = vst [vmem:[#allocation27_spill] sm:$0xff] %v5585_v41  ;;  %8421 = vst [vmem:[#allocation28_spill] sm:$0xff] %v5587_v42  ;;  %1773 = vperm.xlu1 %5157, %v5002_v39   ;;  %1769 = vperm.xlu0 %5156, %v5001_v40   ;;  %v5042_v39 = vld [vmem:[%s8261_s3 + $0x83] ss:$0 sm:$0xff]  ;;  %v5041_v40 = vld [vmem:[%s8261_s3 + $0x82] ss:$0 sm:$0xff] }
  0xda   : > { %v5595_v45 = vpop.permute.xlu1 %1029  ;;  %v5597_v46 = vpop.permute.xlu0 %1025 }
  0xdb   : > { %8422 = vst [vmem:[#allocation29_spill] sm:$0xff] %v5595_v45  ;;  %8423 = vst [vmem:[#allocation30_spill] sm:$0xff] %v5597_v46  ;;  %1830 = vperm.xlu1 %5157, %v5008_v43   ;;  %1826 = vperm.xlu0 %5156, %v5007_v44  }
  0xde   : > { %v5605_v49 = vpop.permute.xlu1 %1086  ;;  %v5607_v50 = vpop.permute.xlu0 %1082 }
  0xdf   : > { %8424 = vst [vmem:[#allocation31_spill] sm:$0xff] %v5605_v49  ;;  %8425 = vst [vmem:[#allocation32_spill] sm:$0xff] %v5607_v50  ;;  %1838 = vperm.xlu1 %5157, %v5010_v47   ;;  %1834 = vperm.xlu0 %5156, %v5009_v48   ;;  %v5048_v47 = vld [vmem:[%s8261_s3 + $0x19] ss:$0 sm:$0xff]  ;;  %v5047_v48 = vld [vmem:[%s8261_s3 + $0x18] ss:$0 sm:$0xff] }
  0xe0   : > { %v5137_v49 = vld [vmem:[%s8261_s3 + $0x8e] ss:$0 sm:$0xff] }
  0xe2   : > { %v5615_v53 = vpop.permute.xlu1 %1094  ;;  %v5617_v54 = vpop.permute.xlu0 %1090 }
  0xe3   : > { %8426 = vst [vmem:[#allocation33_spill] sm:$0xff] %v5615_v53  ;;  %8427 = vst [vmem:[#allocation34_spill] sm:$0xff] %v5617_v54  ;;  %1895 = vperm.xlu1 %5157, %v5016_v51   ;;  %1891 = vperm.xlu0 %5156, %v5015_v52  }
  0xe6   : > { %v5625_v59 = vpop.permute.xlu1 %1151  ;;  %v5627_v60 = vpop.permute.xlu0 %1147 }
  0xe7   : > { %1903 = vperm.xlu1 %5157, %v5018_v55   ;;  %1899 = vperm.xlu0 %5156, %v5017_v58   ;;  %v5050_v55 = vld [vmem:[%s8261_s3 + $0x1b] ss:$0 sm:$0xff]  ;;  %v5049_v58 = vld [vmem:[%s8261_s3 + $0x1a] ss:$0 sm:$0xff] }
  0xea   : > { %v5635_v3 = vpop.permute.xlu1 %1159  ;;  %v5637_v4 = vpop.permute.xlu0 %1155 }
  0xeb   : > { %1948 = vperm.xlu1 %5157, %v5024_v63   ;;  %1944 = vperm.xlu0 %5156, %v5023_v0  }
  0xee   : > { %v5645_v11 = vpop.permute.xlu1 %1204  ;;  %v5647_v12 = vpop.permute.xlu0 %1200 }
  0xef   : > { %1956 = vperm.xlu1 %5157, %v5026_v7   ;;  %1952 = vperm.xlu0 %5156, %v5025_v8   ;;  %v5056_v7 = vld [vmem:[%s8261_s3 + $0x3d] ss:$0 sm:$0xff]  ;;  %v5055_v8 = vld [vmem:[%s8261_s3 + $0x3c] ss:$0 sm:$0xff] }
  0xf2   : > { %v5655_v19 = vpop.permute.xlu1 %1212  ;;  %v5657_v20 = vpop.permute.xlu0 %1208 }
  0xf3   : > { %2013 = vperm.xlu1 %5157, %v5032_v15   ;;  %2009 = vperm.xlu0 %5156, %v5031_v16  }
  0xf6   : > { %v5665_v27 = vpop.permute.xlu1 %1269  ;;  %v5667_v28 = vpop.permute.xlu0 %1265 }
  0xf7   : > { %2021 = vperm.xlu1 %5157, %v5034_v23   ;;  %2017 = vperm.xlu0 %5156, %v5033_v24   ;;  %v5058_v23 = vld [vmem:[%s8261_s3 + $0x3f] ss:$0 sm:$0xff]  ;;  %v5057_v24 = vld [vmem:[%s8261_s3 + $0x3e] ss:$0 sm:$0xff] }
  0xfa   : > { %v5675_v35 = vpop.permute.xlu1 %1277  ;;  %v5677_v36 = vpop.permute.xlu0 %1273 }
  0xfb   : > { %2078 = vperm.xlu1 %5157, %v5040_v31   ;;  %2074 = vperm.xlu0 %5156, %v5039_v32  }
  0xfe   : > { %v5685_v43 = vpop.permute.xlu1 %1334  ;;  %v5687_v44 = vpop.permute.xlu0 %1330 }
  0xff   : > { %2086 = vperm.xlu1 %5157, %v5042_v39   ;;  %2082 = vperm.xlu0 %5156, %v5041_v40   ;;  %v5064_v39 = vld [vmem:[%s8261_s3 + $0x61] ss:$0 sm:$0xff]  ;;  %v5063_v40 = vld [vmem:[%s8261_s3 + $0x60] ss:$0 sm:$0xff] }
 0x102   : > { %v5695_v51 = vpop.permute.xlu1 %1342  ;;  %v5697_v52 = vpop.permute.xlu0 %1338 }
 0x103   : > { %2143 = vperm.xlu1 %5157, %v5048_v47   ;;  %2139 = vperm.xlu0 %5156, %v5047_v48  }
 0x106   : > { %v5705_v63 = vpop.permute.xlu1 %1399  ;;  %v5707_v0 = vpop.permute.xlu0 %1395 }
 0x107   : > { %8428 = vst [vmem:[#allocation35_spill] sm:$0xff] %v5705_v63  ;;  %8429 = vst [vmem:[#allocation36_spill] sm:$0xff] %v5707_v0  ;;  %2151 = vperm.xlu1 %5157, %v5050_v55   ;;  %2147 = vperm.xlu0 %5156, %v5049_v58   ;;  %v5066_v55 = vld [vmem:[%s8261_s3 + $0x63] ss:$0 sm:$0xff]  ;;  %v5065_v58 = vld [vmem:[%s8261_s3 + $0x62] ss:$0 sm:$0xff] }
 0x10a   : > { %v5715_v15 = vpop.permute.xlu1 %1407  ;;  %v5717_v16 = vpop.permute.xlu0 %1403 }
 0x10b   : > { %8430 = vst [vmem:[#allocation37_spill] sm:$0xff] %v5715_v15  ;;  %8431 = vst [vmem:[#allocation38_spill] sm:$0xff] %v5717_v16  ;;  %2196 = vperm.xlu1 %5157, %v5056_v7   ;;  %2192 = vperm.xlu0 %5156, %v5055_v8   ;;  %v5104_v15 = vld [vmem:[%s8261_s3 + $0x89] ss:$0 sm:$0xff]  ;;  %v5112_v16 = vld [vmem:[%s8261_s3 + $0x21] ss:$0 sm:$0xff] }
 0x10e   : > { %v581_v31 = vpop.permute.xlu1 %580  ;;  %v579_v32 = vpop.permute.xlu0 %578 }
 0x10f   : > { %604 = vst.msk [vmem:[#allocation2 + $0xa] sm:$0xff] %vm602_vm4, %v581_v31  ;;  %603 = vst.msk [vmem:[#allocation2 + $0x2] sm:$0xff] %vm602_vm4, %v579_v32  ;;  %2204 = vperm.xlu1 %5157, %v5058_v23   ;;  %2200 = vperm.xlu0 %5156, %v5057_v24   ;;  %v5072_v23 = vld [vmem:[%s8261_s3 + $0x85] ss:$0 sm:$0xff]  ;;  %v5071_v24 = vld [vmem:[%s8261_s3 + $0x84] ss:$0 sm:$0xff] }
 0x112   : > { %v585_v47 = vpop.permute.xlu1 %584  ;;  %v583_v48 = vpop.permute.xlu0 %582 }
 0x113   : > { %606 = vst.msk [vmem:[#allocation2 + $0x22] sm:$0xff] %vm602_vm4, %v585_v47  ;;  %605 = vst.msk [vmem:[#allocation2 + $0x1a] sm:$0xff] %vm602_vm4, %v583_v48  ;;  %2261 = vperm.xlu1 %5157, %v5064_v39   ;;  %2257 = vperm.xlu0 %5156, %v5063_v40   ;;  %v5074_v39 = vld [vmem:[%s8261_s3 + $0x87] ss:$0 sm:$0xff]  ;;  %v5073_v40 = vld [vmem:[%s8261_s3 + $0x86] ss:$0 sm:$0xff] }
 0x114   : > { %v5080_v47 = vld [vmem:[%s8261_s3 + $0x1d] ss:$0 sm:$0xff]  ;;  %v5079_v48 = vld [vmem:[%s8261_s3 + $0x1c] ss:$0 sm:$0xff] }
 0x116   : > { %v589_v7 = vpop.permute.xlu1 %588  ;;  %v587_v8 = vpop.permute.xlu0 %586  ;;  %v5921_v53 = vld [vmem:[#allocation2 + $0x10] sm:$0xf] }
 0x117   : > { %608 = vst.msk [vmem:[#allocation2 + $0x3a] sm:$0xff] %vm602_vm4, %v589_v7  ;;  %607 = vst.msk [vmem:[#allocation2 + $0x32] sm:$0xff] %vm602_vm4, %v587_v8  ;;  %2269 = vperm.xlu1 %5157, %v5066_v55   ;;  %2265 = vperm.xlu0 %5156, %v5065_v58   ;;  %v5082_v55 = vld [vmem:[%s8261_s3 + $0x1f] ss:$0 sm:$0xff]  ;;  %v5081_v58 = vld [vmem:[%s8261_s3 + $0x1e] ss:$0 sm:$0xff] }
 0x118   : > { %v5088_v7 = vld [vmem:[%s8261_s3 + $0x41] ss:$0 sm:$0xff]  ;;  %v5087_v8 = vld [vmem:[%s8261_s3 + $0x40] ss:$0 sm:$0xff] }
 0x11a   : > { %v593_v31 = vpop.permute.xlu1 %592  ;;  %v591_v32 = vpop.permute.xlu0 %590 }
 0x11b   : > { %610 = vst.msk [vmem:[#allocation2 + $0x52] sm:$0xff] %vm602_vm4, %v593_v31  ;;  %609 = vst.msk [vmem:[#allocation2 + $0x4a] sm:$0xff] %vm602_vm4, %v591_v32  ;;  %2326 = vperm.xlu1 %5157, %v5072_v23   ;;  %2322 = vperm.xlu0 %5156, %v5071_v24   ;;  %v5090_v31 = vld [vmem:[%s8261_s3 + $0x43] ss:$0 sm:$0xff]  ;;  %v5089_v32 = vld [vmem:[%s8261_s3 + $0x42] ss:$0 sm:$0xff] }
 0x11e   : > { %v5905_v63 = vld [vmem:[#allocation2 + $0x38] sm:$0xff]  ;;  %v5938_v18 = vld [vmem:[#allocation2 + $0x40] sm:$0xf] }
 0x11f   : > { %2334 = vperm.xlu1 %5157, %v5074_v39   ;;  %2330 = vperm.xlu0 %5156, %v5073_v40  }
 0x122   : > { %v5953_v13 = vld [vmem:[#allocation2 + $0x58] sm:$0xf] }
 0x123   : > { %2391 = vperm.xlu1 %5157, %v5080_v47   ;;  %2387 = vperm.xlu0 %5156, %v5079_v48   ;;  %v5096_v47 = vld [vmem:[%s8261_s3 + $0x65] ss:$0 sm:$0xff]  ;;  %v5095_v48 = vld [vmem:[%s8261_s3 + $0x64] ss:$0 sm:$0xff] }
 0x127   : > { %2399 = vperm.xlu1 %5157, %v5082_v55   ;;  %2395 = vperm.xlu0 %5156, %v5081_v58  }
 0x12a   : > { %v5775_v23 = vpop.permute.xlu1 %1452  ;;  %v5777_v24 = vpop.permute.xlu0 %1448 }
 0x12b   : > { %8432 = vst [vmem:[#allocation39_spill] sm:$0xff] %v5775_v23  ;;  %8433 = vst [vmem:[#allocation40_spill] sm:$0xff] %v5777_v24  ;;  %2444 = vperm.xlu1 %5157, %v5088_v7   ;;  %2440 = vperm.xlu0 %5156, %v5087_v8   ;;  %v5098_v7 = vld [vmem:[%s8261_s3 + $0x67] ss:$0 sm:$0xff]  ;;  %v5097_v8 = vld [vmem:[%s8261_s3 + $0x66] ss:$0 sm:$0xff] }
 0x12c   : > { %v5907_v23 = vld [vmem:[#allocation2 + $0x28] sm:$0xf] }
 0x12e   : > { %v5785_v39 = vpop.permute.xlu1 %1460  ;;  %v5787_v40 = vpop.permute.xlu0 %1456 }
 0x12f   : > { %8434 = vst [vmem:[#allocation41_spill] sm:$0xff] %v5785_v39  ;;  %8435 = vst [vmem:[#allocation42_spill] sm:$0xff] %v5787_v40  ;;  %2452 = vperm.xlu1 %5157, %v5090_v31   ;;  %2448 = vperm.xlu0 %5156, %v5089_v32  }
 0x132   : > { %v5795_v55 = vpop.permute.xlu1 %1517  ;;  %v5797_v58 = vpop.permute.xlu0 %1513 }
 0x133   : > { %8436 = vst [vmem:[#allocation43_spill] sm:$0xff] %v5795_v55  ;;  %8437 = vst [vmem:[#allocation44_spill] sm:$0xff] %v5797_v58  ;;  %2509 = vperm.xlu1 %5157, %v5096_v47   ;;  %2505 = vperm.xlu0 %5156, %v5095_v48   ;;  %v5103_v47 = vld [vmem:[%s8261_s3 + $0x88] ss:$0 sm:$0xff]  ;;  %v5917_v58 = vld [vmem:[#allocation2 + $0x50] sm:$0xff] }
 0x134   : > { %v1346_v46 = vmul.f32 %v5687_v44, %v5917_v58 }
 0x136   : > { %v5805_v31 = vpop.permute.xlu1 %1525  ;;  %v5807_v32 = vpop.permute.xlu0 %1521 }
 0x137   : > { %8438 = vst [vmem:[#allocation45_spill] sm:$0xff] %v5805_v31  ;;  %8439 = vst [vmem:[#allocation46_spill] sm:$0xff] %v5807_v32  ;;  %2517 = vperm.xlu1 %5157, %v5098_v7   ;;  %2513 = vperm.xlu0 %5156, %v5097_v8   ;;  %v5106_v31 = vld [vmem:[%s8261_s3 + $0x8b] ss:$0 sm:$0xff]  ;;  %v5105_v7 = vld [vmem:[%s8261_s3 + $0x8a] ss:$0 sm:$0xff] }
 0x13a   : > { %v5815_v48 = vpop.permute.xlu1 %1582  ;;  %v5817_v39 = vpop.permute.xlu0 %1578 }
 0x13b   : > { %8440 = vst [vmem:[#allocation47_spill] sm:$0xff] %v5815_v48  ;;  %8441 = vst [vmem:[#allocation48_spill] sm:$0xff] %v5817_v39  ;;  %2574 = vperm.xlu1 %5157, %v5104_v15   ;;  %2570 = vperm.xlu0 %5156, %v5103_v47   ;;  %v5111_v15 = vld [vmem:[%s8261_s3 + $0x20] ss:$0 sm:$0xff]  ;;  %v5915_v39 = vld [vmem:[#allocation2 + $0x48] sm:$0xff] }
 0x13c   : > { %v5889_v48 = vld [vmem:[#allocation2 + $0x20] sm:$0xff] }
 0x13e   : > { %v5825_v8 = vpop.permute.xlu1 %1590  ;;  %v5827_v32 = vpop.permute.xlu0 %1586 }
 0x13f   : > { %8442 = vst [vmem:[#allocation49_spill] sm:$0xff] %v5825_v8  ;;  %8443 = vst [vmem:[#allocation50_spill] sm:$0xff] %v5827_v32  ;;  %2582 = vperm.xlu1 %5157, %v5106_v31   ;;  %2578 = vperm.xlu0 %5156, %v5105_v7   ;;  %v5114_v8 = vld [vmem:[%s8261_s3 + $0x23] ss:$0 sm:$0xff]  ;;  %v5113_v31 = vld [vmem:[%s8261_s3 + $0x22] ss:$0 sm:$0xff] }
 0x142   : > { %v5835_v47 = vpop.permute.xlu1 %1647  ;;  %v5837_v40 = vpop.permute.xlu0 %1643 }
 0x143   : > { %8444 = vst [vmem:[#allocation51_spill] sm:$0xff] %v5835_v47  ;;  %8445 = vst [vmem:[#allocation52_spill] sm:$0xff] %v5837_v40  ;;  %2639 = vperm.xlu1 %5157, %v5112_v16   ;;  %2635 = vperm.xlu0 %5156, %v5111_v15   ;;  %v5120_v47 = vld [vmem:[%s8261_s3 + $0x45] ss:$0 sm:$0xff]  ;;  %v5119_v16 = vld [vmem:[%s8261_s3 + $0x44] ss:$0 sm:$0xff] }
 0x146   : > { %v5845_v7 = vpop.permute.xlu1 %1655  ;;  %v5847_v32 = vpop.permute.xlu0 %1651 }
 0x147   : > { %8446 = vst [vmem:[#allocation53_spill] sm:$0xff] %v5845_v7  ;;  %8447 = vst [vmem:[#allocation54_spill] sm:$0xff] %v5847_v32  ;;  %2647 = vperm.xlu1 %5157, %v5114_v8   ;;  %2643 = vperm.xlu0 %5156, %v5113_v31   ;;  %v5122_v7 = vld [vmem:[%s8261_s3 + $0x47] ss:$0 sm:$0xff]  ;;  %v5121_v8 = vld [vmem:[%s8261_s3 + $0x46] ss:$0 sm:$0xff] }
 0x14a   : > { %v5855_v15 = vpop.permute.xlu1 %1700  ;;  %v5857_v40 = vpop.permute.xlu0 %1696 }
 0x14b   : > { %8448 = vst [vmem:[#allocation55_spill] sm:$0xff] %v5855_v15  ;;  %8449 = vst [vmem:[#allocation56_spill] sm:$0xff] %v5857_v40  ;;  %2692 = vperm.xlu1 %5157, %v5120_v47   ;;  %2688 = vperm.xlu0 %5156, %v5119_v16   ;;  %v5128_v15 = vld [vmem:[%s8261_s3 + $0x69] ss:$0 sm:$0xff]  ;;  %v5127_v47 = vld [vmem:[%s8261_s3 + $0x68] ss:$0 sm:$0xff] }
 0x14e   : > { %v5865_v31 = vpop.permute.xlu1 %1708  ;;  %v5867_v32 = vpop.permute.xlu0 %1704 }
 0x14f   : > { %8450 = vst [vmem:[#allocation57_spill] sm:$0xff] %v5865_v31  ;;  %8451 = vst [vmem:[#allocation58_spill] sm:$0xff] %v5867_v32  ;;  %2700 = vperm.xlu1 %5157, %v5122_v7   ;;  %2696 = vperm.xlu0 %5156, %v5121_v8   ;;  %v5130_v31 = vld [vmem:[%s8261_s3 + $0x6b] ss:$0 sm:$0xff]  ;;  %v5129_v7 = vld [vmem:[%s8261_s3 + $0x6a] ss:$0 sm:$0xff] }
 0x150   : > { %v5887_v32 = vld [vmem:[#allocation2 + $0x18] sm:$0xff] }
 0x151   : > { %v1218_v54 = vmul.f32 %v5645_v11, %v5887_v32 }
 0x152   : > { %v5875_v16 = vpop.permute.xlu1 %1765  ;;  %v5877_v40 = vpop.permute.xlu0 %1761 }
 0x153   : > { %8452 = vst [vmem:[#allocation59_spill] sm:$0xff] %v5875_v16  ;;  %8453 = vst [vmem:[#allocation60_spill] sm:$0xff] %v5877_v40  ;;  %2757 = vperm.xlu1 %5157, %v5128_v15   ;;  %2753 = vperm.xlu0 %5156, %v5127_v47   ;;  %v5893_v16 = vld [vmem:[#allocation2] sm:$0xff]  ;;  %v5136_v15 = vld [vmem:[%s8261_s3 + $0x8d] ss:$0 sm:$0xff] }
 0x154   : > { %v5135_v47 = vld [vmem:[%s8261_s3 + $0x8c] ss:$0 sm:$0xff]  ;;  %v1162_v21 = vmul.f32 %v5627_v60, %v5893_v16  ;;  %v1165_v42 = vmul.f32 %v5625_v59, %v5893_v16 }
 0x155   : > { %v5901_v40 = vld [vmem:[#allocation2 + $0x8] sm:$0xff] }
 0x156   : > { %v5885_v8 = vpop.permute.xlu1 %1773  ;;  %v5891_v55 = vpop.permute.xlu0 %1769  ;;  %v1163_v22 = vmul.f32 %v5627_v60, %v5901_v40  ;;  %v1230_v10 = vadd.f32 %v1218_v54, %v1165_v42  ;;  %v1284_v54 = vmul.f32 %v5665_v27, %v5905_v63 }
 0x157   : > { %8454 = vst [vmem:[#allocation61_spill] sm:$0xff] %v5885_v8  ;;  %8455 = vst [vmem:[#allocation62_spill] sm:$0xff] %v5891_v55  ;;  %2765 = vperm.xlu1 %5157, %v5130_v31   ;;  %2761 = vperm.xlu0 %5156, %v5129_v7   ;;  %v5903_v8 = vld [vmem:[#allocation2 + $0x30] sm:$0xff]  ;;  %v1215_v31 = vmul.f32 %v5647_v12, %v5887_v32  ;;  %v1216_v7 = vmul.f32 %v5647_v12, %v5889_v48 }
 0x158   : > { %v1280_v17 = vmul.f32 %v5667_v28, %v5903_v8 }
 0x159   : > { %v1227_v45 = vadd.f32 %v1215_v31, %v1162_v21  ;;  %v1228_v50 = vadd.f32 %v1216_v7, %v1163_v22  ;;  %v1282_v21 = vmul.f32 %v5667_v28, %v5938_v18  ;;  %v1283_v22 = vmul.f32 %v5665_v27, %v5903_v8 }
 0x15a   : > { %v5913_v55 = vpop.permute.xlu1 %1830  ;;  %v5919_v24 = vpop.permute.xlu0 %1826 }
 0x15b   : > { %8456 = vst [vmem:[#allocation63_spill] sm:$0xff] %v5913_v55  ;;  %8457 = vst [vmem:[#allocation64_spill] sm:$0xff] %v5919_v24  ;;  %2822 = vperm.xlu1 %5157, %v5136_v15   ;;  %v1281_v55 = vmul.f32 %v5667_v28, %v5905_v63  ;;  %2818 = vperm.xlu0 %5156, %v5135_v47   ;;  %v5138_v24 = vld [vmem:[%s8261_s3 + $0x8f] ss:$0 sm:$0xff]  ;;  %v1217_v15 = vmul.f32 %v5647_v12, %v5907_v23 }
 0x15c   : > { %v1345_v47 = vmul.f32 %v5687_v44, %v5915_v39  ;;  %v1164_v12 = vmul.f32 %v5627_v60, %v5921_v53  ;;  %v1292_v31 = vadd.f32 %v1280_v17, %v1227_v45  ;;  %v1220_v60 = vmul.f32 %v5645_v11, %v5907_v23 }
 0x15d   : > { %v1293_v7 = vadd.f32 %v1281_v55, %v1228_v50  ;;  %v1348_v28 = vmul.f32 %v5685_v43, %v5915_v39  ;;  %v1167_v45 = vmul.f32 %v5625_v59, %v5921_v53  ;;  %v1285_v50 = vmul.f32 %v5665_v27, %v5938_v18 }
 0x15e   : > { %v5947_v41 = vpop.permute.xlu1 %1838  ;;  %v5955_v14 = vpop.permute.xlu0 %1834  ;;  %v1229_v9 = vadd.f32 %v1217_v15, %v1164_v12  ;;  %v1357_v17 = vadd.f32 %v1345_v47, %v1292_v31  ;;  %v1350_v47 = vmul.f32 %v5685_v43, %v5953_v13  ;;  %v1168_v12 = vmul.f32 %v5637_v4, %v5893_v16 }
 0x15f   : > { %8458 = vst [vmem:[#allocation65_spill] sm:$0xff] %v5947_v41  ;;  %8459 = vst [vmem:[#allocation66_spill] sm:$0xff] %v5955_v14  ;;  %2830 = vperm.xlu1 %5157, %v5138_v24   ;;  %2826 = vperm.xlu0 %5156, %v5137_v49   ;;  %v1219_v41 = vmul.f32 %v5645_v11, %v5889_v48  ;;  %v1347_v24 = vmul.f32 %v5687_v44, %v5953_v13 }
 0x160   : > { %v1358_v37 = vadd.f32 %v1346_v46, %v1293_v7  ;;  %v1166_v49 = vmul.f32 %v5625_v59, %v5901_v40  ;;  %v1294_v11 = vadd.f32 %v1282_v21, %v1229_v9  ;;  %v1295_v44 = vadd.f32 %v1283_v22, %v1230_v10 }
 0x161   : > { %v1221_v46 = vmul.f32 %v5657_v20, %v5887_v32  ;;  %v1222_v59 = vmul.f32 %v5657_v20, %v5889_v48  ;;  %v1232_v55 = vadd.f32 %v1220_v60, %v1167_v45  ;;  %v1349_v9 = vmul.f32 %v5685_v43, %v5917_v58 }
 0x162   : > { %v5969_v14 = vpop.permute.xlu1 %1895  ;;  %v5977_v42 = vpop.permute.xlu0 %1891  ;;  %v1231_v15 = vadd.f32 %v1219_v41, %v1166_v49  ;;  %v1360_v27 = vadd.f32 %v1348_v28, %v1295_v44  ;;  %v1169_v21 = vmul.f32 %v5637_v4, %v5901_v40  ;;  %v1286_v22 = vmul.f32 %v5677_v36, %v5903_v8 }
 0x163   : > { %2871 = vrot.lane.b32.xlu1 %v1358_v37, %s5185_s16  ;;  %2869 = vrot.lane.b32.xlu0 %v1357_v17, %s5185_s16  ;;  %v1359_v37 = vadd.f32 %v1347_v24, %v1294_v11  ;;  %v1287_v31 = vmul.f32 %v5677_v36, %v5905_v63  ;;  %v1297_v7 = vadd.f32 %v1285_v50, %v1232_v55 }
 0x164   : > { %v1296_v43 = vadd.f32 %v1284_v54, %v1231_v15  ;;  %v1223_v60 = vmul.f32 %v5657_v20, %v5907_v23  ;;  %v1224_v24 = vmul.f32 %v5655_v19, %v5887_v32  ;;  %v1233_v28 = vadd.f32 %v1221_v46, %v1168_v12 }
 0x165   : > { %v1234_v17 = vadd.f32 %v1222_v59, %v1169_v21  ;;  %v1351_v45 = vmul.f32 %v5697_v52, %v5915_v39  ;;  %v1352_v49 = vmul.f32 %v5697_v52, %v5917_v58  ;;  %v1362_v54 = vadd.f32 %v1350_v47, %v1297_v7 }
 0x166   : > { %v5991_v10 = vpop.permute.xlu1 %1903  ;;  %v5999_v41 = vpop.permute.xlu0 %1899  ;;  %v1361_v11 = vadd.f32 %v1349_v9, %v1296_v43  ;;  %v1170_v44 = vmul.f32 %v5637_v4, %v5921_v53  ;;  %v1171_v20 = vmul.f32 %v5635_v3, %v5893_v16  ;;  %v1288_v46 = vmul.f32 %v5677_v36, %v5938_v18 }
 0x167   : > { %8460 = vst [vmem:[#allocation67_spill] sm:$0xff] %v5991_v10  ;;  %2875 = vrot.lane.b32.xlu1 %v1360_v27, %s5185_s16  ;;  %2873 = vrot.lane.b32.xlu0 %v1359_v37, %s5185_s16  ;;  %v1289_v55 = vmul.f32 %v5675_v35, %v5903_v8  ;;  %v1298_v15 = vadd.f32 %v1286_v22, %v1233_v28 }
 0x168   : > { %v1299_v27 = vadd.f32 %v1287_v31, %v1234_v17  ;;  %v1226_v4 = vmul.f32 %v5655_v19, %v5907_v23  ;;  %v1225_v47 = vmul.f32 %v5655_v19, %v5889_v48  ;;  %v1235_v9 = vadd.f32 %v1223_v60, %v1170_v44 }
 0x169   : > { %v1236_v37 = vadd.f32 %v1224_v24, %v1171_v20  ;;  %v1353_v36 = vmul.f32 %v5697_v52, %v5953_v13  ;;  %v1354_v12 = vmul.f32 %v5695_v51, %v5915_v39  ;;  %v1363_v31 = vadd.f32 %v1351_v45, %v1298_v15 }
 0x16a   : > { %v6013_v50 = vpop.permute.xlu1 %1948  ;;  %v6021_v59 = vpop.permute.xlu0 %1944  ;;  %v1364_v22 = vadd.f32 %v1352_v49, %v1299_v27  ;;  %v1173_v7 = vmul.f32 %v5635_v3, %v5921_v53  ;;  %v1172_v43 = vmul.f32 %v5635_v3, %v5901_v40  ;;  %v1291_v19 = vmul.f32 %v5675_v35, %v5938_v18 }
 0x16b   : > { %2879 = vrot.lane.b32.xlu1 %v1362_v54, %s5185_s16  ;;  %2877 = vrot.lane.b32.xlu0 %v1361_v11, %s5185_s16  ;;  %v1290_v52 = vmul.f32 %v5675_v35, %v5905_v63  ;;  %v1300_v24 = vadd.f32 %v1288_v46, %v1235_v9  ;;  %v1301_v28 = vadd.f32 %v1289_v55, %v1236_v37 }
 0x16c   : > { %v1238_v17 = vadd.f32 %v1226_v4, %v1173_v7  ;;  %v1237_v45 = vadd.f32 %v1225_v47, %v1172_v43  ;;  %v1356_v49 = vmul.f32 %v5695_v51, %v5953_v13  ;;  %v1355_v3 = vmul.f32 %v5695_v51, %v5917_v58 }
 0x16d   : > { %v1366_v11 = vadd.f32 %v1354_v12, %v1301_v28  ;;  %v1365_v44 = vadd.f32 %v1353_v36, %v1300_v24 }
 0x16e   : > { %v6035_v21 = vpop.permute.xlu1 %1956  ;;  %v6043_v60 = vpop.permute.xlu0 %1952  ;;  %v1303_v35 = vadd.f32 %v1291_v19, %v1238_v17  ;;  %v1302_v46 = vadd.f32 %v1290_v52, %v1237_v45 }
 0x16f   : > { %8461 = vst [vmem:[#allocation68_spill] sm:$0xff] %v6035_v21  ;;  %2883 = vrot.lane.b32.xlu1 %v1364_v22, %s5185_s16  ;;  %2881 = vrot.lane.b32.xlu0 %v1363_v31, %s5185_s16 }
 0x170   : > { %v1368_v15 = vadd.f32 %v1356_v49, %v1303_v35  ;;  %v1367_v27 = vadd.f32 %v1355_v3, %v1302_v46 }
 0x172   : > { %v6053_v54 = vpop.permute.xlu1 %2013  ;;  %v6055_v20 = vpop.permute.xlu0 %2009 }
 0x173   : > { %2887 = vrot.lane.b32.xlu1 %v1366_v11, %s5185_s16  ;;  %2885 = vrot.lane.b32.xlu0 %v1365_v44, %s5185_s16 }
 0x176   : > { %v6059_v55 = vpop.permute.xlu1 %2021  ;;  %v6061_v4 = vpop.permute.xlu0 %2017 }
 0x177   : > { %8462 = vst [vmem:[#allocation69_spill] sm:$0xff] %v6059_v55  ;;  %2891 = vrot.lane.b32.xlu1 %v1368_v15, %s5185_s16  ;;  %2889 = vrot.lane.b32.xlu0 %v1367_v27, %s5185_s16 }
 0x17a   : > { %v6065_v51 = vpop.permute.xlu1 %2078  ;;  %v6067_v47 = vpop.permute.xlu0 %2074 }
 0x17e   : > { %v6069_v9 = vpop.permute.xlu1 %2086  ;;  %v6071_v37 = vpop.permute.xlu0 %2082 }
 0x17f   : > { %8463 = vst [vmem:[#allocation70_spill] sm:$0xff] %v6069_v9 }
 0x182   : > { %v6073_v36 = vpop.permute.xlu1 %2143  ;;  %v6075_v12 = vpop.permute.xlu0 %2139 }
 0x183   : > { %8464 = vst [vmem:[#allocation71_spill] sm:$0xff] %v6073_v36  ;;  %8465 = vst [vmem:[#allocation72_spill] sm:$0xff] %v6075_v12 }
 0x186   : > { %v6077_v22 = vpop.permute.xlu1 %2151  ;;  %v6079_v31 = vpop.permute.xlu0 %2147 }
 0x187   : > { %8466 = vst [vmem:[#allocation73_spill] sm:$0xff] %v6077_v22  ;;  %8467 = vst [vmem:[#allocation74_spill] sm:$0xff] %v6079_v31 }
 0x18a   : > { %v6081_v7 = vpop.permute.xlu1 %2196  ;;  %v6083_v43 = vpop.permute.xlu0 %2192 }
 0x18b   : > { %8468 = vst [vmem:[#allocation75_spill] sm:$0xff] %v6081_v7  ;;  %8469 = vst [vmem:[#allocation76_spill] sm:$0xff] %v6083_v43 }
 0x18e   : > { %v6085_v19 = vpop.permute.xlu1 %2204  ;;  %v6087_v52 = vpop.permute.xlu0 %2200 }
 0x18f   : > { %8470 = vst [vmem:[#allocation77_spill] sm:$0xff] %v6085_v19  ;;  %8471 = vst [vmem:[#allocation78_spill] sm:$0xff] %v6087_v52 }
 0x192   : > { %v6089_v24 = vpop.permute.xlu1 %2261  ;;  %v6091_v28 = vpop.permute.xlu0 %2257 }
 0x193   : > { %8472 = vst [vmem:[#allocation79_spill] sm:$0xff] %v6089_v24  ;;  %8473 = vst [vmem:[#allocation80_spill] sm:$0xff] %v6091_v28 }
 0x196   : > { %v6093_v17 = vpop.permute.xlu1 %2269  ;;  %v6095_v45 = vpop.permute.xlu0 %2265 }
 0x197   : > { %8474 = vst [vmem:[#allocation81_spill] sm:$0xff] %v6093_v17  ;;  %8475 = vst [vmem:[#allocation82_spill] sm:$0xff] %v6095_v45 }
 0x19a   : > { %v6097_v49 = vpop.permute.xlu1 %2326  ;;  %v6099_v3 = vpop.permute.xlu0 %2322 }
 0x19b   : > { %8476 = vst [vmem:[#allocation83_spill] sm:$0xff] %v6097_v49  ;;  %8477 = vst [vmem:[#allocation84_spill] sm:$0xff] %v6099_v3 }
 0x19e   : > { %v6101_v11 = vpop.permute.xlu1 %2334  ;;  %v6103_v44 = vpop.permute.xlu0 %2330 }
 0x19f   : > { %8478 = vst [vmem:[#allocation85_spill] sm:$0xff] %v6101_v11  ;;  %8479 = vst [vmem:[#allocation86_spill] sm:$0xff] %v6103_v44 }
 0x1a2   : > { %v6105_v35 = vpop.permute.xlu1 %2391  ;;  %v6107_v46 = vpop.permute.xlu0 %2387 }
 0x1a3   : > { %8480 = vst [vmem:[#allocation87_spill] sm:$0xff] %v6105_v35  ;;  %8481 = vst [vmem:[#allocation88_spill] sm:$0xff] %v6107_v46 }
 0x1a6   : > { %v6109_v15 = vpop.permute.xlu1 %2399  ;;  %v6111_v27 = vpop.permute.xlu0 %2395 }
 0x1a7   : > { %8482 = vst [vmem:[#allocation89_spill] sm:$0xff] %v6109_v15  ;;  %8483 = vst [vmem:[#allocation90_spill] sm:$0xff] %v6111_v27 }
 0x1aa   : > { %v6113_v28 = vpop.permute.xlu1 %2444  ;;  %v6115_v17 = vpop.permute.xlu0 %2440 }
 0x1ab   : > { %8484 = vst [vmem:[#allocation91_spill] sm:$0xff] %v6113_v28  ;;  %8485 = vst [vmem:[#allocation92_spill] sm:$0xff] %v6115_v17 }
 0x1ae   : > { %v6117_v45 = vpop.permute.xlu1 %2452  ;;  %v6119_v49 = vpop.permute.xlu0 %2448 }
 0x1af   : > { %8486 = vst [vmem:[#allocation93_spill] sm:$0xff] %v6117_v45  ;;  %8487 = vst [vmem:[#allocation94_spill] sm:$0xff] %v6119_v49 }
 0x1b2   : > { %v6121_v3 = vpop.permute.xlu1 %2509  ;;  %v6123_v11 = vpop.permute.xlu0 %2505 }
 0x1b3   : > { %8488 = vst [vmem:[#allocation95_spill] sm:$0xff] %v6121_v3  ;;  %8489 = vst [vmem:[#allocation96_spill] sm:$0xff] %v6123_v11 }
 0x1b6   : > { %v6125_v44 = vpop.permute.xlu1 %2517  ;;  %v6127_v35 = vpop.permute.xlu0 %2513 }
 0x1b7   : > { %8490 = vst [vmem:[#allocation97_spill] sm:$0xff] %v6125_v44  ;;  %8491 = vst [vmem:[#allocation98_spill] sm:$0xff] %v6127_v35 }
 0x1ba   : > { %v6129_v46 = vpop.permute.xlu1 %2574  ;;  %v6131_v15 = vpop.permute.xlu0 %2570 }
 0x1bb   : > { %8492 = vst [vmem:[#allocation99_spill] sm:$0xff] %v6129_v46  ;;  %8493 = vst [vmem:[#allocation100_spill] sm:$0xff] %v6131_v15 }
 0x1be   : > { %v6133_v27 = vpop.permute.xlu1 %2582  ;;  %v6135_v28 = vpop.permute.xlu0 %2578 }
 0x1bf   : > { %8494 = vst [vmem:[#allocation101_spill] sm:$0xff] %v6133_v27  ;;  %8495 = vst [vmem:[#allocation102_spill] sm:$0xff] %v6135_v28 }
 0x1c2   : > { %v2640_v17 = vpop.permute.xlu1 %2639  ;;  %v2636_v45 = vpop.permute.xlu0 %2635 }
 0x1c3   : > { %v2653_v46 = vmul.f32 %v2640_v17, %v5893_v16  ;;  %v2654_v15 = vmul.f32 %v2640_v17, %v5901_v40  ;;  %v2655_v27 = vmul.f32 %v2640_v17, %v5921_v53  ;;  %v2650_v38 = vmul.f32 %v2636_v45, %v5893_v16 }
 0x1c4   : > { %v2651_v33 = vmul.f32 %v2636_v45, %v5901_v40  ;;  %v2652_v6 = vmul.f32 %v2636_v45, %v5921_v53 }
 0x1c6   : > { %v6137_v24 = vpop.permute.xlu1 %2647  ;;  %v2644_v49 = vpop.permute.xlu0 %2643 }
 0x1c7   : > { %v6159_v1 = vmul.f32 %v6137_v24, %v5893_v16  ;;  %v2657_v2 = vmul.f32 %v2644_v49, %v5901_v40  ;;  %v2658_v0 = vmul.f32 %v2644_v49, %v5921_v53 }
 0x1ca   : > { %v2693_v3 = vpop.permute.xlu1 %2692  ;;  %v2689_v52 = vpop.permute.xlu0 %2688 }
 0x1cb   : > { %v2703_v28 = vmul.f32 %v2689_v52, %v5887_v32  ;;  %v2704_v31 = vmul.f32 %v2689_v52, %v5889_v48  ;;  %v2706_v43 = vmul.f32 %v2693_v3, %v5887_v32  ;;  %v2707_v22 = vmul.f32 %v2693_v3, %v5889_v48 }
 0x1cc   : > { %v2708_v7 = vmul.f32 %v2693_v3, %v5907_v23  ;;  %v2705_v12 = vmul.f32 %v2689_v52, %v5907_v23  ;;  %v2656_v3 = vmul.f32 %v2644_v49, %v5893_v16 }
 0x1cd   : > { %v2715_v29 = vadd.f32 %v2703_v28, %v2650_v38  ;;  %v2716_v30 = vadd.f32 %v2704_v31, %v2651_v33  ;;  %v2718_v25 = vadd.f32 %v2706_v43, %v2653_v46  ;;  %v2719_v26 = vadd.f32 %v2707_v22, %v2654_v15 }
 0x1ce   : > { %v6139_v11 = vpop.permute.xlu1 %2700  ;;  %v2697_v44 = vpop.permute.xlu0 %2696  ;;  %v2720_v61 = vadd.f32 %v2708_v7, %v2655_v27  ;;  %v2717_v62 = vadd.f32 %v2705_v12, %v2652_v6 }
 0x1cf   : > { %v2709_v38 = vmul.f32 %v2697_v44, %v5887_v32  ;;  %v2710_v31 = vmul.f32 %v2697_v44, %v5889_v48  ;;  %v2711_v28 = vmul.f32 %v2697_v44, %v5907_v23 }
 0x1d2   : > { %v2758_v19 = vpop.permute.xlu1 %2757  ;;  %v2754_v35 = vpop.permute.xlu0 %2753 }
 0x1d3   : > { %v2768_v17 = vmul.f32 %v2754_v35, %v5903_v8  ;;  %v2769_v34 = vmul.f32 %v2754_v35, %v5905_v63  ;;  %v2770_v52 = vmul.f32 %v2754_v35, %v5938_v18  ;;  %v2771_v45 = vmul.f32 %v2758_v19, %v5903_v8 }
 0x1d4   : > { %v2772_v57 = vmul.f32 %v2758_v19, %v5905_v63  ;;  %v2773_v6 = vmul.f32 %v2758_v19, %v5938_v18 }
 0x1d5   : > { %v2780_v9 = vadd.f32 %v2768_v17, %v2715_v29  ;;  %v2781_v55 = vadd.f32 %v2769_v34, %v2716_v30  ;;  %v2782_v35 = vadd.f32 %v2770_v52, %v2717_v62  ;;  %v2712_v62 = vmul.f32 %v6139_v11, %v5887_v32 }
 0x1d6   : > { %v6150_v36 = vpop.permute.xlu1 %2765  ;;  %v2762_v5 = vpop.permute.xlu0 %2761  ;;  %v2783_v7 = vadd.f32 %v2771_v45, %v2718_v25  ;;  %v2784_v43 = vadd.f32 %v2772_v57, %v2719_v26  ;;  %v2785_v17 = vadd.f32 %v2773_v6, %v2720_v61  ;;  %v2713_v61 = vmul.f32 %v6139_v11, %v5889_v48 }
 0x1d7   : > { %v2774_v19 = vmul.f32 %v2762_v5, %v5903_v8  ;;  %v2775_v46 = vmul.f32 %v2762_v5, %v5905_v63  ;;  %v2723_v45 = vadd.f32 %v2711_v28, %v2658_v0  ;;  %v2778_v0 = vmul.f32 %v6150_v36, %v5905_v63 }
 0x1d8   : > { %v2724_v28 = vadd.f32 %v2712_v62, %v6159_v1 }
 0x1da   : > { %v2823_v56 = vpop.permute.xlu1 %2822  ;;  %v2819_v10 = vpop.permute.xlu0 %2818 }
 0x1db   : > { %v2833_v21 = vmul.f32 %v2819_v10, %v5915_v39  ;;  %v2834_v49 = vmul.f32 %v2819_v10, %v5917_v58  ;;  %v2835_v33 = vmul.f32 %v2819_v10, %v5953_v13  ;;  %v2836_v12 = vmul.f32 %v2823_v56, %v5915_v39 }
 0x1dc   : > { %v2837_v22 = vmul.f32 %v2823_v56, %v5917_v58  ;;  %v2838_v10 = vmul.f32 %v2823_v56, %v5953_v13 }
 0x1dd   : > { %v2845_v29 = vadd.f32 %v2833_v21, %v2780_v9  ;;  %v2846_v30 = vadd.f32 %v2834_v49, %v2781_v55  ;;  %v2847_v34 = vadd.f32 %v2835_v33, %v2782_v35  ;;  %v2848_v52 = vadd.f32 %v2836_v12, %v2783_v7 }
 0x1de   : > { %v2827_v15 = vpop.permute.xlu0 %2826  ;;  %v2849_v21 = vadd.f32 %v2837_v22, %v2784_v43  ;;  %v2721_v9 = vadd.f32 %v2709_v38, %v2656_v3  ;;  %v2722_v35 = vadd.f32 %v2710_v31, %v2657_v2  ;;  %v2776_v49 = vmul.f32 %v2762_v5, %v5938_v18 }
 0x1df   : > { %v2986_v27 = vrot.slane %v2845_v29, 7  ;;  %v2987_v55 = vrot.slane %v2846_v30, 7  ;;  %v2989_v57 = vrot.slane %v2847_v34, 7  ;;  %v2850_v56 = vadd.f32 %v2838_v10, %v2785_v17  ;;  %v2831_v29 = vpop.permute.xlu1 %2830 }
 0x1e0   : > { %v2839_v25 = vmul.f32 %v2827_v15, %v5915_v39  ;;  %v2840_v26 = vmul.f32 %v2827_v15, %v5917_v58  ;;  %v2786_v33 = vadd.f32 %v2774_v19, %v2721_v9  ;;  %v2787_v6 = vadd.f32 %v2775_v46, %v2722_v35 }
 0x1e1   : > { %3006 = vrot.lane.b32.xlu0 %v2986_v27, %s5185_s16  ;;  %v2988_v44 = vsel %vm2929_vm5, %v2986_v27, %v2987_v55  ;;  %v2841_v2 = vmul.f32 %v2827_v15, %v5953_v13  ;;  %v2990_v5 = vsel %vm2929_vm5, %v2987_v55, %v2989_v57  ;;  %v2991_v3 = vrot.slane %v2848_v52, 7 }
 0x1e2   : > { %3008 = vrot.lane.b32.xlu1 %v2988_v44, %s5185_s16  ;;  %v2992_v38 = vrot.slane %v2849_v21, 7  ;;  %v2660_v12 = vmul.f32 %v6137_v24, %v5901_v40  ;;  %v2714_v22 = vmul.f32 %v6139_v11, %v5907_v23  ;;  %v2777_v31 = vmul.f32 %v6150_v36, %v5903_v8 }
 0x1e3   : > { %v2788_v30 = vadd.f32 %v2776_v49, %v2723_v45  ;;  %v2851_v34 = vadd.f32 %v2839_v25, %v2786_v33  ;;  %v2852_v7 = vadd.f32 %v2840_v26, %v2787_v6  ;;  %v2994_v43 = vrot.slane %v2850_v56, 7 }
 0x1e4   : > { %v2661_v10 = vmul.f32 %v6137_v24, %v5921_v53  ;;  %v2725_v19 = vadd.f32 %v2713_v61, %v2660_v12  ;;  %v2779_v11 = vmul.f32 %v6150_v36, %v5938_v18  ;;  %v2842_v46 = vmul.f32 %v2831_v29, %v5915_v39 }
 0x1e5   : > { %3010 = vrot.lane.b32.xlu0 %v2990_v5, %s5185_s16  ;;  %v2843_v15 = vmul.f32 %v2831_v29, %v5917_v58  ;;  %v2853_v27 = vadd.f32 %v2841_v2, %v2788_v30  ;;  %v2993_v17 = vsel %vm2929_vm5, %v2991_v3, %v2992_v38  ;;  %v2789_v21 = vadd.f32 %v2777_v31, %v2724_v28 }
 0x1e6   : > { %3012 = vrot.lane.b32.xlu1 %v2991_v3, %s5185_s16  ;;  %v2726_v52 = vadd.f32 %v2714_v22, %v2661_v10  ;;  %v2790_v55 = vadd.f32 %v2778_v0, %v2725_v19  ;;  %v2844_v1 = vmul.f32 %v2831_v29, %v5953_v13  ;;  %v2995_v24 = vsel %vm2929_vm5, %v2992_v38, %v2994_v43 }
 0x1e7   : > { %v2996_v62 = vrot.slane %v2851_v34, 7  ;;  %v2997_v36 = vrot.slane %v2852_v7, 7  ;;  %v2854_v35 = vadd.f32 %v2842_v46, %v2789_v21  ;;  %v2999_v57 = vrot.slane %v2853_v27, 7 }
 0x1e8   : > { %v2791_v9 = vadd.f32 %v2779_v11, %v2726_v52  ;;  %v2855_v49 = vadd.f32 %v2843_v15, %v2790_v55  ;;  %v1959_v26 = vmul.f32 %v6021_v59, %v5887_v32  ;;  %v1906_v33 = vmul.f32 %v5977_v42, %v5893_v16 }
 0x1e9   : > { %3014 = vrot.lane.b32.xlu0 %v2993_v17, %s5185_s16  ;;  %v2998_v25 = vsel %vm2929_vm5, %v2996_v62, %v2997_v36  ;;  %v3000_v44 = vsel %vm2929_vm5, %v2997_v36, %v2999_v57  ;;  %v3001_v61 = vrot.slane %v2854_v35, 7  ;;  %v1960_v6 = vmul.f32 %v6021_v59, %v5889_v48 }
 0x1ea   : > { %3016 = vrot.lane.b32.xlu1 %v2995_v24, %s5185_s16  ;;  %v2856_v56 = vadd.f32 %v2844_v1, %v2791_v9  ;;  %v3002_v45 = vrot.slane %v2855_v49, 7  ;;  %v2024_v2 = vmul.f32 %v6055_v20, %v5903_v8  ;;  %v1961_v5 = vmul.f32 %v6021_v59, %v5907_v23 }
 0x1eb   : > { %v1907_v38 = vmul.f32 %v5977_v42, %v5901_v40  ;;  %v1971_v12 = vadd.f32 %v1959_v26, %v1906_v33  ;;  %v2025_v22 = vmul.f32 %v6055_v20, %v5905_v63  ;;  %v2089_v31 = vmul.f32 %v6067_v47, %v5915_v39 }
 0x1ec   : > { %v3004_v3 = vrot.slane %v2856_v56, 7  ;;  %v1908_v0 = vmul.f32 %v5977_v42, %v5921_v53  ;;  %v1962_v29 = vmul.f32 %v6013_v50, %v5887_v32  ;;  %v3003_v59 = vsel %vm2929_vm5, %v3001_v61, %v3002_v45 }
 0x1ed   : > { %3018 = vrot.lane.b32.xlu0 %v2996_v62, %s5185_s16  ;;  %v1972_v30 = vadd.f32 %v1960_v6, %v1907_v38  ;;  %v2026_v34 = vmul.f32 %v6055_v20, %v5938_v18  ;;  %v2036_v7 = vadd.f32 %v2024_v2, %v1971_v12  ;;  %v2090_v43 = vmul.f32 %v6067_v47, %v5917_v58  ;;  %v8496_v38 = vld [vmem:[#allocation68_spill] sm:$0xff] }
 0x1ee   : > { %3020 = vrot.lane.b32.xlu1 %v2998_v25, %s5185_s16  ;;  %v1909_v10 = vmul.f32 %v5969_v14, %v5893_v16  ;;  %v1963_v42 = vmul.f32 %v6013_v50, %v5889_v48  ;;  %v1973_v28 = vadd.f32 %v1961_v5, %v1908_v0  ;;  %v3005_v19 = vsel %vm2929_vm5, %v3002_v45, %v3004_v3 }
 0x1ef   : > { %v2027_v11 = vmul.f32 %v6053_v54, %v5903_v8  ;;  %v2037_v46 = vadd.f32 %v2025_v22, %v1972_v30  ;;  %v2091_v20 = vmul.f32 %v6067_v47, %v5953_v13  ;;  %v2101_v15 = vadd.f32 %v2089_v31, %v2036_v7  ;;  %v8498_v7 = vld [vmem:[#allocation69_spill] sm:$0xff] }
 0x1f0   : > { %v1910_v27 = vmul.f32 %v5969_v14, %v5901_v40  ;;  %v1964_v17 = vmul.f32 %v6013_v50, %v5907_v23  ;;  %v1974_v52 = vadd.f32 %v1962_v29, %v1909_v10  ;;  %v2028_v21 = vmul.f32 %v6053_v54, %v5905_v63 }
 0x1f1   : > { %3022 = vrot.lane.b32.xlu0 %v3000_v44, %s5185_s16  ;;  %v2038_v55 = vadd.f32 %v2026_v34, %v1973_v28  ;;  %v2092_v1 = vmul.f32 %v6065_v51, %v5915_v39  ;;  %v2102_v47 = vadd.f32 %v2090_v43, %v2037_v46  ;;  %v1911_v24 = vmul.f32 %v5969_v14, %v5921_v53 }
 0x1f2   : > { %3024 = vrot.lane.b32.xlu1 %v3001_v61, %s5185_s16  ;;  %v1975_v62 = vadd.f32 %v1963_v42, %v1910_v27  ;;  %v1965_v36 = vmul.f32 %v6043_v60, %v5887_v32  ;;  %v2029_v50 = vmul.f32 %v6053_v54, %v5938_v18  ;;  %v2039_v9 = vadd.f32 %v2027_v11, %v1974_v52 }
 0x1f3   : > { %v2093_v35 = vmul.f32 %v6065_v51, %v5917_v58  ;;  %v2103_v49 = vadd.f32 %v2091_v20, %v2038_v55  ;;  %v1912_v57 = vmul.f32 %v5999_v41, %v5893_v16  ;;  %v1976_v56 = vadd.f32 %v1964_v17, %v1911_v24 }
 0x1f4   : > { %v1966_v14 = vmul.f32 %v6043_v60, %v5889_v48  ;;  %v2040_v25 = vadd.f32 %v2028_v21, %v1975_v62  ;;  %v2030_v26 = vmul.f32 %v6061_v4, %v5903_v8  ;;  %v2094_v54 = vmul.f32 %v6065_v51, %v5953_v13 }
 0x1f5   : > { %3026 = vrot.lane.b32.xlu0 %v3003_v59, %s5185_s16  ;;  %v2104_v44 = vadd.f32 %v2092_v1, %v2039_v9  ;;  %v1913_v61 = vmul.f32 %v5999_v41, %v5901_v40  ;;  %v1967_v45 = vmul.f32 %v6043_v60, %v5907_v23  ;;  %v1977_v33 = vadd.f32 %v1965_v36, %v1912_v57  ;;  %v8497_v59 = vld [vmem:[#allocation67_spill] sm:$0xff]  ;;  %v8500_v57 = vld [vmem:[#allocation4_spill] sm:$0xff] }
 0x1f6   : > { %3028 = vrot.lane.b32.xlu1 %v3005_v19, %s5185_s16  ;;  %v2041_v6 = vadd.f32 %v2029_v50, %v1976_v56  ;;  %v2031_v2 = vmul.f32 %v6061_v4, %v5905_v63  ;;  %v2095_v5 = vmul.f32 %v6071_v37, %v5915_v39  ;;  %v2105_v51 = vadd.f32 %v2093_v35, %v2040_v25 }
 0x1f7   : > { %v1914_v3 = vmul.f32 %v5999_v41, %v5921_v53  ;;  %v1968_v12 = vmul.f32 %v8496_v38, %v5887_v32  ;;  %v1978_v22 = vadd.f32 %v1966_v14, %v1913_v61  ;;  %v2032_v60 = vmul.f32 %v6061_v4, %v5938_v18  ;;  %v8501_v14 = vld [vmem:[#allocation3_spill] sm:$0xff] }
 0x1f8   : > { %v2042_v31 = vadd.f32 %v2030_v26, %v1977_v33  ;;  %v2096_v0 = vmul.f32 %v6071_v37, %v5917_v58  ;;  %v2106_v29 = vadd.f32 %v2094_v54, %v2041_v6  ;;  %v1915_v30 = vmul.f32 %v8497_v59, %v5893_v16  ;;  %v8502_v26 = vld [vmem:[#allocation6_spill] sm:$0xff]  ;;  %v8506_v6 = vld [vmem:[#allocation19_spill] sm:$0xff] }
 0x1f9   : > { %3122 = vrot.lane.b32.xlu0 %v2101_v15, %s5185_s16  ;;  %v1969_v41 = vmul.f32 %v8496_v38, %v5889_v48  ;;  %v1979_v34 = vadd.f32 %v1967_v45, %v1914_v3  ;;  %v2033_v43 = vmul.f32 %v8498_v7, %v5903_v8  ;;  %v2043_v10 = vadd.f32 %v2031_v2, %v1978_v22  ;;  %v8499_v15 = vld [vmem:[#allocation70_spill] sm:$0xff]  ;;  %v8505_v45 = vld [vmem:[#allocation20_spill] sm:$0xff]  ;;  %v8508_v3 = vld [vmem:[#allocation21_spill] sm:$0xff] }
 0x1fa   : > { %3124 = vrot.lane.b32.xlu1 %v2102_v47, %s5185_s16  ;;  %v2097_v4 = vmul.f32 %v6071_v37, %v5953_v13  ;;  %v2107_v42 = vadd.f32 %v2095_v5, %v2042_v31  ;;  %v1916_v28 = vmul.f32 %v8497_v59, %v5901_v40  ;;  %v1970_v19 = vmul.f32 %v8496_v38, %v5907_v23  ;;  %v8507_v5 = vld [vmem:[#allocation22_spill] sm:$0xff] }
 0x1fb   : > { %v1980_v11 = vadd.f32 %v1968_v12, %v1915_v30  ;;  %v2034_v46 = vmul.f32 %v8498_v7, %v5905_v63  ;;  %v2044_v20 = vadd.f32 %v2032_v60, %v1979_v34  ;;  %v2098_v27 = vmul.f32 %v8499_v15, %v5915_v39  ;;  %v8509_v12 = vld [vmem:[#allocation36_spill] sm:$0xff] }
 0x1fc   : > { %v2108_v37 = vadd.f32 %v2096_v0, %v2043_v10  ;;  %v1917_v17 = vmul.f32 %v8497_v59, %v5921_v53  ;;  %v1981_v52 = vadd.f32 %v1969_v41, %v1916_v28  ;;  %v2035_v21 = vmul.f32 %v8498_v7, %v5938_v18 }
 0x1fd   : > { %3126 = vrot.lane.b32.xlu0 %v2103_v49, %s5185_s16  ;;  %v2045_v55 = vadd.f32 %v2033_v43, %v1980_v11  ;;  %v2099_v1 = vmul.f32 %v8499_v15, %v5917_v58  ;;  %v2109_v47 = vadd.f32 %v2097_v4, %v2044_v20  ;;  %v2100_v36 = vmul.f32 %v8499_v15, %v5953_v13  ;;  %v8514_v15 = vld [vmem:[#allocation7_spill] sm:$0xff] }
 0x1fe   : > { %3128 = vrot.lane.b32.xlu1 %v2104_v44, %s5185_s16  ;;  %v1982_v24 = vadd.f32 %v1970_v19, %v1917_v17  ;;  %v2046_v62 = vadd.f32 %v2034_v46, %v1981_v52  ;;  %v6333_v56 = vmul.f32 %v8500_v57, %v5921_v53  ;;  %v6337_v25 = vmul.f32 %v8501_v14, %v5921_v53  ;;  %v8503_v44 = vld [vmem:[#allocation5_spill] sm:$0xff]  ;;  %v8513_v46 = vld [vmem:[#allocation8_spill] sm:$0xff] }
 0x1ff   : > { %v2110_v50 = vadd.f32 %v2098_v27, %v2045_v55  ;;  %v6341_v54 = vmul.f32 %v8502_v26, %v5921_v53  ;;  %v6345_v61 = vmul.f32 %v8503_v44, %v5921_v53  ;;  %v916_v33 = vmul.f32 %v8505_v45, %v5921_v53  ;;  %v8517_v52 = vld [vmem:[#allocation9_spill] sm:$0xff]  ;;  %v8520_v55 = vld [vmem:[#allocation23_spill] sm:$0xff] }
 0x200   : > { %v2047_v9 = vadd.f32 %v2035_v21, %v1982_v24  ;;  %v2111_v35 = vadd.f32 %v2099_v1, %v2046_v62  ;;  %v919_v2 = vmul.f32 %v8506_v6, %v5921_v53  ;;  %v925_v38 = vmul.f32 %v8508_v3, %v5921_v53  ;;  %v8522_v62 = vld [vmem:[#allocation25_spill] sm:$0xff] }
 0x201   : > { %3130 = vrot.lane.b32.xlu0 %v2105_v51, %s5185_s16  ;;  %8504 = vst [vmem:[#allocation68_spill] sm:$0xff] %v6345_v61  ;;  %v922_v51 = vmul.f32 %v8507_v5, %v5921_v53  ;;  %v6357_v22 = vmul.f32 %v8509_v12, %v5921_v53  ;;  %v6361_v60 = vmul.f32 %v8500_v57, %v5893_v16 }
 0x202   : > { %3132 = vrot.lane.b32.xlu1 %v2106_v29, %s5185_s16  ;;  %v2112_v49 = vadd.f32 %v2100_v36, %v2047_v9  ;;  %v6365_v31 = vmul.f32 %v8500_v57, %v5901_v40  ;;  %v6369_v0 = vmul.f32 %v8501_v14, %v5893_v16  ;;  %v6373_v29 = vmul.f32 %v8501_v14, %v5901_v40 }
 0x203   : > { %8510 = vst [vmem:[#allocation67_spill] sm:$0xff] %v6357_v22  ;;  %v6377_v53 = vmul.f32 %v8502_v26, %v5893_v16  ;;  %v6381_v59 = vmul.f32 %v8502_v26, %v5901_v40  ;;  %v6385_v30 = vmul.f32 %v8503_v44, %v5893_v16  ;;  %v6389_v41 = vmul.f32 %v8503_v44, %v5901_v40 }
 0x204   : > { %v914_v34 = vmul.f32 %v8505_v45, %v5893_v16  ;;  %v915_v7 = vmul.f32 %v8505_v45, %v5901_v40  ;;  %v917_v43 = vmul.f32 %v8506_v6, %v5893_v16  ;;  %v918_v10 = vmul.f32 %v8506_v6, %v5901_v40 }
 0x205   : > { %3134 = vrot.lane.b32.xlu0 %v2107_v42, %s5185_s16  ;;  %8511 = vst [vmem:[#allocation69_spill] sm:$0xff] %v6389_v41  ;;  %v920_v4 = vmul.f32 %v8507_v5, %v5893_v16  ;;  %v921_v42 = vmul.f32 %v8507_v5, %v5901_v40  ;;  %v923_v28 = vmul.f32 %v8508_v3, %v5893_v16 }
 0x206   : > { %3136 = vrot.lane.b32.xlu1 %v2108_v37, %s5185_s16  ;;  %v924_v19 = vmul.f32 %v8508_v3, %v5901_v40  ;;  %v6409_v11 = vmul.f32 %v8509_v12, %v5893_v16  ;;  %v6413_v20 = vmul.f32 %v8513_v46, %v5907_v23  ;;  %v6417_v27 = vmul.f32 %v8514_v15, %v5907_v23  ;;  %v8515_v37 = vld [vmem:[#allocation10_spill] sm:$0xff]  ;;  %v8519_v40 = vld [vmem:[#allocation24_spill] sm:$0xff] }
 0x207   : > { %v6421_v17 = vmul.f32 %v8515_v37, %v5907_v23  ;;  %v6425_v21 = vmul.f32 %v8517_v52, %v5907_v23  ;;  %v969_v16 = vmul.f32 %v8519_v40, %v5907_v23  ;;  %v972_v1 = vmul.f32 %v8520_v55, %v5907_v23 }
 0x208   : > { %8512 = vst [vmem:[#allocation70_spill] sm:$0xff] %v6409_v11  ;;  %v978_v36 = vmul.f32 %v8522_v62, %v5907_v23  ;;  %v720_v9 = vmul.f32 %v8513_v46, %v5889_v48  ;;  %v967_v57 = vmul.f32 %v8519_v40, %v5887_v32  ;;  %v970_v14 = vmul.f32 %v8520_v55, %v5887_v32 }
 0x209   : > { %3138 = vrot.lane.b32.xlu0 %v2109_v47, %s5185_s16  ;;  %8516 = vst [vmem:[#allocation4_spill] sm:$0xff] %v6421_v17  ;;  %8518 = vst [vmem:[#allocation3_spill] sm:$0xff] %v6425_v21  ;;  %v8521_v47 = vld [vmem:[#allocation26_spill] sm:$0xff]  ;;  %v971_v26 = vmul.f32 %v8520_v55, %v5889_v48  ;;  %v976_v6 = vmul.f32 %v8522_v62, %v5887_v32  ;;  %v977_v5 = vmul.f32 %v8522_v62, %v5889_v48 }
 0x20a   : > { %3140 = vrot.lane.b32.xlu1 %v2110_v50, %s5185_s16  ;;  %v975_v24 = vmul.f32 %v8521_v47, %v5907_v23  ;;  %v6437_v50 = vmul.f32 %v8513_v46, %v5887_v32  ;;  %v968_v23 = vmul.f32 %v8519_v40, %v5889_v48  ;;  %v973_v44 = vmul.f32 %v8521_v47, %v5887_v32 }
 0x20b   : > { %v974_v45 = vmul.f32 %v8521_v47, %v5889_v48  ;;  %v6467_v3 = vmul.f32 %v8515_v37, %v5887_v32  ;;  %v6471_v46 = vmul.f32 %v8515_v37, %v5889_v48  ;;  %v6479_v40 = vmul.f32 %v8517_v52, %v5889_v48 }
 0x20c   : > { %v981_v55 = vadd.f32 %v969_v16, %v916_v33  ;;  %v984_v47 = vadd.f32 %v972_v1, %v919_v2  ;;  %v6481_v22 = vadd.f32 %v975_v24, %v922_v51  ;;  %v6483_v62 = vadd.f32 %v978_v36, %v925_v38  ;;  %v8530_v2 = vld [vmem:[#allocation11_spill] sm:$0xff]  ;;  %v8531_v38 = vld [vmem:[#allocation14_spill] sm:$0xff] }
 0x20d   : > { %3142 = vrot.lane.b32.xlu0 %v2111_v35, %s5185_s16  ;;  %v6443_v35 = vmul.f32 %v8514_v15, %v5887_v32  ;;  %v979_v11 = vadd.f32 %v967_v57, %v914_v34  ;;  %v980_v12 = vadd.f32 %v968_v23, %v915_v7  ;;  %v982_v41 = vadd.f32 %v970_v14, %v917_v43  ;;  %v8532_v7 = vld [vmem:[#allocation13_spill] sm:$0xff] }
 0x20e   : > { %3144 = vrot.lane.b32.xlu1 %v2112_v49, %s5185_s16  ;;  %v6447_v49 = vmul.f32 %v8514_v15, %v5889_v48  ;;  %v6475_v15 = vmul.f32 %v8517_v52, %v5887_v32  ;;  %8523 = vst [vmem:[#allocation6_spill] sm:$0xff] %v6481_v22  ;;  %8524 = vst [vmem:[#allocation5_spill] sm:$0xff] %v6483_v62  ;;  %v983_v21 = vadd.f32 %v971_v26, %v918_v10  ;;  %v8529_v48 = vld [vmem:[#allocation12_spill] sm:$0xff]  ;;  %v8540_v62 = vld [vmem:[#allocation29_spill] sm:$0xff] }
 0x20f   : > { %v6485_v37 = vadd.f32 %v973_v44, %v920_v4  ;;  %v6487_v61 = vadd.f32 %v974_v45, %v921_v42  ;;  %v6489_v32 = vadd.f32 %v976_v6, %v923_v28  ;;  %v6491_v17 = vadd.f32 %v977_v5, %v924_v19  ;;  %v8533_v10 = vld [vmem:[#allocation28_spill] sm:$0xff]  ;;  %v8534_v42 = vld [vmem:[#allocation27_spill] sm:$0xff]  ;;  %v8535_v19 = vld [vmem:[#allocation30_spill] sm:$0xff] }
 0x210   : > { %v6495_v33 = vmul.f32 %v8529_v48, %v5938_v18  ;;  %v6499_v51 = vmul.f32 %v8530_v2, %v5938_v18  ;;  %v6503_v34 = vmul.f32 %v8531_v38, %v5938_v18  ;;  %v6507_v43 = vmul.f32 %v8532_v7, %v5938_v18 }
 0x211   : > { %8525 = vst [vmem:[#allocation20_spill] sm:$0xff] %v6485_v37  ;;  %8526 = vst [vmem:[#allocation19_spill] sm:$0xff] %v6487_v61  ;;  %v1034_v4 = vmul.f32 %v8533_v10, %v5938_v18  ;;  %v1037_v28 = vmul.f32 %v8534_v42, %v5938_v18  ;;  %v6515_v52 = vmul.f32 %v8535_v19, %v5938_v18 }
 0x212   : > { %8527 = vst [vmem:[#allocation22_spill] sm:$0xff] %v6489_v32  ;;  %8528 = vst [vmem:[#allocation21_spill] sm:$0xff] %v6491_v17  ;;  %v784_v16 = vmul.f32 %v8529_v48, %v5903_v8  ;;  %v785_v1 = vmul.f32 %v8529_v48, %v5905_v63  ;;  %v787_v24 = vmul.f32 %v8530_v2, %v5903_v8  ;;  %v8542_v32 = vld [vmem:[#allocation31_spill] sm:$0xff] }
 0x213   : > { %8536 = vst [vmem:[#allocation8_spill] sm:$0xff] %v6515_v52  ;;  %v788_v36 = vmul.f32 %v8530_v2, %v5905_v63  ;;  %v790_v57 = vmul.f32 %v8531_v38, %v5903_v8  ;;  %v791_v23 = vmul.f32 %v8531_v38, %v5905_v63  ;;  %v1032_v18 = vmul.f32 %v8533_v10, %v5903_v8  ;;  %v8539_v2 = vld [vmem:[#allocation32_spill] sm:$0xff] }
 0x214   : > { %v1033_v14 = vmul.f32 %v8533_v10, %v5905_v63  ;;  %v1035_v26 = vmul.f32 %v8534_v42, %v5903_v8  ;;  %v793_v44 = vmul.f32 %v8532_v7, %v5903_v8  ;;  %v6539_v45 = vmul.f32 %v8532_v7, %v5905_v63 }
 0x215   : > { %v1036_v6 = vmul.f32 %v8534_v42, %v5905_v63  ;;  %v6545_v5 = vmul.f32 %v8535_v19, %v5903_v8  ;;  %v6549_v48 = vmul.f32 %v8535_v19, %v5905_v63  ;;  %v1099_v38 = vmul.f32 %v8539_v2, %v5953_v13 }
 0x216   : > { %v1097_v10 = vmul.f32 %v8539_v2, %v5915_v39  ;;  %v1098_v7 = vmul.f32 %v8539_v2, %v5917_v58  ;;  %v6559_v42 = vmul.f32 %v8540_v62, %v5903_v8  ;;  %v1046_v17 = vadd.f32 %v1034_v4, %v981_v55  ;;  %v8545_v55 = vld [vmem:[#allocation16_spill] sm:$0xff] }
 0x217   : > { %8537 = vst [vmem:[#allocation7_spill] sm:$0xff] %v6545_v5  ;;  %8538 = vst [vmem:[#allocation10_spill] sm:$0xff] %v6549_v48  ;;  %v1100_v52 = vmul.f32 %v8542_v32, %v5915_v39  ;;  %v1101_v63 = vmul.f32 %v8542_v32, %v5917_v58  ;;  %v6565_v19 = vadd.f32 %v1037_v28, %v984_v47 }
 0x218   : > { %8541 = vst [vmem:[#allocation9_spill] sm:$0xff] %v6559_v42  ;;  %v1044_v22 = vadd.f32 %v1032_v18, %v979_v11  ;;  %v1045_v48 = vadd.f32 %v1033_v14, %v980_v12  ;;  %v1047_v61 = vadd.f32 %v1035_v26, %v982_v41  ;;  %v1048_v5 = vadd.f32 %v1036_v6, %v983_v21  ;;  %v8546_v42 = vld [vmem:[#allocation34_spill] sm:$0xff]  ;;  %v6626_v6 = vpop.permute.xlu1 %2871 }
 0x219   : > { %8543 = vst [vmem:[#allocation24_spill] sm:$0xff] %v6565_v19  ;;  %v6569_v2 = vmul.f32 %v8542_v32, %v5953_v13  ;;  %v732_v8 = vadd.f32 %v720_v9, %v6365_v31  ;;  %v850_v4 = vmul.f32 %v8545_v55, %v5917_v58  ;;  %v6576_v62 = vmul.f32 %v8546_v42, %v5915_v39 }
 0x21a   : > { %v6578_v37 = vadd.f32 %v1099_v38, %v1046_v17  ;;  %v6580_v47 = vadd.f32 %v1097_v10, %v1044_v22  ;;  %v6582_v12 = vadd.f32 %v1098_v7, %v1045_v48  ;;  %v6584_v41 = vadd.f32 %v1100_v52, %v1047_v61  ;;  %v8553_v17 = vld [vmem:[#allocation15_spill] sm:$0xff]  ;;  %v8556_v48 = vld [vmem:[#allocation17_spill] sm:$0xff]  ;;  %v8560_v7 = vld [vmem:[#allocation68_spill] sm:$0xff] }
 0x21b   : > { %8544 = vst [vmem:[#allocation23_spill] sm:$0xff] %v6569_v2  ;;  %8547 = vst [vmem:[#allocation26_spill] sm:$0xff] %v6576_v62  ;;  %v6586_v11 = vadd.f32 %v1101_v63, %v1048_v5  ;;  %v797_v21 = vadd.f32 %v785_v1, %v732_v8  ;;  %v731_v31 = vadd.f32 %v6437_v50, %v6361_v60  ;;  %v8561_v63 = vld [vmem:[#allocation3_spill] sm:$0xff] }
 0x21c   : > { %8548 = vst [vmem:[#allocation25_spill] sm:$0xff] %v6578_v37  ;;  %8549 = vst [vmem:[#allocation12_spill] sm:$0xff] %v6580_v47  ;;  %v849_v9 = vmul.f32 %v8545_v55, %v5915_v39  ;;  %v734_v32 = vadd.f32 %v6443_v35, %v6369_v0  ;;  %v852_v22 = vmul.f32 %v8553_v17, %v5915_v39  ;;  %v8572_v2 = vld [vmem:[#allocation79_spill] sm:$0xff] }
 0x21d   : > { %8550 = vst [vmem:[#allocation11_spill] sm:$0xff] %v6582_v12  ;;  %8551 = vst [vmem:[#allocation14_spill] sm:$0xff] %v6584_v41  ;;  %v733_v28 = vadd.f32 %v6413_v20, %v6333_v56  ;;  %v6598_v61 = vadd.f32 %v850_v4, %v797_v21  ;;  %v796_v52 = vadd.f32 %v784_v16, %v731_v31  ;;  %v6610_v56 = vpop.permute.xlu0 %2869  ;;  %v8554_v16 = vld [vmem:[#allocation18_spill] sm:$0xff]  ;;  %v8562_v4 = vld [vmem:[#allocation71_spill] sm:$0xff] }
 0x21e   : > { %8552 = vst [vmem:[#allocation13_spill] sm:$0xff] %v6586_v11  ;;  %v851_v1 = vmul.f32 %v8545_v55, %v5953_v13  ;;  %v736_v60 = vadd.f32 %v6417_v27, %v6337_v25  ;;  %v799_v50 = vadd.f32 %v787_v24, %v734_v32  ;;  %v854_v18 = vmul.f32 %v8553_v17, %v5953_v13  ;;  %v6659_v55 = vld [vmem:[#allocation2] sm:$0xff] }
 0x21f   : > { %v735_v0 = vadd.f32 %v6447_v49, %v6373_v29  ;;  %v853_v35 = vmul.f32 %v8553_v17, %v5917_v58  ;;  %v738_v20 = vadd.f32 %v6471_v46, %v6381_v59  ;;  %v856_v14 = vmul.f32 %v8554_v16, %v5917_v58  ;;  %v6671_v17 = vld [vmem:[#allocation2 + $0x50] sm:$0xff]  ;;  %v6751_v41 = vld [vmem:[#allocation2 + $0x40] sm:$0xf] }
 0x220   : > { %v737_v25 = vadd.f32 %v6467_v3, %v6377_v53  ;;  %v855_v27 = vmul.f32 %v8554_v16, %v5915_v39  ;;  %v6620_v24 = vadd.f32 %v849_v9, %v796_v52  ;;  %v6622_v29 = vadd.f32 %v852_v22, %v799_v50  ;;  %v6634_v39 = vld [vmem:[#allocation2 + $0x48] sm:$0xff]  ;;  %v8563_v9 = vld [vmem:[#allocation69_spill] sm:$0xff]  ;;  %8575 = vst [vmem:[#allocation15_spill] sm:$0xff] %v6751_v41  ;;  %v8577_v12 = vld [vmem:[#allocation83_spill] sm:$0xff] }
 0x221   : > { %v798_v49 = vadd.f32 %v6495_v33, %v733_v28  ;;  %v801_v26 = vadd.f32 %v6499_v51, %v736_v60  ;;  %v800_v59 = vadd.f32 %v788_v36, %v735_v0  ;;  %v803_v46 = vadd.f32 %v791_v23, %v738_v20  ;;  %v8557_v33 = vld [vmem:[#allocation4_spill] sm:$0xff]  ;;  %v6667_v31 = vpop.permute.xlu0 %2873  ;;  %v6677_v22 = vld [vmem:[#allocation2 + $0x10] sm:$0xf]  ;;  %v8566_v0 = vld [vmem:[#allocation75_spill] sm:$0xff] }
 0x222   : > { %v802_v5 = vadd.f32 %v790_v57, %v737_v25  ;;  %v740_v58 = vadd.f32 %v6475_v15, %v6385_v30  ;;  %v858_v38 = vmul.f32 %v6634_v39, %v8556_v48  ;;  %v739_v51 = vadd.f32 %v8557_v33, %v6341_v54  ;;  %v8564_v52 = vld [vmem:[#allocation72_spill] sm:$0xff]  ;;  %v6693_v20 = vld [vmem:[#allocation2 + $0x20] sm:$0xff] }
 0x223   : > { %v6630_v53 = vadd.f32 %v851_v1, %v798_v49  ;;  %v6632_v3 = vadd.f32 %v854_v18, %v801_v26  ;;  %v6640_v10 = vadd.f32 %v853_v35, %v800_v59  ;;  %v6642_v36 = vadd.f32 %v856_v14, %v803_v46  ;;  %v6689_v18 = vld [vmem:[#allocation2 + $0x18] sm:$0xff]  ;;  %v6697_v14 = vpop.permute.xlu1 %2875  ;;  %v6706_v59 = vld [vmem:[#allocation2 + $0x28] sm:$0xf] }
 0x224   : > { %v6644_v57 = vadd.f32 %v855_v27, %v802_v5  ;;  %v805_v23 = vadd.f32 %v793_v44, %v740_v58  ;;  %v6647_v30 = vadd.f32 %v6503_v34, %v739_v51  ;;  %v6651_v15 = vmul.f32 %v8554_v16, %v5953_v13  ;;  %v6663_v44 = vld [vmem:[#allocation2 + $0x8] sm:$0xff]  ;;  %v8567_v27 = vld [vmem:[#allocation73_spill] sm:$0xff]  ;;  %v8569_v51 = vld [vmem:[#allocation74_spill] sm:$0xff] }
 0x225   : > { %8555 = vst [vmem:[#allocation28_spill] sm:$0xff] %v6632_v3  ;;  %8558 = vst [vmem:[#allocation27_spill] sm:$0xff] %v6642_v36  ;;  %v742_v8 = vadd.f32 %v8561_v63, %v8560_v7  ;;  %v6657_v54 = vmul.f32 %v8556_v48, %v5953_v13  ;;  %v2157_v21 = vmul.f32 %v6659_v55, %v8562_v4  ;;  %v8570_v63 = vld [vmem:[#allocation77_spill] sm:$0xff]  ;;  %v6763_v36 = vld [vmem:[#allocation2 + $0x58] sm:$0xf] }
 0x226   : > { %8559 = vst [vmem:[#allocation30_spill] sm:$0xff] %v6644_v57  ;;  %v2158_v34 = vmul.f32 %v6663_v44, %v8562_v4  ;;  %v741_v32 = vadd.f32 %v6479_v40, %v8563_v9  ;;  %v6675_v13 = vmul.f32 %v6671_v17, %v8556_v48  ;;  %v2159_v28 = vmul.f32 %v6677_v22, %v8562_v4  ;;  %v8568_v48 = vld [vmem:[#allocation76_spill] sm:$0xff] }
 0x227   : > { %v2154_v1 = vmul.f32 %v6659_v55, %v8564_v52  ;;  %v2155_v60 = vmul.f32 %v6663_v44, %v8564_v52  ;;  %v6685_v50 = vadd.f32 %v858_v38, %v805_v23  ;;  %v2156_v40 = vmul.f32 %v6677_v22, %v8564_v52  ;;  %v6745_v19 = vpop.permute.xlu1 %2879 }
 0x228   : > { %v2210_v35 = vmul.f32 %v6689_v18, %v8566_v0  ;;  %v2211_v16 = vmul.f32 %v6693_v20, %v8566_v0  ;;  %v6700_v25 = vadd.f32 %v6507_v43, %v742_v8  ;;  %v2163_v49 = vmul.f32 %v6659_v55, %v8567_v27  ;;  %8573 = vst [vmem:[#allocation31_spill] sm:$0xff] %v6745_v19 }
 0x229   : > { %8565 = vst [vmem:[#allocation32_spill] sm:$0xff] %v6685_v50  ;;  %v2164_v26 = vmul.f32 %v6663_v44, %v8567_v27  ;;  %v2212_v46 = vmul.f32 %v6706_v59, %v8566_v0  ;;  %v6711_v5 = vadd.f32 %v6539_v45, %v741_v32  ;;  %v2165_v58 = vmul.f32 %v6677_v22, %v8567_v27  ;;  %v6733_v0 = vpop.permute.xlu0 %2877 }
 0x22a   : > { %v2207_v43 = vmul.f32 %v6689_v18, %v8568_v48  ;;  %v2208_v38 = vmul.f32 %v6693_v20, %v8568_v48  ;;  %v2209_v33 = vmul.f32 %v6706_v59, %v8568_v48  ;;  %v2160_v23 = vmul.f32 %v6659_v55, %v8569_v51  ;;  %v8571_v48 = vld [vmem:[#allocation78_spill] sm:$0xff] }
 0x22b   : > { %v2161_v7 = vmul.f32 %v6663_v44, %v8569_v51  ;;  %v2162_v45 = vmul.f32 %v6677_v22, %v8569_v51  ;;  %v2216_v8 = vmul.f32 %v6689_v18, %v8570_v63  ;;  %v2222_v4 = vadd.f32 %v2210_v35, %v2157_v21  ;;  %v6779_v19 = vpop.permute.xlu1 %2883 }
 0x22c   : > { %v2223_v9 = vadd.f32 %v2211_v16, %v2158_v34  ;;  %v2217_v32 = vmul.f32 %v6693_v20, %v8570_v63  ;;  %v2218_v52 = vmul.f32 %v6706_v59, %v8570_v63  ;;  %v2224_v27 = vadd.f32 %v2212_v46, %v2159_v28  ;;  %v6741_v16 = vld [vmem:[#allocation2 + $0x30] sm:$0xff]  ;;  %v6747_v46 = vld [vmem:[#allocation2 + $0x38] sm:$0xff] }
 0x22d   : > { %v2213_v62 = vmul.f32 %v6689_v18, %v8571_v48  ;;  %v2214_v51 = vmul.f32 %v6693_v20, %v8571_v48  ;;  %v2215_v11 = vmul.f32 %v6706_v59, %v8571_v48  ;;  %v2219_v21 = vadd.f32 %v2207_v43, %v2154_v1  ;;  %8574 = vst [vmem:[#allocation16_spill] sm:$0xff] %v6747_v46 }
 0x22e   : > { %v2220_v34 = vadd.f32 %v2208_v38, %v2155_v60  ;;  %v2221_v35 = vadd.f32 %v2209_v33, %v2156_v40  ;;  %v2275_v63 = vmul.f32 %v6741_v16, %v8572_v2  ;;  %v2228_v28 = vadd.f32 %v2216_v8, %v2163_v49  ;;  %v8576_v60 = vld [vmem:[#allocation80_spill] sm:$0xff] }
 0x22f   : > { %v2276_v42 = vmul.f32 %v6747_v46, %v8572_v2  ;;  %v2277_v1 = vmul.f32 %v6751_v41, %v8572_v2  ;;  %v2272_v40 = vmul.f32 %v6741_v16, %v8576_v60  ;;  %v2229_v43 = vadd.f32 %v2217_v32, %v2164_v26  ;;  %v8578_v26 = vld [vmem:[#allocation84_spill] sm:$0xff] }
 0x230   : > { %v2230_v38 = vadd.f32 %v2218_v52, %v2165_v58  ;;  %v2273_v33 = vmul.f32 %v6747_v46, %v8576_v60  ;;  %v2274_v49 = vmul.f32 %v6751_v41, %v8576_v60  ;;  %v2225_v8 = vadd.f32 %v2213_v62, %v2160_v23  ;;  %v6771_v52 = vpop.permute.xlu0 %2881  ;;  %v8580_v60 = vld [vmem:[#allocation82_spill] sm:$0xff] }
 0x231   : > { %v2226_v48 = vadd.f32 %v2214_v51, %v2161_v7  ;;  %v2227_v37 = vadd.f32 %v2215_v11, %v2162_v45  ;;  %v2341_v47 = vmul.f32 %v6671_v17, %v8577_v12  ;;  %v2287_v50 = vadd.f32 %v2275_v63, %v2222_v4  ;;  %v8579_v7 = vld [vmem:[#allocation81_spill] sm:$0xff] }
 0x232   : > { %v2342_v2 = vmul.f32 %v6763_v36, %v8577_v12  ;;  %v2338_v58 = vmul.f32 %v6671_v17, %v8578_v26  ;;  %v2339_v32 = vmul.f32 %v6763_v36, %v8578_v26  ;;  %v2288_v62 = vadd.f32 %v2276_v42, %v2223_v9 }
 0x233   : > { %v2289_v23 = vadd.f32 %v2277_v1, %v2224_v27  ;;  %v2284_v11 = vadd.f32 %v2272_v40, %v2219_v21  ;;  %v2282_v45 = vmul.f32 %v6747_v46, %v8579_v7  ;;  %v2285_v4 = vadd.f32 %v2273_v33, %v2220_v34  ;;  %v8581_v1 = vld [vmem:[#allocation85_spill] sm:$0xff] }
 0x234   : > { %v2286_v51 = vadd.f32 %v2274_v49, %v2221_v35  ;;  %v2283_v63 = vmul.f32 %v6751_v41, %v8579_v7  ;;  %v2279_v57 = vmul.f32 %v6747_v46, %v8580_v60  ;;  %v2280_v3 = vmul.f32 %v6751_v41, %v8580_v60  ;;  %v8582_v46 = vld [vmem:[#allocation86_spill] sm:$0xff] }
 0x235   : > { %v2340_v42 = vmul.f32 %v6634_v39, %v8577_v12  ;;  %v2353_v9 = vadd.f32 %v2341_v47, %v2288_v62  ;;  %v2337_v27 = vmul.f32 %v6634_v39, %v8578_v26  ;;  %v2354_v21 = vadd.f32 %v2342_v2, %v2289_v23 }
 0x236   : > { %v2350_v34 = vadd.f32 %v2338_v58, %v2285_v4  ;;  %v2351_v35 = vadd.f32 %v2339_v32, %v2286_v51  ;;  %v2347_v40 = vmul.f32 %v6671_v17, %v8581_v1  ;;  %v2281_v33 = vmul.f32 %v6741_v16, %v8579_v7  ;;  %v6799_v58 = vpop.permute.xlu0 %2885 }
 0x237   : > { %v2294_v49 = vadd.f32 %v2282_v45, %v2229_v43  ;;  %v2278_v41 = vmul.f32 %v6741_v16, %v8580_v60  ;;  %v2348_v12 = vmul.f32 %v6763_v36, %v8581_v1  ;;  %v2295_v47 = vadd.f32 %v2283_v63, %v2230_v38  ;;  %v6805_v38 = vpop.permute.xlu1 %2887 }
 0x238   : > { %v2291_v62 = vadd.f32 %v2279_v57, %v2226_v48  ;;  %v2344_v2 = vmul.f32 %v6671_v17, %v8582_v46  ;;  %v2345_v26 = vmul.f32 %v6763_v36, %v8582_v46  ;;  %v2292_v32 = vadd.f32 %v2280_v3, %v2227_v37 }
 0x239   : > { %v2936_v23 = vrot.slane %v2353_v9, 7  ;;  %v2349_v7 = vadd.f32 %v2337_v27, %v2284_v11  ;;  %v6801_v43 = vadd.f32 %v2340_v42, %v2287_v50  ;;  %v2938_v45 = vrot.slane %v2354_v21, 7 }
 0x23a   : > { %v2931_v4 = vrot.slane %v2350_v34, 7  ;;  %v2933_v51 = vrot.slane %v2351_v35, 7  ;;  %v6803_v60 = vadd.f32 %v2347_v40, %v2294_v49  ;;  %v6807_v57 = vadd.f32 %v2348_v12, %v2295_v47  ;;  %v6830_v27 = vpop.permute.xlu0 %2889 }
 0x23b   : > { %v6811_v48 = vadd.f32 %v6651_v15, %v6647_v30  ;;  %v6815_v37 = vadd.f32 %v6657_v54, %v6700_v25  ;;  %v6819_v3 = vadd.f32 %v6675_v13, %v6711_v5  ;;  %v2293_v50 = vadd.f32 %v2281_v33, %v2228_v28  ;;  %v6849_v33 = vpop.permute.xlu1 %2891 }
 0x23c   : > { %v2290_v11 = vadd.f32 %v2278_v41, %v2225_v8  ;;  %v6821_v63 = vadd.f32 %v2344_v2, %v2291_v62  ;;  %v2357_v42 = vadd.f32 %v2345_v26, %v2292_v32  ;;  %v2346_v9 = vmul.f32 %v6634_v39, %v8581_v1  ;;  %v8583_v8 = vld [vmem:[#allocation87_spill] sm:$0xff]  ;;  %v8584_v1 = vld [vmem:[#allocation88_spill] sm:$0xff] }
 0x23d   : > { %v2343_v30 = vmul.f32 %v6634_v39, %v8582_v46  ;;  %v2905_v15 = vadd.f32 %v6610_v56, %v6620_v24  ;;  %v2930_v54 = vrot.slane %v2349_v7, 7  ;;  %v2946_v25 = vrot.slane %v6803_v60, 7  ;;  %v8585_v7 = vld [vmem:[#allocation89_spill] sm:$0xff] }
 0x23e   : > { %v2934_v13 = vsel %vm2929_vm5, %v2931_v4, %v2933_v51  ;;  %v2935_v41 = vrot.slane %v6801_v43, 7  ;;  %v6835_v5 = vsel %vm2929_vm5, %v2936_v23, %v2938_v45  ;;  %v2948_v28 = vrot.slane %v6807_v57, 7 }
 0x23f   : > { %v2405_v46 = vmul.f32 %v6659_v55, %v8583_v8  ;;  %v2406_v56 = vmul.f32 %v6663_v44, %v8583_v8  ;;  %v2906_v24 = vadd.f32 %v6626_v6, %v6598_v61  ;;  %v2941_v21 = vrot.slane %v6821_v63, 7 }
 0x240   : > { %v2943_v34 = vrot.slane %v2357_v42, 7  ;;  %v2407_v35 = vmul.f32 %v6677_v22, %v8583_v8  ;;  %v2402_v40 = vmul.f32 %v6659_v55, %v8584_v1  ;;  %v2403_v49 = vmul.f32 %v6663_v44, %v8584_v1 }
 0x241   : > { %v2404_v12 = vmul.f32 %v6677_v22, %v8584_v1  ;;  %v2907_v61 = vadd.f32 %v6667_v31, %v6630_v53  ;;  %v2962_v6 = vadd.f32 %v2930_v54, %v2905_v15  ;;  %v2932_v62 = vsel %vm2929_vm5, %v2930_v54, %v2931_v4 }
 0x242   : > { %v2937_v2 = vsel %vm2929_vm5, %v2935_v41, %v2936_v23  ;;  %v2355_v26 = vadd.f32 %v2343_v30, %v2290_v11  ;;  %v6859_v32 = vadd.f32 %v2346_v9, %v2293_v50  ;;  %v6863_v43 = vmul.f32 %v6659_v55, %v8585_v7  ;;  %v8586_v23 = vld [vmem:[#allocation90_spill] sm:$0xff]  ;;  %v8587_v9 = vld [vmem:[#allocation91_spill] sm:$0xff] }
 0x243   : > { %v2908_v45 = vadd.f32 %v6697_v14, %v6622_v29  ;;  %v2963_v57 = vadd.f32 %v2932_v62, %v2906_v24  ;;  %v6871_v53 = vmul.f32 %v6663_v44, %v8585_v7  ;;  %v6875_v31 = vmul.f32 %v6677_v22, %v8585_v7 }
 0x244   : > { %v6879_v4 = vmul.f32 %v6659_v55, %v8586_v23  ;;  %v6882_v11 = vsel %vm2929_vm5, %v2941_v21, %v2943_v34  ;;  %v6886_v29 = vmul.f32 %v6663_v44, %v8586_v23  ;;  %v2909_v14 = vadd.f32 %v6733_v0, %v6640_v10  ;;  %v8588_v0 = vld [vmem:[#allocation28_spill] sm:$0xff]  ;;  %v8589_v34 = vld [vmem:[#allocation31_spill] sm:$0xff] }
 0x245   : > { %v2964_v42 = vadd.f32 %v2934_v13, %v2907_v61  ;;  %v2458_v30 = vmul.f32 %v6689_v18, %v8587_v9  ;;  %v2459_v15 = vmul.f32 %v6693_v20, %v8587_v9  ;;  %v2940_v8 = vrot.slane %v2355_v26, 7 }
 0x246   : > { %v8373_v24 = vrot.slane %v6859_v32, 7  ;;  %v2460_v10 = vmul.f32 %v6706_v59, %v8587_v9  ;;  %v2910_v1 = vadd.f32 %v8589_v34, %v8588_v0  ;;  %v2965_v61 = vadd.f32 %v2935_v41, %v2908_v45  ;;  %v8591_v41 = vld [vmem:[#allocation30_spill] sm:$0xff] }
 0x247   : > { %v2911_v45 = vadd.f32 %v6771_v52, %v8591_v41  ;;  %v2470_v9 = vadd.f32 %v2458_v30, %v2405_v46  ;;  %v2942_v34 = vsel %vm2929_vm5, %v2940_v8, %v2941_v21  ;;  %v8592_v52 = vld [vmem:[#allocation27_spill] sm:$0xff]  ;;  %v8595_v30 = vld [vmem:[#allocation16_spill] sm:$0xff] }
 0x248   : > { %v2967_v46 = vadd.f32 %v6835_v5, %v2910_v1  ;;  %v8596_v5 = vld [vmem:[#allocation93_spill] sm:$0xff] }
 0x253   : > { %v3007_v47 = vpop.permute.xlu0 %3006 }
 0x254   : > { %v6867_v51 = vadd.f32 %v3007_v47, %v2962_v6  ;;  %v3009_v50 = vpop.permute.xlu1 %3008  ;;  %v6909_v6 = vmul.f32 %v6677_v22, %v8586_v23  ;;  %v8590_v47 = vld [vmem:[#allocation92_spill] sm:$0xff] }
 0x255   : > { %v6890_v63 = vadd.f32 %v3009_v50, %v2963_v57  ;;  %v2455_v62 = vmul.f32 %v6689_v18, %v8590_v47  ;;  %v2456_v26 = vmul.f32 %v6693_v20, %v8590_v47  ;;  %v6918_v57 = vsel %vm2929_vm5, %v2946_v25, %v2948_v28 }
 0x256   : > { %3182 = vrot.lane.b32.xlu0 %v6867_v51, %s5186_s17  ;;  %v2457_v50 = vmul.f32 %v6706_v59, %v8590_v47  ;;  %v2947_v28 = vsel %vm2929_vm5, %v8373_v24, %v2946_v25  ;;  %v6934_v47 = vadd.f32 %v2460_v10, %v2407_v35  ;;  %v8601_v24 = vld [vmem:[#allocation95_spill] sm:$0xff] }
 0x257   : > { %v3011_v54 = vpop.permute.xlu0 %3010  ;;  %3184 = vrot.lane.b32.xlu1 %v6890_v63, %s5186_s17  ;;  %v2468_v21 = vadd.f32 %v2456_v26, %v2403_v49  ;;  %v8597_v49 = vld [vmem:[#allocation15_spill] sm:$0xff] }
 0x258   : > { %v6905_v13 = vadd.f32 %v3011_v54, %v2964_v42  ;;  %v3013_v7 = vpop.permute.xlu1 %3012  ;;  %v2966_v42 = vadd.f32 %v2937_v2, %v2909_v14  ;;  %v2471_v54 = vadd.f32 %v2459_v15, %v2406_v56  ;;  %v2467_v56 = vadd.f32 %v2455_v62, %v2402_v40  ;;  %v8594_v14 = vld [vmem:[#allocation96_spill] sm:$0xff] }
 0x259   : > { %v6924_v23 = vadd.f32 %v3013_v7, %v2965_v61  ;;  %v2912_v61 = vadd.f32 %v6779_v19, %v8592_v52  ;;  %v2520_v60 = vmul.f32 %v6741_v16, %v8594_v14  ;;  %v2521_v25 = vmul.f32 %v8595_v30, %v8594_v14  ;;  %v8598_v62 = vld [vmem:[#allocation100_spill] sm:$0xff] }
 0x25a   : > { %3186 = vrot.lane.b32.xlu0 %v6905_v13, %s5186_s17  ;;  %v2469_v15 = vadd.f32 %v2457_v50, %v2404_v12  ;;  %v2913_v19 = vadd.f32 %v6799_v58, %v6811_v48  ;;  %v2968_v7 = vadd.f32 %v2940_v8, %v2911_v45  ;;  %v6955_v40 = vmul.f32 %v6689_v18, %v8596_v5  ;;  %v8599_v50 = vld [vmem:[#allocation32_spill] sm:$0xff] }
 0x25b   : > { %v3015_v0 = vpop.permute.xlu0 %3014  ;;  %3188 = vrot.lane.b32.xlu1 %v6924_v23, %s5186_s17  ;;  %v2522_v1 = vmul.f32 %v8597_v49, %v8594_v14  ;;  %v2585_v26 = vmul.f32 %v6634_v39, %v8598_v62  ;;  %v2586_v12 = vmul.f32 %v6671_v17, %v8598_v62  ;;  %v6965_v48 = vmul.f32 %v6693_v20, %v8596_v5 }
 0x25c   : > { %v6940_v2 = vadd.f32 %v3015_v0, %v2966_v42  ;;  %v3017_v35 = vpop.permute.xlu1 %3016  ;;  %v2914_v8 = vadd.f32 %v6805_v38, %v8599_v50  ;;  %v2969_v45 = vadd.f32 %v2942_v34, %v2912_v61  ;;  %v8600_v42 = vld [vmem:[#allocation94_spill] sm:$0xff]  ;;  %v2532_v52 = vadd.f32 %v2520_v60, %v2467_v56 }
 0x25d   : > { %v6949_v10 = vadd.f32 %v3017_v35, %v2967_v46  ;;  %v2461_v0 = vmul.f32 %v6689_v18, %v8600_v42  ;;  %v2533_v46 = vadd.f32 %v2521_v25, %v2468_v21  ;;  %v2587_v14 = vmul.f32 %v6763_v36, %v8598_v62 }
 0x25e   : > { %8593 = vst [vmem:[#allocation18_spill] sm:$0xff] %v6940_v2  ;;  %3190 = vrot.lane.b32.xlu0 %v6940_v2, %s5186_s17  ;;  %v2523_v2 = vmul.f32 %v6741_v16, %v8601_v24  ;;  %v2915_v38 = vadd.f32 %v6830_v27, %v6819_v3  ;;  %v2970_v34 = vadd.f32 %v6882_v11, %v2913_v19  ;;  %v8602_v11 = vrot.slane %v6859_v32, 7 }
 0x25f   : > { %v3019_v58 = vpop.permute.xlu0 %3018  ;;  %3192 = vrot.lane.b32.xlu1 %v6949_v10, %s5186_s17  ;;  %v2524_v61 = vmul.f32 %v8595_v30, %v8601_v24  ;;  %v2534_v56 = vadd.f32 %v2522_v1, %v2469_v15  ;;  %v2597_v21 = vadd.f32 %v2585_v26, %v2532_v52  ;;  %v2598_v60 = vadd.f32 %v2586_v12, %v2533_v46  ;;  %v8603_v1 = vld [vmem:[#allocation99_spill] sm:$0xff] }
 0x260   : > { %v6971_v41 = vadd.f32 %v3019_v58, %v2968_v7  ;;  %v3021_v35 = vpop.permute.xlu1 %3020  ;;  %v2462_v7 = vmul.f32 %v6693_v20, %v8600_v42  ;;  %v2916_v3 = vadd.f32 %v6849_v33, %v6815_v37  ;;  %v2971_v19 = vadd.f32 %v8602_v11, %v2914_v8 }
 0x261   : > { %v6981_v50 = vadd.f32 %v3021_v35, %v2969_v45  ;;  %v2525_v15 = vmul.f32 %v8597_v49, %v8601_v24  ;;  %v2588_v62 = vmul.f32 %v6634_v39, %v8603_v1  ;;  %v2589_v26 = vmul.f32 %v6671_v17, %v8603_v1 }
 0x262   : > { %3194 = vrot.lane.b32.xlu0 %v6971_v41, %s5186_s17  ;;  %v2599_v12 = vadd.f32 %v2587_v14, %v2534_v56  ;;  %v2463_v37 = vmul.f32 %v6706_v59, %v8600_v42  ;;  %v2535_v33 = vadd.f32 %v2523_v2, %v2470_v9  ;;  %v2972_v32 = vadd.f32 %v2947_v28, %v2915_v38 }
 0x263   : > { %v3023_v25 = vpop.permute.xlu0 %3022  ;;  %3196 = vrot.lane.b32.xlu1 %v6981_v50, %s5186_s17  ;;  %v2536_v8 = vadd.f32 %v2524_v61, %v2471_v54  ;;  %v2590_v24 = vmul.f32 %v6763_v36, %v8603_v1  ;;  %v3066_v52 = vrot.slane %v2597_v21, 7  ;;  %v3067_v46 = vrot.slane %v2598_v60, 7 }
 0x264   : > { %v6994_v27 = vadd.f32 %v3023_v25, %v2970_v34  ;;  %v3025_v58 = vpop.permute.xlu1 %3024  ;;  %v8604_v34 = vld [vmem:[#allocation98_spill] sm:$0xff]  ;;  %v2973_v28 = vadd.f32 %v6918_v57, %v2916_v3  ;;  %v2537_v54 = vadd.f32 %v2525_v15, %v6934_v47  ;;  %v2600_v2 = vadd.f32 %v2588_v62, %v2535_v33 }
 0x265   : > { %v7006_v45 = vadd.f32 %v3025_v58, %v2971_v19  ;;  %v2526_v14 = vmul.f32 %v6741_v16, %v8604_v34  ;;  %v2527_v42 = vmul.f32 %v8595_v30, %v8604_v34  ;;  %v2601_v38 = vadd.f32 %v2589_v26, %v2536_v8  ;;  %v8605_v57 = vld [vmem:[#allocation102_spill] sm:$0xff]  ;;  %v8608_v8 = vld [vmem:[#allocation11_spill] sm:$0xff] }
 0x266   : > { %3198 = vrot.lane.b32.xlu0 %v6994_v27, %s5186_s17  ;;  %v3069_v61 = vrot.slane %v2599_v12, 7  ;;  %v2473_v21 = vadd.f32 %v2461_v0, %v6879_v4  ;;  %v2474_v60 = vadd.f32 %v2462_v7, %v6886_v29  ;;  %v2528_v25 = vmul.f32 %v8597_v49, %v8604_v34  ;;  %v8606_v7 = vld [vmem:[#allocation12_spill] sm:$0xff] }
 0x267   : > { %v3027_v35 = vpop.permute.xlu0 %3026  ;;  %3200 = vrot.lane.b32.xlu1 %v7006_v45, %s5186_s17  ;;  %v2602_v19 = vadd.f32 %v2590_v24, %v2537_v54  ;;  %v2591_v47 = vmul.f32 %v6634_v39, %v8605_v57  ;;  %v2592_v3 = vmul.f32 %v6671_v17, %v8605_v57  ;;  %v3068_v15 = vsel %vm2929_vm5, %v3066_v52, %v3067_v46 }
 0x268   : > { %v7018_v9 = vadd.f32 %v3027_v35, %v2972_v32  ;;  %v3029_v56 = vpop.permute.xlu1 %3028  ;;  %v2475_v4 = vadd.f32 %v2463_v37, %v6909_v6  ;;  %v2538_v29 = vadd.f32 %v2526_v14, %v2473_v21  ;;  %v2539_v0 = vadd.f32 %v2527_v42, %v2474_v60  ;;  %v8607_v32 = vld [vmem:[#allocation97_spill] sm:$0xff]  ;;  %v8611_v21 = vld [vmem:[#allocation14_spill] sm:$0xff] }
 0x269   : > { %v7026_v11 = vadd.f32 %v3029_v56, %v2973_v28  ;;  %v7039_v1 = vadd.f32 %v3066_v52, %v8606_v7  ;;  %v3071_v62 = vrot.slane %v2600_v2, 7  ;;  %v3072_v26 = vrot.slane %v2601_v38, 7  ;;  %v8609_v28 = vld [vmem:[#allocation25_spill] sm:$0xff]  ;;  %v8616_v7 = vld [vmem:[#allocation23_spill] sm:$0xff] }
 0x26a   : > { %3202 = vrot.lane.b32.xlu0 %v7018_v9, %s5186_s17  ;;  %v2593_v12 = vmul.f32 %v6763_v36, %v8605_v57  ;;  %v3070_v58 = vsel %vm2929_vm5, %v3067_v46, %v3069_v61  ;;  %v2466_v33 = vmul.f32 %v6706_v59, %v8596_v5  ;;  %v2529_v6 = vmul.f32 %v6741_v16, %v8607_v32  ;;  %v8610_v2 = vld [vmem:[#allocation101_spill] sm:$0xff] }
 0x26b   : > { %3204 = vrot.lane.b32.xlu1 %v7026_v11, %s5186_s17  ;;  %v2530_v37 = vmul.f32 %v8595_v30, %v8607_v32  ;;  %v7053_v24 = vadd.f32 %v3068_v15, %v8608_v8  ;;  %v2540_v52 = vadd.f32 %v2528_v25, %v2475_v4  ;;  %v3074_v35 = vrot.slane %v2602_v19, 7  ;;  %v8613_v15 = vld [vmem:[#allocation7_spill] sm:$0xff]  ;;  %v8619_v8 = vld [vmem:[#allocation10_spill] sm:$0xff] }
 0x26c   : > { %v2603_v34 = vadd.f32 %v2591_v47, %v2538_v29  ;;  %v2604_v14 = vadd.f32 %v2592_v3, %v2539_v0  ;;  %v2476_v46 = vadd.f32 %v6955_v40, %v6863_v43  ;;  %v2477_v5 = vadd.f32 %v6965_v48, %v6871_v53  ;;  %v8612_v3 = vld [vmem:[#allocation20_spill] sm:$0xff]  ;;  %v8614_v29 = vld [vmem:[#allocation34_spill] sm:$0xff] }
 0x26d   : > { %v2531_v42 = vmul.f32 %v8597_v49, %v8607_v32  ;;  %v7064_v54 = vadd.f32 %v3070_v58, %v8609_v28  ;;  %v2594_v38 = vmul.f32 %v6634_v39, %v8610_v2  ;;  %v2595_v61 = vmul.f32 %v6671_v17, %v8610_v2  ;;  %v8615_v0 = vld [vmem:[#allocation24_spill] sm:$0xff] }
 0x26e   : > { %3245 = vrot.lane.b32.xlu0 %v7039_v1, %s5186_s17  ;;  %v2605_v56 = vadd.f32 %v2593_v12, %v2540_v52  ;;  %v3073_v43 = vsel %vm2929_vm5, %v3071_v62, %v3072_v26  ;;  %v2478_v53 = vadd.f32 %v2466_v33, %v6875_v31  ;;  %v2541_v40 = vadd.f32 %v2529_v6, %v2476_v46 }
 0x26f   : > { %3247 = vrot.lane.b32.xlu1 %v7053_v24, %s5186_s17  ;;  %v2542_v48 = vadd.f32 %v2530_v37, %v2477_v5  ;;  %v7075_v60 = vadd.f32 %v3071_v62, %v8611_v21  ;;  %v2596_v25 = vmul.f32 %v6763_v36, %v8610_v2  ;;  %v3076_v19 = vrot.slane %v2603_v34, 7  ;;  %v8617_v62 = vld [vmem:[#allocation13_spill] sm:$0xff]  ;;  %v8620_v34 = vld [vmem:[#allocation26_spill] sm:$0xff] }
 0x270   : > { %v3077_v57 = vrot.slane %v2604_v14, 7  ;;  %v3075_v47 = vsel %vm2929_vm5, %v3072_v26, %v3074_v35  ;;  %v1050_v4 = vadd.f32 %v8613_v15, %v8612_v3  ;;  %v1104_v31 = vmul.f32 %v6671_v17, %v8614_v29  ;;  %v8618_v26 = vld [vmem:[#allocation19_spill] sm:$0xff]  ;;  %v8621_v5 = vld [vmem:[#allocation29_spill] sm:$0xff] }
 0x271   : > { %v1114_v12 = vadd.f32 %v8616_v7, %v8615_v0  ;;  %v7089_v58 = vadd.f32 %v3073_v43, %v8617_v62  ;;  %v2543_v33 = vadd.f32 %v2531_v42, %v2478_v53  ;;  %v2606_v32 = vadd.f32 %v2594_v38, %v2541_v40  ;;  %v3123_v38 = vpop.permute.xlu0 %3122  ;;  %v8623_v43 = vld [vmem:[#allocation8_spill] sm:$0xff]  ;;  %v8624_v40 = vld [vmem:[#allocation33_spill] sm:$0xff]  ;;  %v8625_v0 = vld [vmem:[#allocation22_spill] sm:$0xff] }
 0x272   : > { %3249 = vrot.lane.b32.xlu0 %v7064_v54, %s5186_s17  ;;  %v2607_v6 = vadd.f32 %v2595_v61, %v2542_v48  ;;  %v3079_v37 = vrot.slane %v2605_v56, 7  ;;  %v1051_v52 = vadd.f32 %v8619_v8, %v8618_v26  ;;  %v1105_v35 = vmul.f32 %v6763_v36, %v8614_v29  ;;  %v8622_v56 = vld [vmem:[#allocation6_spill] sm:$0xff]  ;;  %v8626_v7 = vld [vmem:[#allocation9_spill] sm:$0xff] }
 0x273   : > { %3251 = vrot.lane.b32.xlu1 %v7075_v60, %s5186_s17  ;;  %v1115_v14 = vadd.f32 %v8620_v34, %v1050_v4  ;;  %v7098_v46 = vadd.f32 %v3075_v47, %v1114_v12  ;;  %v1043_v28 = vmul.f32 %v8597_v49, %v8621_v5  ;;  %v1042_v42 = vmul.f32 %v8595_v30, %v8621_v5  ;;  %v3125_v4 = vpop.permute.xlu1 %3124  ;;  %v8628_v26 = vld [vmem:[#allocation21_spill] sm:$0xff]  ;;  %v8630_v34 = vld [vmem:[#allocation44_spill] sm:$0xff] }
 0x274   : > { %v2608_v2 = vadd.f32 %v2596_v25, %v2543_v33  ;;  %v3078_v61 = vsel %vm2929_vm5, %v3076_v19, %v3077_v57  ;;  %v1052_v53 = vadd.f32 %v8623_v43, %v8622_v56  ;;  %v1106_v48 = vmul.f32 %v6634_v39, %v8624_v40  ;;  %v8627_v33 = vld [vmem:[#allocation40_spill] sm:$0xff] }
 0x275   : > { %v1116_v21 = vadd.f32 %v1104_v31, %v1051_v52  ;;  %v7111_v47 = vadd.f32 %v3076_v19, %v1115_v14  ;;  %v1107_v3 = vmul.f32 %v6671_v17, %v8624_v40  ;;  %v3081_v15 = vrot.slane %v2606_v32, 7 }
 0x276   : > { %3253 = vrot.lane.b32.xlu0 %v7089_v58, %s5186_s17  ;;  %v3082_v25 = vrot.slane %v2607_v6, 7  ;;  %v3080_v29 = vsel %vm2929_vm5, %v3077_v57, %v3079_v37  ;;  %v1053_v12 = vadd.f32 %v8626_v7, %v8625_v0  ;;  %v1117_v62 = vadd.f32 %v1105_v35, %v1052_v53  ;;  %v8629_v37 = vld [vmem:[#allocation36_spill] sm:$0xff]  ;;  %v3127_v53 = vpop.permute.xlu0 %3126 }
 0x277   : > { %3255 = vrot.lane.b32.xlu1 %v7098_v46, %s5186_s17  ;;  %v1463_v31 = vmul.f32 %v6689_v18, %v8627_v33  ;;  %v7122_v19 = vadd.f32 %v3078_v61, %v1116_v21  ;;  %v1054_v8 = vadd.f32 %v1042_v42, %v8628_v26  ;;  %v1108_v32 = vmul.f32 %v6763_v36, %v8624_v40  ;;  %v8632_v42 = vld [vmem:[#allocation5_spill] sm:$0xff]  ;;  %v8634_v0 = vld [vmem:[#allocation48_spill] sm:$0xff] }
 0x278   : > { %v1464_v57 = vmul.f32 %v6693_v20, %v8627_v33  ;;  %v3084_v6 = vrot.slane %v2608_v2, 7  ;;  %v1411_v52 = vmul.f32 %v6663_v44, %v8629_v37  ;;  %v1118_v35 = vadd.f32 %v1106_v48, %v1053_v12  ;;  %v8633_v48 = vld [vmem:[#allocation70_spill] sm:$0xff] }
 0x279   : > { %v1528_v14 = vmul.f32 %v6741_v16, %v8630_v34  ;;  %v7135_v5 = vadd.f32 %v3080_v29, %v1117_v62  ;;  %v1055_v61 = vadd.f32 %v1043_v28, %v8632_v42  ;;  %v1119_v56 = vadd.f32 %v1107_v3, %v1054_v8  ;;  %v3129_v62 = vpop.permute.xlu1 %3128  ;;  %v8635_v8 = vld [vmem:[#allocation39_spill] sm:$0xff] }
 0x27a   : > { %3257 = vrot.lane.b32.xlu0 %v7111_v47, %s5186_s17  ;;  %v1529_v43 = vmul.f32 %v8595_v30, %v8630_v34  ;;  %v3083_v2 = vsel %vm2929_vm5, %v3081_v15, %v3082_v25  ;;  %v1465_v40 = vmul.f32 %v6706_v59, %v8627_v33  ;;  %v1475_v21 = vadd.f32 %v1463_v31, %v8633_v48 }
 0x27b   : > { %3259 = vrot.lane.b32.xlu1 %v7122_v19, %s5186_s17  ;;  %8631 = vst [vmem:[#allocation17_spill] sm:$0xff] %v7135_v5  ;;  %v1593_v7 = vmul.f32 %v6634_v39, %v8634_v0  ;;  %v7148_v29 = vadd.f32 %v3081_v15, %v1118_v35  ;;  %v1120_v28 = vadd.f32 %v1108_v32, %v1055_v61  ;;  %v8637_v32 = vld [vmem:[#allocation35_spill] sm:$0xff] }
 0x27c   : > { %v1476_v3 = vadd.f32 %v1464_v57, %v1411_v52  ;;  %v1594_v12 = vmul.f32 %v6671_v17, %v8634_v0  ;;  %v3085_v26 = vsel %vm2929_vm5, %v3082_v25, %v3084_v6  ;;  %v1466_v33 = vmul.f32 %v6689_v18, %v8635_v8  ;;  %v8638_v35 = vld [vmem:[#allocation43_spill] sm:$0xff] }
 0x27d   : > { %v1530_v31 = vmul.f32 %v8597_v49, %v8630_v34  ;;  %v1540_v37 = vadd.f32 %v1528_v14, %v1475_v21  ;;  %v7159_v15 = vadd.f32 %v3083_v2, %v1119_v56  ;;  %v1413_v57 = vmul.f32 %v6659_v55, %v8637_v32  ;;  %v8639_v61 = vld [vmem:[#allocation67_spill] sm:$0xff] }
 0x27e   : > { %3261 = vrot.lane.b32.xlu0 %v7135_v5, %s5186_s17  ;;  %v1467_v52 = vmul.f32 %v6693_v20, %v8635_v8  ;;  %v1531_v25 = vmul.f32 %v6741_v16, %v8638_v35  ;;  %v1541_v6 = vadd.f32 %v1529_v43, %v1476_v3  ;;  %v1477_v48 = vadd.f32 %v1465_v40, %v8639_v61 }
 0x27f   : > { %3263 = vrot.lane.b32.xlu1 %v7148_v29, %s5186_s17  ;;  %8636 = vst [vmem:[#allocation4_spill] sm:$0xff] %v7159_v15  ;;  %v1605_v42 = vadd.f32 %v1593_v7, %v1540_v37  ;;  %v1595_v34 = vmul.f32 %v6763_v36, %v8634_v0  ;;  %v7172_v14 = vadd.f32 %v3085_v26, %v1120_v28  ;;  %v3131_v7 = vpop.permute.xlu0 %3130  ;;  %v8641_v37 = vld [vmem:[#allocation47_spill] sm:$0xff]  ;;  %v8642_v26 = vld [vmem:[#allocation42_spill] sm:$0xff] }
 0x280   : > { %v1414_v56 = vmul.f32 %v6663_v44, %v8637_v32  ;;  %v1468_v2 = vmul.f32 %v6706_v59, %v8635_v8  ;;  %v1532_v43 = vmul.f32 %v8595_v30, %v8638_v35  ;;  %v1606_v21 = vadd.f32 %v1594_v12, %v1541_v6 }
 0x281   : > { %8640 = vst [vmem:[#allocation68_spill] sm:$0xff] %v7172_v14  ;;  %v7180_v40 = vadd.f32 %v3123_v38, %v1605_v42  ;;  %v1542_v3 = vadd.f32 %v1530_v31, %v1477_v48  ;;  %v1478_v0 = vadd.f32 %v1466_v33, %v1413_v57  ;;  %v1596_v61 = vmul.f32 %v6634_v39, %v8641_v37  ;;  %v3133_v38 = vpop.permute.xlu1 %3132  ;;  %v8644_v42 = vld [vmem:[#allocation38_spill] sm:$0xff] }
 0x282   : > { %3265 = vrot.lane.b32.xlu0 %v7159_v15, %s5186_s17  ;;  %v1415_v28 = vmul.f32 %v6677_v22, %v8637_v32  ;;  %v1469_v8 = vmul.f32 %v6689_v18, %v8642_v26  ;;  %v1479_v15 = vadd.f32 %v1467_v52, %v1414_v56  ;;  %v1597_v12 = vmul.f32 %v6671_v17, %v8641_v37  ;;  %v8645_v48 = vld [vmem:[#allocation46_spill] sm:$0xff] }
 0x283   : > { %3267 = vrot.lane.b32.xlu1 %v7172_v14, %s5186_s17  ;;  %v1533_v33 = vmul.f32 %v8597_v49, %v8638_v35  ;;  %v7194_v31 = vadd.f32 %v3125_v4, %v1606_v21  ;;  %v1607_v57 = vadd.f32 %v1595_v34, %v1542_v3  ;;  %v1543_v6 = vadd.f32 %v1531_v25, %v1478_v0 }
 0x284   : > { %v1416_v32 = vmul.f32 %v6659_v55, %v8644_v42  ;;  %v1470_v52 = vmul.f32 %v6693_v20, %v8642_v26  ;;  %v1534_v56 = vmul.f32 %v6741_v16, %v8645_v48  ;;  %v1544_v14 = vadd.f32 %v1532_v43, %v1479_v15 }
 0x285   : > { %8643 = vst [vmem:[#allocation3_spill] sm:$0xff] %v7194_v31  ;;  %v7204_v5 = vadd.f32 %v3127_v53, %v1607_v57  ;;  %v1608_v35 = vadd.f32 %v1596_v61, %v1543_v6  ;;  %v1480_v4 = vadd.f32 %v1468_v2, %v1415_v28  ;;  %v1598_v25 = vmul.f32 %v6763_v36, %v8641_v37  ;;  %v3135_v53 = vpop.permute.xlu0 %3134  ;;  %v8648_v61 = vld [vmem:[#allocation50_spill] sm:$0xff]  ;;  %v8649_v57 = vld [vmem:[#allocation41_spill] sm:$0xff] }
 0x286   : > { %3308 = vrot.lane.b32.xlu0 %v7180_v40, %s5186_s17  ;;  %v1417_v34 = vmul.f32 %v6663_v44, %v8644_v42  ;;  %v1471_v21 = vmul.f32 %v6706_v59, %v8642_v26  ;;  %v1535_v3 = vmul.f32 %v8595_v30, %v8645_v48  ;;  %v1609_v15 = vadd.f32 %v1597_v12, %v1544_v14 }
 0x287   : > { %8646 = vst [vmem:[#allocation71_spill] sm:$0xff] %v7204_v5  ;;  %3310 = vrot.lane.b32.xlu1 %v7194_v31, %s5186_s17  ;;  %v7216_v43 = vadd.f32 %v3129_v62, %v1608_v35  ;;  %v1545_v2 = vadd.f32 %v1533_v33, %v1480_v4  ;;  %v1481_v0 = vadd.f32 %v1469_v8, %v1416_v32  ;;  %v3137_v62 = vpop.permute.xlu1 %3136  ;;  %v8650_v35 = vld [vmem:[#allocation37_spill] sm:$0xff] }
 0x288   : > { %v1599_v37 = vmul.f32 %v6634_v39, %v8648_v61  ;;  %v1418_v28 = vmul.f32 %v6677_v22, %v8644_v42  ;;  %v1472_v26 = vmul.f32 %v6689_v18, %v8649_v57  ;;  %v1536_v14 = vmul.f32 %v8597_v49, %v8645_v48  ;;  %v8651_v31 = vld [vmem:[#allocation45_spill] sm:$0xff] }
 0x289   : > { %8647 = vst [vmem:[#allocation69_spill] sm:$0xff] %v7216_v43  ;;  %v1482_v12 = vadd.f32 %v1470_v52, %v1417_v34  ;;  %v7228_v6 = vadd.f32 %v3131_v7, %v1609_v15  ;;  %v1610_v8 = vadd.f32 %v1598_v25, %v1545_v2  ;;  %v1546_v33 = vadd.f32 %v1534_v56, %v1481_v0  ;;  %v3139_v0 = vpop.permute.xlu0 %3138 }
 0x28a   : > { %3312 = vrot.lane.b32.xlu0 %v7204_v5, %s5186_s17  ;;  %v1600_v32 = vmul.f32 %v6671_v17, %v8648_v61  ;;  %v1419_v42 = vmul.f32 %v6659_v55, %v8650_v35  ;;  %v1473_v4 = vmul.f32 %v6693_v20, %v8649_v57  ;;  %v1537_v52 = vmul.f32 %v6741_v16, %v8651_v31  ;;  %v8652_v5 = vld [vmem:[#allocation49_spill] sm:$0xff] }
 0x28b   : > { %3314 = vrot.lane.b32.xlu1 %v7216_v43, %s5186_s17  ;;  %v1547_v48 = vadd.f32 %v1535_v3, %v1482_v12  ;;  %v7240_v7 = vadd.f32 %v3133_v38, %v1610_v8  ;;  %v1611_v25 = vadd.f32 %v1599_v37, %v1546_v33  ;;  %v1483_v56 = vadd.f32 %v1471_v21, %v1418_v28  ;;  %v3141_v12 = vpop.permute.xlu1 %3140 }
 0x28c   : > { %v1601_v34 = vmul.f32 %v6763_v36, %v8648_v61  ;;  %v1420_v15 = vmul.f32 %v6663_v44, %v8650_v35  ;;  %v1474_v2 = vmul.f32 %v6706_v59, %v8649_v57  ;;  %v1484_v43 = vadd.f32 %v1472_v26, %v1419_v42 }
 0x28d   : > { %v1602_v38 = vmul.f32 %v6634_v39, %v8652_v5  ;;  %v1538_v21 = vmul.f32 %v8595_v30, %v8651_v31  ;;  %v7254_v3 = vadd.f32 %v3135_v53, %v1611_v25  ;;  %v1612_v61 = vadd.f32 %v1600_v32, %v1547_v48 }
 0x28e   : > { %3316 = vrot.lane.b32.xlu0 %v7228_v6, %s5186_s17  ;;  %v1548_v37 = vadd.f32 %v1536_v14, %v1483_v56  ;;  %v1421_v28 = vmul.f32 %v6677_v22, %v8650_v35  ;;  %v1539_v57 = vmul.f32 %v8597_v49, %v8651_v31  ;;  %v1549_v26 = vadd.f32 %v1537_v52, %v1484_v43  ;;  %v8653_v14 = vld [vmem:[#allocation56_spill] sm:$0xff]  ;;  %v3143_v56 = vpop.permute.xlu0 %3142 }
 0x28f   : > { %3318 = vrot.lane.b32.xlu1 %v7240_v7, %s5186_s17  ;;  %v7262_v8 = vadd.f32 %v3137_v62, %v1612_v61  ;;  %v1485_v42 = vadd.f32 %v1473_v4, %v1420_v15  ;;  %v1603_v53 = vmul.f32 %v6671_v17, %v8652_v5  ;;  %v1711_v32 = vmul.f32 %v6689_v18, %v8653_v14  ;;  %v8654_v62 = vld [vmem:[#allocation52_spill] sm:$0xff] }
 0x290   : > { %v1613_v33 = vadd.f32 %v1601_v34, %v1548_v37  ;;  %v1614_v48 = vadd.f32 %v1602_v38, %v1549_v26  ;;  %v1486_v31 = vadd.f32 %v1474_v2, %v1421_v28  ;;  %v1604_v43 = vmul.f32 %v6763_v36, %v8652_v5  ;;  %v8655_v34 = vld [vmem:[#allocation60_spill] sm:$0xff]  ;;  %v3145_v37 = vpop.permute.xlu1 %3144 }
 0x291   : > { %v1550_v25 = vadd.f32 %v1538_v21, %v1485_v42  ;;  %v1658_v4 = vmul.f32 %v6659_v55, %v8654_v62  ;;  %v1712_v52 = vmul.f32 %v6693_v20, %v8653_v14  ;;  %v1776_v15 = vmul.f32 %v6741_v16, %v8655_v34  ;;  %v8656_v26 = vld [vmem:[#allocation64_spill] sm:$0xff] }
 0x292   : > { %3320 = vrot.lane.b32.xlu0 %v7254_v3, %s5186_s17  ;;  %v7270_v35 = vadd.f32 %v3139_v0, %v1613_v33  ;;  %v7282_v0 = vadd.f32 %v3141_v12, %v1614_v48  ;;  %v1551_v2 = vadd.f32 %v1539_v57, %v1486_v31  ;;  %v1659_v5 = vmul.f32 %v6663_v44, %v8654_v62 }
 0x293   : > { %3322 = vrot.lane.b32.xlu1 %v7262_v8, %s5186_s17  ;;  %v1615_v38 = vadd.f32 %v1603_v53, %v1550_v25  ;;  %v1713_v21 = vmul.f32 %v6706_v59, %v8653_v14  ;;  %v1723_v61 = vadd.f32 %v1711_v32, %v1658_v4  ;;  %v1777_v28 = vmul.f32 %v8595_v30, %v8655_v34  ;;  %v8657_v53 = vld [vmem:[#allocation55_spill] sm:$0xff] }
 0x294   : > { %v1841_v12 = vmul.f32 %v6634_v39, %v8656_v26  ;;  %v1616_v57 = vadd.f32 %v1604_v43, %v1551_v2  ;;  %v1660_v42 = vmul.f32 %v6677_v22, %v8654_v62  ;;  %v1714_v14 = vmul.f32 %v6689_v18, %v8657_v53  ;;  %v8659_v43 = vld [vmem:[#allocation51_spill] sm:$0xff] }
 0x295   : > { %v7294_v33 = vadd.f32 %v3143_v56, %v1615_v38  ;;  %v1724_v32 = vadd.f32 %v1712_v52, %v1659_v5  ;;  %v1778_v48 = vmul.f32 %v8597_v49, %v8655_v34  ;;  %v1788_v25 = vadd.f32 %v1776_v15, %v1723_v61  ;;  %v8660_v52 = vld [vmem:[#allocation59_spill] sm:$0xff] }
 0x296   : > { %3324 = vrot.lane.b32.xlu0 %v7270_v35, %s5186_s17  ;;  %v1842_v31 = vmul.f32 %v6671_v17, %v8656_v26  ;;  %v7306_v4 = vadd.f32 %v3145_v37, %v1616_v57  ;;  %v1661_v56 = vmul.f32 %v6659_v55, %v8659_v43  ;;  %v1715_v62 = vmul.f32 %v6693_v20, %v8657_v53 }
 0x297   : > { %3326 = vrot.lane.b32.xlu1 %v7282_v0, %s5186_s17  ;;  %v1725_v38 = vadd.f32 %v1713_v21, %v1660_v42  ;;  %v1779_v2 = vmul.f32 %v6741_v16, %v8660_v52  ;;  %v1789_v34 = vadd.f32 %v1777_v28, %v1724_v32  ;;  %v1843_v15 = vmul.f32 %v6763_v36, %v8656_v26  ;;  %v8662_v28 = vld [vmem:[#allocation63_spill] sm:$0xff] }
 0x298   : > { %8658 = vst [vmem:[#allocation72_spill] sm:$0xff] %v7306_v4  ;;  %v7320_v5 = vadd.f32 %v1841_v12, %v1788_v25  ;;  %v1662_v61 = vmul.f32 %v6663_v44, %v8659_v43  ;;  %v1716_v37 = vmul.f32 %v6706_v59, %v8657_v53  ;;  %v1726_v57 = vadd.f32 %v1714_v14, %v1661_v56 }
 0x299   : > { %v1780_v21 = vmul.f32 %v8595_v30, %v8660_v52  ;;  %v1790_v42 = vadd.f32 %v1778_v48, %v1725_v38  ;;  %v1844_v32 = vmul.f32 %v6634_v39, %v8662_v28  ;;  %v7332_v26 = vadd.f32 %v1842_v31, %v1789_v34  ;;  %v8665_v31 = vld [vmem:[#allocation54_spill] sm:$0xff] }
 0x29a   : > { %3328 = vrot.lane.b32.xlu0 %v7294_v33, %s5186_s17  ;;  %8661 = vst [vmem:[#allocation75_spill] sm:$0xff] %v7320_v5  ;;  %v1663_v12 = vmul.f32 %v6677_v22, %v8659_v43  ;;  %v1727_v25 = vadd.f32 %v1715_v62, %v1662_v61  ;;  %v1781_v14 = vmul.f32 %v8597_v49, %v8660_v52 }
 0x29b   : > { %3330 = vrot.lane.b32.xlu1 %v7306_v4, %s5186_s17  ;;  %8663 = vst [vmem:[#allocation73_spill] sm:$0xff] %v7332_v26  ;;  %v8664_v4 = vld [vmem:[#allocation58_spill] sm:$0xff]  ;;  %v1791_v56 = vadd.f32 %v1779_v2, %v1726_v57  ;;  %v1845_v48 = vmul.f32 %v6671_v17, %v8662_v28  ;;  %v7344_v38 = vadd.f32 %v1843_v15, %v1790_v42 }
 0x29c   : > { %v1717_v53 = vmul.f32 %v6689_v18, %v8664_v4  ;;  %v1664_v34 = vmul.f32 %v6659_v55, %v8665_v31  ;;  %v1728_v43 = vadd.f32 %v1716_v37, %v1663_v12  ;;  %v1718_v62 = vmul.f32 %v6693_v20, %v8664_v4 }
 0x29d   : > { %v1792_v61 = vadd.f32 %v1780_v21, %v1727_v25  ;;  %v1846_v2 = vmul.f32 %v6763_v36, %v8662_v28  ;;  %v7356_v57 = vadd.f32 %v1844_v32, %v1791_v56  ;;  %v1665_v15 = vmul.f32 %v6663_v44, %v8665_v31  ;;  %v8667_v25 = vld [vmem:[#allocation66_spill] sm:$0xff]  ;;  %v8668_v44 = vld [vmem:[#allocation57_spill] sm:$0xff] }
 0x29e   : > { %3369 = vrot.lane.b32.xlu0 %v7320_v5, %s5186_s17  ;;  %v8666_v5 = vld [vmem:[#allocation62_spill] sm:$0xff]  ;;  %v1719_v37 = vmul.f32 %v6706_v59, %v8664_v4  ;;  %v1729_v42 = vadd.f32 %v1717_v53, %v1664_v34  ;;  %v1793_v12 = vadd.f32 %v1781_v14, %v1728_v43  ;;  %v1666_v32 = vmul.f32 %v6677_v22, %v8665_v31  ;;  %v8670_v31 = vld [vmem:[#allocation61_spill] sm:$0xff] }
 0x29f   : > { %3371 = vrot.lane.b32.xlu1 %v7332_v26, %s5186_s17  ;;  %v1782_v52 = vmul.f32 %v6741_v16, %v8666_v5  ;;  %v1783_v21 = vmul.f32 %v8595_v30, %v8666_v5  ;;  %v1847_v26 = vmul.f32 %v6634_v39, %v8667_v25  ;;  %v7368_v28 = vadd.f32 %v1845_v48, %v1792_v61  ;;  %v8669_v48 = vld [vmem:[#allocation53_spill] sm:$0xff] }
 0x2a0   : > { %v1720_v56 = vmul.f32 %v6689_v18, %v8668_v44  ;;  %v1730_v4 = vadd.f32 %v1718_v62, %v1665_v15  ;;  %v1784_v53 = vmul.f32 %v8597_v49, %v8666_v5  ;;  %v1848_v34 = vmul.f32 %v6671_v17, %v8667_v25 }
 0x2a1   : > { %v1794_v14 = vadd.f32 %v1782_v52, %v1729_v42  ;;  %v7380_v39 = vadd.f32 %v1846_v2, %v1793_v12  ;;  %v1667_v43 = vmul.f32 %v6659_v55, %v8669_v48  ;;  %v1721_v22 = vmul.f32 %v6693_v20, %v8668_v44  ;;  %v5170_v52 = vld [vmem:[#allocation2 + $0x8] sm:$0xff]  ;;  %v8671_v42 = vld [vmem:[#allocation65_spill] sm:$0xff] }
 0x2a2   : > { %3373 = vrot.lane.b32.xlu0 %v7344_v38, %s5186_s17  ;;  %v1731_v18 = vadd.f32 %v1719_v37, %v1666_v32  ;;  %v1785_v62 = vmul.f32 %v6741_v16, %v8670_v31  ;;  %v1795_v5 = vadd.f32 %v1783_v21, %v1730_v4  ;;  %v1849_v61 = vmul.f32 %v6763_v36, %v8667_v25  ;;  %v5171_v37 = vld [vmem:[#allocation2 + $0x48] sm:$0xff] }
 0x2a3   : > { %3375 = vrot.lane.b32.xlu1 %v7356_v57, %s5186_s17  ;;  %v7392_v17 = vadd.f32 %v1847_v26, %v1794_v14  ;;  %v1668_v2 = vmul.f32 %v5170_v52, %v8669_v48  ;;  %v1722_v55 = vmul.f32 %v6706_v59, %v8668_v44  ;;  %v1732_v20 = vadd.f32 %v1720_v56, %v1667_v43  ;;  %v5172_v26 = vld [vmem:[#allocation2 + $0x10] sm:$0xf] }
 0x2a4   : > { %v1786_v15 = vmul.f32 %v8595_v30, %v8670_v31  ;;  %v1796_v16 = vadd.f32 %v1784_v53, %v1731_v18  ;;  %v1850_v12 = vmul.f32 %v5171_v37, %v8671_v42  ;;  %v7402_v21 = vadd.f32 %v1848_v34, %v1795_v5  ;;  %v5173_v56 = vld [vmem:[#allocation2 + $0x50] sm:$0xff] }
 0x2a5   : > { %v1669_v25 = vmul.f32 %v5172_v26, %v8669_v48  ;;  %v1733_v32 = vadd.f32 %v1721_v22, %v1668_v2  ;;  %v1787_v59 = vmul.f32 %v8597_v49, %v8670_v31  ;;  %v1797_v44 = vadd.f32 %v1785_v62, %v1732_v20 }
 0x2a6   : > { %3377 = vrot.lane.b32.xlu0 %v7368_v28, %s5186_s17  ;;  %v1851_v30 = vmul.f32 %v5173_v56, %v8671_v42  ;;  %v7410_v4 = vadd.f32 %v1849_v61, %v1796_v16  ;;  %v1852_v34 = vmul.f32 %v6763_v36, %v8671_v42 }
 0x2a7   : > { %3379 = vrot.lane.b32.xlu1 %v7380_v39, %s5186_s17  ;;  %v1734_v53 = vadd.f32 %v1722_v55, %v1669_v25  ;;  %v1798_v14 = vadd.f32 %v1786_v15, %v1733_v32  ;;  %v7416_v48 = vadd.f32 %v1850_v12, %v1797_v44 }
 0x2a9   : > { %v1799_v49 = vadd.f32 %v1787_v59, %v1734_v53  ;;  %v7420_v43 = vadd.f32 %v1851_v30, %v1798_v14 }
 0x2aa   : > { %3381 = vrot.lane.b32.xlu0 %v7392_v17, %s5186_s17 }
 0x2ab   : > { %3383 = vrot.lane.b32.xlu1 %v7402_v21, %s5186_s17  ;;  %v7424_v22 = vadd.f32 %v1852_v34, %v1799_v49 }
 0x2ae   : > { %3385 = vrot.lane.b32.xlu0 %v7410_v4, %s5186_s17 }
 0x2af   : > { %3387 = vrot.lane.b32.xlu1 %v7416_v48, %s5186_s17 }
 0x2b2   : > { %3389 = vrot.lane.b32.xlu0 %v7420_v43, %s5186_s17 }
 0x2b3   : > { %3391 = vrot.lane.b32.xlu1 %v7424_v22, %s5186_s17 }
 0x2c8   : > { %v3183_v36 = vpop.permute.xlu0 %3182 }
 0x2c9   : > { %3219 = vst.msk [vmem:[%s7435_s21 - $0x1] sm:$0xfe] %vm3218_vm6, %v3183_v36  ;;  %v3185_v18 = vpop.permute.xlu1 %3184  ;;  %v3418_v61 = vsel %vm3218_vm6, %v3183_v36, 0.0 }
 0x2ca   : > { %3221 = vst.msk [vmem:[%s7435_s21 + $0x7] sm:$0xff] %vm3220_vm7, %v3185_v18  ;;  %v3421_v15 = vsel %vm3220_vm7, %v3185_v18, 0.0 }
 0x2cc   : > { %v3187_v31 = vpop.permute.xlu0 %3186 }
 0x2cd   : > { %3223 = vst.msk [vmem:[%s7435_s21 + $0xf] sm:$0xf] %vm3222_vm8, %v3187_v31  ;;  %v3189_v62 = vpop.permute.xlu1 %3188  ;;  %v3424_v55 = vsel %vm3222_vm8, %v3187_v31, 0.0 }
 0x2ce   : > { %3224 = vst.msk [vmem:[%s7435_s21 + $0x17] sm:$0xfe] %vm3218_vm6, %v3189_v62  ;;  %v3427_v37 = vsel %vm3218_vm6, %v3189_v62, 0.0 }
 0x2d0   : > { %v3191_v5 = vpop.permute.xlu0 %3190 }
 0x2d1   : > { %3225 = vst.msk [vmem:[%s7435_s21 + $0x1f] sm:$0xff] %vm3220_vm7, %v3191_v5  ;;  %3419 = vadd.xlane.f32.xlu0 %v3418_v61  ;;  %v3193_v52 = vpop.permute.xlu1 %3192  ;;  %v3430_v12 = vsel %vm3220_vm7, %v3191_v5, 0.0 }
 0x2d2   : > { %3226 = vst.msk [vmem:[%s7435_s21 + $0x27] sm:$0xf] %vm3222_vm8, %v3193_v52  ;;  %v3433_v25 = vsel %vm3222_vm8, %v3193_v52, 0.0 }
 0x2d4   : > { %v3195_v2 = vpop.permute.xlu0 %3194 }
 0x2d5   : > { %3227 = vst.msk [vmem:[%s7435_s21 + $0x2f] sm:$0xfe] %vm3218_vm6, %v3195_v2  ;;  %3425 = vadd.xlane.f32.xlu0 %v3424_v55  ;;  %v3197_v20 = vpop.permute.xlu1 %3196  ;;  %v3436_v59 = vsel %vm3218_vm6, %v3195_v2, 0.0 }
 0x2d6   : > { %3228 = vst.msk [vmem:[%s7435_s21 + $0x37] sm:$0xff] %vm3220_vm7, %v3197_v20  ;;  %v3439_v56 = vsel %vm3220_vm7, %v3197_v20, 0.0 }
 0x2d7   : > { %3422 = vadd.xlane.f32.xlu1 %v3421_v15  ;;  %v3536_v15 = vmul.f32 %v6867_v51, %v6867_v51 }
 0x2d8   : > { %v3199_v16 = vpop.permute.xlu0 %3198 }
 0x2d9   : > { %3229 = vst.msk [vmem:[%s7435_s21 + $0x3f] sm:$0xf] %vm3222_vm8, %v3199_v16  ;;  %3428 = vadd.xlane.f32.xlu0 %v3427_v37  ;;  %v3201_v42 = vpop.permute.xlu1 %3200  ;;  %v3442_v53 = vsel %vm3222_vm8, %v3199_v16, 0.0 }
 0x2da   : > { %3230 = vst.msk [vmem:[%s7435_s21 + $0x47] sm:$0xfe] %vm3218_vm6, %v3201_v42  ;;  %v3445_v34 = vsel %vm3218_vm6, %v3201_v42, 0.0  ;;  %v3538_v42 = vmul.f32 %v6905_v13, %v6905_v13  ;;  %v3539_v13 = vmul.f32 %v6924_v23, %v6924_v23  ;;  %v3541_v23 = vmul.f32 %v6949_v10, %v6949_v10 }
 0x2db   : > { %3431 = vadd.xlane.f32.xlu1 %v3430_v12  ;;  %v3537_v12 = vmul.f32 %v6890_v63, %v6890_v63  ;;  %v8672_v63 = vld [vmem:[#allocation18_spill] sm:$0xff]  ;;  %v3543_v10 = vmul.f32 %v6981_v50, %v6981_v50  ;;  %v3545_v50 = vmul.f32 %v7006_v45, %v7006_v45  ;;  %v3547_v45 = vmul.f32 %v7026_v11, %v7026_v11 }
 0x2dc   : > { %v3203_v26 = vpop.permute.xlu0 %3202 }
 0x2dd   : > { %3231 = vst.msk [vmem:[%s7435_s21 + $0x4f] sm:$0xff] %vm3220_vm7, %v3203_v26  ;;  %3434 = vadd.xlane.f32.xlu0 %v3433_v25  ;;  %v3205_v32 = vpop.permute.xlu1 %3204  ;;  %v3448_v36 = vsel %vm3220_vm7, %v3203_v26, 0.0 }
 0x2de   : > { %3232 = vst.msk [vmem:[%s7435_s21 + $0x57] sm:$0xf] %vm3222_vm8, %v3205_v32  ;;  %v3451_v31 = vsel %vm3222_vm8, %v3205_v32, 0.0  ;;  %v3540_v32 = vmul.f32 %v8672_v63, %v8672_v63 }
 0x2df   : > { %3437 = vadd.xlane.f32.xlu1 %v3436_v59 }
 0x2e0   : > { %v7474_v44 = vpop.permute.xlu0 %3245 }
 0x2e1   : > { %3282 = vst.msk [vmem:[%s7469_s24 - $0x1] sm:$0xfe] %vm3281_vm9, %v7474_v44  ;;  %3440 = vadd.xlane.f32.xlu0 %v3439_v56  ;;  %v7480_v30 = vpop.permute.xlu1 %3247 }
 0x2e2   : > { %3284 = vst.msk [vmem:[%s7469_s24 + $0x7] sm:$0xff] %vm3283_vm10, %v7480_v30 }
 0x2e3   : > { %3443 = vadd.xlane.f32.xlu1 %v3442_v53  ;;  %v3542_v53 = vmul.f32 %v6971_v41, %v6971_v41  ;;  %v3544_v41 = vmul.f32 %v6994_v27, %v6994_v27  ;;  %v3546_v27 = vmul.f32 %v7018_v9, %v7018_v9 }
 0x2e4   : > { %v7486_v14 = vpop.permute.xlu0 %3249 }
 0x2e5   : > { %3286 = vst.msk [vmem:[%s7469_s24 + $0xf] sm:$0xf] %vm3285_vm11, %v7486_v14  ;;  %3446 = vadd.xlane.f32.xlu0 %v3445_v34  ;;  %v7492_v49 = vpop.permute.xlu1 %3251 }
 0x2e6   : > { %3287 = vst.msk [vmem:[%s7469_s24 + $0x17] sm:$0xfe] %vm3281_vm9, %v7492_v49 }
 0x2e7   : > { %3449 = vadd.xlane.f32.xlu1 %v3448_v36 }
 0x2e8   : > { %v7498_v18 = vpop.permute.xlu0 %3253 }
 0x2e9   : > { %3288 = vst.msk [vmem:[%s7469_s24 + $0x1f] sm:$0xff] %vm3283_vm10, %v7498_v18  ;;  %3452 = vadd.xlane.f32.xlu0 %v3451_v31  ;;  %v7504_v62 = vpop.permute.xlu1 %3255 }
 0x2ea   : > { %3289 = vst.msk [vmem:[%s7469_s24 + $0x27] sm:$0xf] %vm3285_vm11, %v7504_v62 }
 0x2ec   : > { %v7509_v5 = vpop.permute.xlu0 %3257 }
 0x2ed   : > { %3290 = vst.msk [vmem:[%s7469_s24 + $0x2f] sm:$0xfe] %vm3281_vm9, %v7509_v5  ;;  %v7514_v61 = vpop.permute.xlu1 %3259 }
 0x2ee   : > { %3291 = vst.msk [vmem:[%s7469_s24 + $0x37] sm:$0xff] %vm3283_vm10, %v7514_v61 }
 0x2f0   : > { %v7519_v52 = vpop.permute.xlu0 %3261 }
 0x2f1   : > { %3292 = vst.msk [vmem:[%s7469_s24 + $0x3f] sm:$0xf] %vm3285_vm11, %v7519_v52  ;;  %v7524_v2 = vpop.permute.xlu1 %3263 }
 0x2f2   : > { %3293 = vst.msk [vmem:[%s7469_s24 + $0x47] sm:$0xfe] %vm3281_vm9, %v7524_v2 }
 0x2f4   : > { %v7529_v55 = vpop.permute.xlu0 %3265 }
 0x2f5   : > { %3294 = vst.msk [vmem:[%s7469_s24 + $0x4f] sm:$0xff] %vm3283_vm10, %v7529_v55  ;;  %v7534_v20 = vpop.permute.xlu1 %3267 }
 0x2f6   : > { %3295 = vst.msk [vmem:[%s7469_s24 + $0x57] sm:$0xf] %vm3285_vm11, %v7534_v20 }
 0x2f8   : > { %v7547_v16 = vpop.permute.xlu0 %3308  ;;  %3560 = vrot.lane.b32.xlu1 %v3536_v15, %s5186_s17 }
 0x2f9   : > { %3344 = vst.msk [vmem:[%s7540_s27 - $0x1] sm:$0xfe] %vm3218_vm6, %v7547_v16  ;;  %v7553_v37 = vpop.permute.xlu1 %3310 }
 0x2fa   : > { %3345 = vst.msk [vmem:[%s7540_s27 + $0x7] sm:$0xff] %vm3220_vm7, %v7553_v37 }
 0x2fc   : > { %v7560_v51 = vpop.permute.xlu0 %3312  ;;  %3564 = vrot.lane.b32.xlu1 %v3538_v42, %s5186_s17 }
 0x2fd   : > { %3347 = vst.msk [vmem:[%s7540_s27 + $0xf] sm:$0x7] %vm3346_vm12, %v7560_v51  ;;  %v7568_v26 = vpop.permute.xlu1 %3314 }
 0x2fe   : > { %3348 = vst.msk [vmem:[%s7540_s27 + $0x17] sm:$0xfe] %vm3218_vm6, %v7568_v26 }
 0x2ff   : > { %3562 = vrot.lane.b32.xlu0 %v3537_v12, %s5186_s17 }
 0x300   : > { %v7576_v25 = vpop.permute.xlu0 %3316  ;;  %3566 = vrot.lane.b32.xlu1 %v3539_v13, %s5186_s17 }
 0x301   : > { %3349 = vst.msk [vmem:[%s7540_s27 + $0x1f] sm:$0xff] %vm3220_vm7, %v7576_v25  ;;  %v7584_v59 = vpop.permute.xlu1 %3318 }
 0x302   : > { %3350 = vst.msk [vmem:[%s7540_s27 + $0x27] sm:$0x7] %vm3346_vm12, %v7584_v59 }
 0x303   : > { %3568 = vrot.lane.b32.xlu0 %v3540_v32, %s5186_s17 }
 0x304   : > { %v7592_v56 = vpop.permute.xlu0 %3320  ;;  %3570 = vrot.lane.b32.xlu1 %v3541_v23, %s5186_s17 }
 0x305   : > { %3351 = vst.msk [vmem:[%s7540_s27 + $0x2f] sm:$0xfe] %vm3218_vm6, %v7592_v56  ;;  %v7600_v34 = vpop.permute.xlu1 %3322 }
 0x306   : > { %3352 = vst.msk [vmem:[%s7540_s27 + $0x37] sm:$0xff] %vm3220_vm7, %v7600_v34 }
 0x307   : > { %3572 = vrot.lane.b32.xlu0 %v3542_v53, %s5186_s17 }
 0x308   : > { %v7608_v36 = vpop.permute.xlu0 %3324  ;;  %3574 = vrot.lane.b32.xlu1 %v3543_v10, %s5186_s17 }
 0x309   : > { %3353 = vst.msk [vmem:[%s7540_s27 + $0x3f] sm:$0x7] %vm3346_vm12, %v7608_v36  ;;  %v7616_v31 = vpop.permute.xlu1 %3326 }
 0x30a   : > { %3354 = vst.msk [vmem:[%s7540_s27 + $0x47] sm:$0xfe] %vm3218_vm6, %v7616_v31 }
 0x30b   : > { %3576 = vrot.lane.b32.xlu0 %v3544_v41, %s5186_s17 }
 0x30c   : > { %v7624_v15 = vpop.permute.xlu0 %3328  ;;  %3578 = vrot.lane.b32.xlu1 %v3545_v50, %s5186_s17 }
 0x30d   : > { %3355 = vst.msk [vmem:[%s7540_s27 + $0x4f] sm:$0xff] %vm3220_vm7, %v7624_v15  ;;  %v7632_v42 = vpop.permute.xlu1 %3330 }
 0x30e   : > { %3356 = vst.msk [vmem:[%s7540_s27 + $0x57] sm:$0x7] %vm3346_vm12, %v7632_v42 }
 0x30f   : > { %3580 = vrot.lane.b32.xlu0 %v3546_v27, %s5186_s17 }
 0x310   : > { %v7644_v9 = vpop.permute.xlu0 %3369  ;;  %3582 = vrot.lane.b32.xlu1 %v3547_v45, %s5186_s17 }
 0x311   : > { %8673 = vst [vmem:[#allocation76_spill] sm:$0xff] %v7644_v9  ;;  %3405 = vst.msk [vmem:[%s381_s11 - $0x1] sm:$0xfe] %vm3281_vm9, %v7644_v9  ;;  %v7649_v12 = vpop.permute.xlu1 %3371 }
 0x312   : > { %8674 = vst [vmem:[#allocation74_spill] sm:$0xff] %v7649_v12  ;;  %3406 = vst.msk [vmem:[%s381_s11 + $0x7] sm:$0xff] %vm3283_vm10, %v7649_v12 }
 0x314   : > { %v7653_v13 = vpop.permute.xlu0 %3373 }
 0x315   : > { %8675 = vst [vmem:[#allocation77_spill] sm:$0xff] %v7653_v13  ;;  %3408 = vst.msk [vmem:[%s381_s11 + $0xf] sm:$0x7] %vm3407_vm13, %v7653_v13  ;;  %v7657_v11 = vpop.permute.xlu1 %3375 }
 0x316   : > { %8676 = vst [vmem:[#allocation78_spill] sm:$0xff] %v7657_v11  ;;  %3409 = vst.msk [vmem:[%s381_s11 + $0x17] sm:$0xfe] %vm3281_vm9, %v7657_v11 }
 0x318   : > { %v7661_v63 = vpop.permute.xlu0 %3377 }
 0x319   : > { %8677 = vst [vmem:[#allocation79_spill] sm:$0xff] %v7661_v63  ;;  %3410 = vst.msk [vmem:[%s381_s11 + $0x1f] sm:$0xff] %vm3283_vm10, %v7661_v63  ;;  %v7665_v32 = vpop.permute.xlu1 %3379 }
 0x31a   : > { %8678 = vst [vmem:[#allocation80_spill] sm:$0xff] %v7665_v32  ;;  %3411 = vst.msk [vmem:[%s381_s11 + $0x27] sm:$0x7] %vm3407_vm13, %v7665_v32 }
 0x31c   : > { %v7669_v23 = vpop.permute.xlu0 %3381 }
 0x31d   : > { %8679 = vst [vmem:[#allocation83_spill] sm:$0xff] %v7669_v23  ;;  %3412 = vst.msk [vmem:[%s381_s11 + $0x2f] sm:$0xfe] %vm3281_vm9, %v7669_v23  ;;  %v7673_v53 = vpop.permute.xlu1 %3383 }
 0x31e   : > { %8680 = vst [vmem:[#allocation84_spill] sm:$0xff] %v7673_v53  ;;  %3413 = vst.msk [vmem:[%s381_s11 + $0x37] sm:$0xff] %vm3283_vm10, %v7673_v53 }
 0x320   : > { %v7677_v10 = vpop.permute.xlu0 %3385 }
 0x321   : > { %8681 = vst [vmem:[#allocation81_spill] sm:$0xff] %v7677_v10  ;;  %3414 = vst.msk [vmem:[%s381_s11 + $0x3f] sm:$0x7] %vm3407_vm13, %v7677_v10  ;;  %v7681_v41 = vpop.permute.xlu1 %3387 }
 0x322   : > { %8682 = vst [vmem:[#allocation82_spill] sm:$0xff] %v7681_v41  ;;  %3415 = vst.msk [vmem:[%s381_s11 + $0x47] sm:$0xfe] %vm3281_vm9, %v7681_v41 }
 0x324   : > { %v7685_v50 = vpop.permute.xlu0 %3389 }
 0x325   : > { %8683 = vst [vmem:[#allocation85_spill] sm:$0xff] %v7685_v50  ;;  %3416 = vst.msk [vmem:[%s381_s11 + $0x4f] sm:$0xff] %vm3283_vm10, %v7685_v50  ;;  %v7689_v27 = vpop.permute.xlu1 %3391 }
 0x326   : > { %8684 = vst [vmem:[#allocation86_spill] sm:$0xff] %v7689_v27  ;;  %3417 = vst.msk [vmem:[%s381_s11 + $0x57] sm:$0x7] %vm3407_vm13, %v7689_v27 }
 0x35e   : > { %v7693_v45 = vpop.xlane.xlu0 %3419 }
 0x35f   : > { %8685 = vst [vmem:[#allocation87_spill] sm:$0xff] %v7693_v45 }
 0x362   : > { %v7695_v53 = vpop.xlane.xlu0 %3425 }
 0x363   : > { %8686 = vst [vmem:[#allocation88_spill] sm:$0xff] %v7695_v53 }
 0x364   : > { %v7697_v10 = vpop.xlane.xlu1 %3422 }
 0x365   : > { %8687 = vst [vmem:[#allocation89_spill] sm:$0xff] %v7697_v10 }
 0x366   : > { %v7699_v32 = vpop.xlane.xlu0 %3428 }
 0x367   : > { %8688 = vst [vmem:[#allocation90_spill] sm:$0xff] %v7699_v32 }
 0x368   : > { %v7701_v23 = vpop.xlane.xlu1 %3431 }
 0x369   : > { %8689 = vst [vmem:[#allocation91_spill] sm:$0xff] %v7701_v23 }
 0x36a   : > { %v7703_v41 = vpop.xlane.xlu0 %3434 }
 0x36b   : > { %8690 = vst [vmem:[#allocation28_spill] sm:$0xff] %v7703_v41 }
 0x36c   : > { %v7705_v11 = vpop.xlane.xlu1 %3437 }
 0x36d   : > { %8691 = vst [vmem:[#allocation31_spill] sm:$0xff] %v7705_v11 }
 0x36e   : > { %v7707_v50 = vpop.xlane.xlu0 %3440 }
 0x36f   : > { %8692 = vst [vmem:[#allocation92_spill] sm:$0xff] %v7707_v50 }
 0x370   : > { %v7709_v63 = vpop.xlane.xlu1 %3443 }
 0x371   : > { %8693 = vst [vmem:[#allocation30_spill] sm:$0xff] %v7709_v63 }
 0x372   : > { %v7711_v12 = vpop.xlane.xlu0 %3446 }
 0x373   : > { %8694 = vst [vmem:[#allocation27_spill] sm:$0xff] %v7711_v12 }
 0x374   : > { %v7713_v27 = vpop.xlane.xlu1 %3449 }
 0x376   : > { %v7715_v45 = vpop.xlane.xlu0 %3452 }
 0x378   : > { %v3561_v53 = vpop.permute.xlu1 %3560 }
 0x379   : > { %v3596_v10 = vsel %vm3218_vm6, %v3561_v53, 0.0 }
 0x37a   : > { %v3563_v32 = vpop.permute.xlu0 %3562  ;;  %3597 = vadd.xlane.f32.xlu0 %v3596_v10 }
 0x37b   : > { %v3599_v23 = vsel %vm3220_vm7, %v3563_v32, 0.0 }
 0x37c   : > { %3600 = vadd.xlane.f32.xlu1 %v3599_v23  ;;  %v3565_v41 = vpop.permute.xlu1 %3564 }
 0x37d   : > { %v3602_v11 = vsel %vm3222_vm8, %v3565_v41, 0.0 }
 0x37e   : > { %v3569_v50 = vpop.permute.xlu0 %3568  ;;  %3603 = vadd.xlane.f32.xlu0 %v3602_v11 }
 0x37f   : > { %v3608_v63 = vsel %vm3220_vm7, %v3569_v50, 0.0 }
 0x380   : > { %3609 = vadd.xlane.f32.xlu1 %v3608_v63  ;;  %v3567_v13 = vpop.permute.xlu1 %3566 }
 0x381   : > { %v3605_v9 = vsel %vm3218_vm6, %v3567_v13, 0.0 }
 0x382   : > { %v3573_v12 = vpop.permute.xlu0 %3572  ;;  %3606 = vadd.xlane.f32.xlu0 %v3605_v9 }
 0x383   : > { %v3614_v53 = vsel %vm3218_vm6, %v3573_v12, 0.0 }
 0x384   : > { %3615 = vadd.xlane.f32.xlu1 %v3614_v53  ;;  %v3571_v10 = vpop.permute.xlu1 %3570  ;;  %v3712_v53 = vsel %vm3281_vm9, %v7474_v44, 0.0  ;;  %v3721_v44 = vsel %vm3281_vm9, %v7492_v49, 0.0  ;;  %v3742_v49 = vsel %vm3283_vm10, %v7529_v55, 0.0  ;;  %v3831_v55 = vmul.f32 %v7075_v60, %v7075_v60 }
 0x385   : > { %v3611_v32 = vsel %vm3222_vm8, %v3571_v10, 0.0  ;;  %v3837_v60 = vmul.f32 %v7148_v29, %v7148_v29 }
 0x386   : > { %v3577_v23 = vpop.permute.xlu0 %3576  ;;  %3612 = vadd.xlane.f32.xlu0 %v3611_v32 }
 0x387   : > { %v3620_v41 = vsel %vm3222_vm8, %v3577_v23, 0.0  ;;  %v3718_v23 = vsel %vm3285_vm11, %v7486_v14, 0.0  ;;  %v3727_v14 = vsel %vm3285_vm11, %v7504_v62, 0.0  ;;  %v3745_v62 = vsel %vm3285_vm11, %v7534_v20, 0.0 }
 0x388   : > { %3621 = vadd.xlane.f32.xlu1 %v3620_v41  ;;  %v3575_v11 = vpop.permute.xlu1 %3574  ;;  %v3715_v41 = vsel %vm3283_vm10, %v7480_v30, 0.0  ;;  %v3736_v30 = vsel %vm3285_vm11, %v7519_v52, 0.0  ;;  %v3828_v52 = vmul.f32 %v7039_v1, %v7039_v1  ;;  %v3833_v20 = vmul.f32 %v7098_v46, %v7098_v46  ;;  %v8695_v46 = vld [vmem:[#allocation17_spill] sm:$0xff] }
 0x389   : > { %v3617_v50 = vsel %vm3220_vm7, %v3575_v11, 0.0  ;;  %v3724_v11 = vsel %vm3283_vm10, %v7498_v18, 0.0  ;;  %v3733_v18 = vsel %vm3283_vm10, %v7514_v61, 0.0  ;;  %v3830_v61 = vmul.f32 %v7064_v54, %v7064_v54 }
 0x38a   : > { %v3581_v63 = vpop.permute.xlu0 %3580  ;;  %3618 = vadd.xlane.f32.xlu0 %v3617_v50  ;;  %v3730_v50 = vsel %vm3281_vm9, %v7509_v5, 0.0  ;;  %v3739_v5 = vsel %vm3281_vm9, %v7524_v2, 0.0  ;;  %v3829_v2 = vmul.f32 %v7053_v24, %v7053_v24  ;;  %v3832_v1 = vmul.f32 %v7089_v58, %v7089_v58 }
 0x38b   : > { %v3626_v13 = vsel %vm3220_vm7, %v3581_v63, 0.0  ;;  %v3835_v54 = vmul.f32 %v7122_v19, %v7122_v19  ;;  %v3834_v24 = vmul.f32 %v7111_v47, %v7111_v47  ;;  %v3836_v58 = vmul.f32 %v8695_v46, %v8695_v46  ;;  %v8696_v63 = vld [vmem:[#allocation68_spill] sm:$0xff] }
 0x38c   : > { %3627 = vadd.xlane.f32.xlu1 %v3626_v13  ;;  %v3579_v9 = vpop.permute.xlu1 %3578  ;;  %v3839_v19 = vmul.f32 %v8696_v63, %v8696_v63  ;;  %v8697_v13 = vld [vmem:[#allocation4_spill] sm:$0xff] }
 0x38d   : > { %v3623_v12 = vsel %vm3218_vm6, %v3579_v9, 0.0  ;;  %v3838_v47 = vmul.f32 %v8697_v13, %v8697_v13 }
 0x38e   : > { %3624 = vadd.xlane.f32.xlu0 %v3623_v12 }
 0x390   : > { %3713 = vadd.xlane.f32.xlu1 %v3712_v53  ;;  %v3583_v10 = vpop.permute.xlu1 %3582 }
 0x391   : > { %v3629_v32 = vsel %vm3222_vm8, %v3583_v10, 0.0 }
 0x392   : > { %3630 = vadd.xlane.f32.xlu0 %v3629_v32 }
 0x394   : > { %3719 = vadd.xlane.f32.xlu1 %v3718_v23 }
 0x396   : > { %3716 = vadd.xlane.f32.xlu0 %v3715_v41 }
 0x398   : > { %3725 = vadd.xlane.f32.xlu1 %v3724_v11 }
 0x39a   : > { %3722 = vadd.xlane.f32.xlu0 %v3721_v44 }
 0x39c   : > { %3731 = vadd.xlane.f32.xlu1 %v3730_v50 }
 0x39e   : > { %3728 = vadd.xlane.f32.xlu0 %v3727_v14 }
 0x3a0   : > { %3737 = vadd.xlane.f32.xlu1 %v3736_v30 }
 0x3a2   : > { %3734 = vadd.xlane.f32.xlu0 %v3733_v18 }
 0x3a4   : > { %3743 = vadd.xlane.f32.xlu1 %v3742_v49 }
 0x3a6   : > { %3740 = vadd.xlane.f32.xlu0 %v3739_v5 }
 0x3aa   : > { %3746 = vadd.xlane.f32.xlu0 %v3745_v62 }
 0x3b5   : > { %3852 = vrot.lane.b32.xlu1 %v3828_v52, %s5186_s17 }
 0x3b9   : > { %3856 = vrot.lane.b32.xlu1 %v3830_v61, %s5186_s17 }
 0x3bd   : > { %3858 = vrot.lane.b32.xlu1 %v3831_v55, %s5186_s17 }
 0x3c0   : > { %3854 = vrot.lane.b32.xlu0 %v3829_v2, %s5186_s17 }
 0x3c1   : > { %3862 = vrot.lane.b32.xlu1 %v3833_v20, %s5186_s17 }
 0x3c4   : > { %3860 = vrot.lane.b32.xlu0 %v3832_v1, %s5186_s17 }
 0x3c5   : > { %3866 = vrot.lane.b32.xlu1 %v3835_v54, %s5186_s17 }
 0x3c8   : > { %3864 = vrot.lane.b32.xlu0 %v3834_v24, %s5186_s17 }
 0x3c9   : > { %3870 = vrot.lane.b32.xlu1 %v3837_v60, %s5186_s17 }
 0x3cc   : > { %3868 = vrot.lane.b32.xlu0 %v3836_v58, %s5186_s17 }
 0x3cd   : > { %3874 = vrot.lane.b32.xlu1 %v3839_v19, %s5186_s17 }
 0x3d0   : > { %3872 = vrot.lane.b32.xlu0 %v3838_v47, %s5186_s17 }
 0x407   : > { %v7789_v29 = vpop.xlane.xlu0 %3597 }
 0x409   : > { %v7791_v9 = vpop.xlane.xlu1 %3600 }
 0x40b   : > { %v7793_v12 = vpop.xlane.xlu0 %3603 }
 0x40d   : > { %v7795_v53 = vpop.xlane.xlu1 %3609 }
 0x40f   : > { %v7797_v10 = vpop.xlane.xlu0 %3606 }
 0x411   : > { %v7799_v32 = vpop.xlane.xlu1 %3615 }
 0x413   : > { %v7801_v23 = vpop.xlane.xlu0 %3612 }
 0x415   : > { %v7803_v41 = vpop.xlane.xlu1 %3621 }
 0x416   : > { %8698 = vst [vmem:[#allocation96_spill] sm:$0xff] %v7803_v41 }
 0x417   : > { %v7805_v11 = vpop.xlane.xlu0 %3618 }
 0x419   : > { %v7807_v44 = vpop.xlane.xlu1 %3627 }
 0x41a   : > { %8699 = vst [vmem:[#allocation16_spill] sm:$0xff] %v7807_v44 }
 0x41b   : > { %v7809_v50 = vpop.xlane.xlu0 %3624 }
 0x41c   : > { %8700 = vst [vmem:[#allocation93_spill] sm:$0xff] %v7809_v50 }
 0x41d   : > { %v7811_v14 = vpop.xlane.xlu1 %3713 }
 0x41f   : > { %v7813_v30 = vpop.xlane.xlu0 %3630 }
 0x420   : > { %8701 = vst [vmem:[#allocation15_spill] sm:$0xff] %v7813_v30 }
 0x421   : > { %v7815_v18 = vpop.xlane.xlu1 %3719 }
 0x423   : > { %v7817_v49 = vpop.xlane.xlu0 %3716 }
 0x425   : > { %v7819_v5 = vpop.xlane.xlu1 %3725 }
 0x427   : > { %v7821_v62 = vpop.xlane.xlu0 %3722 }
 0x429   : > { %v7823_v52 = vpop.xlane.xlu1 %3731 }
 0x42b   : > { %v7825_v61 = vpop.xlane.xlu0 %3728 }
 0x42d   : > { %v7827_v55 = vpop.xlane.xlu1 %3737 }
 0x42f   : > { %v7829_v2 = vpop.xlane.xlu0 %3734 }
 0x431   : > { %v3744_v20 = vpop.xlane.xlu1 %3743 }
 0x432   : > { %v3776_v58 = vrot.slane %v3744_v20, 1 }
 0x433   : > { %v3741_v1 = vpop.xlane.xlu0 %3740 }
 0x434   : > { %v3775_v60 = vrot.slane %v3741_v1, 1 }
 0x435   : > { %v3853_v54 = vpop.permute.xlu1 %3852 }
 0x436   : > { %v3888_v24 = vsel %vm3281_vm9, %v3853_v54, 0.0  ;;  %v3777_v47 = vsel %vm3466_vm14, %v3775_v60, %v3776_v58 }
 0x437   : > { %3889 = vadd.xlane.f32.xlu0 %v3888_v24  ;;  %v3747_v46 = vpop.xlane.xlu0 %3746 }
 0x438   : > { %v3778_v63 = vrot.slane %v3747_v46, 1 }
 0x439   : > { %v3857_v19 = vpop.permute.xlu1 %3856 }
 0x43a   : > { %v3894_v13 = vsel %vm3285_vm11, %v3857_v19, 0.0  ;;  %v3779_v50 = vsel %vm3466_vm14, %v3776_v58, %v3778_v63  ;;  %v3820_v41 = vsel %vm3500_vm15, %v3778_v63, 0.0 }
 0x43b   : > { %3895 = vadd.xlane.f32.xlu0 %v3894_v13  ;;  %v3819_v44 = vadd.f32 %v3779_v50, %v3777_v47  ;;  %v3855_v30 = vpop.permute.xlu0 %3854 }
 0x43c   : > { %v3891_v1 = vsel %vm3283_vm10, %v3855_v30, 0.0 }
 0x43d   : > { %v3859_v54 = vpop.permute.xlu1 %3858  ;;  %v7837_v24 = vadd.f32 %v3820_v41, %v3819_v44  ;;  %3892 = vadd.xlane.f32.xlu1 %v3891_v1 }
 0x43e   : > { %v3897_v20 = vsel %vm3281_vm9, %v3859_v54, 0.0 }
 0x43f   : > { %3898 = vadd.xlane.f32.xlu0 %v3897_v20  ;;  %v3861_v46 = vpop.permute.xlu0 %3860 }
 0x440   : > { %v3900_v60 = vsel %vm3283_vm10, %v3861_v46, 0.0 }
 0x441   : > { %v3863_v19 = vpop.permute.xlu1 %3862  ;;  %3901 = vadd.xlane.f32.xlu1 %v3900_v60 }
 0x442   : > { %v3903_v58 = vsel %vm3285_vm11, %v3863_v19, 0.0  ;;  %v4012_v19 = vsel %vm3218_vm6, %v7547_v16, 0.0  ;;  %v4027_v16 = vsel %vm3346_vm12, %v7584_v59, 0.0  ;;  %v4042_v59 = vsel %vm3220_vm7, %v7624_v15, 0.0 }
 0x443   : > { %3904 = vadd.xlane.f32.xlu0 %v3903_v58  ;;  %v3865_v50 = vpop.permute.xlu0 %3864  ;;  %v4015_v58 = vsel %vm3220_vm7, %v7553_v37, 0.0  ;;  %v4030_v37 = vsel %vm3218_vm6, %v7592_v56, 0.0  ;;  %v4045_v56 = vsel %vm3346_vm12, %v7632_v42, 0.0  ;;  %v4133_v42 = vmul.f32 %v7228_v6, %v7228_v6 }
 0x444   : > { %v3906_v63 = vsel %vm3281_vm9, %v3865_v50, 0.0  ;;  %v4018_v50 = vsel %vm3346_vm12, %v7560_v51, 0.0  ;;  %v4033_v51 = vsel %vm3220_vm7, %v7600_v34, 0.0  ;;  %v4129_v34 = vmul.f32 %v7180_v40, %v7180_v40 }
 0x445   : > { %v3867_v13 = vpop.permute.xlu1 %3866  ;;  %3907 = vadd.xlane.f32.xlu1 %v3906_v63  ;;  %v4021_v63 = vsel %vm3218_vm6, %v7568_v26, 0.0  ;;  %v4036_v26 = vsel %vm3346_vm12, %v7608_v36, 0.0  ;;  %v4134_v40 = vmul.f32 %v7240_v7, %v7240_v7  ;;  %v4137_v6 = vmul.f32 %v7270_v35, %v7270_v35  ;;  %v8706_v35 = vld [vmem:[#allocation75_spill] sm:$0xff] }
 0x446   : > { %v3909_v30 = vsel %vm3283_vm10, %v3867_v13, 0.0  ;;  %v4024_v13 = vsel %vm3220_vm7, %v7576_v25, 0.0  ;;  %v4039_v25 = vsel %vm3218_vm6, %v7616_v31, 0.0  ;;  %v4138_v7 = vmul.f32 %v7282_v0, %v7282_v0  ;;  %v8707_v0 = vld [vmem:[#allocation73_spill] sm:$0xff] }
 0x447   : > { %3910 = vadd.xlane.f32.xlu0 %v3909_v30  ;;  %v3869_v41 = vpop.permute.xlu0 %3868  ;;  %v8702_v30 = vld [vmem:[#allocation71_spill] sm:$0xff] }
 0x448   : > { %v3912_v44 = vsel %vm3285_vm11, %v3869_v41, 0.0  ;;  %v4131_v36 = vmul.f32 %v8702_v30, %v8702_v30  ;;  %v8703_v41 = vld [vmem:[#allocation3_spill] sm:$0xff] }
 0x449   : > { %v3871_v47 = vpop.permute.xlu1 %3870  ;;  %3913 = vadd.xlane.f32.xlu1 %v3912_v44  ;;  %v4130_v31 = vmul.f32 %v8703_v41, %v8703_v41  ;;  %v8704_v44 = vld [vmem:[#allocation69_spill] sm:$0xff] }
 0x44a   : > { %v3915_v1 = vsel %vm3281_vm9, %v3871_v47, 0.0  ;;  %v4132_v15 = vmul.f32 %v8704_v44, %v8704_v44  ;;  %v4135_v47 = vmul.f32 %v7254_v3, %v7254_v3  ;;  %v4139_v3 = vmul.f32 %v7294_v33, %v7294_v33 }
 0x44b   : > { %3916 = vadd.xlane.f32.xlu0 %v3915_v1  ;;  %v3873_v54 = vpop.permute.xlu0 %3872  ;;  %v4136_v1 = vmul.f32 %v7262_v8, %v7262_v8  ;;  %v4431_v33 = vmul.f32 %v7344_v38, %v7344_v38  ;;  %v4435_v38 = vmul.f32 %v7392_v17, %v7392_v17  ;;  %v4439_v17 = vmul.f32 %v7420_v43, %v7420_v43 }
 0x44c   : > { %v3918_v20 = vsel %vm3283_vm10, %v3873_v54, 0.0  ;;  %v8705_v54 = vld [vmem:[#allocation72_spill] sm:$0xff] }
 0x44d   : > { %v3875_v46 = vpop.permute.xlu1 %3874  ;;  %3919 = vadd.xlane.f32.xlu1 %v3918_v20  ;;  %v4140_v8 = vmul.f32 %v8705_v54, %v8705_v54  ;;  %v4429_v20 = vmul.f32 %v8706_v35, %v8706_v35 }
 0x44e   : > { %v3921_v60 = vsel %vm3285_vm11, %v3875_v46, 0.0  ;;  %v4430_v46 = vmul.f32 %v8707_v0, %v8707_v0 }
 0x44f   : > { %3922 = vadd.xlane.f32.xlu0 %v3921_v60  ;;  %v4432_v60 = vmul.f32 %v7356_v57, %v7356_v57  ;;  %v4436_v57 = vmul.f32 %v7402_v21, %v7402_v21  ;;  %v4440_v21 = vmul.f32 %v7424_v22, %v7424_v22 }
 0x451   : > { %4013 = vadd.xlane.f32.xlu1 %v4012_v19  ;;  %v4433_v19 = vmul.f32 %v7368_v28, %v7368_v28  ;;  %v4437_v28 = vmul.f32 %v7410_v4, %v7410_v4 }
 0x453   : > { %4016 = vadd.xlane.f32.xlu0 %v4015_v58  ;;  %v4434_v58 = vmul.f32 %v7380_v39, %v7380_v39  ;;  %v4438_v39 = vmul.f32 %v7416_v48, %v7416_v48 }
 0x455   : > { %4019 = vadd.xlane.f32.xlu1 %v4018_v50 }
 0x457   : > { %4022 = vadd.xlane.f32.xlu0 %v4021_v63 }
 0x459   : > { %4025 = vadd.xlane.f32.xlu1 %v4024_v13 }
 0x45b   : > { %4028 = vadd.xlane.f32.xlu0 %v4027_v16 }
 0x45d   : > { %4031 = vadd.xlane.f32.xlu1 %v4030_v37 }
 0x45f   : > { %4034 = vadd.xlane.f32.xlu0 %v4033_v51 }
 0x461   : > { %4037 = vadd.xlane.f32.xlu1 %v4036_v26 }
 0x463   : > { %4040 = vadd.xlane.f32.xlu0 %v4039_v25 }
 0x465   : > { %4043 = vadd.xlane.f32.xlu1 %v4042_v59 }
 0x467   : > { %4046 = vadd.xlane.f32.xlu0 %v4045_v56 }
 0x476   : > { %4153 = vrot.lane.b32.xlu1 %v4129_v34, %s5186_s17 }
 0x47a   : > { %4157 = vrot.lane.b32.xlu1 %v4131_v36, %s5186_s17 }
 0x47d   : > { %4155 = vrot.lane.b32.xlu0 %v4130_v31, %s5186_s17 }
 0x47e   : > { %4159 = vrot.lane.b32.xlu1 %v4132_v15, %s5186_s17 }
 0x481   : > { %4161 = vrot.lane.b32.xlu0 %v4133_v42, %s5186_s17 }
 0x482   : > { %4163 = vrot.lane.b32.xlu1 %v4134_v40, %s5186_s17 }
 0x485   : > { %4165 = vrot.lane.b32.xlu0 %v4135_v47, %s5186_s17 }
 0x486   : > { %4167 = vrot.lane.b32.xlu1 %v4136_v1, %s5186_s17 }
 0x489   : > { %4169 = vrot.lane.b32.xlu0 %v4137_v6, %s5186_s17 }
 0x48a   : > { %4171 = vrot.lane.b32.xlu1 %v4138_v7, %s5186_s17 }
 0x48d   : > { %4173 = vrot.lane.b32.xlu0 %v4139_v3, %s5186_s17 }
 0x48e   : > { %4175 = vrot.lane.b32.xlu1 %v4140_v8, %s5186_s17 }
 0x491   : > { %4453 = vrot.lane.b32.xlu0 %v4429_v20, %s5186_s17 }
 0x492   : > { %4455 = vrot.lane.b32.xlu1 %v4430_v46, %s5186_s17 }
 0x495   : > { %4457 = vrot.lane.b32.xlu0 %v4431_v33, %s5186_s17 }
 0x496   : > { %4459 = vrot.lane.b32.xlu1 %v4432_v60, %s5186_s17 }
 0x499   : > { %4461 = vrot.lane.b32.xlu0 %v4433_v19, %s5186_s17 }
 0x49a   : > { %4463 = vrot.lane.b32.xlu1 %v4434_v58, %s5186_s17 }
 0x49d   : > { %4465 = vrot.lane.b32.xlu0 %v4435_v38, %s5186_s17 }
 0x49e   : > { %4467 = vrot.lane.b32.xlu1 %v4436_v57, %s5186_s17 }
 0x4a1   : > { %4469 = vrot.lane.b32.xlu0 %v4437_v28, %s5186_s17 }
 0x4a2   : > { %4471 = vrot.lane.b32.xlu1 %v4438_v39, %s5186_s17 }
 0x4a5   : > { %4473 = vrot.lane.b32.xlu0 %v4439_v17, %s5186_s17 }
 0x4a6   : > { %4475 = vrot.lane.b32.xlu1 %v4440_v21, %s5186_s17 }
 0x4c4   : > { %v3890_v50 = vpop.xlane.xlu0 %3889 }
 0x4c5   : > { %v3936_v13 = vrot.slane %v3890_v50, 1  ;;  %v3485_v50 = vrot.slane %v7715_v45, 1 }
 0x4c8   : > { %v3896_v63 = vpop.xlane.xlu0 %3895 }
 0x4c9   : > { %v3939_v16 = vrot.slane %v3896_v63, 1 }
 0x4ca   : > { %v3893_v4 = vpop.xlane.xlu1 %3892 }
 0x4cb   : > { %v3937_v37 = vrot.slane %v3893_v4, 1  ;;  %v3969_v59 = vsel %vm3500_vm15, %v3939_v16, 0.0 }
 0x4cc   : > { %v3899_v51 = vpop.xlane.xlu0 %3898 }
 0x4cd   : > { %v3938_v48 = vsel %vm3466_vm14, %v3936_v13, %v3937_v37  ;;  %v3940_v26 = vsel %vm3466_vm14, %v3937_v37, %v3939_v16  ;;  %v3941_v56 = vrot.slane %v3899_v51, 1  ;;  %v3483_v37 = vrot.slane %v7713_v27, 1 }
 0x4ce   : > { %v3968_v25 = vadd.f32 %v3940_v26, %v3938_v48  ;;  %v3902_v43 = vpop.xlane.xlu1 %3901 }
 0x4cf   : > { %v3942_v34 = vrot.slane %v3902_v43, 1  ;;  %v8708_v43 = vld [vmem:[#allocation27_spill] sm:$0xff] }
 0x4d0   : > { %v3905_v22 = vpop.xlane.xlu0 %3904  ;;  %v7947_v30 = vadd.f32 %v3969_v59, %v3968_v25  ;;  %v3482_v59 = vrot.slane %v8708_v43, 1 }
 0x4d1   : > { %v3944_v36 = vrot.slane %v3905_v22, 1  ;;  %v3943_v41 = vsel %vm3466_vm14, %v3941_v56, %v3942_v34  ;;  %v3486_v56 = vsel %vm3466_vm14, %v3483_v37, %v3485_v50 }
 0x4d2   : > { %v3908_v44 = vpop.xlane.xlu1 %3907 }
 0x4d3   : > { %v3945_v31 = vsel %vm3466_vm14, %v3942_v34, %v3944_v36  ;;  %v3978_v40 = vsel %vm3500_vm15, %v3944_v36, 0.0  ;;  %v3946_v47 = vrot.slane %v3908_v44, 1  ;;  %v3484_v34 = vsel %vm3466_vm14, %v3482_v59, %v3483_v37 }
 0x4d4   : > { %v3977_v15 = vadd.f32 %v3945_v31, %v3943_v41  ;;  %v3911_v42 = vpop.xlane.xlu0 %3910  ;;  %v3527_v41 = vadd.f32 %v3486_v56, %v3484_v34 }
 0x4d5   : > { %v3947_v1 = vrot.slane %v3911_v42, 1 }
 0x4d6   : > { %v7952_v6 = vadd.f32 %v3978_v40, %v3977_v15  ;;  %v3914_v3 = vpop.xlane.xlu1 %3913 }
 0x4d7   : > { %v3948_v7 = vsel %vm3466_vm14, %v3946_v47, %v3947_v1  ;;  %v3949_v54 = vrot.slane %v3914_v3, 1 }
 0x4d8   : > { %v3917_v8 = vpop.xlane.xlu0 %3916 }
 0x4d9   : > { %v3950_v35 = vsel %vm3466_vm14, %v3947_v1, %v3949_v54  ;;  %v3987_v46 = vsel %vm3500_vm15, %v3949_v54, 0.0  ;;  %v3951_v33 = vrot.slane %v3917_v8, 1  ;;  %v3528_v1 = vsel %vm3500_vm15, %v3485_v50, 0.0 }
 0x4da   : > { %v3986_v20 = vadd.f32 %v3950_v35, %v3948_v7  ;;  %v3920_v0 = vpop.xlane.xlu1 %3919  ;;  %v3529_v54 = vadd.f32 %v3528_v1, %v3527_v41 }
 0x4db   : > { %v3952_v60 = vrot.slane %v3920_v0, 1 }
 0x4dc   : > { %v3923_v19 = vpop.xlane.xlu0 %3922  ;;  %v7957_v58 = vadd.f32 %v3987_v46, %v3986_v20 }
 0x4dd   : > { %v3954_v38 = vrot.slane %v3923_v19, 1  ;;  %v3953_v57 = vsel %vm3466_vm14, %v3951_v33, %v3952_v60  ;;  %v3822_v33 = vrot.slane %v7837_v24, 4 }
 0x4de   : > { %v4014_v39 = vpop.xlane.xlu1 %4013 }
 0x4df   : > { %v3955_v28 = vsel %vm3466_vm14, %v3952_v60, %v3954_v38  ;;  %v3996_v63 = vsel %vm3500_vm15, %v3954_v38, 0.0  ;;  %v4060_v4 = vrot.slane %v4014_v39, 1 }
 0x4e0   : > { %v3995_v17 = vadd.f32 %v3955_v28, %v3953_v57  ;;  %v4017_v21 = vpop.xlane.xlu0 %4016  ;;  %v3530_v57 = vrot.slane %v3529_v54, 4 }
 0x4e1   : > { %v4061_v13 = vrot.slane %v4017_v21, 1 }
 0x4e2   : > { %v7963_v16 = vadd.f32 %v3996_v63, %v3995_v17  ;;  %v4020_v48 = vpop.xlane.xlu1 %4019  ;;  %v3823_v17 = vadd.f32 %v3822_v33, %v7837_v24 }
 0x4e3   : > { %v4062_v51 = vsel %vm3466_vm14, %v4060_v4, %v4061_v13  ;;  %v4063_v26 = vrot.slane %v4020_v48, 1  ;;  %v3531_v4 = vadd.f32 %v3530_v57, %v3529_v54 }
 0x4e4   : > { %v4023_v25 = vpop.xlane.xlu0 %4022  ;;  %v3824_v43 = vrot.slane %v3823_v17, 2 }
 0x4e5   : > { %v4064_v45 = vsel %vm3466_vm14, %v4061_v13, %v4063_v26  ;;  %v4094_v31 = vsel %vm4093_vm0, %v4063_v26, 0.0  ;;  %v4065_v27 = vrot.slane %v4023_v25, 1  ;;  %v3532_v24 = vrot.slane %v3531_v4, 2 }
 0x4e6   : > { %v4092_v22 = vadd.f32 %v4064_v45, %v4062_v51  ;;  %v4026_v36 = vpop.xlane.xlu1 %4025 }
 0x4e7   : > { %v4066_v44 = vrot.slane %v4026_v36, 1 }
 0x4e8   : > { %v4029_v15 = vpop.xlane.xlu0 %4028  ;;  %v7972_v42 = vadd.f32 %v4094_v31, %v4092_v22 }
 0x4e9   : > { %v4068_v40 = vrot.slane %v4029_v15, 1  ;;  %v4067_v47 = vsel %vm3466_vm14, %v4065_v27, %v4066_v44  ;;  %v3825_v27 = vadd.f32 %v3824_v43, %v3823_v17 }
 0x4ea   : > { %v4032_v3 = vpop.xlane.xlu1 %4031 }
 0x4eb   : > { %v4069_v7 = vsel %vm3466_vm14, %v4066_v44, %v4068_v40  ;;  %v4103_v20 = vsel %vm4093_vm0, %v4068_v40, 0.0  ;;  %v4070_v0 = vrot.slane %v4032_v3, 1  ;;  %v3533_v40 = vadd.f32 %v3532_v24, %v3531_v4 }
 0x4ec   : > { %v4102_v8 = vadd.f32 %v4069_v7, %v4067_v47  ;;  %v4035_v35 = vpop.xlane.xlu0 %4034  ;;  %v3826_v54 = vrot.slane %v3825_v27, 1 }
 0x4ed   : > { %v4071_v46 = vrot.slane %v4035_v35, 1 }
 0x4ee   : > { %v7979_v60 = vadd.f32 %v4103_v20, %v4102_v8  ;;  %v4038_v38 = vpop.xlane.xlu1 %4037  ;;  %v3534_v20 = vrot.slane %v3533_v40, 1 }
 0x4ef   : > { %v4072_v19 = vsel %vm3466_vm14, %v4070_v0, %v4071_v46  ;;  %v4073_v28 = vrot.slane %v4038_v38, 1  ;;  %v3827_v38 = vadd.f32 %v3826_v54, %v3825_v27  ;;  %v8715_v54 = vld [vmem:[#allocation80_spill] sm:$0xff] }
 0x4f0   : > { %v4041_v39 = vpop.xlane.xlu0 %4040 }
 0x4f1   : > { %v4074_v21 = vsel %vm3466_vm14, %v4071_v46, %v4073_v28  ;;  %v4112_v13 = vsel %vm4093_vm0, %v4073_v28, 0.0  ;;  %v4075_v37 = vrot.slane %v4041_v39, 1  ;;  %v3535_v39 = vadd.f32 %v3534_v20, %v3533_v40 }
 0x4f2   : > { %v4111_v50 = vadd.f32 %v4074_v21, %v4072_v19  ;;  %v4044_v63 = vpop.xlane.xlu1 %4043 }
 0x4f3   : > { %v4076_v51 = vrot.slane %v4044_v63, 1  ;;  %v4007_v4 = vadd.f32 %v3827_v38, %v3535_v39  ;;  %v8718_v38 = vld [vmem:[#allocation85_spill] sm:$0xff]  ;;  %v8719_v39 = vld [vmem:[#allocation82_spill] sm:$0xff] }
 0x4f4   : > { %v4047_v48 = vpop.xlane.xlu0 %4046  ;;  %v7985_v26 = vadd.f32 %v4112_v13, %v4111_v50 }
 0x4f5   : > { %v4078_v25 = vrot.slane %v4047_v48, 1  ;;  %v4077_v59 = vsel %vm3466_vm14, %v4075_v37, %v4076_v51 }
 0x4f6   : > { %v4154_v45 = vpop.permute.xlu1 %4153 }
 0x4f7   : > { %v4079_v56 = vsel %vm3466_vm14, %v4076_v51, %v4078_v25  ;;  %v4189_v22 = vsel %vm3218_vm6, %v4154_v45, 0.0  ;;  %v4121_v41 = vsel %vm4093_vm0, %v4078_v25, 0.0  ;;  %v8709_v45 = vld [vmem:[#allocation76_spill] sm:$0xff] }
 0x4f8   : > { %v4120_v34 = vadd.f32 %v4079_v56, %v4077_v59  ;;  %v4156_v36 = vpop.permute.xlu0 %4155  ;;  %4190 = vadd.xlane.f32.xlu0 %v4189_v22  ;;  %v4313_v24 = vsel %vm3281_vm9, %v8709_v45, 0.0 }
 0x4f9   : > { %v4192_v31 = vsel %vm3220_vm7, %v4156_v36, 0.0  ;;  %v8710_v36 = vld [vmem:[#allocation77_spill] sm:$0xff] }
 0x4fa   : > { %v4122_v44 = vadd.f32 %v4121_v41, %v4120_v34  ;;  %4193 = vadd.xlane.f32.xlu1 %v4192_v31  ;;  %v4158_v15 = vpop.permute.xlu1 %4157  ;;  %v4319_v41 = vsel %vm3407_vm13, %v8710_v36, 0.0  ;;  %v8711_v31 = vld [vmem:[#allocation74_spill] sm:$0xff] }
 0x4fb   : > { %v4195_v1 = vsel %vm3346_vm12, %v4158_v15, 0.0  ;;  %v4316_v27 = vsel %vm3283_vm10, %v8711_v31, 0.0 }
 0x4fc   : > { %v4123_v47 = vrot.slane %v4122_v44, 4  ;;  %v4162_v7 = vpop.permute.xlu0 %4161  ;;  %4196 = vadd.xlane.f32.xlu0 %v4195_v1 }
 0x4fd   : > { %v4201_v3 = vsel %vm3220_vm7, %v4162_v7, 0.0  ;;  %v8714_v7 = vld [vmem:[#allocation83_spill] sm:$0xff] }
 0x4fe   : > { %v4124_v8 = vadd.f32 %v4123_v47, %v4122_v44  ;;  %4202 = vadd.xlane.f32.xlu1 %v4201_v3  ;;  %v4160_v35 = vpop.permute.xlu1 %4159  ;;  %v8712_v44 = vld [vmem:[#allocation79_spill] sm:$0xff]  ;;  %v8713_v47 = vld [vmem:[#allocation78_spill] sm:$0xff]  ;;  %v4331_v3 = vsel %vm3281_vm9, %v8714_v7, 0.0 }
 0x4ff   : > { %v4198_v46 = vsel %vm3218_vm6, %v4160_v35, 0.0  ;;  %v4325_v15 = vsel %vm3283_vm10, %v8712_v44, 0.0  ;;  %v4322_v1 = vsel %vm3281_vm9, %v8713_v47, 0.0  ;;  %v8716_v35 = vld [vmem:[#allocation81_spill] sm:$0xff]  ;;  %v8722_v7 = vld [vmem:[#allocation87_spill] sm:$0xff] }
 0x500   : > { %v4125_v0 = vrot.slane %v4124_v8, 2  ;;  %v4166_v33 = vpop.permute.xlu0 %4165  ;;  %4199 = vadd.xlane.f32.xlu0 %v4198_v46  ;;  %v4337_v20 = vsel %vm3407_vm13, %v8716_v35, 0.0  ;;  %v8721_v47 = vld [vmem:[#allocation89_spill] sm:$0xff]  ;;  %v8724_v35 = vld [vmem:[#allocation28_spill] sm:$0xff] }
 0x501   : > { %v4207_v19 = vsel %vm3218_vm6, %v4166_v33, 0.0  ;;  %v8717_v33 = vld [vmem:[#allocation84_spill] sm:$0xff] }
 0x502   : > { %v4126_v57 = vadd.f32 %v4125_v0, %v4124_v8  ;;  %4208 = vadd.xlane.f32.xlu1 %v4207_v19  ;;  %v4164_v28 = vpop.permute.xlu1 %4163  ;;  %v4328_v8 = vsel %vm3407_vm13, %v8715_v54, 0.0  ;;  %v4334_v19 = vsel %vm3283_vm10, %v8717_v33, 0.0  ;;  %v8723_v54 = vld [vmem:[#allocation88_spill] sm:$0xff]  ;;  %v8725_v33 = vld [vmem:[#allocation91_spill] sm:$0xff] }
 0x503   : > { %v4204_v21 = vsel %vm3346_vm12, %v4164_v28, 0.0 }
 0x504   : > { %v4127_v17 = vrot.slane %v4126_v57, 1  ;;  %v4170_v50 = vpop.permute.xlu0 %4169  ;;  %4205 = vadd.xlane.f32.xlu0 %v4204_v21 }
 0x505   : > { %v4213_v63 = vsel %vm3346_vm12, %v4170_v50, 0.0 }
 0x506   : > { %v4128_v13 = vadd.f32 %v4127_v17, %v4126_v57  ;;  %4214 = vadd.xlane.f32.xlu1 %v4213_v63  ;;  %v4168_v37 = vpop.permute.xlu1 %4167  ;;  %v4343_v57 = vsel %vm3283_vm10, %v8718_v38, 0.0  ;;  %v4340_v17 = vsel %vm3281_vm9, %v8719_v39, 0.0  ;;  %v8720_v63 = vld [vmem:[#allocation86_spill] sm:$0xff] }
 0x507   : > { %v4210_v48 = vsel %vm3220_vm7, %v4168_v37, 0.0  ;;  %v8726_v38 = vld [vmem:[#allocation90_spill] sm:$0xff] }
 0x508   : > { %v7998_v51 = vadd.f32 %v4128_v13, %v4007_v4  ;;  %v4174_v25 = vpop.permute.xlu0 %4173  ;;  %4211 = vadd.xlane.f32.xlu0 %v4210_v48  ;;  %v4346_v4 = vsel %vm3407_vm13, %v8720_v63, 0.0  ;;  %v8727_v39 = vld [vmem:[#allocation30_spill] sm:$0xff]  ;;  %v8728_v63 = vld [vmem:[#allocation92_spill] sm:$0xff] }
 0x509   : > { %v4219_v43 = vsel %vm3220_vm7, %v4174_v25, 0.0 }
 0x50a   : > { %4220 = vadd.xlane.f32.xlu1 %v4219_v43  ;;  %v4172_v59 = vpop.permute.xlu1 %4171 }
 0x50b   : > { %v4216_v56 = vsel %vm3218_vm6, %v4172_v59, 0.0 }
 0x50c   : > { %4217 = vadd.xlane.f32.xlu0 %v4216_v56  ;;  %v4454_v40 = vpop.permute.xlu0 %4453 }
 0x50d   : > { %v4489_v21 = vsel %vm3281_vm9, %v4454_v40, 0.0 }
 0x50e   : > { %4314 = vadd.xlane.f32.xlu1 %v4313_v24  ;;  %v4176_v34 = vpop.permute.xlu1 %4175 }
 0x50f   : > { %v4222_v22 = vsel %vm3346_vm12, %v4176_v34, 0.0 }
 0x510   : > { %4223 = vadd.xlane.f32.xlu0 %v4222_v22  ;;  %v4458_v0 = vpop.permute.xlu0 %4457 }
 0x511   : > { %v4495_v13 = vsel %vm3407_vm13, %v4458_v0, 0.0 }
 0x512   : > { %4320 = vadd.xlane.f32.xlu1 %v4319_v41  ;;  %v4456_v46 = vpop.permute.xlu1 %4455 }
 0x513   : > { %v4492_v25 = vsel %vm3283_vm10, %v4456_v46, 0.0 }
 0x514   : > { %4317 = vadd.xlane.f32.xlu0 %v4316_v27  ;;  %v4462_v28 = vpop.permute.xlu0 %4461 }
 0x515   : > { %v4501_v43 = vsel %vm3283_vm10, %v4462_v28, 0.0 }
 0x516   : > { %4326 = vadd.xlane.f32.xlu1 %v4325_v15  ;;  %v4460_v50 = vpop.permute.xlu1 %4459 }
 0x517   : > { %v4498_v59 = vsel %vm3281_vm9, %v4460_v50, 0.0 }
 0x518   : > { %4323 = vadd.xlane.f32.xlu0 %v4322_v1  ;;  %v4466_v37 = vpop.permute.xlu0 %4465  ;;  %v3468_v1 = vrot.slane %v8721_v47, 1  ;;  %v3760_v47 = vrot.slane %v7811_v14, 1 }
 0x519   : > { %v4507_v45 = vsel %vm3281_vm9, %v4466_v37, 0.0  ;;  %v3647_v37 = vrot.slane %v7793_v12, 1 }
 0x51a   : > { %4332 = vadd.xlane.f32.xlu1 %v4331_v3  ;;  %v4464_v48 = vpop.permute.xlu1 %4463  ;;  %v3467_v3 = vrot.slane %v8722_v7, 1 }
 0x51b   : > { %v4504_v34 = vsel %vm3407_vm13, %v4464_v48, 0.0 }
 0x51c   : > { %4329 = vadd.xlane.f32.xlu0 %v4328_v8  ;;  %v4470_v56 = vpop.permute.xlu0 %4469  ;;  %v3470_v8 = vrot.slane %v8723_v54, 1  ;;  %v3469_v0 = vsel %vm3466_vm14, %v3467_v3, %v3468_v1 }
 0x51d   : > { %v4513_v22 = vsel %vm3407_vm13, %v4470_v56, 0.0  ;;  %v3645_v56 = vrot.slane %v7791_v9, 1  ;;  %v3650_v9 = vrot.slane %v7795_v53, 1 }
 0x51e   : > { %4338 = vadd.xlane.f32.xlu1 %v4337_v20  ;;  %v4468_v24 = vpop.permute.xlu1 %4467  ;;  %v3475_v20 = vrot.slane %v8724_v35, 1  ;;  %v3471_v46 = vsel %vm3466_vm14, %v3468_v1, %v3470_v8  ;;  %v3501_v48 = vsel %vm3500_vm15, %v3470_v8, 0.0  ;;  %v3771_v1 = vrot.slane %v7829_v2, 1 }
 0x51f   : > { %v4510_v31 = vsel %vm3283_vm10, %v4468_v24, 0.0 }
 0x520   : > { %4335 = vadd.xlane.f32.xlu0 %v4334_v19  ;;  %v4474_v36 = vpop.permute.xlu0 %4473  ;;  %v3473_v19 = vrot.slane %v8725_v33, 1  ;;  %v3510_v24 = vsel %vm3500_vm15, %v3475_v20, 0.0 }
 0x521   : > { %v4519_v27 = vsel %vm3283_vm10, %v4474_v36, 0.0  ;;  %v3652_v36 = vrot.slane %v7801_v23, 1  ;;  %v3766_v23 = vrot.slane %v7819_v5, 1 }
 0x522   : > { %4344 = vadd.xlane.f32.xlu1 %v4343_v57  ;;  %v4472_v41 = vpop.permute.xlu1 %4471  ;;  %v3472_v57 = vrot.slane %v8726_v38, 1  ;;  %v3476_v28 = vsel %vm3466_vm14, %v3473_v19, %v3475_v20 }
 0x523   : > { %v4516_v44 = vsel %vm3281_vm9, %v4472_v41, 0.0  ;;  %v3761_v41 = vrot.slane %v7817_v49, 1  ;;  %v3765_v49 = vrot.slane %v7821_v62, 1 }
 0x524   : > { %4341 = vadd.xlane.f32.xlu0 %v4340_v17  ;;  %v3480_v17 = vrot.slane %v8727_v39, 1  ;;  %v3474_v50 = vsel %vm3466_vm14, %v3472_v57, %v3473_v19  ;;  %v3654_v39 = vrot.slane %v7799_v32, 1 }
 0x525   : > { %v3762_v54 = vsel %vm3466_vm14, %v3760_v47, %v3761_v41  ;;  %v3767_v2 = vsel %vm3466_vm14, %v3765_v49, %v3766_v23 }
 0x526   : > { %4490 = vadd.xlane.f32.xlu1 %v4489_v21  ;;  %v4476_v15 = vpop.permute.xlu1 %4475  ;;  %v3499_v21 = vadd.f32 %v3471_v46, %v3469_v0  ;;  %v3519_v7 = vsel %vm3500_vm15, %v3480_v17, 0.0  ;;  %v3677_v0 = vsel %vm3500_vm15, %v3647_v37, 0.0  ;;  %v3655_v46 = vrot.slane %v7805_v11, 1 }
 0x527   : > { %v4522_v40 = vsel %vm3407_vm13, %v4476_v15, 0.0 }
 0x528   : > { %4347 = vadd.xlane.f32.xlu0 %v4346_v4  ;;  %v3478_v4 = vrot.slane %v8728_v63, 1 }
 0x52a   : > { %4496 = vadd.xlane.f32.xlu1 %v4495_v13  ;;  %v3509_v13 = vadd.f32 %v3476_v28, %v3474_v50 }
 0x52c   : > { %4493 = vadd.xlane.f32.xlu0 %v4492_v25  ;;  %v8729_v25 = vld [vmem:[#allocation31_spill] sm:$0xff]  ;;  %v3511_v12 = vadd.f32 %v3510_v24, %v3509_v13 }
 0x52e   : > { %4502 = vadd.xlane.f32.xlu1 %v4501_v43  ;;  %v3477_v43 = vrot.slane %v8729_v25, 1 }
 0x530   : > { %4499 = vadd.xlane.f32.xlu0 %v4498_v59  ;;  %v3481_v59 = vsel %vm3466_vm14, %v3478_v4, %v3480_v17  ;;  %v3686_v17 = vsel %vm3500_vm15, %v3652_v36, 0.0 }
 0x532   : > { %4508 = vadd.xlane.f32.xlu1 %v4507_v45  ;;  %v3502_v45 = vadd.f32 %v3501_v48, %v3499_v21  ;;  %v8730_v21 = vld [vmem:[#allocation96_spill] sm:$0xff]  ;;  %v3656_v48 = vsel %vm3466_vm14, %v3654_v39, %v3655_v46 }
 0x533   : > { %v3657_v50 = vrot.slane %v8730_v21, 1 }
 0x534   : > { %4505 = vadd.xlane.f32.xlu0 %v4504_v34  ;;  %v3479_v34 = vsel %vm3466_vm14, %v3477_v43, %v3478_v4  ;;  %v3503_v38 = vrot.slane %v3502_v45, 4 }
 0x535   : > { %v3658_v25 = vsel %vm3466_vm14, %v3655_v46, %v3657_v50 }
 0x536   : > { %4514 = vadd.xlane.f32.xlu1 %v4513_v22  ;;  %v3644_v22 = vrot.slane %v7789_v29, 1  ;;  %v3763_v29 = vrot.slane %v7815_v18, 1  ;;  %v3773_v18 = vrot.slane %v7827_v55, 1  ;;  %v3512_v55 = vrot.slane %v3511_v12, 4 }
 0x537   : > { %v3504_v32 = vadd.f32 %v3503_v38, %v3502_v45 }
 0x538   : > { %4511 = vadd.xlane.f32.xlu0 %v4510_v31  ;;  %v3518_v31 = vadd.f32 %v3481_v59, %v3479_v34  ;;  %v3646_v15 = vsel %vm3466_vm14, %v3644_v22, %v3645_v56  ;;  %v3764_v53 = vsel %vm3466_vm14, %v3761_v41, %v3763_v29  ;;  %v3774_v20 = vsel %vm3466_vm14, %v3771_v1, %v3773_v18 }
 0x539   : > { %v3792_v33 = vadd.f32 %v3764_v53, %v3762_v54  ;;  %v3793_v11 = vsel %vm3500_vm15, %v3763_v29, 0.0  ;;  %v3811_v34 = vsel %vm3500_vm15, %v3773_v18, 0.0  ;;  %v3505_v47 = vrot.slane %v3504_v32, 2  ;;  %v8732_v54 = vld [vmem:[#allocation16_spill] sm:$0xff] }
 0x53a   : > { %4520 = vadd.xlane.f32.xlu1 %v4519_v27  ;;  %v3648_v27 = vsel %vm3466_vm14, %v3645_v56, %v3647_v37  ;;  %v3520_v5 = vadd.f32 %v3519_v7, %v3518_v31  ;;  %v3695_v7 = vsel %vm3500_vm15, %v3657_v50, 0.0  ;;  %v3660_v53 = vrot.slane %v8732_v54, 1 }
 0x53b   : > { %v3676_v3 = vadd.f32 %v3648_v27, %v3646_v15  ;;  %v3794_v43 = vadd.f32 %v3793_v11, %v3792_v33  ;;  %v3694_v27 = vadd.f32 %v3658_v25, %v3656_v48  ;;  %v4096_v11 = vrot.slane %v7972_v42, 4 }
 0x53c   : > { %4517 = vadd.xlane.f32.xlu0 %v4516_v44  ;;  %v3768_v44 = vrot.slane %v7825_v61, 1  ;;  %v3653_v61 = vsel %vm3466_vm14, %v3650_v9, %v3652_v36  ;;  %v3521_v4 = vrot.slane %v3520_v5, 4  ;;  %v3513_v36 = vadd.f32 %v3512_v55, %v3511_v12 }
 0x53d   : > { %v3678_v57 = vadd.f32 %v3677_v0, %v3676_v3  ;;  %v3696_v12 = vadd.f32 %v3695_v7, %v3694_v27 }
 0x53e   : > { %v3769_v14 = vsel %vm3466_vm14, %v3766_v23, %v3768_v44  ;;  %v3802_v37 = vsel %vm3500_vm15, %v3768_v44, 0.0  ;;  %v3522_v15 = vadd.f32 %v3521_v4, %v3520_v5  ;;  %v3795_v44 = vrot.slane %v3794_v43, 4  ;;  %v8731_v23 = vld [vmem:[#allocation15_spill] sm:$0xff] }
 0x53f   : > { %v3679_v24 = vrot.slane %v3678_v57, 4  ;;  %v3662_v49 = vrot.slane %v8731_v23, 1  ;;  %v3514_v45 = vrot.slane %v3513_v36, 2  ;;  %v3697_v55 = vrot.slane %v3696_v12, 4 }
 0x540   : > { %4523 = vadd.xlane.f32.xlu0 %v4522_v40  ;;  %v3649_v40 = vrot.slane %v7797_v10, 1  ;;  %v3770_v10 = vrot.slane %v7823_v52, 1  ;;  %v3801_v52 = vadd.f32 %v3769_v14, %v3767_v2  ;;  %v3523_v18 = vrot.slane %v3522_v15, 2 }
 0x541   : > { %v3680_v29 = vadd.f32 %v3679_v24, %v3678_v57  ;;  %v3796_v5 = vadd.f32 %v3795_v44, %v3794_v43  ;;  %v3506_v2 = vadd.f32 %v3505_v47, %v3504_v32  ;;  %v3515_v46 = vadd.f32 %v3514_v45, %v3513_v36 }
 0x542   : > { %v3651_v62 = vsel %vm3466_vm14, %v3649_v40, %v3650_v9  ;;  %v3772_v35 = vsel %vm3466_vm14, %v3770_v10, %v3771_v1  ;;  %v3803_v59 = vadd.f32 %v3802_v37, %v3801_v52  ;;  %v8733_v10 = vld [vmem:[#allocation93_spill] sm:$0xff]  ;;  %v3971_v52 = vrot.slane %v7947_v30, 4 }
 0x543   : > { %v3685_v8 = vadd.f32 %v3653_v61, %v3651_v62  ;;  %v3810_v63 = vadd.f32 %v3774_v20, %v3772_v35  ;;  %v3659_v14 = vrot.slane %v8733_v10, 1  ;;  %v3681_v35 = vrot.slane %v3680_v29, 2 }
 0x544   : > { %v3804_v9 = vrot.slane %v3803_v59, 4  ;;  %v3663_v20 = vsel %vm3466_vm14, %v3660_v53, %v3662_v49  ;;  %v3524_v39 = vadd.f32 %v3523_v18, %v3522_v15  ;;  %v3797_v21 = vrot.slane %v3796_v5, 2 }
 0x545   : > { %v3687_v13 = vadd.f32 %v3686_v17, %v3685_v8  ;;  %v3812_v41 = vadd.f32 %v3811_v34, %v3810_v63  ;;  %v3661_v57 = vsel %vm3466_vm14, %v3659_v14, %v3660_v53  ;;  %v3507_v4 = vrot.slane %v3506_v2, 1 }
 0x546   : > { %v3805_v62 = vadd.f32 %v3804_v9, %v3803_v59  ;;  %v3703_v17 = vadd.f32 %v3663_v20, %v3661_v57  ;;  %v3516_v48 = vrot.slane %v3515_v46, 1  ;;  %v3972_v43 = vadd.f32 %v3971_v52, %v7947_v30 }
 0x547   : > { %v3688_v31 = vrot.slane %v3687_v13, 4  ;;  %v3813_v3 = vrot.slane %v3812_v41, 4  ;;  %v4105_v59 = vrot.slane %v7979_v60, 4  ;;  %v3698_v24 = vadd.f32 %v3697_v55, %v3696_v12 }
 0x548   : > { %v3806_v50 = vrot.slane %v3805_v62, 2  ;;  %v3704_v34 = vsel %vm3500_vm15, %v3662_v49, 0.0  ;;  %v3525_v36 = vrot.slane %v3524_v39, 1  ;;  %v3508_v44 = vadd.f32 %v3507_v4, %v3506_v2 }
 0x549   : > { %v3689_v61 = vadd.f32 %v3688_v31, %v3687_v13  ;;  %v3814_v33 = vadd.f32 %v3813_v3, %v3812_v41  ;;  %v3682_v13 = vadd.f32 %v3681_v35, %v3680_v29  ;;  %v3705_v41 = vadd.f32 %v3704_v34, %v3703_v17 }
 0x54a   : > { %v3798_v31 = vadd.f32 %v3797_v21, %v3796_v5  ;;  %v3807_v27 = vadd.f32 %v3806_v50, %v3805_v62  ;;  %v4097_v47 = vadd.f32 %v4096_v11, %v7972_v42  ;;  %v3517_v30 = vadd.f32 %v3516_v48, %v3515_v46 }
 0x54b   : > { %v3690_v38 = vrot.slane %v3689_v61, 2  ;;  %v3815_v25 = vrot.slane %v3814_v33, 2  ;;  %v3683_v9 = vrot.slane %v3682_v13, 1  ;;  %v3973_v7 = vrot.slane %v3972_v43, 2 }
 0x54c   : > { %v4106_v3 = vadd.f32 %v4105_v59, %v7979_v60  ;;  %v3699_v49 = vrot.slane %v3698_v24, 2  ;;  %v3980_v12 = vrot.slane %v7952_v6, 4  ;;  %v3526_v53 = vadd.f32 %v3525_v36, %v3524_v39 }
 0x54d   : > { %v3691_v32 = vadd.f32 %v3690_v38, %v3689_v61  ;;  %v3816_v45 = vadd.f32 %v3815_v25, %v3814_v33  ;;  %v3706_v10 = vrot.slane %v3705_v41, 4  ;;  %v3799_v14 = vrot.slane %v3798_v31, 1 }
 0x54e   : > { %v3808_v18 = vrot.slane %v3807_v27, 1  ;;  %v8133_v42 = vadd.f32 %v3683_v9, %v3682_v13  ;;  %v3974_v20 = vadd.f32 %v3973_v7, %v3972_v43  ;;  %v4107_v46 = vrot.slane %v4106_v3, 2 }
 0x54f   : > { %v3692_v61 = vrot.slane %v3691_v32, 1  ;;  %v3817_v35 = vrot.slane %v3816_v45, 1  ;;  %v4114_v33 = vrot.slane %v7985_v26, 4  ;;  %v8140_v52 = vadd.f32 %v3699_v49, %v3698_v24 }
 0x550   : > { %v3981_v38 = vadd.f32 %v3980_v12, %v7952_v6  ;;  %v8144_v57 = vadd.f32 %v3706_v10, %v3705_v41  ;;  %v3800_v39 = vadd.f32 %v3799_v14, %v3798_v31  ;;  %v3975_v43 = vrot.slane %v3974_v20, 1 }
 0x551   : > { %v3818_v25 = vadd.f32 %v3817_v35, %v3816_v45  ;;  %v4108_v59 = vadd.f32 %v4107_v46, %v4106_v3  ;;  %v3989_v31 = vrot.slane %v7957_v58, 4 }
 0x552   : > { %v3982_v24 = vrot.slane %v3981_v38, 2  ;;  %v3708_v41 = vrot.slane %v8144_v57, 2  ;;  %v4004_v45 = vadd.f32 %v3800_v39, %v3508_v44 }
 0x554   : > { %v8159_v10 = vadd.f32 %v3982_v24, %v3981_v38 }
 0x585   : > { %v8085_v19 = vpop.xlane.xlu0 %4190 }
 0x586   : > { %v4237_v62 = vrot.slane %v8085_v19, 1  ;;  %v3809_v19 = vadd.f32 %v3808_v18, %v3807_v27 }
 0x587   : > { %v8087_v28 = vpop.xlane.xlu1 %4193 }
 0x588   : > { %v4238_v54 = vrot.slane %v8087_v28, 1  ;;  %v8138_v28 = vadd.f32 %v3692_v61, %v3691_v32  ;;  %v4115_v32 = vadd.f32 %v4114_v33, %v7985_v26  ;;  %v4109_v61 = vrot.slane %v4108_v59, 1 }
 0x589   : > { %v8096_v56 = vpop.xlane.xlu0 %4196 }
 0x58a   : > { %v4240_v29 = vrot.slane %v8096_v56, 1  ;;  %v4098_v56 = vrot.slane %v4097_v47, 2  ;;  %v4239_v55 = vsel %vm3466_vm14, %v4237_v62, %v4238_v54  ;;  %v4116_v49 = vrot.slane %v4115_v32, 2 }
 0x58b   : > { %v8099_v22 = vpop.xlane.xlu1 %4202  ;;  %v4110_v33 = vadd.f32 %v4109_v61, %v4108_v59 }
 0x58c   : > { %v4241_v2 = vsel %vm3466_vm14, %v4238_v54, %v4240_v29  ;;  %v4099_v50 = vadd.f32 %v4098_v56, %v4097_v47  ;;  %v4270_v6 = vsel %vm4093_vm0, %v4240_v29, 0.0  ;;  %v8155_v29 = vadd.f32 %v3818_v25, %v3526_v53 }
 0x58d   : > { %v8101_v40 = vpop.xlane.xlu0 %4199  ;;  %v4269_v17 = vadd.f32 %v4241_v2, %v4239_v55  ;;  %v8157_v54 = vadd.f32 %v3975_v43, %v3974_v20  ;;  %v4243_v53 = vrot.slane %v8099_v22, 1  ;;  %v4117_v38 = vadd.f32 %v4116_v49, %v4115_v32 }
 0x58e   : > { %v4100_v7 = vrot.slane %v4099_v50, 1  ;;  %v4242_v56 = vrot.slane %v8101_v40, 1 }
 0x58f   : > { %v8104_v1 = vpop.xlane.xlu1 %4208  ;;  %v4271_v27 = vadd.f32 %v4270_v6, %v4269_v17  ;;  %v4118_v24 = vrot.slane %v4117_v38, 1 }
 0x590   : > { %v4247_v55 = vrot.slane %v8104_v1, 1 }
 0x591   : > { %v8109_v8 = vpop.xlane.xlu0 %4205  ;;  %v4272_v44 = vrot.slane %v4271_v27, 4 }
 0x592   : > { %v4245_v14 = vrot.slane %v8109_v8, 1 }
 0x593   : > { %v8112_v0 = vpop.xlane.xlu1 %4214  ;;  %v4273_v17 = vadd.f32 %v4272_v44, %v4271_v27 }
 0x594   : > { %v4246_v39 = vsel %vm3466_vm14, %v4243_v53, %v4245_v14 }
 0x595   : > { %v8116_v63 = vpop.xlane.xlu0 %4211 }
 0x597   : > { %v8119_v37 = vpop.xlane.xlu1 %4220 }
 0x599   : > { %v8124_v15 = vpop.xlane.xlu0 %4217 }
 0x59b   : > { %v4315_v23 = vpop.xlane.xlu1 %4314 }
 0x59c   : > { %v4361_v4 = vrot.slane %v4315_v23, 1  ;;  %v8152_v23 = vadd.f32 %v3809_v19, %v3517_v30  ;;  %v8163_v30 = vadd.f32 %v3989_v31, %v7957_v58  ;;  %v4248_v58 = vrot.slane %v8116_v63, 1 }
 0x59d   : > { %v8131_v5 = vpop.xlane.xlu0 %4223  ;;  %v4250_v63 = vrot.slane %v8112_v0, 1  ;;  %v4279_v0 = vsel %vm4093_vm0, %v4245_v14, 0.0  ;;  %v4119_v14 = vadd.f32 %v4118_v24, %v4117_v38 }
 0x59e   : > { %v4249_v6 = vsel %vm3466_vm14, %v4247_v55, %v4248_v58  ;;  %v4255_v38 = vrot.slane %v8131_v5, 1 }
 0x59f   : > { %v4321_v60 = vpop.xlane.xlu1 %4320  ;;  %v4251_v31 = vsel %vm3466_vm14, %v4248_v58, %v4250_v63  ;;  %v4288_v55 = vsel %vm4093_vm0, %v4250_v63, 0.0  ;;  %v4253_v58 = vrot.slane %v8119_v37, 1 }
 0x5a0   : > { %v4364_v13 = vrot.slane %v4321_v60, 1  ;;  %v4101_v60 = vadd.f32 %v4100_v7, %v4099_v50 }
 0x5a1   : > { %v4318_v21 = vpop.xlane.xlu0 %4317 }
 0x5a2   : > { %v4362_v11 = vrot.slane %v4318_v21, 1  ;;  %v4394_v26 = vsel %vm4093_vm0, %v4364_v13, 0.0  ;;  %v4244_v21 = vsel %vm3466_vm14, %v4242_v56, %v4243_v53 }
 0x5a3   : > { %v4327_v48 = vpop.xlane.xlu1 %4326  ;;  %v4278_v43 = vadd.f32 %v4246_v39, %v4244_v21 }
 0x5a4   : > { %v4363_v34 = vsel %vm3466_vm14, %v4361_v4, %v4362_v11  ;;  %v4365_v36 = vsel %vm3466_vm14, %v4362_v11, %v4364_v13  ;;  %v4367_v35 = vrot.slane %v4327_v48, 1 }
 0x5a5   : > { %v4393_v9 = vadd.f32 %v4365_v36, %v4363_v34  ;;  %v4324_v47 = vpop.xlane.xlu0 %4323 }
 0x5a6   : > { %v4366_v18 = vrot.slane %v4324_v47, 1 }
 0x5a7   : > { %v4333_v3 = vpop.xlane.xlu1 %4332  ;;  %v4395_v12 = vadd.f32 %v4394_v26, %v4393_v9  ;;  %v4305_v26 = vadd.f32 %v4101_v60, %v4004_v45 }
 0x5a8   : > { %v4368_v19 = vsel %vm3466_vm14, %v4366_v18, %v4367_v35  ;;  %v4371_v13 = vrot.slane %v4333_v3, 1  ;;  %v4274_v3 = vrot.slane %v4273_v17, 2 }
 0x5a9   : > { %v4396_v62 = vrot.slane %v4395_v12, 4  ;;  %v4330_v2 = vpop.xlane.xlu0 %4329 }
 0x5aa   : > { %v4369_v46 = vrot.slane %v4330_v2, 1  ;;  %v4287_v2 = vadd.f32 %v4251_v31, %v4249_v6 }
 0x5ab   : > { %v4339_v20 = vpop.xlane.xlu1 %4338  ;;  %v4397_v8 = vadd.f32 %v4396_v62, %v4395_v12  ;;  %v4280_v12 = vadd.f32 %v4279_v0, %v4278_v43  ;;  %v4306_v62 = vadd.f32 %v4110_v33, %v8152_v23 }
 0x5ac   : > { %v4370_v40 = vsel %vm3466_vm14, %v4367_v35, %v4369_v46  ;;  %v4403_v11 = vsel %vm4093_vm0, %v4369_v46, 0.0  ;;  %v4374_v1 = vrot.slane %v4339_v20, 1  ;;  %v8190_v20 = vadd.f32 %v4274_v3, %v4273_v17 }
 0x5ad   : > { %v4398_v22 = vrot.slane %v4397_v8, 2  ;;  %v4402_v50 = vadd.f32 %v4370_v40, %v4368_v19  ;;  %v4336_v4 = vpop.xlane.xlu0 %4335  ;;  %v4281_v39 = vrot.slane %v4280_v12, 4  ;;  %v4289_v21 = vadd.f32 %v4288_v55, %v4287_v2 }
 0x5ae   : > { %v4372_v48 = vrot.slane %v4336_v4, 1  ;;  %v4412_v61 = vsel %vm4093_vm0, %v4374_v1, 0.0  ;;  %v4307_v3 = vadd.f32 %v4119_v14, %v8155_v29  ;;  %v4276_v2 = vrot.slane %v8190_v20, 1 }
 0x5af   : > { %v4345_v25 = vpop.xlane.xlu1 %4344  ;;  %v4399_v59 = vadd.f32 %v4398_v22, %v4397_v8  ;;  %v4404_v32 = vadd.f32 %v4403_v11, %v4402_v50  ;;  %v4252_v50 = vrot.slane %v8124_v15, 1  ;;  %v4290_v6 = vrot.slane %v4289_v21, 4 }
 0x5b0   : > { %v4373_v34 = vsel %vm3466_vm14, %v4371_v13, %v4372_v48  ;;  %v4375_v36 = vsel %vm3466_vm14, %v4372_v48, %v4374_v1  ;;  %v4377_v23 = vrot.slane %v4345_v25, 1  ;;  %v3998_v55 = vrot.slane %v7963_v16, 4 }
 0x5b1   : > { %v4400_v27 = vrot.slane %v4399_v59, 1  ;;  %v4405_v9 = vrot.slane %v4404_v32, 4  ;;  %v4411_v47 = vadd.f32 %v4375_v36, %v4373_v34  ;;  %v4342_v7 = vpop.xlane.xlu0 %4341  ;;  %v4256_v34 = vsel %vm3466_vm14, %v4253_v58, %v4255_v38 }
 0x5b2   : > { %v4376_v45 = vrot.slane %v4342_v7, 1  ;;  %v4254_v0 = vsel %vm3466_vm14, %v4252_v50, %v4253_v58 }
 0x5b3   : > { %v4491_v49 = vpop.xlane.xlu1 %4490  ;;  %v4401_v18 = vadd.f32 %v4400_v27, %v4399_v59  ;;  %v4406_v44 = vadd.f32 %v4405_v9, %v4404_v32  ;;  %v4413_v56 = vadd.f32 %v4412_v61, %v4411_v47  ;;  %v4282_v59 = vadd.f32 %v4281_v39, %v4280_v12 }
 0x5b4   : > { %v4378_v22 = vsel %vm3466_vm14, %v4376_v45, %v4377_v23  ;;  %v4537_v48 = vrot.slane %v4491_v49, 1  ;;  %v4296_v12 = vadd.f32 %v4256_v34, %v4254_v0 }
 0x5b5   : > { %v4605_v60 = vadd.f32 %v4401_v18, %v4305_v26  ;;  %v4407_v53 = vrot.slane %v4406_v44, 2  ;;  %v4414_v35 = vrot.slane %v4413_v56, 4  ;;  %v4348_v46 = vpop.xlane.xlu0 %4347  ;;  %v3991_v26 = vrot.slane %v8163_v30, 2 }
 0x5b6   : > { %v4379_v33 = vrot.slane %v4348_v46, 1  ;;  %v4283_v45 = vrot.slane %v4282_v59, 2 }
 0x5b7   : > { %v4497_v8 = vpop.xlane.xlu1 %4496  ;;  %4614 = vst.msk [vmem:[%s8188_s15] sm:$0x1] %vm4613_vm1, %v4605_v60  ;;  %v4408_v19 = vadd.f32 %v4407_v53, %v4406_v44  ;;  %v4415_v40 = vadd.f32 %v4414_v35, %v4413_v56  ;;  %v4291_v53 = vadd.f32 %v4290_v6, %v4289_v21  ;;  %v3992_v39 = vadd.f32 %v3991_v26, %v8163_v30 }
 0x5b8   : > { %v4380_v17 = vsel %vm3466_vm14, %v4377_v23, %v4379_v33  ;;  %v4421_v37 = vsel %vm4093_vm0, %v4379_v33, 0.0  ;;  %v4540_v25 = vrot.slane %v4497_v8, 1  ;;  %v4297_v23 = vsel %vm4093_vm0, %v4255_v38, 0.0 }
 0x5b9   : > { %v4409_v4 = vrot.slane %v4408_v19, 1  ;;  %v4416_v13 = vrot.slane %v4415_v40, 2  ;;  %v4420_v11 = vadd.f32 %v4380_v17, %v4378_v22  ;;  %v4494_v1 = vpop.xlane.xlu0 %4493  ;;  %v4298_v58 = vadd.f32 %v4297_v23, %v4296_v12 }
 0x5ba   : > { %v4538_v43 = vrot.slane %v4494_v1, 1  ;;  %v4570_v61 = vsel %vm4093_vm0, %v4540_v25, 0.0  ;;  %v4277_v21 = vadd.f32 %v4276_v2, %v8190_v20  ;;  %v4284_v17 = vadd.f32 %v4283_v45, %v4282_v59 }
 0x5bb   : > { %v4503_v63 = vpop.xlane.xlu1 %4502  ;;  %v4410_v32 = vadd.f32 %v4409_v4, %v4408_v19  ;;  %v4417_v24 = vadd.f32 %v4416_v13, %v4415_v40  ;;  %v4422_v5 = vadd.f32 %v4421_v37, %v4420_v11  ;;  %v4292_v13 = vrot.slane %v4291_v53, 2 }
 0x5bc   : > { %v4539_v15 = vsel %vm3466_vm14, %v4537_v48, %v4538_v43  ;;  %v4541_v36 = vsel %vm3466_vm14, %v4538_v43, %v4540_v25  ;;  %v4543_v33 = vrot.slane %v4503_v63, 1  ;;  %v4299_v63 = vrot.slane %v4298_v58, 4 }
 0x5bd   : > { %v4606_v31 = vadd.f32 %v4410_v32, %v4306_v62  ;;  %v4418_v27 = vrot.slane %v4417_v24, 1  ;;  %v4423_v9 = vrot.slane %v4422_v5, 4  ;;  %v4569_v47 = vadd.f32 %v4541_v36, %v4539_v15  ;;  %v4500_v7 = vpop.xlane.xlu0 %4499 }
 0x5be   : > { %v3984_v62 = vrot.slane %v8159_v10, 1  ;;  %v4542_v60 = vrot.slane %v4500_v7, 1  ;;  %v3999_v59 = vadd.f32 %v3998_v55, %v7963_v16  ;;  %v4285_v7 = vrot.slane %v4284_v17, 1 }
 0x5bf   : > { %v4509_v49 = vpop.xlane.xlu1 %4508  ;;  %4615 = vst.msk [vmem:[%s8188_s15 + $0x1] sm:$0x1] %vm4613_vm1, %v4606_v31  ;;  %v4419_v18 = vadd.f32 %v4418_v27, %v4417_v24  ;;  %v4424_v44 = vadd.f32 %v4423_v9, %v4422_v5  ;;  %v4571_v56 = vadd.f32 %v4570_v61, %v4569_v47  ;;  %v4008_v5 = vadd.f32 %v8157_v54, %v8133_v42 }
 0x5c0   : > { %v4544_v50 = vsel %vm3466_vm14, %v4542_v60, %v4543_v33  ;;  %v4547_v37 = vrot.slane %v4509_v49, 1  ;;  %v4293_v26 = vadd.f32 %v4292_v13, %v4291_v53  ;;  %v4300_v16 = vadd.f32 %v4299_v63, %v4298_v58 }
 0x5c1   : > { %v4607_v29 = vadd.f32 %v4419_v18, %v4307_v3  ;;  %v4425_v14 = vrot.slane %v4424_v44, 2  ;;  %v4572_v35 = vrot.slane %v4571_v56, 4  ;;  %v4506_v46 = vpop.xlane.xlu0 %4505  ;;  %v4309_v47 = vadd.f32 %v4277_v21, %v4008_v5 }
 0x5c2   : > { %v4545_v8 = vrot.slane %v4506_v46, 1  ;;  %v3701_v49 = vrot.slane %v8140_v52, 1  ;;  %v3993_v12 = vrot.slane %v3992_v39, 1  ;;  %v4286_v53 = vadd.f32 %v4285_v7, %v4284_v17 }
 0x5c3   : > { %4616 = vst.msk [vmem:[%s8188_s15 + $0x2] sm:$0x1] %vm4613_vm1, %v4607_v29  ;;  %v4426_v19 = vadd.f32 %v4425_v14, %v4424_v44  ;;  %v4573_v40 = vadd.f32 %v4572_v35, %v4571_v56  ;;  %v4515_v22 = vpop.xlane.xlu1 %4514  ;;  %v4000_v44 = vrot.slane %v3999_v59, 2  ;;  %v4294_v29 = vrot.slane %v4293_v26, 1 }
 0x5c4   : > { %v4546_v4 = vsel %vm3466_vm14, %v4543_v33, %v4545_v8  ;;  %v4579_v30 = vsel %vm4093_vm0, %v4545_v8, 0.0  ;;  %v4550_v25 = vrot.slane %v4515_v22, 1  ;;  %v3994_v33 = vadd.f32 %v3993_v12, %v3992_v39 }
 0x5c5   : > { %v4427_v11 = vrot.slane %v4426_v19, 1  ;;  %v4574_v38 = vrot.slane %v4573_v40, 2  ;;  %v4578_v1 = vadd.f32 %v4546_v4, %v4544_v50  ;;  %v4512_v48 = vpop.xlane.xlu0 %4511  ;;  %v3702_v17 = vadd.f32 %v3701_v49, %v8140_v52 }
 0x5c6   : > { %v4548_v43 = vrot.slane %v4512_v48, 1  ;;  %v4588_v3 = vsel %vm4093_vm0, %v4550_v25, 0.0 }
 0x5c7   : > { %v4428_v32 = vadd.f32 %v4427_v11, %v4426_v19  ;;  %v4575_v24 = vadd.f32 %v4574_v38, %v4573_v40  ;;  %v4580_v20 = vadd.f32 %v4579_v30, %v4578_v1  ;;  %v4521_v61 = vpop.xlane.xlu1 %4520  ;;  %v4001_v19 = vadd.f32 %v4000_v44, %v3999_v59 }
 0x5c8   : > { %v4549_v6 = vsel %vm3466_vm14, %v4547_v37, %v4548_v43  ;;  %v4551_v34 = vsel %vm3466_vm14, %v4548_v43, %v4550_v25  ;;  %v4553_v14 = vrot.slane %v4521_v61, 1  ;;  %v4010_v39 = vadd.f32 %v3994_v33, %v3702_v17 }
 0x5c9   : > { %v4608_v15 = vadd.f32 %v4428_v32, %v7998_v51  ;;  %v4576_v36 = vrot.slane %v4575_v24, 1  ;;  %v4581_v31 = vrot.slane %v4580_v20, 4  ;;  %v4587_v27 = vadd.f32 %v4551_v34, %v4549_v6  ;;  %v4518_v9 = vpop.xlane.xlu0 %4517 }
 0x5ca   : > { %v3985_v51 = vadd.f32 %v3984_v62, %v8159_v10  ;;  %v4552_v18 = vrot.slane %v4518_v9, 1  ;;  %v3709_v10 = vadd.f32 %v3708_v41, %v8144_v57  ;;  %v4301_v62 = vrot.slane %v4300_v16, 2 }
 0x5cb   : > { %4617 = vst.msk [vmem:[%s8188_s15 + $0x3] sm:$0x1] %vm4613_vm1, %v4608_v15  ;;  %v4577_v42 = vadd.f32 %v4576_v36, %v4575_v24  ;;  %v4582_v54 = vadd.f32 %v4581_v31, %v4580_v20  ;;  %v4589_v0 = vadd.f32 %v4588_v3, %v4587_v27  ;;  %v4295_v41 = vadd.f32 %v4294_v29, %v4293_v26 }
 0x5cc   : > { %v4009_v23 = vadd.f32 %v3985_v51, %v8138_v28  ;;  %v4554_v8 = vsel %vm3466_vm14, %v4552_v18, %v4553_v14  ;;  %v4302_v4 = vadd.f32 %v4301_v62, %v4300_v16  ;;  %v4002_v38 = vrot.slane %v4001_v19, 1 }
 0x5cd   : > { %v4609_v56 = vadd.f32 %v4577_v42, %v4309_v47  ;;  %v4583_v2 = vrot.slane %v4582_v54, 2  ;;  %v4590_v45 = vrot.slane %v4589_v0, 4  ;;  %v4524_v60 = vpop.xlane.xlu0 %4523  ;;  %v3710_v30 = vrot.slane %v3709_v10, 1 }
 0x5ce   : > { %v4555_v35 = vrot.slane %v4524_v60, 1  ;;  %v4310_v57 = vadd.f32 %v4286_v53, %v4009_v23  ;;  %v4311_v25 = vadd.f32 %v4295_v41, %v4010_v39  ;;  %v4303_v43 = vrot.slane %v4302_v4, 1 }
 0x5cf   : > { %4618 = vst.msk [vmem:[%s8237_s18] sm:$0x1] %vm4613_vm1, %v4609_v56  ;;  %v4584_v46 = vadd.f32 %v4583_v2, %v4582_v54  ;;  %v4591_v55 = vadd.f32 %v4590_v45, %v4589_v0  ;;  %v4003_v32 = vadd.f32 %v4002_v38, %v4001_v19  ;;  %v3711_v59 = vadd.f32 %v3710_v30, %v3709_v10 }
 0x5d0   : > { %v4556_v58 = vsel %vm3466_vm14, %v4553_v14, %v4555_v35  ;;  %v4597_v50 = vsel %vm4093_vm0, %v4555_v35, 0.0  ;;  %v4304_v5 = vadd.f32 %v4303_v43, %v4302_v4 }
 0x5d1   : > { %v4585_v40 = vrot.slane %v4584_v46, 1  ;;  %v4592_v22 = vrot.slane %v4591_v55, 2  ;;  %v4596_v21 = vadd.f32 %v4556_v58, %v4554_v8  ;;  %v4011_v34 = vadd.f32 %v4003_v32, %v3711_v59 }
 0x5d3   : > { %v4586_v13 = vadd.f32 %v4585_v40, %v4584_v46  ;;  %v4593_v11 = vadd.f32 %v4592_v22, %v4591_v55  ;;  %v4598_v28 = vadd.f32 %v4597_v50, %v4596_v21  ;;  %v4312_v36 = vadd.f32 %v4304_v5, %v4011_v34 }
 0x5d5   : > { %v4610_v1 = vadd.f32 %v4586_v13, %v4310_v57  ;;  %v4594_v48 = vrot.slane %v4593_v11, 1  ;;  %v4599_v37 = vrot.slane %v4598_v28, 4 }
 0x5d7   : > { %4619 = vst.msk [vmem:[%s8237_s18 + $0x1] sm:$0x1] %vm4613_vm1, %v4610_v1  ;;  %v4595_v52 = vadd.f32 %v4594_v48, %v4593_v11  ;;  %v4600_v63 = vadd.f32 %v4599_v37, %v4598_v28 }
 0x5d9   : > { %v4611_v24 = vadd.f32 %v4595_v52, %v4311_v25  ;;  %v4601_v20 = vrot.slane %v4600_v63, 2 }
 0x5db   : > { %4620 = vst.msk [vmem:[%s8237_s18 + $0x2] sm:$0x1] %vm4613_vm1, %v4611_v24  ;;  %v4602_v6 = vadd.f32 %v4601_v20, %v4600_v63 }
 0x5dd   : > { %v4603_v15 = vrot.slane %v4602_v6, 1 }
 0x5df   : > { %v4604_v31 = vadd.f32 %v4603_v15, %v4602_v6 }
 0x5e1   : > { %v4612_v27 = vadd.f32 %v4604_v31, %v4312_v36 }
 0x5e3   : > { %4621 = vst.msk [vmem:[%s8237_s18 + $0x3] sm:$0x1] %vm4613_vm1, %v4612_v27 }
 0x5e4 PF: > { %s20_s30 = sadd.s32 1, %s5180_s30  }
 0x5e5   : > { %p17_p4 = scmp.ge.s32.totalorder %s20_s30, 4  }
 0x5e7   :  { %19 = sbr.rel (!%p17_p4) target bundleno = 1 (0x1), region = 164 }

</bundles_post_ra>
